<compile_context>
chip_gen: v5e
topology: v5e:2x2
jax: 0.10.0
libtpu: 0.0.40
codegen_flags: <defaults>
</compile_context>

<pallas_src>
import functools
import math

import jax
import jax.numpy as jnp
from jax.experimental import pallas as pl
from jax.experimental.pallas import tpu as pltpu

EPS = 1e-5
LANES = 128
VMEM_LIMIT = 32 * 1024 * 1024  # safe scoped-VMEM cap on v5e / v6e / v7x


def _round_up(x, m):
    return (x + m - 1) // m * m


def _pick_row_tile(h, w):
    for tr in (8, 16, 4, 2, 1):
        if h % tr == 0 and (tr * w) % 8 == 0:
            return tr
    raise ValueError(f"unsupported spatial shape ({h}, {w})")


# ---------------------------------------------------------------------------
# Kernel 1: 3x3 conv (stride 1, pad 1) [+ fused 1x1 shortcut conv]
#           -> raw (pre-BN) outputs + per-tile BN partial statistics.
# Optionally applies a preceding BatchNorm (scale/shift) + ReLU while staging
# the input image into the padded VMEM scratch (used to fuse bn1+relu into
# the conv2 pass so `out1` never hits HBM).
# ---------------------------------------------------------------------------
def _conv_pass_kernel(*refs, kh, kw, tr, has_bn_in, has_sc):
    i = 0
    x_ref, w_ref = refs[i], refs[i + 1]; i += 2
    if has_bn_in:
        sci_ref, shi_ref = refs[i], refs[i + 1]; i += 2
    if has_sc:
        wsc_ref = refs[i]; i += 1
    y_ref, st_ref = refs[i], refs[i + 1]; i += 2
    if has_sc:
        ysc_ref, stsc_ref = refs[i], refs[i + 1]; i += 2
    xpad_ref, patch_ref = refs[i], refs[i + 1]

    r = pl.program_id(1)
    _, H, W, cin = x_ref.shape          # input block covers the full image
    ck = xpad_ref.shape[-1]             # lane-padded input channels
    cp = w_ref.shape[-1]                # lane-padded output channels
    m = tr * W

    # Stage the (optionally bn+relu'd) image once per batch element into a
    # zero-padded bf16 VMEM scratch: halo handled here, not via jnp.pad / HBM.
    @pl.when(r == 0)
    def _prep():
        xpad_ref[...] = jnp.zeros_like(xpad_ref)
        xin = x_ref[0]
        if has_bn_in:
            xin = jnp.maximum(
                xin.astype(jnp.float32) * sci_ref[...].reshape(1, 1, -1)
                + shi_ref[...].reshape(1, 1, -1), 0.0)
        xpad_ref[1:H + 1, 1:W + 1, :cin] = xin.astype(jnp.bfloat16)

    # im2col for this row tile: ONE fat MXU matmul with K = kh*kw*ck.
    row0 = pl.multiple_of(r * tr, tr)
    t = 0
    for dy in range(kh):
        for dx in range(kw):
            slab = xpad_ref[pl.ds(row0 + dy, tr), pl.ds(dx, W), :]
            patch_ref[:, t * ck:(t + 1) * ck] = slab.reshape(m, ck)
            t += 1
    y = jnp.dot(patch_ref[...], w_ref[...], preferred_element_type=jnp.float32)

    y_ref[0] = y.reshape(tr, W, cp)
    # Single-pass BN partials: rows 0..7 = sum, rows 8..15 = sum of squares.
    st_ref[0, 0] = jnp.concatenate(
        [y.reshape(-1, 8, cp).sum(axis=0),
         (y * y).reshape(-1, 8, cp).sum(axis=0)], axis=0)

    if has_sc:
        xin2 = xpad_ref[pl.ds(row0 + 1, tr), pl.ds(1, W), :].reshape(m, ck)
        ysc = jnp.dot(xin2, wsc_ref[...], preferred_element_type=jnp.float32)
        ysc_ref[0] = ysc.reshape(tr, W, cp)
        stsc_ref[0, 0] = jnp.concatenate(
            [ysc.reshape(-1, 8, cp).sum(axis=0),
             (ysc * ysc).reshape(-1, 8, cp).sum(axis=0)], axis=0)


def _conv_pass(x, wcol, *, tr, cp, kh=3, kw=3,
               scale_in=None, shift_in=None, wsc=None):
    n, h, w, cin = x.shape
    n_rt = h // tr
    ck = wcol.shape[0] // (kh * kw)
    has_bn_in = scale_in is not None
    has_sc = wsc is not None

    whole_img = lambda b, r: (b, 0, 0, 0)   # image block stays resident over r
    const2 = lambda b, r: (0, 0)
    row_blk = lambda b, r: (b, r, 0, 0)

    inputs = [x, wcol]
    in_specs = [pl.BlockSpec((1, h, w, cin), whole_img),
                pl.BlockSpec(wcol.shape, const2)]
    if has_bn_in:
        inputs += [scale_in, shift_in]
        in_specs += [pl.BlockSpec((1, cp), const2)] * 2
    if has_sc:
        inputs += [wsc]
        in_specs += [pl.BlockSpec(wsc.shape, const2)]

    raw = jax.ShapeDtypeStruct((n, h, w, cp), jnp.float32)
    stat = jax.ShapeDtypeStruct((n, n_rt, 16, cp), jnp.float32)
    raw_spec = pl.BlockSpec((1, tr, w, cp), row_blk)
    stat_spec = pl.BlockSpec((1, 1, 16, cp), row_blk)
    out_shape = [raw, stat] + ([raw, stat] if has_sc else [])
    out_specs = [raw_spec, stat_spec] + ([raw_spec, stat_spec] if has_sc else [])

    flops = 2 * n * h * w * (kh * kw * ck) * cp
    if has_sc:
        flops += 2 * n * h * w * ck * cp
    bytes_accessed = sum(int(math.prod(a.shape)) * a.dtype.itemsize for a in inputs)
    bytes_accessed += sum(int(math.prod(o.shape)) * 4 for o in out_shape)

    kernel = functools.partial(_conv_pass_kernel, kh=kh, kw=kw, tr=tr,
                               has_bn_in=has_bn_in, has_sc=has_sc)
    return pl.pallas_call(
        kernel,
        out_shape=out_shape,
        grid_spec=pltpu.PrefetchScalarGridSpec(
            num_scalar_prefetch=0,
            grid=(n, n_rt),
            in_specs=in_specs,
            out_specs=out_specs,
            scratch_shapes=[pltpu.VMEM((h + 2, w + 2, ck), jnp.bfloat16),
                            pltpu.VMEM((tr * w, kh * kw * ck), jnp.bfloat16)]),
        compiler_params=pltpu.CompilerParams(
            dimension_semantics=("parallel", "arbitrary"),
            vmem_limit_bytes=VMEM_LIMIT),
        cost_estimate=pl.CostEstimate(flops=flops, transcendentals=0,
                                      bytes_accessed=bytes_accessed),
    )(*inputs)


# ---------------------------------------------------------------------------
# Kernel 2: finalize — bn2 (+ shortcut BN) + residual add + relu (elementwise)
# ---------------------------------------------------------------------------
def _finalize_kernel(*refs, has_conv_sc):
    if has_conv_sc:
        y2_ref, ysc_ref, s2_ref, b2_ref, ssc_ref, bsc_ref, o_ref = refs
        res = (ysc_ref[0] * ssc_ref[...].reshape(1, 1, -1)
               + bsc_ref[...].reshape(1, 1, -1))
    else:
        y2_ref, res_ref, s2_ref, b2_ref, o_ref = refs
        res = res_ref[0]
    y = y2_ref[0] * s2_ref[...].reshape(1, 1, -1) + b2_ref[...].reshape(1, 1, -1)
    o_ref[0] = jnp.maximum(y + res, 0.0).astype(o_ref.dtype)


def _finalize(y2, scale2, shift2, *, tr, ysc=None, scale_sc=None, shift_sc=None,
              residual=None):
    n, h, w, cp = y2.shape
    n_rt = h // tr
    row_blk = lambda b, r: (b, r, 0, 0)
    const2 = lambda b, r: (0, 0)
    big = pl.BlockSpec((1, tr, w, cp), row_blk)
    vec = pl.BlockSpec((1, cp), const2)
    has_conv_sc = ysc is not None
    if has_conv_sc:
        inputs = [y2, ysc, scale2, shift2, scale_sc, shift_sc]
        in_specs = [big, big, vec, vec, vec, vec]
    else:
        inputs = [y2, residual, scale2, shift2]
        in_specs = [big, big, vec, vec]

    bytes_accessed = sum(int(math.prod(a.shape)) * a.dtype.itemsize for a in inputs)
    bytes_accessed += int(math.prod(y2.shape)) * 4
    return pl.pallas_call(
        functools.partial(_finalize_kernel, has_conv_sc=has_conv_sc),
        out_shape=jax.ShapeDtypeStruct((n, h, w, cp), jnp.float32),
        grid_spec=pltpu.PrefetchScalarGridSpec(
            num_scalar_prefetch=0,
            grid=(n, n_rt),
            in_specs=in_specs,
            out_specs=big),
        compiler_params=pltpu.CompilerParams(
            dimension_semantics=("parallel", "parallel"),
            vmem_limit_bytes=VMEM_LIMIT),
        cost_estimate=pl.CostEstimate(flops=4 * n * h * w * cp, transcendentals=0,
                                      bytes_accessed=bytes_accessed),
    )(*inputs)


# ---------------------------------------------------------------------------
# Wrapper glue
# ---------------------------------------------------------------------------
def _bn_scale_shift(stats, count, gamma, beta, cp):
    """Reduce per-tile partials -> per-channel BN affine (scale, shift)."""
    s = jnp.sum(stats[:, :, :8, :], axis=(0, 1, 2))
    ss = jnp.sum(stats[:, :, 8:, :], axis=(0, 1, 2))
    mean = s / count
    var = jnp.maximum(ss / count - mean * mean, 0.0)   # biased var (training BN)
    g = jnp.pad(gamma.astype(jnp.float32), (0, cp - gamma.shape[0]),
                constant_values=1.0)
    b = jnp.pad(beta.astype(jnp.float32), (0, cp - beta.shape[0]))
    scale = g * jax.lax.rsqrt(var + EPS)
    shift = b - mean * scale
    return scale.reshape(1, cp), shift.reshape(1, cp)


def _prep_conv_w(w, ck, cp):
    """HWIO conv weight -> zero-padded, im2col-flattened (kh*kw*ck, cp) bf16."""
    kh, kw, cin, cout = w.shape
    wp = jnp.zeros((kh, kw, ck, cp), jnp.float32).at[:, :, :cin, :cout].set(w)
    return wp.reshape(kh * kw * ck, cp).astype(jnp.bfloat16)


def basic_block_forward(x_nchw, params, stride=1):
    """Forward of the PyTorch BasicBlock (training-mode BN, fresh gamma/beta)."""
    assert stride == 1, "only stride=1 implemented"
    # TODO(synk): stride>1 would require strided row/col sampling in the im2col.

    x = jnp.transpose(x_nchw, (0, 2, 3, 1)).astype(jnp.float32)   # NCHW -> NHWC
    n, h, w, cin = x.shape
    cout = params["w1"].shape[-1]
    cp = _round_up(cout, LANES)          # lane-dense output channels
    ck_in = _round_up(cin, LANES)
    tr = _pick_row_tile(h, w)
    count = n * h * w
    has_conv_sc = "w_sc" in params

    # Conv biases are intentionally unused: a per-channel constant added
    # before BatchNorm cancels exactly in the mean subtraction.
    w1col = _prep_conv_w(params["w1"], ck_in, cp)
    w2col = _prep_conv_w(params["w2"], cp, cp)
    x_bf = x.astype(jnp.bfloat16)

    # Pass A: conv1 (+ fused 1x1 shortcut) raw outputs + BN partial stats.
    if has_conv_sc:
        wsc = _prep_conv_w(params["w_sc"], ck_in, cp)
        y1_raw, st1, ysc_raw, stsc = _conv_pass(x_bf, w1col, tr=tr, cp=cp, wsc=wsc)
    else:
        y1_raw, st1 = _conv_pass(x_bf, w1col, tr=tr, cp=cp)

    scale1, shift1 = _bn_scale_shift(st1, count, params["g1"], params["be1"], cp)

    # Pass B: bn1 + relu fused into the conv2 pass (out1 never written to HBM).
    y2_raw, st2 = _conv_pass(y1_raw, w2col, tr=tr, cp=cp,
                             scale_in=scale1, shift_in=shift1)
    scale2, shift2 = _bn_scale_shift(st2, count, params["g2"], params["be2"], cp)

    # Pass C: bn2 (+ shortcut BN) + residual add + relu.
    if has_conv_sc:
        ssc, bsc = _bn_scale_shift(stsc, count, params["g_sc"], params["be_sc"], cp)
        out = _finalize(y2_raw, scale2, shift2, tr=tr,
                        ysc=ysc_raw, scale_sc=ssc, shift_sc=bsc)
    else:
        res = jnp.pad(x, ((0, 0), (0, 0), (0, 0), (0, cp - cin)))
        out = _finalize(y2_raw, scale2, shift2, tr=tr, residual=res)

    # TODO(synk): when chaining blocks, keep activations NHWC (lane-padded)
    # end-to-end instead of transposing at every block boundary.
    return jnp.transpose(out[..., :cout], (0, 3, 1, 2))   # NHWC -> NCHW


# ---------------------------------------------------------------------------
# Plain-JAX f32 reference (PyTorch-equivalent math, includes the conv biases)
# ---------------------------------------------------------------------------
def _ref_conv_bn(x, w, b, gamma, beta, pad, relu, residual=None):
    y = jax.lax.conv_general_dilated(
        x, w, (1, 1), [(pad, pad), (pad, pad)],
        dimension_numbers=("NHWC", "HWIO", "NHWC")) + b.reshape(1, 1, 1, -1)
    mean = y.mean(axis=(0, 1, 2), keepdims=True)
    var = ((y - mean) ** 2).mean(axis=(0, 1, 2), keepdims=True)
    y = (y - mean) * jax.lax.rsqrt(var + EPS) * gamma.reshape(1, 1, 1, -1) \
        + beta.reshape(1, 1, 1, -1)
    if residual is not None:
        y = y + residual
    if relu:
        y = jnp.maximum(y, 0.0)
    return y


def _ref_basic_block(x_nchw, params):
    x = jnp.transpose(x_nchw, (0, 2, 3, 1)).astype(jnp.float32)
    if "w_sc" in params:
        sc = _ref_conv_bn(x, params["w_sc"], params["b_sc"],
                          params["g_sc"], params["be_sc"], 0, False)
    else:
        sc = x
    o1 = _ref_conv_bn(x, params["w1"], params["b1"], params["g1"],
                      params["be1"], 1, True)
    o = _ref_conv_bn(o1, params["w2"], params["b2"], params["g2"],
                     params["be2"], 1, True, residual=sc)
    return jnp.transpose(o, (0, 3, 1, 2))


# ---------------------------------------------------------------------------
def init_params(key, in_channels, out_channels, stride=1):
    ks = jax.random.split(key, 6)
    p = {
        # conv weights stored in HWIO layout (the kernels' native layout)
        "w1": 0.1 * jax.random.normal(ks[0], (3, 3, in_channels, out_channels), jnp.float32),
        "b1": 0.05 * jax.random.normal(ks[1], (out_channels,), jnp.float32),
        "g1": jnp.ones((out_channels,), jnp.float32),
        "be1": jnp.zeros((out_channels,), jnp.float32),
        "w2": 0.1 * jax.random.normal(ks[2], (3, 3, out_channels, out_channels), jnp.float32),
        "b2": 0.05 * jax.random.normal(ks[3], (out_channels,), jnp.float32),
        "g2": jnp.ones((out_channels,), jnp.float32),
        "be2": jnp.zeros((out_channels,), jnp.float32),
    }
    if stride != 1 or in_channels != out_channels:
        p["w_sc"] = 0.1 * jax.random.normal(ks[4], (1, 1, in_channels, out_channels), jnp.float32)
        p["b_sc"] = 0.05 * jax.random.normal(ks[5], (out_channels,), jnp.float32)
        p["g_sc"] = jnp.ones((out_channels,), jnp.float32)
        p["be_sc"] = jnp.zeros((out_channels,), jnp.float32)
    return p


if __name__ == "__main__":
    key = jax.random.PRNGKey(0)
    kx1, kp1, kx2, kp2 = jax.random.split(key, 4)
    fwd = jax.jit(basic_block_forward)

    # Tolerances account for bf16 MXU inputs in the kernel vs the f32 reference.
    ATOL, RTOL = 1e-1, 1e-1

    # Channel-changing block (1x1-conv + BN shortcut path).
    N, Cin, Cout, HW = 2, 4, 8, 16
    x = jax.random.normal(kx1, (N, Cin, HW, HW), jnp.float32)   # NCHW like torch
    params = init_params(kp1, Cin, Cout, stride=1)
    out = jax.block_until_ready(fwd(x, params))
    ref = jax.block_until_ready(_ref_basic_block(x, params))
    assert out.shape == (N, Cout, HW, HW), out.shape
    assert jnp.allclose(out, ref, atol=ATOL, rtol=RTOL), \
        float(jnp.max(jnp.abs(out - ref)))

    # Identity-shortcut path (Cin == Cout).
    x2 = jax.random.normal(kx2, (N, Cout, HW, HW), jnp.float32)
    params2 = init_params(kp2, Cout, Cout, stride=1)
    out2 = jax.block_until_ready(fwd(x2, params2))
    ref2 = jax.block_until_ready(_ref_basic_block(x2, params2))
    assert jnp.allclose(out2, ref2, atol=ATOL, rtol=RTOL), \
        float(jnp.max(jnp.abs(out2 - ref2)))

    print("KERNEL_OK")
</pallas_src>

<mosaic_0001>
module attributes {stable_mosaic.version = 11 : i64} {
  func.func @_conv_pass_kernel(%arg0: i32, %arg1: i32, %arg2: memref<1x16x16x4xbf16, #tpu.memory_space<vmem>>, %arg3: memref<1152x128xbf16, #tpu.memory_space<vmem>>, %arg4: memref<128x128xbf16, #tpu.memory_space<vmem>>, %arg5: memref<1x8x16x128xf32, #tpu.memory_space<vmem>>, %arg6: memref<1x1x16x128xf32, #tpu.memory_space<vmem>>, %arg7: memref<1x8x16x128xf32, #tpu.memory_space<vmem>>, %arg8: memref<1x1x16x128xf32, #tpu.memory_space<vmem>>, %arg9: memref<18x18x128xbf16, #tpu.memory_space<vmem>>, %arg10: memref<128x1152xbf16, #tpu.memory_space<vmem>>) attributes {dimension_semantics = [#tpu.dimension_semantics<parallel>, #tpu.dimension_semantics<arbitrary>], iteration_bounds = array<i64: 2, 2>, scalar_prefetch = 0 : i64, scratch_operands = 2 : i64, tpu.core_type = #tpu.core_type<tc>, window_params = [{transform_indices = @transform_0, window_bounds = array<i64: 1, 16, 16, 4>}, {pipeline_mode = #tpu.pipeline_mode<synchronous>, transform_indices = @transform_1, window_bounds = array<i64: 1152, 128>}, {pipeline_mode = #tpu.pipeline_mode<synchronous>, transform_indices = @transform_2, window_bounds = array<i64: 128, 128>}, {transform_indices = @transform_3, window_bounds = array<i64: 1, 8, 16, 128>}, {transform_indices = @transform_4, window_bounds = array<i64: 1, 1, 16, 128>}, {transform_indices = @transform_5, window_bounds = array<i64: 1, 8, 16, 128>}, {transform_indices = @transform_6, window_bounds = array<i64: 1, 1, 16, 128>}]} {
    %c0_i32 = arith.constant 0 : i32
    %0 = arith.cmpi eq, %arg1, %c0_i32 : i32
    %1 = arith.extui %0 : i1 to i32
    %c0_i32_0 = arith.constant 0 : i32
    %2 = arith.cmpi ne, %1, %c0_i32_0 : i32
    scf.if %2 {
      %cst_63 = arith.constant 0.000000e+00 : bf16
      %85 = vector.broadcast %cst_63 : bf16 to vector<18x18x128xbf16>
      %c0_64 = arith.constant 0 : index
      %c0_65 = arith.constant 0 : index
      %c0_66 = arith.constant 0 : index
      %86 = vector.load %arg9[%c0_64, %c0_65, %c0_66] : memref<18x18x128xbf16, #tpu.memory_space<vmem>>, vector<18x18x128xbf16>
      tpu.vector_store %arg9[%c0_64, %c0_65, %c0_66], %85 {strides = array<i32>} : memref<18x18x128xbf16, #tpu.memory_space<vmem>>, vector<18x18x128xbf16>,
      %c0_67 = arith.constant 0 : index
      %c0_68 = arith.constant 0 : index
      %c0_69 = arith.constant 0 : index
      %c0_70 = arith.constant 0 : index
      %87 = vector.load %arg2[%c0_67, %c0_68, %c0_69, %c0_70] : memref<1x16x16x4xbf16, #tpu.memory_space<vmem>>, vector<1x16x16x4xbf16>
      %88 = vector.shape_cast %87 : vector<1x16x16x4xbf16> to vector<16x16x4xbf16>
      %c1_71 = arith.constant 1 : index
      %c1_72 = arith.constant 1 : index
      %c0_73 = arith.constant 0 : index
      %89 = vector.load %arg9[%c1_71, %c1_72, %c0_73] : memref<18x18x128xbf16, #tpu.memory_space<vmem>>, vector<16x16x4xbf16>
      tpu.vector_store %arg9[%c1_71, %c1_72, %c0_73], %88 {strides = array<i32>} : memref<18x18x128xbf16, #tpu.memory_space<vmem>>, vector<16x16x4xbf16>,
    } else {
    }
    %c8_i32 = arith.constant 8 : i32
    %3 = arith.muli %arg1, %c8_i32 : i32
    %4 = tpu.assume_multiple %3, 8 : i32
    %c0_i32_1 = arith.constant 0 : i32
    %5 = arith.addi %4, %c0_i32_1 : i32
    %6 = arith.index_cast %5 : i32 to index
    %c0 = arith.constant 0 : index
    %c0_2 = arith.constant 0 : index
    %7 = vector.load %arg9[%6, %c0, %c0_2] : memref<18x18x128xbf16, #tpu.memory_space<vmem>>, vector<8x16x128xbf16>
    %8 = vector.shape_cast %7 : vector<8x16x128xbf16> to vector<128x128xbf16>
    %c0_3 = arith.constant 0 : index
    %c0_4 = arith.constant 0 : index
    %9 = vector.load %arg10[%c0_3, %c0_4] : memref<128x1152xbf16, #tpu.memory_space<vmem>>, vector<128x128xbf16>
    tpu.vector_store %arg10[%c0_3, %c0_4], %8 {strides = array<i32>} : memref<128x1152xbf16, #tpu.memory_space<vmem>>, vector<128x128xbf16>,
    %c0_i32_5 = arith.constant 0 : i32
    %10 = arith.addi %4, %c0_i32_5 : i32
    %11 = arith.index_cast %10 : i32 to index
    %c1 = arith.constant 1 : index
    %c0_6 = arith.constant 0 : index
    %12 = vector.load %arg9[%11, %c1, %c0_6] : memref<18x18x128xbf16, #tpu.memory_space<vmem>>, vector<8x16x128xbf16>
    %13 = vector.shape_cast %12 : vector<8x16x128xbf16> to vector<128x128xbf16>
    %c0_7 = arith.constant 0 : index
    %c128 = arith.constant 128 : index
    %14 = vector.load %arg10[%c0_7, %c128] : memref<128x1152xbf16, #tpu.memory_space<vmem>>, vector<128x128xbf16>
    tpu.vector_store %arg10[%c0_7, %c128], %13 {strides = array<i32>} : memref<128x1152xbf16, #tpu.memory_space<vmem>>, vector<128x128xbf16>,
    %c0_i32_8 = arith.constant 0 : i32
    %15 = arith.addi %4, %c0_i32_8 : i32
    %16 = arith.index_cast %15 : i32 to index
    %c2 = arith.constant 2 : index
    %c0_9 = arith.constant 0 : index
    %17 = vector.load %arg9[%16, %c2, %c0_9] : memref<18x18x128xbf16, #tpu.memory_space<vmem>>, vector<8x16x128xbf16>
    %18 = vector.shape_cast %17 : vector<8x16x128xbf16> to vector<128x128xbf16>
    %c0_10 = arith.constant 0 : index
    %c256 = arith.constant 256 : index
    %19 = vector.load %arg10[%c0_10, %c256] : memref<128x1152xbf16, #tpu.memory_space<vmem>>, vector<128x128xbf16>
    tpu.vector_store %arg10[%c0_10, %c256], %18 {strides = array<i32>} : memref<128x1152xbf16, #tpu.memory_space<vmem>>, vector<128x128xbf16>,
    %c1_i32 = arith.constant 1 : i32
    %20 = arith.addi %4, %c1_i32 : i32
    %21 = arith.index_cast %20 : i32 to index
    %c0_11 = arith.constant 0 : index
    %c0_12 = arith.constant 0 : index
    %22 = vector.load %arg9[%21, %c0_11, %c0_12] : memref<18x18x128xbf16, #tpu.memory_space<vmem>>, vector<8x16x128xbf16>
    %23 = vector.shape_cast %22 : vector<8x16x128xbf16> to vector<128x128xbf16>
    %c0_13 = arith.constant 0 : index
    %c384 = arith.constant 384 : index
    %24 = vector.load %arg10[%c0_13, %c384] : memref<128x1152xbf16, #tpu.memory_space<vmem>>, vector<128x128xbf16>
    tpu.vector_store %arg10[%c0_13, %c384], %23 {strides = array<i32>} : memref<128x1152xbf16, #tpu.memory_space<vmem>>, vector<128x128xbf16>,
    %c1_i32_14 = arith.constant 1 : i32
    %25 = arith.addi %4, %c1_i32_14 : i32
    %26 = arith.index_cast %25 : i32 to index
    %c1_15 = arith.constant 1 : index
    %c0_16 = arith.constant 0 : index
    %27 = vector.load %arg9[%26, %c1_15, %c0_16] : memref<18x18x128xbf16, #tpu.memory_space<vmem>>, vector<8x16x128xbf16>
    %28 = vector.shape_cast %27 : vector<8x16x128xbf16> to vector<128x128xbf16>
    %c0_17 = arith.constant 0 : index
    %c512 = arith.constant 512 : index
    %29 = vector.load %arg10[%c0_17, %c512] : memref<128x1152xbf16, #tpu.memory_space<vmem>>, vector<128x128xbf16>
    tpu.vector_store %arg10[%c0_17, %c512], %28 {strides = array<i32>} : memref<128x1152xbf16, #tpu.memory_space<vmem>>, vector<128x128xbf16>,
    %c1_i32_18 = arith.constant 1 : i32
    %30 = arith.addi %4, %c1_i32_18 : i32
    %31 = arith.index_cast %30 : i32 to index
    %c2_19 = arith.constant 2 : index
    %c0_20 = arith.constant 0 : index
    %32 = vector.load %arg9[%31, %c2_19, %c0_20] : memref<18x18x128xbf16, #tpu.memory_space<vmem>>, vector<8x16x128xbf16>
    %33 = vector.shape_cast %32 : vector<8x16x128xbf16> to vector<128x128xbf16>
    %c0_21 = arith.constant 0 : index
    %c640 = arith.constant 640 : index
    %34 = vector.load %arg10[%c0_21, %c640] : memref<128x1152xbf16, #tpu.memory_space<vmem>>, vector<128x128xbf16>
    tpu.vector_store %arg10[%c0_21, %c640], %33 {strides = array<i32>} : memref<128x1152xbf16, #tpu.memory_space<vmem>>, vector<128x128xbf16>,
    %c2_i32 = arith.constant 2 : i32
    %35 = arith.addi %4, %c2_i32 : i32
    %36 = arith.index_cast %35 : i32 to index
    %c0_22 = arith.constant 0 : index
    %c0_23 = arith.constant 0 : index
    %37 = vector.load %arg9[%36, %c0_22, %c0_23] : memref<18x18x128xbf16, #tpu.memory_space<vmem>>, vector<8x16x128xbf16>
    %38 = vector.shape_cast %37 : vector<8x16x128xbf16> to vector<128x128xbf16>
    %c0_24 = arith.constant 0 : index
    %c768 = arith.constant 768 : index
    %39 = vector.load %arg10[%c0_24, %c768] : memref<128x1152xbf16, #tpu.memory_space<vmem>>, vector<128x128xbf16>
    tpu.vector_store %arg10[%c0_24, %c768], %38 {strides = array<i32>} : memref<128x1152xbf16, #tpu.memory_space<vmem>>, vector<128x128xbf16>,
    %c2_i32_25 = arith.constant 2 : i32
    %40 = arith.addi %4, %c2_i32_25 : i32
    %41 = arith.index_cast %40 : i32 to index
    %c1_26 = arith.constant 1 : index
    %c0_27 = arith.constant 0 : index
    %42 = vector.load %arg9[%41, %c1_26, %c0_27] : memref<18x18x128xbf16, #tpu.memory_space<vmem>>, vector<8x16x128xbf16>
    %43 = vector.shape_cast %42 : vector<8x16x128xbf16> to vector<128x128xbf16>
    %c0_28 = arith.constant 0 : index
    %c896 = arith.constant 896 : index
    %44 = vector.load %arg10[%c0_28, %c896] : memref<128x1152xbf16, #tpu.memory_space<vmem>>, vector<128x128xbf16>
    tpu.vector_store %arg10[%c0_28, %c896], %43 {strides = array<i32>} : memref<128x1152xbf16, #tpu.memory_space<vmem>>, vector<128x128xbf16>,
    %c2_i32_29 = arith.constant 2 : i32
    %45 = arith.addi %4, %c2_i32_29 : i32
    %46 = arith.index_cast %45 : i32 to index
    %c2_30 = arith.constant 2 : index
    %c0_31 = arith.constant 0 : index
    %47 = vector.load %arg9[%46, %c2_30, %c0_31] : memref<18x18x128xbf16, #tpu.memory_space<vmem>>, vector<8x16x128xbf16>
    %48 = vector.shape_cast %47 : vector<8x16x128xbf16> to vector<128x128xbf16>
    %c0_32 = arith.constant 0 : index
    %c1024 = arith.constant 1024 : index
    %49 = vector.load %arg10[%c0_32, %c1024] : memref<128x1152xbf16, #tpu.memory_space<vmem>>, vector<128x128xbf16>
    tpu.vector_store %arg10[%c0_32, %c1024], %48 {strides = array<i32>} : memref<128x1152xbf16, #tpu.memory_space<vmem>>, vector<128x128xbf16>,
    %c0_33 = arith.constant 0 : index
    %c0_34 = arith.constant 0 : index
    %50 = vector.load %arg10[%c0_33, %c0_34] : memref<128x1152xbf16, #tpu.memory_space<vmem>>, vector<128x1152xbf16>
    %c0_35 = arith.constant 0 : index
    %c0_36 = arith.constant 0 : index
    %51 = vector.load %arg3[%c0_35, %c0_36] : memref<1152x128xbf16, #tpu.memory_space<vmem>>, vector<1152x128xbf16>
    %cst = arith.constant dense<0.000000e+00> : vector<128x128xf32>
    %52 = tpu.matmul %50, %51, %cst {dimension_numbers = #tpu.dot_dimension_numbers<[1], [0], [0], [1], [0, 0, 1, 1], [], []>} : vector<128x1152xbf16>, vector<1152x128xbf16>, vector<128x128xf32> -> vector<128x128xf32>
    %53 = vector.shape_cast %52 : vector<128x128xf32> to vector<8x16x128xf32>
    %c0_37 = arith.constant 0 : index
    %c0_38 = arith.constant 0 : index
    %c0_39 = arith.constant 0 : index
    %c0_40 = arith.constant 0 : index
    %54 = vector.load %arg5[%c0_37, %c0_38, %c0_39, %c0_40] : memref<1x8x16x128xf32, #tpu.memory_space<vmem>>, vector<1x8x16x128xf32>
    %55 = vector.shape_cast %54 : vector<1x8x16x128xf32> to vector<8x16x128xf32>
    %56 = vector.shape_cast %53 : vector<8x16x128xf32> to vector<1x8x16x128xf32>
    tpu.vector_store %arg5[%c0_37, %c0_38, %c0_39, %c0_40], %56 {strides = array<i32>} : memref<1x8x16x128xf32, #tpu.memory_space<vmem>>, vector<1x8x16x128xf32>,
    %57 = vector.shape_cast %52 : vector<128x128xf32> to vector<16x8x128xf32>
    %cst_41 = arith.constant dense<0.000000e+00> : vector<8x128xf32>
    %58 = vector.multi_reduction <add>, %57, %cst_41 [0] : vector<16x8x128xf32> to vector<8x128xf32>
    %59 = arith.mulf %52, %52 : vector<128x128xf32>
    %60 = vector.shape_cast %59 : vector<128x128xf32> to vector<16x8x128xf32>
    %cst_42 = arith.constant dense<0.000000e+00> : vector<8x128xf32>
    %61 = vector.multi_reduction <add>, %60, %cst_42 [0] : vector<16x8x128xf32> to vector<8x128xf32>
    %62 = tpu.concatenate %58, %61 in 0 : vector<8x128xf32>, vector<8x128xf32> -> vector<16x128xf32>
    %c0_43 = arith.constant 0 : index
    %c0_44 = arith.constant 0 : index
    %c0_45 = arith.constant 0 : index
    %c0_46 = arith.constant 0 : index
    %63 = vector.load %arg6[%c0_43, %c0_44, %c0_45, %c0_46] : memref<1x1x16x128xf32, #tpu.memory_space<vmem>>, vector<1x1x16x128xf32>
    %64 = vector.shape_cast %63 : vector<1x1x16x128xf32> to vector<16x128xf32>
    %65 = vector.shape_cast %62 : vector<16x128xf32> to vector<1x1x16x128xf32>
    tpu.vector_store %arg6[%c0_43, %c0_44, %c0_45, %c0_46], %65 {strides = array<i32>} : memref<1x1x16x128xf32, #tpu.memory_space<vmem>>, vector<1x1x16x128xf32>,
    %c1_i32_47 = arith.constant 1 : i32
    %66 = arith.addi %4, %c1_i32_47 : i32
    %67 = arith.index_cast %66 : i32 to index
    %c1_48 = arith.constant 1 : index
    %c0_49 = arith.constant 0 : index
    %68 = vector.load %arg9[%67, %c1_48, %c0_49] : memref<18x18x128xbf16, #tpu.memory_space<vmem>>, vector<8x16x128xbf16>
    %69 = vector.shape_cast %68 : vector<8x16x128xbf16> to vector<128x128xbf16>
    %c0_50 = arith.constant 0 : index
    %c0_51 = arith.constant 0 : index
    %70 = vector.load %arg4[%c0_50, %c0_51] : memref<128x128xbf16, #tpu.memory_space<vmem>>, vector<128x128xbf16>
    %cst_52 = arith.constant dense<0.000000e+00> : vector<128x128xf32>
    %71 = tpu.matmul %69, %70, %cst_52 {dimension_numbers = #tpu.dot_dimension_numbers<[1], [0], [0], [1], [0, 0, 1, 1], [], []>} : vector<128x128xbf16>, vector<128x128xbf16>, vector<128x128xf32> -> vector<128x128xf32>
    %72 = vector.shape_cast %71 : vector<128x128xf32> to vector<8x16x128xf32>
    %c0_53 = arith.constant 0 : index
    %c0_54 = arith.constant 0 : index
    %c0_55 = arith.constant 0 : index
    %c0_56 = arith.constant 0 : index
    %73 = vector.load %arg7[%c0_53, %c0_54, %c0_55, %c0_56] : memref<1x8x16x128xf32, #tpu.memory_space<vmem>>, vector<1x8x16x128xf32>
    %74 = vector.shape_cast %73 : vector<1x8x16x128xf32> to vector<8x16x128xf32>
    %75 = vector.shape_cast %72 : vector<8x16x128xf32> to vector<1x8x16x128xf32>
    tpu.vector_store %arg7[%c0_53, %c0_54, %c0_55, %c0_56], %75 {strides = array<i32>} : memref<1x8x16x128xf32, #tpu.memory_space<vmem>>, vector<1x8x16x128xf32>,
    %76 = vector.shape_cast %71 : vector<128x128xf32> to vector<16x8x128xf32>
    %cst_57 = arith.constant dense<0.000000e+00> : vector<8x128xf32>
    %77 = vector.multi_reduction <add>, %76, %cst_57 [0] : vector<16x8x128xf32> to vector<8x128xf32>
    %78 = arith.mulf %71, %71 : vector<128x128xf32>
    %79 = vector.shape_cast %78 : vector<128x128xf32> to vector<16x8x128xf32>
    %cst_58 = arith.constant dense<0.000000e+00> : vector<8x128xf32>
    %80 = vector.multi_reduction <add>, %79, %cst_58 [0] : vector<16x8x128xf32> to vector<8x128xf32>
    %81 = tpu.concatenate %77, %80 in 0 : vector<8x128xf32>, vector<8x128xf32> -> vector<16x128xf32>
    %c0_59 = arith.constant 0 : index
    %c0_60 = arith.constant 0 : index
    %c0_61 = arith.constant 0 : index
    %c0_62 = arith.constant 0 : index
    %82 = vector.load %arg8[%c0_59, %c0_60, %c0_61, %c0_62] : memref<1x1x16x128xf32, #tpu.memory_space<vmem>>, vector<1x1x16x128xf32>
    %83 = vector.shape_cast %82 : vector<1x1x16x128xf32> to vector<16x128xf32>
    %84 = vector.shape_cast %81 : vector<16x128xf32> to vector<1x1x16x128xf32>
    tpu.vector_store %arg8[%c0_59, %c0_60, %c0_61, %c0_62], %84 {strides = array<i32>} : memref<1x1x16x128xf32, #tpu.memory_space<vmem>>, vector<1x1x16x128xf32>,
    return
  }
  func.func @transform_0(%arg0: i32, %arg1: i32) -> (i32, i32, i32, i32) {
    %c0_i32 = arith.constant 0 : i32
    %c0_i32_0 = arith.constant 0 : i32
    %c0_i32_1 = arith.constant 0 : i32
    %c0_i32_2 = arith.constant 0 : i32
    return %arg0, %c0_i32, %c0_i32_0, %c0_i32_1 : i32, i32, i32, i32
  }
  func.func @transform_1(%arg0: i32, %arg1: i32) -> (i32, i32) {
    %c0_i32 = arith.constant 0 : i32
    %c0_i32_0 = arith.constant 0 : i32
    %c0_i32_1 = arith.constant 0 : i32
    return %c0_i32, %c0_i32_0 : i32, i32
  }
  func.func @transform_2(%arg0: i32, %arg1: i32) -> (i32, i32) {
    %c0_i32 = arith.constant 0 : i32
    %c0_i32_0 = arith.constant 0 : i32
    %c0_i32_1 = arith.constant 0 : i32
    return %c0_i32, %c0_i32_0 : i32, i32
  }
  func.func @transform_3(%arg0: i32, %arg1: i32) -> (i32, i32, i32, i32) {
    %c0_i32 = arith.constant 0 : i32
    %c0_i32_0 = arith.constant 0 : i32
    %c0_i32_1 = arith.constant 0 : i32
    return %arg0, %arg1, %c0_i32, %c0_i32_0 : i32, i32, i32, i32
  }
  func.func @transform_4(%arg0: i32, %arg1: i32) -> (i32, i32, i32, i32) {
    %c0_i32 = arith.constant 0 : i32
    %c0_i32_0 = arith.constant 0 : i32
    %c0_i32_1 = arith.constant 0 : i32
    return %arg0, %arg1, %c0_i32, %c0_i32_0 : i32, i32, i32, i32
  }
  func.func @transform_5(%arg0: i32, %arg1: i32) -> (i32, i32, i32, i32) {
    %c0_i32 = arith.constant 0 : i32
    %c0_i32_0 = arith.constant 0 : i32
    %c0_i32_1 = arith.constant 0 : i32
    return %arg0, %arg1, %c0_i32, %c0_i32_0 : i32, i32, i32, i32
  }
  func.func @transform_6(%arg0: i32, %arg1: i32) -> (i32, i32, i32, i32) {
    %c0_i32 = arith.constant 0 : i32
    %c0_i32_0 = arith.constant 0 : i32
    %c0_i32_1 = arith.constant 0 : i32
    return %arg0, %arg1, %c0_i32, %c0_i32_0 : i32, i32, i32, i32
  }
}

module attributes {stable_mosaic.version = 11 : i64} {
  func.func @_conv_pass_kernel(%arg0: i32, %arg1: i32, %arg2: memref<1x16x16x128xf32, #tpu.memory_space<vmem>>, %arg3: memref<1152x128xbf16, #tpu.memory_space<vmem>>, %arg4: memref<1x128xf32, #tpu.memory_space<vmem>>, %arg5: memref<1x128xf32, #tpu.memory_space<vmem>>, %arg6: memref<1x8x16x128xf32, #tpu.memory_space<vmem>>, %arg7: memref<1x1x16x128xf32, #tpu.memory_space<vmem>>, %arg8: memref<18x18x128xbf16, #tpu.memory_space<vmem>>, %arg9: memref<128x1152xbf16, #tpu.memory_space<vmem>>) attributes {dimension_semantics = [#tpu.dimension_semantics<parallel>, #tpu.dimension_semantics<arbitrary>], iteration_bounds = array<i64: 2, 2>, scalar_prefetch = 0 : i64, scratch_operands = 2 : i64, tpu.core_type = #tpu.core_type<tc>, window_params = [{transform_indices = @transform_0, window_bounds = array<i64: 1, 16, 16, 128>}, {pipeline_mode = #tpu.pipeline_mode<synchronous>, transform_indices = @transform_1, window_bounds = array<i64: 1152, 128>}, {pipeline_mode = #tpu.pipeline_mode<synchronous>, transform_indices = @transform_2, window_bounds = array<i64: 1, 128>}, {pipeline_mode = #tpu.pipeline_mode<synchronous>, transform_indices = @transform_3, window_bounds = array<i64: 1, 128>}, {transform_indices = @transform_4, window_bounds = array<i64: 1, 8, 16, 128>}, {transform_indices = @transform_5, window_bounds = array<i64: 1, 1, 16, 128>}]} {
    %c0_i32 = arith.constant 0 : i32
    %0 = arith.cmpi eq, %arg1, %c0_i32 : i32
    %1 = arith.extui %0 : i1 to i32
    %c0_i32_0 = arith.constant 0 : i32
    %2 = arith.cmpi ne, %1, %c0_i32_0 : i32
    scf.if %2 {
      %cst_47 = arith.constant 0.000000e+00 : bf16
      %66 = vector.broadcast %cst_47 : bf16 to vector<18x18x128xbf16>
      %c0_48 = arith.constant 0 : index
      %c0_49 = arith.constant 0 : index
      %c0_50 = arith.constant 0 : index
      %67 = vector.load %arg8[%c0_48, %c0_49, %c0_50] : memref<18x18x128xbf16, #tpu.memory_space<vmem>>, vector<18x18x128xbf16>
      tpu.vector_store %arg8[%c0_48, %c0_49, %c0_50], %66 {strides = array<i32>} : memref<18x18x128xbf16, #tpu.memory_space<vmem>>, vector<18x18x128xbf16>,
      %c0_51 = arith.constant 0 : index
      %c0_52 = arith.constant 0 : index
      %c0_53 = arith.constant 0 : index
      %c0_54 = arith.constant 0 : index
      %68 = vector.load %arg2[%c0_51, %c0_52, %c0_53, %c0_54] : memref<1x16x16x128xf32, #tpu.memory_space<vmem>>, vector<1x16x16x128xf32>
      %69 = vector.shape_cast %68 : vector<1x16x16x128xf32> to vector<16x16x128xf32>
      %c0_55 = arith.constant 0 : index
      %c0_56 = arith.constant 0 : index
      %70 = vector.load %arg4[%c0_55, %c0_56] : memref<1x128xf32, #tpu.memory_space<vmem>>, vector<1x128xf32>
      %71 = vector.shape_cast %70 : vector<1x128xf32> to vector<1x1x128xf32>
      %72 = vector.broadcast %71 : vector<1x1x128xf32> to vector<16x16x128xf32>
      %73 = arith.mulf %69, %72 : vector<16x16x128xf32>
      %c0_57 = arith.constant 0 : index
      %c0_58 = arith.constant 0 : index
      %74 = vector.load %arg5[%c0_57, %c0_58] : memref<1x128xf32, #tpu.memory_space<vmem>>, vector<1x128xf32>
      %75 = vector.shape_cast %74 : vector<1x128xf32> to vector<1x1x128xf32>
      %76 = vector.broadcast %75 : vector<1x1x128xf32> to vector<16x16x128xf32>
      %77 = arith.addf %73, %76 : vector<16x16x128xf32>
      %cst_59 = arith.constant 0.000000e+00 : f32
      %78 = vector.broadcast %cst_59 : f32 to vector<16x16x128xf32>
      %79 = arith.maximumf %77, %78 : vector<16x16x128xf32>
      %80 = arith.truncf %79 : vector<16x16x128xf32> to vector<16x16x128xbf16>
      %c1_60 = arith.constant 1 : index
      %c1_61 = arith.constant 1 : index
      %c0_62 = arith.constant 0 : index
      %81 = vector.load %arg8[%c1_60, %c1_61, %c0_62] : memref<18x18x128xbf16, #tpu.memory_space<vmem>>, vector<16x16x128xbf16>
      tpu.vector_store %arg8[%c1_60, %c1_61, %c0_62], %80 {strides = array<i32>} : memref<18x18x128xbf16, #tpu.memory_space<vmem>>, vector<16x16x128xbf16>,
    } else {
    }
    %c8_i32 = arith.constant 8 : i32
    %3 = arith.muli %arg1, %c8_i32 : i32
    %4 = tpu.assume_multiple %3, 8 : i32
    %c0_i32_1 = arith.constant 0 : i32
    %5 = arith.addi %4, %c0_i32_1 : i32
    %6 = arith.index_cast %5 : i32 to index
    %c0 = arith.constant 0 : index
    %c0_2 = arith.constant 0 : index
    %7 = vector.load %arg8[%6, %c0, %c0_2] : memref<18x18x128xbf16, #tpu.memory_space<vmem>>, vector<8x16x128xbf16>
    %8 = vector.shape_cast %7 : vector<8x16x128xbf16> to vector<128x128xbf16>
    %c0_3 = arith.constant 0 : index
    %c0_4 = arith.constant 0 : index
    %9 = vector.load %arg9[%c0_3, %c0_4] : memref<128x1152xbf16, #tpu.memory_space<vmem>>, vector<128x128xbf16>
    tpu.vector_store %arg9[%c0_3, %c0_4], %8 {strides = array<i32>} : memref<128x1152xbf16, #tpu.memory_space<vmem>>, vector<128x128xbf16>,
    %c0_i32_5 = arith.constant 0 : i32
    %10 = arith.addi %4, %c0_i32_5 : i32
    %11 = arith.index_cast %10 : i32 to index
    %c1 = arith.constant 1 : index
    %c0_6 = arith.constant 0 : index
    %12 = vector.load %arg8[%11, %c1, %c0_6] : memref<18x18x128xbf16, #tpu.memory_space<vmem>>, vector<8x16x128xbf16>
    %13 = vector.shape_cast %12 : vector<8x16x128xbf16> to vector<128x128xbf16>
    %c0_7 = arith.constant 0 : index
    %c128 = arith.constant 128 : index
    %14 = vector.load %arg9[%c0_7, %c128] : memref<128x1152xbf16, #tpu.memory_space<vmem>>, vector<128x128xbf16>
    tpu.vector_store %arg9[%c0_7, %c128], %13 {strides = array<i32>} : memref<128x1152xbf16, #tpu.memory_space<vmem>>, vector<128x128xbf16>,
    %c0_i32_8 = arith.constant 0 : i32
    %15 = arith.addi %4, %c0_i32_8 : i32
    %16 = arith.index_cast %15 : i32 to index
    %c2 = arith.constant 2 : index
    %c0_9 = arith.constant 0 : index
    %17 = vector.load %arg8[%16, %c2, %c0_9] : memref<18x18x128xbf16, #tpu.memory_space<vmem>>, vector<8x16x128xbf16>
    %18 = vector.shape_cast %17 : vector<8x16x128xbf16> to vector<128x128xbf16>
    %c0_10 = arith.constant 0 : index
    %c256 = arith.constant 256 : index
    %19 = vector.load %arg9[%c0_10, %c256] : memref<128x1152xbf16, #tpu.memory_space<vmem>>, vector<128x128xbf16>
    tpu.vector_store %arg9[%c0_10, %c256], %18 {strides = array<i32>} : memref<128x1152xbf16, #tpu.memory_space<vmem>>, vector<128x128xbf16>,
    %c1_i32 = arith.constant 1 : i32
    %20 = arith.addi %4, %c1_i32 : i32
    %21 = arith.index_cast %20 : i32 to index
    %c0_11 = arith.constant 0 : index
    %c0_12 = arith.constant 0 : index
    %22 = vector.load %arg8[%21, %c0_11, %c0_12] : memref<18x18x128xbf16, #tpu.memory_space<vmem>>, vector<8x16x128xbf16>
    %23 = vector.shape_cast %22 : vector<8x16x128xbf16> to vector<128x128xbf16>
    %c0_13 = arith.constant 0 : index
    %c384 = arith.constant 384 : index
    %24 = vector.load %arg9[%c0_13, %c384] : memref<128x1152xbf16, #tpu.memory_space<vmem>>, vector<128x128xbf16>
    tpu.vector_store %arg9[%c0_13, %c384], %23 {strides = array<i32>} : memref<128x1152xbf16, #tpu.memory_space<vmem>>, vector<128x128xbf16>,
    %c1_i32_14 = arith.constant 1 : i32
    %25 = arith.addi %4, %c1_i32_14 : i32
    %26 = arith.index_cast %25 : i32 to index
    %c1_15 = arith.constant 1 : index
    %c0_16 = arith.constant 0 : index
    %27 = vector.load %arg8[%26, %c1_15, %c0_16] : memref<18x18x128xbf16, #tpu.memory_space<vmem>>, vector<8x16x128xbf16>
    %28 = vector.shape_cast %27 : vector<8x16x128xbf16> to vector<128x128xbf16>
    %c0_17 = arith.constant 0 : index
    %c512 = arith.constant 512 : index
    %29 = vector.load %arg9[%c0_17, %c512] : memref<128x1152xbf16, #tpu.memory_space<vmem>>, vector<128x128xbf16>
    tpu.vector_store %arg9[%c0_17, %c512], %28 {strides = array<i32>} : memref<128x1152xbf16, #tpu.memory_space<vmem>>, vector<128x128xbf16>,
    %c1_i32_18 = arith.constant 1 : i32
    %30 = arith.addi %4, %c1_i32_18 : i32
    %31 = arith.index_cast %30 : i32 to index
    %c2_19 = arith.constant 2 : index
    %c0_20 = arith.constant 0 : index
    %32 = vector.load %arg8[%31, %c2_19, %c0_20] : memref<18x18x128xbf16, #tpu.memory_space<vmem>>, vector<8x16x128xbf16>
    %33 = vector.shape_cast %32 : vector<8x16x128xbf16> to vector<128x128xbf16>
    %c0_21 = arith.constant 0 : index
    %c640 = arith.constant 640 : index
    %34 = vector.load %arg9[%c0_21, %c640] : memref<128x1152xbf16, #tpu.memory_space<vmem>>, vector<128x128xbf16>
    tpu.vector_store %arg9[%c0_21, %c640], %33 {strides = array<i32>} : memref<128x1152xbf16, #tpu.memory_space<vmem>>, vector<128x128xbf16>,
    %c2_i32 = arith.constant 2 : i32
    %35 = arith.addi %4, %c2_i32 : i32
    %36 = arith.index_cast %35 : i32 to index
    %c0_22 = arith.constant 0 : index
    %c0_23 = arith.constant 0 : index
    %37 = vector.load %arg8[%36, %c0_22, %c0_23] : memref<18x18x128xbf16, #tpu.memory_space<vmem>>, vector<8x16x128xbf16>
    %38 = vector.shape_cast %37 : vector<8x16x128xbf16> to vector<128x128xbf16>
    %c0_24 = arith.constant 0 : index
    %c768 = arith.constant 768 : index
    %39 = vector.load %arg9[%c0_24, %c768] : memref<128x1152xbf16, #tpu.memory_space<vmem>>, vector<128x128xbf16>
    tpu.vector_store %arg9[%c0_24, %c768], %38 {strides = array<i32>} : memref<128x1152xbf16, #tpu.memory_space<vmem>>, vector<128x128xbf16>,
    %c2_i32_25 = arith.constant 2 : i32
    %40 = arith.addi %4, %c2_i32_25 : i32
    %41 = arith.index_cast %40 : i32 to index
    %c1_26 = arith.constant 1 : index
    %c0_27 = arith.constant 0 : index
    %42 = vector.load %arg8[%41, %c1_26, %c0_27] : memref<18x18x128xbf16, #tpu.memory_space<vmem>>, vector<8x16x128xbf16>
    %43 = vector.shape_cast %42 : vector<8x16x128xbf16> to vector<128x128xbf16>
    %c0_28 = arith.constant 0 : index
    %c896 = arith.constant 896 : index
    %44 = vector.load %arg9[%c0_28, %c896] : memref<128x1152xbf16, #tpu.memory_space<vmem>>, vector<128x128xbf16>
    tpu.vector_store %arg9[%c0_28, %c896], %43 {strides = array<i32>} : memref<128x1152xbf16, #tpu.memory_space<vmem>>, vector<128x128xbf16>,
    %c2_i32_29 = arith.constant 2 : i32
    %45 = arith.addi %4, %c2_i32_29 : i32
    %46 = arith.index_cast %45 : i32 to index
    %c2_30 = arith.constant 2 : index
    %c0_31 = arith.constant 0 : index
    %47 = vector.load %arg8[%46, %c2_30, %c0_31] : memref<18x18x128xbf16, #tpu.memory_space<vmem>>, vector<8x16x128xbf16>
    %48 = vector.shape_cast %47 : vector<8x16x128xbf16> to vector<128x128xbf16>
    %c0_32 = arith.constant 0 : index
    %c1024 = arith.constant 1024 : index
    %49 = vector.load %arg9[%c0_32, %c1024] : memref<128x1152xbf16, #tpu.memory_space<vmem>>, vector<128x128xbf16>
    tpu.vector_store %arg9[%c0_32, %c1024], %48 {strides = array<i32>} : memref<128x1152xbf16, #tpu.memory_space<vmem>>, vector<128x128xbf16>,
    %c0_33 = arith.constant 0 : index
    %c0_34 = arith.constant 0 : index
    %50 = vector.load %arg9[%c0_33, %c0_34] : memref<128x1152xbf16, #tpu.memory_space<vmem>>, vector<128x1152xbf16>
    %c0_35 = arith.constant 0 : index
    %c0_36 = arith.constant 0 : index
    %51 = vector.load %arg3[%c0_35, %c0_36] : memref<1152x128xbf16, #tpu.memory_space<vmem>>, vector<1152x128xbf16>
    %cst = arith.constant dense<0.000000e+00> : vector<128x128xf32>
    %52 = tpu.matmul %50, %51, %cst {dimension_numbers = #tpu.dot_dimension_numbers<[1], [0], [0], [1], [0, 0, 1, 1], [], []>} : vector<128x1152xbf16>, vector<1152x128xbf16>, vector<128x128xf32> -> vector<128x128xf32>
    %53 = vector.shape_cast %52 : vector<128x128xf32> to vector<8x16x128xf32>
    %c0_37 = arith.constant 0 : index
    %c0_38 = arith.constant 0 : index
    %c0_39 = arith.constant 0 : index
    %c0_40 = arith.constant 0 : index
    %54 = vector.load %arg6[%c0_37, %c0_38, %c0_39, %c0_40] : memref<1x8x16x128xf32, #tpu.memory_space<vmem>>, vector<1x8x16x128xf32>
    %55 = vector.shape_cast %54 : vector<1x8x16x128xf32> to vector<8x16x128xf32>
    %56 = vector.shape_cast %53 : vector<8x16x128xf32> to vector<1x8x16x128xf32>
    tpu.vector_store %arg6[%c0_37, %c0_38, %c0_39, %c0_40], %56 {strides = array<i32>} : memref<1x8x16x128xf32, #tpu.memory_space<vmem>>, vector<1x8x16x128xf32>,
    %57 = vector.shape_cast %52 : vector<128x128xf32> to vector<16x8x128xf32>
    %cst_41 = arith.constant dense<0.000000e+00> : vector<8x128xf32>
    %58 = vector.multi_reduction <add>, %57, %cst_41 [0] : vector<16x8x128xf32> to vector<8x128xf32>
    %59 = arith.mulf %52, %52 : vector<128x128xf32>
    %60 = vector.shape_cast %59 : vector<128x128xf32> to vector<16x8x128xf32>
    %cst_42 = arith.constant dense<0.000000e+00> : vector<8x128xf32>
    %61 = vector.multi_reduction <add>, %60, %cst_42 [0] : vector<16x8x128xf32> to vector<8x128xf32>
    %62 = tpu.concatenate %58, %61 in 0 : vector<8x128xf32>, vector<8x128xf32> -> vector<16x128xf32>
    %c0_43 = arith.constant 0 : index
    %c0_44 = arith.constant 0 : index
    %c0_45 = arith.constant 0 : index
    %c0_46 = arith.constant 0 : index
    %63 = vector.load %arg7[%c0_43, %c0_44, %c0_45, %c0_46] : memref<1x1x16x128xf32, #tpu.memory_space<vmem>>, vector<1x1x16x128xf32>
    %64 = vector.shape_cast %63 : vector<1x1x16x128xf32> to vector<16x128xf32>
    %65 = vector.shape_cast %62 : vector<16x128xf32> to vector<1x1x16x128xf32>
    tpu.vector_store %arg7[%c0_43, %c0_44, %c0_45, %c0_46], %65 {strides = array<i32>} : memref<1x1x16x128xf32, #tpu.memory_space<vmem>>, vector<1x1x16x128xf32>,
    return
  }
  func.func @transform_0(%arg0: i32, %arg1: i32) -> (i32, i32, i32, i32) {
    %c0_i32 = arith.constant 0 : i32
    %c0_i32_0 = arith.constant 0 : i32
    %c0_i32_1 = arith.constant 0 : i32
    %c0_i32_2 = arith.constant 0 : i32
    return %arg0, %c0_i32, %c0_i32_0, %c0_i32_1 : i32, i32, i32, i32
  }
  func.func @transform_1(%arg0: i32, %arg1: i32) -> (i32, i32) {
    %c0_i32 = arith.constant 0 : i32
    %c0_i32_0 = arith.constant 0 : i32
    %c0_i32_1 = arith.constant 0 : i32
    return %c0_i32, %c0_i32_0 : i32, i32
  }
  func.func @transform_2(%arg0: i32, %arg1: i32) -> (i32, i32) {
    %c0_i32 = arith.constant 0 : i32
    %c0_i32_0 = arith.constant 0 : i32
    %c0_i32_1 = arith.constant 0 : i32
    return %c0_i32, %c0_i32_0 : i32, i32
  }
  func.func @transform_3(%arg0: i32, %arg1: i32) -> (i32, i32) {
    %c0_i32 = arith.constant 0 : i32
    %c0_i32_0 = arith.constant 0 : i32
    %c0_i32_1 = arith.constant 0 : i32
    return %c0_i32, %c0_i32_0 : i32, i32
  }
  func.func @transform_4(%arg0: i32, %arg1: i32) -> (i32, i32, i32, i32) {
    %c0_i32 = arith.constant 0 : i32
    %c0_i32_0 = arith.constant 0 : i32
    %c0_i32_1 = arith.constant 0 : i32
    return %arg0, %arg1, %c0_i32, %c0_i32_0 : i32, i32, i32, i32
  }
  func.func @transform_5(%arg0: i32, %arg1: i32) -> (i32, i32, i32, i32) {
    %c0_i32 = arith.constant 0 : i32
    %c0_i32_0 = arith.constant 0 : i32
    %c0_i32_1 = arith.constant 0 : i32
    return %arg0, %arg1, %c0_i32, %c0_i32_0 : i32, i32, i32, i32
  }
}

module attributes {stable_mosaic.version = 11 : i64} {
  func.func @_finalize_kernel(%arg0: i32, %arg1: i32, %arg2: memref<1x8x16x128xf32, #tpu.memory_space<vmem>>, %arg3: memref<1x8x16x128xf32, #tpu.memory_space<vmem>>, %arg4: memref<1x128xf32, #tpu.memory_space<vmem>>, %arg5: memref<1x128xf32, #tpu.memory_space<vmem>>, %arg6: memref<1x128xf32, #tpu.memory_space<vmem>>, %arg7: memref<1x128xf32, #tpu.memory_space<vmem>>, %arg8: memref<1x8x16x128xf32, #tpu.memory_space<vmem>>) attributes {dimension_semantics = [#tpu.dimension_semantics<parallel>, #tpu.dimension_semantics<parallel>], iteration_bounds = array<i64: 2, 2>, scalar_prefetch = 0 : i64, scratch_operands = 0 : i64, tpu.core_type = #tpu.core_type<tc>, window_params = [{transform_indices = @transform_0, window_bounds = array<i64: 1, 8, 16, 128>}, {transform_indices = @transform_1, window_bounds = array<i64: 1, 8, 16, 128>}, {pipeline_mode = #tpu.pipeline_mode<synchronous>, transform_indices = @transform_2, window_bounds = array<i64: 1, 128>}, {pipeline_mode = #tpu.pipeline_mode<synchronous>, transform_indices = @transform_3, window_bounds = array<i64: 1, 128>}, {pipeline_mode = #tpu.pipeline_mode<synchronous>, transform_indices = @transform_4, window_bounds = array<i64: 1, 128>}, {pipeline_mode = #tpu.pipeline_mode<synchronous>, transform_indices = @transform_5, window_bounds = array<i64: 1, 128>}, {transform_indices = @transform_6, window_bounds = array<i64: 1, 8, 16, 128>}]} {
    %c0 = arith.constant 0 : index
    %c0_0 = arith.constant 0 : index
    %c0_1 = arith.constant 0 : index
    %c0_2 = arith.constant 0 : index
    %0 = vector.load %arg3[%c0, %c0_0, %c0_1, %c0_2] : memref<1x8x16x128xf32, #tpu.memory_space<vmem>>, vector<1x8x16x128xf32>
    %1 = vector.shape_cast %0 : vector<1x8x16x128xf32> to vector<8x16x128xf32>
    %c0_3 = arith.constant 0 : index
    %c0_4 = arith.constant 0 : index
    %2 = vector.load %arg6[%c0_3, %c0_4] : memref<1x128xf32, #tpu.memory_space<vmem>>, vector<1x128xf32>
    %3 = vector.shape_cast %2 : vector<1x128xf32> to vector<1x1x128xf32>
    %4 = vector.broadcast %3 : vector<1x1x128xf32> to vector<8x16x128xf32>
    %5 = arith.mulf %1, %4 : vector<8x16x128xf32>
    %c0_5 = arith.constant 0 : index
    %c0_6 = arith.constant 0 : index
    %6 = vector.load %arg7[%c0_5, %c0_6] : memref<1x128xf32, #tpu.memory_space<vmem>>, vector<1x128xf32>
    %7 = vector.shape_cast %6 : vector<1x128xf32> to vector<1x1x128xf32>
    %8 = vector.broadcast %7 : vector<1x1x128xf32> to vector<8x16x128xf32>
    %9 = arith.addf %5, %8 : vector<8x16x128xf32>
    %c0_7 = arith.constant 0 : index
    %c0_8 = arith.constant 0 : index
    %c0_9 = arith.constant 0 : index
    %c0_10 = arith.constant 0 : index
    %10 = vector.load %arg2[%c0_7, %c0_8, %c0_9, %c0_10] : memref<1x8x16x128xf32, #tpu.memory_space<vmem>>, vector<1x8x16x128xf32>
    %11 = vector.shape_cast %10 : vector<1x8x16x128xf32> to vector<8x16x128xf32>
    %c0_11 = arith.constant 0 : index
    %c0_12 = arith.constant 0 : index
    %12 = vector.load %arg4[%c0_11, %c0_12] : memref<1x128xf32, #tpu.memory_space<vmem>>, vector<1x128xf32>
    %13 = vector.shape_cast %12 : vector<1x128xf32> to vector<1x1x128xf32>
    %14 = vector.broadcast %13 : vector<1x1x128xf32> to vector<8x16x128xf32>
    %15 = arith.mulf %11, %14 : vector<8x16x128xf32>
    %c0_13 = arith.constant 0 : index
    %c0_14 = arith.constant 0 : index
    %16 = vector.load %arg5[%c0_13, %c0_14] : memref<1x128xf32, #tpu.memory_space<vmem>>, vector<1x128xf32>
    %17 = vector.shape_cast %16 : vector<1x128xf32> to vector<1x1x128xf32>
    %18 = vector.broadcast %17 : vector<1x1x128xf32> to vector<8x16x128xf32>
    %19 = arith.addf %15, %18 : vector<8x16x128xf32>
    %20 = arith.addf %19, %9 : vector<8x16x128xf32>
    %cst = arith.constant 0.000000e+00 : f32
    %21 = vector.broadcast %cst : f32 to vector<8x16x128xf32>
    %22 = arith.maximumf %20, %21 : vector<8x16x128xf32>
    %c0_15 = arith.constant 0 : index
    %c0_16 = arith.constant 0 : index
    %c0_17 = arith.constant 0 : index
    %c0_18 = arith.constant 0 : index
    %23 = vector.load %arg8[%c0_15, %c0_16, %c0_17, %c0_18] : memref<1x8x16x128xf32, #tpu.memory_space<vmem>>, vector<1x8x16x128xf32>
    %24 = vector.shape_cast %23 : vector<1x8x16x128xf32> to vector<8x16x128xf32>
    %25 = vector.shape_cast %22 : vector<8x16x128xf32> to vector<1x8x16x128xf32>
    tpu.vector_store %arg8[%c0_15, %c0_16, %c0_17, %c0_18], %25 {strides = array<i32>} : memref<1x8x16x128xf32, #tpu.memory_space<vmem>>, vector<1x8x16x128xf32>,
    return
  }
  func.func @transform_0(%arg0: i32, %arg1: i32) -> (i32, i32, i32, i32) {
    %c0_i32 = arith.constant 0 : i32
    %c0_i32_0 = arith.constant 0 : i32
    %c0_i32_1 = arith.constant 0 : i32
    return %arg0, %arg1, %c0_i32, %c0_i32_0 : i32, i32, i32, i32
  }
  func.func @transform_1(%arg0: i32, %arg1: i32) -> (i32, i32, i32, i32) {
    %c0_i32 = arith.constant 0 : i32
    %c0_i32_0 = arith.constant 0 : i32
    %c0_i32_1 = arith.constant 0 : i32
    return %arg0, %arg1, %c0_i32, %c0_i32_0 : i32, i32, i32, i32
  }
  func.func @transform_2(%arg0: i32, %arg1: i32) -> (i32, i32) {
    %c0_i32 = arith.constant 0 : i32
    %c0_i32_0 = arith.constant 0 : i32
    %c0_i32_1 = arith.constant 0 : i32
    return %c0_i32, %c0_i32_0 : i32, i32
  }
  func.func @transform_3(%arg0: i32, %arg1: i32) -> (i32, i32) {
    %c0_i32 = arith.constant 0 : i32
    %c0_i32_0 = arith.constant 0 : i32
    %c0_i32_1 = arith.constant 0 : i32
    return %c0_i32, %c0_i32_0 : i32, i32
  }
  func.func @transform_4(%arg0: i32, %arg1: i32) -> (i32, i32) {
    %c0_i32 = arith.constant 0 : i32
    %c0_i32_0 = arith.constant 0 : i32
    %c0_i32_1 = arith.constant 0 : i32
    return %c0_i32, %c0_i32_0 : i32, i32
  }
  func.func @transform_5(%arg0: i32, %arg1: i32) -> (i32, i32) {
    %c0_i32 = arith.constant 0 : i32
    %c0_i32_0 = arith.constant 0 : i32
    %c0_i32_1 = arith.constant 0 : i32
    return %c0_i32, %c0_i32_0 : i32, i32
  }
  func.func @transform_6(%arg0: i32, %arg1: i32) -> (i32, i32, i32, i32) {
    %c0_i32 = arith.constant 0 : i32
    %c0_i32_0 = arith.constant 0 : i32
    %c0_i32_1 = arith.constant 0 : i32
    return %arg0, %arg1, %c0_i32, %c0_i32_0 : i32, i32, i32, i32
  }
}

</mosaic_0001>

<bundles_post_ra>
// kernel: basic_block_forward.5
= control target key start
LH: loop header
LB: loop body
LE: loop exit
PB: predicated region body
PF: predicated region fallthrough
CT: control target
= control target key end

     0   :  { %s753_s21 = smov 0   ;;  %s755_s22 = smov 0   ;;  %s950_s0 = inlined_call_operand.vmem [shape: f32[2,16,16,128], index: 0, kind: input, shape index: {}]   ;;  %s951_s1 = inlined_call_operand.vmem [shape: f32[2,16,16,128], index: 1, kind: input, shape index: {}]   ;;  %s952_s2 = inlined_call_operand.vmem [shape: f32[1,128], index: 2, kind: input, shape index: {}]   ;;  %s953_s3 = inlined_call_operand.vmem [shape: f32[1,128], index: 3, kind: input, shape index: {}]   ;;  %s954_s4 = inlined_call_operand.vmem [shape: f32[1,128], index: 4, kind: input, shape index: {}]   ;;  %s955_s5 = inlined_call_operand.vmem [shape: f32[1,128], index: 5, kind: input, shape index: {}]   ;;  %s956_s6 = inlined_call_operand.vmem [shape: f32[2,16,16,128], index: 6, kind: output, shape index: {}]  }
   0x1   :  { %s757_s23 = smov 0   ;;  %s759_s24 = smov 0  }
   0x2   :  { %s761_s25 = smov 0  }
   0x3 LB: > { %s25_s26 = sadd.s32 1, %s708_s23  ;;  %s28_s27 = sadd.s32 1, %s712_s24  ;;  %s716_s25 = sphi %s761_s25, %s16_s25   ;;  %s712_s24 = sphi %s759_s24, %s960_s24   ;;  %s708_s23 = sphi %s757_s23, %s959_s23   ;;  %s704_s22 = sphi %s755_s22, %s958_s22   ;;  %s700_s21 = sphi %s753_s21, %s957_s21  }
   0x4   : > { %p26_p0 = scmp.ge.s32.totalorder %s25_s26, 2  ;;  %p619_p1 = scmp.ge.s32.totalorder %s716_s25, 1 }
   0x5   : > { %p252_p2 = scmp.lt.s32.totalorder %s716_s25, 5 }
   0x6   : > { %s962_s26 = smov (%p26_p0, %s25_s26), 0  ;;  %s964_s27 = smov (!%p26_p0, %s28_s27), %s712_s24 }
   0x7   : > { %p253_p3 = pnand %p619_p1, %p252_p2  ;;  %p30_p4 = scmp.ge.s32.totalorder %s964_s27, 2 }
   0x8   : > { %s620_s28 = sshll.u32 (!%p253_p3), %s700_s21, 3  ;;  %p303_p5 = scmp.lt.s32.totalorder (!%p253_p3), %s704_s22, 1 }
   0x9   : > { %s966_s27 = smov (%p30_p4, %s964_s27), 0  ;;  %256 = sbr.rel (%p253_p3) target bundleno = 50 (0x32), region = 44 }
   0xa   : > { %p305_p6 = scmp.lt.s32.totalorder (!%p253_p3), %s620_s28, 15 }
   0xe   : > { %s968_s22 = smov (!%p303_p5, %s704_s22), 1  ;;  %s970_s28 = smov (!%p305_p6, %s620_s28), 15  ;;  %v786_v0 = vld [vmem:[%s954_s4] ss:$0 sm:$0xff] }
   0xf   : > { %s622_s29 = sshll.u32 %s968_s22, 5  ;;  %s621_s30 = sshll.u32 %s970_s28, 1  ;;  %v791_v1 = vld [vmem:[%s952_s2] ss:$0 sm:$0xff] }
  0x10   : > { %s309_s7 = sadd.s32 %s622_s29, %s621_s30  ;;  %v810_v2 = vld [vmem:[%s955_s5] ss:$0 sm:$0xff] }
  0x11   : > { %s793_s12 = sshll.u32 %s309_s7, 3  ;;  %v815_v3 = vld [vmem:[%s953_s3] ss:$0 sm:$0xff] }
  0x12   : > { %s799_s15 = scalar_lea.vmem %s950_s0, %s793_s12  ;;  %s805_s18 = scalar_lea.vmem %s951_s1, %s793_s12 }
  0x13   : > { %v335_v4 = vld [vmem:[%s805_s18] sm:$0xff]  ;;  %v336_v6 = vld [vmem:[%s805_s18 + $0x8] sm:$0xff]  ;;  %v337_v11 = vld [vmem:[%s805_s18 + $0x10] sm:$0xff]  ;;  %s850_s30 = scalar_lea.vmem %s956_s6, %s793_s12 }
  0x14   : > { %v391_v5 = vld [vmem:[%s799_s15] sm:$0xff]  ;;  %v355_v7 = vmul.f32 %v786_v0, %v335_v4  ;;  %v356_v9 = vmul.f32 %v786_v0, %v336_v6  ;;  %v392_v10 = vld [vmem:[%s799_s15 + $0x8] sm:$0xff]  ;;  %v393_v12 = vld [vmem:[%s799_s15 + $0x10] sm:$0xff]  ;;  %v357_v14 = vmul.f32 %v786_v0, %v337_v11 }
  0x15   : > { %v411_v8 = vmul.f32 %v791_v1, %v391_v5  ;;  %v412_v13 = vmul.f32 %v791_v1, %v392_v10  ;;  %v413_v15 = vmul.f32 %v791_v1, %v393_v12  ;;  %v338_v16 = vld [vmem:[%s805_s18 + $0x18] sm:$0xff]  ;;  %v339_v18 = vld [vmem:[%s805_s18 + $0x20] sm:$0xff]  ;;  %v340_v24 = vld [vmem:[%s805_s18 + $0x28] sm:$0xff] }
  0x16   : > { %v394_v17 = vld [vmem:[%s799_s15 + $0x18] sm:$0xff]  ;;  %v375_v19 = vadd.f32 %v810_v2, %v355_v7  ;;  %v376_v21 = vadd.f32 %v810_v2, %v356_v9  ;;  %v358_v22 = vmul.f32 %v786_v0, %v338_v16  ;;  %v395_v23 = vld [vmem:[%s799_s15 + $0x20] sm:$0xff]  ;;  %v377_v26 = vadd.f32 %v810_v2, %v357_v14  ;;  %v396_v29 = vld [vmem:[%s799_s15 + $0x28] sm:$0xff] }
  0x17   : > { %v431_v20 = vadd.f32 %v815_v3, %v411_v8  ;;  %v432_v25 = vadd.f32 %v815_v3, %v412_v13  ;;  %v433_v27 = vadd.f32 %v815_v3, %v413_v15  ;;  %v414_v28 = vmul.f32 %v791_v1, %v394_v17  ;;  %v341_v38 = vld [vmem:[%s805_s18 + $0x30] sm:$0xff]  ;;  %v342_v44 = vld [vmem:[%s805_s18 + $0x38] sm:$0xff]  ;;  %v343_v46 = vld [vmem:[%s805_s18 + $0x40] sm:$0xff] }
  0x18   : > { %v378_v31 = vadd.f32 %v810_v2, %v358_v22  ;;  %v359_v32 = vmul.f32 %v786_v0, %v339_v18  ;;  %v415_v33 = vmul.f32 %v791_v1, %v395_v23  ;;  %v360_v37 = vmul.f32 %v786_v0, %v340_v24  ;;  %v397_v39 = vld [vmem:[%s799_s15 + $0x30] sm:$0xff]  ;;  %v398_v45 = vld [vmem:[%s799_s15 + $0x38] sm:$0xff]  ;;  %v399_v55 = vld [vmem:[%s799_s15 + $0x40] sm:$0xff] }
  0x19   : > { %v447_v30 = vadd.f32 %v431_v20, %v375_v19  ;;  %v448_v34 = vadd.f32 %v432_v25, %v376_v21  ;;  %v449_v35 = vadd.f32 %v433_v27, %v377_v26  ;;  %v434_v36 = vadd.f32 %v815_v3, %v414_v28  ;;  %v344_v60 = vld [vmem:[%s805_s18 + $0x48] sm:$0xff]  ;;  %v345_v6 = vld [vmem:[%s805_s18 + $0x50] sm:$0xff]  ;;  %v346_v12 = vld [vmem:[%s805_s18 + $0x58] sm:$0xff] }
  0x1a   : > { %v379_v41 = vadd.f32 %v810_v2, %v359_v32  ;;  %v435_v42 = vadd.f32 %v815_v3, %v415_v33  ;;  %v416_v43 = vmul.f32 %v791_v1, %v396_v29  ;;  %v380_v50 = vadd.f32 %v810_v2, %v360_v37  ;;  %v400_v61 = vld [vmem:[%s799_s15 + $0x48] sm:$0xff]  ;;  %v401_v7 = vld [vmem:[%s799_s15 + $0x50] sm:$0xff]  ;;  %v402_v21 = vld [vmem:[%s799_s15 + $0x58] sm:$0xff] }
  0x1b   : > { %v463_v40 = vmax.f32 %v447_v30, 0.0  ;;  %v464_v47 = vmax.f32 %v448_v34, 0.0  ;;  %v465_v48 = vmax.f32 %v449_v35, 0.0  ;;  %v450_v49 = vadd.f32 %v434_v36, %v378_v31  ;;  %v347_v22 = vld [vmem:[%s805_s18 + $0x60] sm:$0xff]  ;;  %v348_v28 = vld [vmem:[%s805_s18 + $0x68] sm:$0xff] }
  0x1c   : > { %v451_v51 = vadd.f32 %v435_v42, %v379_v41  ;;  %v436_v52 = vadd.f32 %v815_v3, %v416_v43  ;;  %v361_v53 = vmul.f32 %v786_v0, %v341_v38  ;;  %v417_v54 = vmul.f32 %v791_v1, %v397_v39  ;;  %v403_v27 = vld [vmem:[%s799_s15 + $0x60] sm:$0xff]  ;;  %v404_v33 = vld [vmem:[%s799_s15 + $0x68] sm:$0xff]  ;;  %v349_v38 = vld [vmem:[%s805_s18 + $0x70] sm:$0xff] }
  0x1d   : > { %479 = vst [vmem:[%s850_s30] sm:$0xff] %v463_v40  ;;  %v466_v56 = vmax.f32 %v450_v49, 0.0  ;;  %v362_v57 = vmul.f32 %v786_v0, %v342_v44  ;;  %v418_v58 = vmul.f32 %v791_v1, %v398_v45  ;;  %v363_v59 = vmul.f32 %v786_v0, %v343_v46  ;;  %v405_v43 = vld [vmem:[%s799_s15 + $0x70] sm:$0xff]  ;;  %v350_v44 = vld [vmem:[%s805_s18 + $0x78] sm:$0xff] }
  0x1e   : > { %480 = vst [vmem:[%s850_s30 + $0x8] sm:$0xff] %v464_v47  ;;  %v467_v62 = vmax.f32 %v451_v51, 0.0  ;;  %v452_v63 = vadd.f32 %v436_v52, %v380_v50  ;;  %v381_v4 = vadd.f32 %v810_v2, %v361_v53  ;;  %v437_v5 = vadd.f32 %v815_v3, %v417_v54  ;;  %v406_v49 = vld [vmem:[%s799_s15 + $0x78] sm:$0xff] }
  0x1f   : > { %481 = vst [vmem:[%s850_s30 + $0x10] sm:$0xff] %v465_v48  ;;  %v382_v8 = vadd.f32 %v810_v2, %v362_v57  ;;  %v438_v9 = vadd.f32 %v815_v3, %v418_v58  ;;  %v383_v10 = vadd.f32 %v810_v2, %v363_v59  ;;  %v419_v11 = vmul.f32 %v791_v1, %v399_v55 }
  0x20   : > { %482 = vst [vmem:[%s850_s30 + $0x18] sm:$0xff] %v466_v56  ;;  %v468_v13 = vmax.f32 %v452_v63, 0.0  ;;  %v453_v14 = vadd.f32 %v437_v5, %v381_v4  ;;  %v364_v15 = vmul.f32 %v786_v0, %v344_v60  ;;  %v420_v16 = vmul.f32 %v791_v1, %v400_v61 }
  0x21   : > { %483 = vst [vmem:[%s850_s30 + $0x20] sm:$0xff] %v467_v62  ;;  %v454_v17 = vadd.f32 %v438_v9, %v382_v8  ;;  %v439_v18 = vadd.f32 %v815_v3, %v419_v11  ;;  %v365_v19 = vmul.f32 %v786_v0, %v345_v6  ;;  %v421_v20 = vmul.f32 %v791_v1, %v401_v7 }
  0x22   : > { %484 = vst [vmem:[%s850_s30 + $0x28] sm:$0xff] %v468_v13  ;;  %v469_v23 = vmax.f32 %v453_v14, 0.0  ;;  %v384_v24 = vadd.f32 %v810_v2, %v364_v15  ;;  %v440_v25 = vadd.f32 %v815_v3, %v420_v16  ;;  %v366_v26 = vmul.f32 %v786_v0, %v346_v12 }
  0x23   : > { %v470_v29 = vmax.f32 %v454_v17, 0.0  ;;  %v455_v30 = vadd.f32 %v439_v18, %v383_v10  ;;  %v385_v31 = vadd.f32 %v810_v2, %v365_v19  ;;  %v441_v32 = vadd.f32 %v815_v3, %v421_v20 }
  0x24   : > { %485 = vst [vmem:[%s850_s30 + $0x30] sm:$0xff] %v469_v23  ;;  %v456_v34 = vadd.f32 %v440_v25, %v384_v24  ;;  %v386_v35 = vadd.f32 %v810_v2, %v366_v26  ;;  %v422_v36 = vmul.f32 %v791_v1, %v402_v21  ;;  %v367_v37 = vmul.f32 %v786_v0, %v347_v22 }
  0x25   : > { %486 = vst [vmem:[%s850_s30 + $0x38] sm:$0xff] %v470_v29  ;;  %v471_v39 = vmax.f32 %v455_v30, 0.0  ;;  %v457_v40 = vadd.f32 %v441_v32, %v385_v31  ;;  %v423_v41 = vmul.f32 %v791_v1, %v403_v27  ;;  %v368_v42 = vmul.f32 %v786_v0, %v348_v28 }
  0x26   : > { %v472_v45 = vmax.f32 %v456_v34, 0.0  ;;  %v442_v46 = vadd.f32 %v815_v3, %v422_v36  ;;  %v387_v47 = vadd.f32 %v810_v2, %v367_v37  ;;  %v424_v48 = vmul.f32 %v791_v1, %v404_v33 }
  0x27   : > { %487 = vst [vmem:[%s850_s30 + $0x40] sm:$0xff] %v471_v39  ;;  %v473_v50 = vmax.f32 %v457_v40, 0.0  ;;  %v443_v51 = vadd.f32 %v815_v3, %v423_v41  ;;  %v388_v52 = vadd.f32 %v810_v2, %v368_v42  ;;  %v369_v53 = vmul.f32 %v786_v0, %v349_v38 }
  0x28   : > { %488 = vst [vmem:[%s850_s30 + $0x48] sm:$0xff] %v472_v45  ;;  %v458_v54 = vadd.f32 %v442_v46, %v386_v35  ;;  %v444_v55 = vadd.f32 %v815_v3, %v424_v48  ;;  %v425_v56 = vmul.f32 %v791_v1, %v405_v43  ;;  %v370_v57 = vmul.f32 %v786_v0, %v350_v44 }
  0x29   : > { %489 = vst [vmem:[%s850_s30 + $0x50] sm:$0xff] %v473_v50  ;;  %v459_v58 = vadd.f32 %v443_v51, %v387_v47  ;;  %v389_v59 = vadd.f32 %v810_v2, %v369_v53  ;;  %v426_v60 = vmul.f32 %v791_v1, %v406_v49 }
  0x2a   : > { %v474_v61 = vmax.f32 %v458_v54, 0.0  ;;  %v460_v62 = vadd.f32 %v444_v55, %v388_v52  ;;  %v445_v63 = vadd.f32 %v815_v3, %v425_v56  ;;  %v390_v4 = vadd.f32 %v810_v2, %v370_v57 }
  0x2b   : > { %v475_v5 = vmax.f32 %v459_v58, 0.0  ;;  %v446_v6 = vadd.f32 %v815_v3, %v426_v60 }
  0x2c   : > { %490 = vst [vmem:[%s850_s30 + $0x58] sm:$0xff] %v474_v61  ;;  %v476_v0 = vmax.f32 %v460_v62, 0.0  ;;  %v461_v7 = vadd.f32 %v445_v63, %v389_v59 }
  0x2d   : > { %491 = vst [vmem:[%s850_s30 + $0x60] sm:$0xff] %v475_v5  ;;  %v462_v8 = vadd.f32 %v446_v6, %v390_v4 }
  0x2e   : > { %492 = vst [vmem:[%s850_s30 + $0x68] sm:$0xff] %v476_v0  ;;  %v477_v9 = vmax.f32 %v461_v7, 0.0 }
  0x2f   : > { %v478_v10 = vmax.f32 %v462_v8, 0.0 }
  0x30   : > { %493 = vst [vmem:[%s850_s30 + $0x70] sm:$0xff] %v477_v9 }
  0x31   : > { %494 = vst [vmem:[%s850_s30 + $0x78] sm:$0xff] %v478_v10 }
  0x32 PF: > { %s16_s25 = sadd.s32 1, %s716_s25   ;;  %s957_s21 = smov %s708_s23 }
  0x33   : > { %p13_p7 = scmp.ge.s32.totalorder %s16_s25, 6   ;;  %s958_s22 = smov %s712_s24 }
  0x34   : > { %s959_s23 = smov %s962_s26  ;;  %s960_s24 = smov %s966_s27 }
  0x35   :  { %15 = sbr.rel (!%p13_p7) target bundleno = 3 (0x3), region = 77 }

// kernel: basic_block_forward.4
= control target key start
LH: loop header
LB: loop body
LE: loop exit
PB: predicated region body
PF: predicated region fallthrough
CT: control target
= control target key end

     0   :  { %s4925_s18 = smov 0   ;;  %s4927_s19 = smov 0   ;;  %s6238_s0 = inlined_call_operand.vmem [shape: f32[2,16,16,128], index: 0, kind: input, shape index: {}]   ;;  %s6239_s1 = inlined_call_operand.vmem [shape: bf16[1152,128], index: 1, kind: input, shape index: {}]   ;;  %s6240_s2 = inlined_call_operand.vmem [shape: f32[1,128], index: 2, kind: input, shape index: {}]   ;;  %s6241_s3 = inlined_call_operand.vmem [shape: f32[1,128], index: 3, kind: input, shape index: {}]   ;;  %s6242_s4 = inlined_call_operand.vmem [shape: f32[2,16,16,128], index: 4, kind: output, shape index: {0}]   ;;  %s6243_s5 = inlined_call_operand.vmem [shape: f32[2,2,16,128], index: 5, kind: output, shape index: {1}]  }
   0x1   :  { %s4929_s20 = smov 0   ;;  %s4931_s21 = smov 0  }
   0x2   :  { %s4933_s22 = smov 0  }
   0x3 LB: > { %s25_s23 = sadd.s32 1, %s4884_s20  ;;  %s28_s24 = sadd.s32 1, %s4888_s21  ;;  %s4892_s22 = sphi %s4933_s22, %s16_s22   ;;  %s4888_s21 = sphi %s4931_s21, %s6261_s21   ;;  %s4884_s20 = sphi %s4929_s20, %s6260_s20   ;;  %s4880_s19 = sphi %s4927_s19, %s6259_s19   ;;  %s4876_s18 = sphi %s4925_s18, %s6258_s18  }
   0x4   : > { %p26_p0 = scmp.ge.s32.totalorder %s25_s23, 2  ;;  %p3893_p1 = scmp.ge.s32.totalorder %s4892_s22, 1 }
   0x5   : > { %p206_p2 = scmp.lt.s32.totalorder %s4892_s22, 5 }
   0x6   : > { %s6263_s23 = smov (%p26_p0, %s25_s23), 0  ;;  %s6265_s24 = smov (!%p26_p0, %s28_s24), %s4888_s21 }
   0x7   : > { %6244 = sst [smem:[#allocation4_spill]] %s6263_s23  ;;  %p207_p3 = pnand %p3893_p1, %p206_p2 }
   0x8   : > { %p30_p4 = scmp.ge.s32.totalorder %s6265_s24, 2  ;;  %p248_p5 = scmp.lt.s32.totalorder (!%p207_p3), %s4880_s19, 1 }
   0x9   : > { %210 = sbr.rel (%p207_p3) target bundleno = 584 (0x248), region = 36  ;;  %s3896_s25 = sshll.u32 (!%p207_p3), %s4876_s18, 3 }
   0xa   : > { %s6267_s24 = smov (%p30_p4, %s6265_s24), 0  ;;  %p256_p6 = scmp.lt.s32.totalorder (!%p207_p3), %s3896_s25, 15 }
   0xb   : > { %6245 = sst [smem:[#allocation5_spill]] %s6267_s24  ;;  %p266_p7 = scmp.lt.s32.totalorder (!%p207_p3), %s4876_s18, 1 }
   0xc   : > { %p3903_p8 = scmp.ne.s32.totalorder (!%p207_p3), %s4876_s18, 0 }
   0xe   : > { %s6269_s19 = smov (!%p248_p5, %s4880_s19), 1  ;;  %s6271_s25 = smov (!%p256_p6, %s3896_s25), 15 }
   0xf   : > { %s4641_s26 = sshll.u32 %s6269_s19, 8  ;;  %s3898_s27 = sshll.u32 %s6269_s19, 5 }
  0x10   : > { %s4962_s30 = scalar_lea.vmem %s6238_s0, %s4641_s26  ;;  %s3897_s6 = sshll.u32 %s6271_s25, 1 }
  0x11   : > { %s260_s7 = sadd.s32 %s3898_s27, %s3897_s6  ;;  %s3901_s12 = sshll.u32 %s6269_s19, 2 }
  0x12   : > { %s3899_s8 = sshll.u32 %s260_s7, 3 }
  0x13   : > { %s4967_s11 = scalar_lea.vmem %s6242_s4, %s3899_s8 }
  0x14   : > { %s267_s13 = scalar_select %p266_p7, %s4876_s18, 1 }
  0x15   : > { %277 = sbr.rel (%p3903_p8) target bundleno = 129 (0x81), region = 40 }
  0x16   : > { %s3900_s14 = sshll.u32 %s267_s13, 1 }
  0x17   : > { %s270_s15 = sadd.s32 %s3901_s12, %s3900_s14 }
  0x18   : > { %s3902_s16 = sshll.u32 %s270_s15, 3 }
  0x19   : > { %s4973_s23 = scalar_lea.vmem %s6243_s5, %s3902_s16 }
  0x1a   : > { %v4894_v0 = vmov 0   ;;  %v4990_v1 = vld [vmem:[%s6240_s2] ss:$0 sm:$0xff]  ;;  %v333_v3 = vld [vmem:[%s4962_s30 + $0x8] sm:$0xff]  ;;  %v334_v4 = vld [vmem:[%s4962_s30 + $0x10] sm:$0xff]  ;;  %vm824_vm0 = vcmask 1043456  }
  0x1b   : > { %281 = vst [vmem:[#allocation2 + $0xc] sm:$0xf] %v4894_v0  ;;  %v332_v2 = vld [vmem:[%s4962_s30] sm:$0xff]  ;;  %v369_v7 = vmul.f32 %v4990_v1, %v333_v3  ;;  %v370_v8 = vmul.f32 %v4990_v1, %v334_v4  ;;  %v335_v9 = vld [vmem:[%s4962_s30 + $0x18] sm:$0xff]  ;;  %v337_v13 = vld [vmem:[%s4962_s30 + $0x28] sm:$0xff]  ;;  %vm831_vm5 = vcmask 1040384  }
  0x1c   : > { %278 = vst [vmem:[#allocation2] sm:$0xf] %v4894_v0  ;;  %v368_v5 = vmul.f32 %v4990_v1, %v332_v2  ;;  %v5001_v6 = vld [vmem:[%s6241_s3] ss:$0 sm:$0xff]  ;;  %v371_v11 = vmul.f32 %v4990_v1, %v335_v9  ;;  %v373_v17 = vmul.f32 %v4990_v1, %v337_v13  ;;  %v338_v18 = vld [vmem:[%s4962_s30 + $0x30] sm:$0xff]  ;;  %v339_v26 = vld [vmem:[%s4962_s30 + $0x38] sm:$0xff] }
  0x1d   : > { %279 = vst [vmem:[#allocation2 + $0x4] sm:$0xf] %v4894_v0  ;;  %v336_v10 = vld [vmem:[%s4962_s30 + $0x20] sm:$0xff]  ;;  %v405_v15 = vadd.f32 %v5001_v6, %v369_v7  ;;  %v406_v16 = vadd.f32 %v5001_v6, %v370_v8  ;;  %v374_v21 = vmul.f32 %v4990_v1, %v338_v18  ;;  %v375_v35 = vmul.f32 %v4990_v1, %v339_v26  ;;  %v341_v37 = vld [vmem:[%s4962_s30 + $0x48] sm:$0xff]  ;;  %v342_v42 = vld [vmem:[%s4962_s30 + $0x50] sm:$0xff] }
  0x1e   : > { %280 = vst [vmem:[#allocation2 + $0x8] sm:$0x1] %v4894_v0  ;;  %v372_v12 = vmul.f32 %v4990_v1, %v336_v10  ;;  %v404_v14 = vadd.f32 %v5001_v6, %v368_v5  ;;  %v407_v19 = vadd.f32 %v5001_v6, %v371_v11  ;;  %v409_v25 = vadd.f32 %v5001_v6, %v373_v17  ;;  %v340_v36 = vld [vmem:[%s4962_s30 + $0x40] sm:$0xff] }
  0x1f   : > { %282 = vst [vmem:[#allocation2 + $0x10] sm:$0xf] %v4894_v0  ;;  %v437_v23 = vmax.f32 %v405_v15, 0.0  ;;  %v438_v24 = vmax.f32 %v406_v16, 0.0  ;;  %v410_v29 = vadd.f32 %v5001_v6, %v374_v21  ;;  %vm825_vm1 = vsmask.f32 7938 }
  0x20   : > { %283 = vst [vmem:[#allocation2 + $0x14] sm:$0x1] %v4894_v0  ;;  %v408_v20 = vadd.f32 %v5001_v6, %v372_v12  ;;  %v436_v22 = vmax.f32 %v404_v14, 0.0  ;;  %v439_v27 = vmax.f32 %v407_v19, 0.0  ;;  %v441_v33 = vmax.f32 %v409_v25, 0.0  ;;  %vm5048_vm4 = vmand %vm824_vm0, %vm825_vm1  ;;  %v343_v19 = vld [vmem:[%s4962_s30 + $0x58] sm:$0xff] }
  0x21   : > { %284 = vst [vmem:[#allocation2 + $0x18] sm:$0xf] %v4894_v0  ;;  %v469_v31 = vpack.c.bf16 %v437_v23, %v437_v23  ;;  %v470_v32 = vpack.c.bf16 %v438_v24, %v438_v24  ;;  %v442_v34 = vmax.f32 %v410_v29, 0.0  ;;  %v376_v48 = vmul.f32 %v4990_v1, %v340_v36 }
  0x22   : > { %285 = vst [vmem:[#allocation2 + $0x1c] sm:$0xf] %v4894_v0  ;;  %v440_v28 = vmax.f32 %v408_v20, 0.0  ;;  %v468_v30 = vpack.c.bf16 %v436_v22, %v436_v22  ;;  %v471_v41 = vpack.c.bf16 %v439_v27, %v439_v27  ;;  %v5037_v46 = vld [vmem:[#allocation2 + $0xc] sm:$0xf]  ;;  %v377_v49 = vmul.f32 %v4990_v1, %v341_v37 }
  0x23   : > { %286 = vst [vmem:[#allocation2 + $0x20] sm:$0x1] %v4894_v0  ;;  %v512_v39 = vshrl.u32 %v469_v31, 16  ;;  %v521_v40 = vshrl.u32 %v470_v32, 16  ;;  %vm500_vm2 = vsmask.f32 256  ;;  %v473_v50 = vpack.c.bf16 %v441_v33, %v441_v33 }
  0x24   : > { %287 = vst [vmem:[#allocation2 + $0x24] sm:$0xf] %v4894_v0  ;;  %v504_v38 = vshrl.u32 %v468_v30, 16  ;;  %v507_v43 = vshll.u32 %v468_v30, 16  ;;  %v5034_v44 = vpack.c.bf16 %v440_v28, %v440_v28  ;;  %vm501_vm3 = vsmask.f32 4368  ;;  %vm5056_vm6 = vmand %vm831_vm5, %vm500_vm2 }
  0x25   : > { %288 = vst [vmem:[#allocation2 + $0x28] sm:$0xf] %v4894_v0  ;;  %v514_v47 = vrot.slane %v512_v39, 7  ;;  %v411_v51 = vadd.f32 %v5001_v6, %v375_v35  ;;  %v515_v55 = vshll.u32 %v469_v31, 16  ;;  %v523_v58 = vrot.slane %v521_v40, 7  ;;  %vm5082_vm7 = vmor %vm500_vm2, %vm501_vm3 }
  0x26   : > { %289 = vst [vmem:[#allocation2 + $0x2c] sm:$0x1] %v4894_v0  ;;  %v506_v45 = vrot.slane %v504_v38, 7  ;;  %v474_v59 = vpack.c.bf16 %v442_v34, %v442_v34  ;;  %v378_v60 = vmul.f32 %v4990_v1, %v342_v42  ;;  %v524_v62 = vshll.u32 %v470_v32, 16  ;;  %v344_v42 = vld [vmem:[%s4962_s30 + $0x60] sm:$0xff] }
  0x27   : > { %290 = vst [vmem:[#allocation2 + $0x30] sm:$0xf] %v4894_v0  ;;  %v519_v56 = vrot.slane %v514_v47, 4  ;;  %v833_v57 = vld [vmem:[#allocation2 + $0x14] sm:$0x1]  ;;  %v529_v63 = vshrl.u32 %v471_v41, 16  ;;  %v412_v2 = vadd.f32 %v5001_v6, %v376_v48  ;;  %v5062_v3 = vadd.f32 %v5001_v6, %v377_v49 }
  0x28   : > { %291 = vst [vmem:[#allocation2 + $0x34] sm:$0xf] %v4894_v0  ;;  %v5044_v52 = vor.u32 %v507_v43, %v506_v45  ;;  %v510_v54 = vrot.slane %v506_v45, 4  ;;  %v517_v5 = vor.u32 %v515_v55, %v514_v47  ;;  %v5073_v8 = vld [vmem:[#allocation2 + $0x18] sm:$0xf]  ;;  %v532_v9 = vshll.u32 %v471_v41, 16 }
  0x29   : > { %292 = vst [vmem:[#allocation2 + $0x38] sm:$0x1] %v4894_v0  ;;  %v5071_v7 = vsel %vm5056_vm6, %v519_v56, %v833_v57  ;;  %v5076_v10 = vor.u32 %v524_v62, %v523_v58  ;;  %v527_v11 = vrot.slane %v523_v58, 4  ;;  %v531_v12 = vrot.slane %v529_v63, 7  ;;  %v345_v43 = vld [vmem:[%s4962_s30 + $0x68] sm:$0xff] }
  0x2a   : > { %293 = vst [vmem:[#allocation2 + $0x3c] sm:$0xf] %v4894_v0  ;;  %v828_v4 = vsel %vm5048_vm4, %v5044_v52, %v5037_v46  ;;  %v538_v13 = vshrl.u32 %v5034_v44, 16  ;;  %v541_v15 = vshll.u32 %v5034_v44, 16  ;;  %v546_v16 = vshrl.u32 %v473_v50, 16 }
  0x2b   : > { %294 = vst [vmem:[#allocation2 + $0x40] sm:$0xf] %v4894_v0  ;;  %v549_v17 = vshll.u32 %v473_v50, 16  ;;  %v555_v18 = vshrl.u32 %v474_v59, 16  ;;  %v534_v20 = vor.u32 %v532_v9, %v531_v12  ;;  %v536_v21 = vrot.slane %v531_v12, 4 }
  0x2c   : > { %295 = vst [vmem:[#allocation2 + $0x44] sm:$0x1] %v4894_v0  ;;  %v840_v22 = vld [vmem:[#allocation2 + $0x20] sm:$0x1]  ;;  %v540_v23 = vrot.slane %v538_v13, 7  ;;  %v414_v24 = vadd.f32 %v5001_v6, %v378_v60  ;;  %v548_v25 = vrot.slane %v546_v16, 7  ;;  %v5096_v29 = vsel %vm5082_vm7, %v510_v54, %v517_v5 }
  0x2d   : > { %296 = vst [vmem:[#allocation2 + $0x48] sm:$0xf] %v4894_v0  ;;  %v5091_v26 = vrot.slane %v555_v18, 7  ;;  %v558_v27 = vshll.u32 %v474_v59, 16  ;;  %v443_v28 = vmax.f32 %v411_v51, 0.0  ;;  %v837_v30 = vsel %vm5048_vm4, %v5076_v10, %v5073_v8 }
  0x2e   : > { %297 = vst [vmem:[#allocation2 + $0x4c] sm:$0xf] %v4894_v0  ;;  %v5102_v31 = vor.u32 %v541_v15, %v540_v23  ;;  %v5104_v32 = vld [vmem:[#allocation2 + $0x24] sm:$0xf]  ;;  %v544_v33 = vrot.slane %v540_v23, 4  ;;  %v5109_v34 = vsel %vm5082_vm7, %v527_v11, %v534_v20  ;;  %v5113_v35 = vsel %vm5056_vm6, %v536_v21, %v840_v22 }
  0x2f   : > { %298 = vst [vmem:[#allocation2 + $0x50] sm:$0x1] %v4894_v0  ;;  %v551_v36 = vor.u32 %v549_v17, %v548_v25  ;;  %v475_v37 = vpack.c.bf16 %v443_v28, %v443_v28  ;;  %v553_v38 = vrot.slane %v548_v25, 4  ;;  %v5117_v39 = vor.u32 %v558_v27, %v5091_v26  ;;  %v847_v55 = vld [vmem:[#allocation2 + $0x2c] sm:$0x1] }
  0x30   : > { %299 = vst [vmem:[#allocation2 + $0x54] sm:$0xf] %v4894_v0  ;;  %v444_v40 = vmax.f32 %v412_v2, 0.0  ;;  %v379_v41 = vmul.f32 %v4990_v1, %v343_v19  ;;  %v844_v44 = vsel %vm5048_vm4, %v5102_v31, %v5104_v32  ;;  %v561_v47 = vrot.slane %v5091_v26, 4  ;;  %v5139_v60 = vld [vmem:[#allocation2 + $0x30] sm:$0xf] }
  0x31   : > { %300 = vst [vmem:[#allocation2 + $0x58] sm:$0xf] %v4894_v0  ;;  %v5129_v45 = vsel %vm5082_vm7, %v544_v33, %v551_v36  ;;  %v563_v48 = vshrl.u32 %v475_v37, 16  ;;  %v566_v49 = vshll.u32 %v475_v37, 16  ;;  %v445_v51 = vmax.f32 %v5062_v3, 0.0 }
  0x32   : > { %301 = vst [vmem:[#allocation2 + $0x5c] sm:$0x1] %v4894_v0  ;;  %v476_v50 = vpack.c.bf16 %v444_v40, %v444_v40  ;;  %v446_v54 = vmax.f32 %v414_v24, 0.0  ;;  %v415_v57 = vadd.f32 %v5001_v6, %v379_v41  ;;  %v380_v58 = vmul.f32 %v4990_v1, %v344_v42  ;;  %v854_v11 = vld [vmem:[#allocation2 + $0x38] sm:$0x1] }
  0x33   : > { %302 = vst [vmem:[#allocation2 + $0x60] sm:$0xf] %v4894_v0  ;;  %v565_v56 = vrot.slane %v563_v48, 7  ;;  %v381_v59 = vmul.f32 %v4990_v1, %v345_v43  ;;  %v477_v2 = vpack.c.bf16 %v445_v51, %v445_v51  ;;  %v5147_v19 = vsel %vm5056_vm6, %v553_v38, %v847_v55  ;;  %v5153_v21 = vld [vmem:[#allocation2 + $0x3c] sm:$0xf]  ;;  %v346_v38 = vld [vmem:[%s4962_s30 + $0x70] sm:$0xff] }
  0x34   : > { %303 = vst [vmem:[#allocation2 + $0x64] sm:$0xf] %v4894_v0  ;;  %v572_v62 = vshrl.u32 %v476_v50, 16  ;;  %v575_v63 = vshll.u32 %v476_v50, 16  ;;  %v478_v5 = vpack.c.bf16 %v446_v54, %v446_v54  ;;  %v447_v12 = vmax.f32 %v415_v57, 0.0  ;;  %v347_v55 = vld [vmem:[%s4962_s30 + $0x78] sm:$0xff] }
  0x35   : > { %304 = vst [vmem:[#allocation2 + $0x68] sm:$0x1] %v4894_v0  ;;  %v568_v3 = vor.u32 %v566_v49, %v565_v56  ;;  %v570_v9 = vrot.slane %v565_v56, 4  ;;  %v416_v13 = vadd.f32 %v5001_v6, %v380_v58  ;;  %v580_v16 = vshrl.u32 %v477_v2, 16  ;;  %v861_v48 = vld [vmem:[#allocation2 + $0x44] sm:$0x1] }
  0x36   : > { %305 = vst [vmem:[#allocation2 + $0x6c] sm:$0xf] %v4894_v0  ;;  %v574_v15 = vrot.slane %v572_v62, 7  ;;  %v583_v17 = vshll.u32 %v477_v2, 16  ;;  %v589_v18 = vshrl.u32 %v478_v5, 16  ;;  %v851_v20 = vsel %vm5048_vm4, %v5117_v39, %v5139_v60  ;;  %v348_v56 = vld [vmem:[%s4962_s30 + $0x80] sm:$0xff] }
  0x37   : > { %306 = vst [vmem:[#allocation2 + $0x70] sm:$0xf] %v4894_v0  ;;  %v592_v22 = vshll.u32 %v478_v5, 16  ;;  %v479_v23 = vpack.c.bf16 %v447_v12, %v447_v12  ;;  %v582_v26 = vrot.slane %v580_v16, 7  ;;  %v448_v36 = vmax.f32 %v416_v13, 0.0 }
  0x38   : > { %307 = vst [vmem:[#allocation2 + $0x74] sm:$0x1] %v4894_v0  ;;  %v5156_v24 = vor.u32 %v575_v63, %v574_v15  ;;  %v578_v25 = vrot.slane %v574_v15, 4  ;;  %v591_v27 = vrot.slane %v589_v18, 7  ;;  %v417_v37 = vadd.f32 %v5001_v6, %v381_v59  ;;  %v5184_v58 = vld [vmem:[#allocation2 + $0x48] sm:$0xf] }
  0x39   : > { %308 = vst [vmem:[#allocation2 + $0x78] sm:$0xf] %v4894_v0  ;;  %v597_v28 = vshrl.u32 %v479_v23, 16  ;;  %v600_v33 = vshll.u32 %v479_v23, 16  ;;  %v5164_v40 = vsel %vm5082_vm7, %v561_v47, %v568_v3  ;;  %v5168_v41 = vsel %vm5056_vm6, %v570_v9, %v854_v11  ;;  %v349_v63 = vld [vmem:[%s4962_s30 + $0x88] sm:$0xff] }
  0x3a   : > { %309 = vst [vmem:[#allocation2 + $0x7c] sm:$0xf] %v4894_v0  ;;  %v585_v42 = vor.u32 %v583_v17, %v582_v26  ;;  %v587_v43 = vrot.slane %v582_v26, 4  ;;  %v5171_v49 = vor.u32 %v592_v22, %v591_v27  ;;  %v480_v51 = vpack.c.bf16 %v448_v36, %v448_v36  ;;  %v868_v11 = vld [vmem:[#allocation2 + $0x50] sm:$0x1]  ;;  %v351_v36 = vld [vmem:[%s4962_s30 + $0x98] sm:$0xff] }
  0x3b   : > { %310 = vst [vmem:[#allocation2 + $0x80] sm:$0x1] %v4894_v0  ;;  %v599_v50 = vrot.slane %v597_v28, 7  ;;  %v449_v54 = vmax.f32 %v417_v37, 0.0  ;;  %v858_v47 = vsel %vm5048_vm4, %v5156_v24, %v5153_v21  ;;  %v595_v59 = vrot.slane %v591_v27, 4 }
  0x3c   : > { %311 = vst [vmem:[#allocation2 + $0x84] sm:$0xf] %v4894_v0  ;;  %v5182_v57 = vsel %vm5082_vm7, %v578_v25, %v585_v42  ;;  %v382_v62 = vmul.f32 %v4990_v1, %v346_v38  ;;  %v5191_v2 = vsel %vm5056_vm6, %v587_v43, %v861_v48  ;;  %v606_v3 = vshrl.u32 %v480_v51, 16  ;;  %v350_v25 = vld [vmem:[%s4962_s30 + $0x90] sm:$0xff] }
  0x3d   : > { %312 = vst [vmem:[#allocation2 + $0x88] sm:$0xf] %v4894_v0  ;;  %v602_v5 = vor.u32 %v600_v33, %v599_v50  ;;  %v609_v9 = vshll.u32 %v480_v51, 16  ;;  %v481_v12 = vpack.c.bf16 %v449_v54, %v449_v54  ;;  %v383_v15 = vmul.f32 %v4990_v1, %v347_v55  ;;  %v5214_v38 = vld [vmem:[#allocation2 + $0x54] sm:$0xf] }
  0x3e   : > { %313 = vst [vmem:[#allocation2 + $0x8c] sm:$0x1] %v4894_v0  ;;  %v418_v13 = vadd.f32 %v5001_v6, %v382_v62  ;;  %v384_v16 = vmul.f32 %v4990_v1, %v348_v56  ;;  %v865_v17 = vsel %vm5048_vm4, %v5171_v49, %v5184_v58  ;;  %v604_v18 = vrot.slane %v599_v50, 4  ;;  %v5269_v32 = vld [vmem:[#allocation2 + $0x6c] sm:$0xf] }
  0x3f   : > { %314 = vst [vmem:[#allocation2 + $0x90] sm:$0xf] %v4894_v0  ;;  %v608_v22 = vrot.slane %v606_v3, 7  ;;  %v385_v23 = vmul.f32 %v4990_v1, %v349_v63  ;;  %v5207_v26 = vsel %vm5082_vm7, %v595_v59, %v602_v5  ;;  %v614_v27 = vshrl.u32 %v481_v12, 16 }
  0x40   : > { %315 = vst [vmem:[#allocation2 + $0x94] sm:$0xf] %v4894_v0  ;;  %v450_v28 = vmax.f32 %v418_v13, 0.0  ;;  %v419_v33 = vadd.f32 %v5001_v6, %v383_v15  ;;  %v617_v42 = vshll.u32 %v481_v12, 16  ;;  %v420_v43 = vadd.f32 %v5001_v6, %v384_v16  ;;  %v5320_v24 = vld [vmem:[#allocation2 + $0x78] sm:$0xf] }
  0x41   : > { %316 = vst [vmem:[#allocation2 + $0x98] sm:$0x1] %v4894_v0  ;;  %v5212_v37 = vor.u32 %v609_v9, %v608_v22  ;;  %v421_v48 = vadd.f32 %v5001_v6, %v385_v23  ;;  %v616_v50 = vrot.slane %v614_v27, 7  ;;  %v386_v55 = vmul.f32 %v4990_v1, %v350_v25  ;;  %v352_v23 = vld [vmem:[%s4962_s30 + $0xa0] sm:$0xff] }
  0x42   : > { %317 = vst [vmem:[#allocation2 + $0x9c] sm:$0xf] %v4894_v0  ;;  %v482_v51 = vpack.c.bf16 %v450_v28, %v450_v28  ;;  %v451_v54 = vmax.f32 %v419_v33, 0.0  ;;  %v5223_v56 = vsel %vm5056_vm6, %v604_v18, %v868_v11  ;;  %v452_v59 = vmax.f32 %v420_v43, 0.0  ;;  %v875_v11 = vld [vmem:[#allocation2 + $0x5c] sm:$0x1] }
  0x43   : > { %318 = vst [vmem:[#allocation2 + $0xa0] sm:$0xf] %v4894_v0  ;;  %v453_v62 = vmax.f32 %v421_v48, 0.0  ;;  %v387_v63 = vmul.f32 %v4990_v1, %v351_v36  ;;  %v612_v5 = vrot.slane %v608_v22, 4  ;;  %v422_v16 = vadd.f32 %v5001_v6, %v386_v55  ;;  %v5248_v28 = vld [vmem:[#allocation2 + $0x60] sm:$0xf] }
  0x44   : > { %319 = vst [vmem:[#allocation2 + $0xa4] sm:$0x1] %v4894_v0  ;;  %v623_v3 = vshrl.u32 %v482_v51, 16  ;;  %v626_v9 = vshll.u32 %v482_v51, 16  ;;  %v483_v12 = vpack.c.bf16 %v451_v54, %v451_v54  ;;  %v484_v13 = vpack.c.bf16 %v452_v59, %v452_v59  ;;  %v353_v43 = vld [vmem:[%s4962_s30 + $0xa8] sm:$0xff] }
  0x45   : > { %320 = vst [vmem:[#allocation2 + $0xa8] sm:$0xf] %v4894_v0  ;;  %v485_v15 = vpack.c.bf16 %v453_v62, %v453_v62  ;;  %v619_v46 = vor.u32 %v617_v42, %v616_v50  ;;  %v621_v52 = vrot.slane %v616_v50, 4  ;;  %v423_v18 = vadd.f32 %v5001_v6, %v387_v63  ;;  %v882_v51 = vld [vmem:[#allocation2 + $0x68] sm:$0x1] }
  0x46   : > { %321 = vst [vmem:[#allocation2 + $0xac] sm:$0xf] %v4894_v0  ;;  %v634_v22 = vshll.u32 %v483_v12, 16  ;;  %v640_v25 = vshrl.u32 %v484_v13, 16  ;;  %v643_v27 = vshll.u32 %v484_v13, 16  ;;  %v454_v8 = vmax.f32 %v422_v16, 0.0 }
  0x47   : > { %322 = vst [vmem:[#allocation2 + $0xb0] sm:$0x1] %v4894_v0  ;;  %v648_v36 = vshrl.u32 %v485_v15, 16  ;;  %v651_v42 = vshll.u32 %v485_v15, 16  ;;  %v455_v10 = vmax.f32 %v423_v18, 0.0  ;;  %v388_v54 = vmul.f32 %v4990_v1, %v352_v23  ;;  %v355_v13 = vld [vmem:[%s4962_s30 + $0xb8] sm:$0xff] }
  0x48   : > { %323 = vst [vmem:[#allocation2 + $0xb4] sm:$0xf] %v4894_v0  ;;  %v642_v50 = vrot.slane %v640_v25, 7  ;;  %v356_v16 = vld [vmem:[%s4962_s30 + $0xc0] sm:$0xff]  ;;  %v889_v25 = vld [vmem:[#allocation2 + $0x74] sm:$0x1] }
  0x49   : > { %324 = vst [vmem:[#allocation2 + $0xb8] sm:$0xf] %v4894_v0 }
  0x4a   : > { %325 = vst [vmem:[#allocation2 + $0xbc] sm:$0x1] %v4894_v0  ;;  %v5267_v31 = vor.u32 %v643_v27, %v642_v50  ;;  %v646_v62 = vrot.slane %v642_v50, 4 }
  0x4b   : > { %326 = vst [vmem:[#allocation2 + $0xc0] sm:$0xf] %v4894_v0 }
  0x4c   : > { %327 = vst [vmem:[#allocation2 + $0xc4] sm:$0xf] %v4894_v0  ;;  %v886_v60 = vsel %vm5048_vm4, %v5267_v31, %v5269_v32 }
  0x4d   : > { %328 = vst [vmem:[#allocation2 + $0xc8] sm:$0x1] %v4894_v0 }
  0x4e   : > { %329 = vst [vmem:[#allocation2 + $0xcc] sm:$0xf] %v4894_v0 }
  0x4f   : > { %330 = vst [vmem:[#allocation2 + $0xd0] sm:$0xf] %v4894_v0 }
  0x50   : > { %331 = vst [vmem:[#allocation2 + $0xd4] sm:$0x1] %v4894_v0  ;;  %v872_v0 = vsel %vm5048_vm4, %v5212_v37, %v5214_v38 }
  0x51   : > { %829 = vst [vmem:[#allocation2 + $0xc] sm:$0xf] %v828_v4  ;;  %v625_v4 = vrot.slane %v623_v3, 7  ;;  %v487_v3 = vpack.c.bf16 %v455_v10, %v455_v10 }
  0x52   : > { %830 = vst [vmem:[#allocation2 + $0x10] sm:$0xf] %v5096_v29  ;;  %v631_v29 = vshrl.u32 %v483_v12, 16  ;;  %v354_v12 = vld [vmem:[%s4962_s30 + $0xb0] sm:$0xff] }
  0x53   : > { %835 = vst [vmem:[#allocation2 + $0x14] sm:$0x1] %v5071_v7  ;;  %v5246_v7 = vor.u32 %v626_v9, %v625_v4  ;;  %v629_v33 = vrot.slane %v625_v4, 4 }
  0x54   : > { %838 = vst [vmem:[#allocation2 + $0x18] sm:$0xf] %v837_v30  ;;  %v633_v48 = vrot.slane %v631_v29, 7  ;;  %v5259_v30 = vsel %vm5082_vm7, %v612_v5, %v619_v46  ;;  %v486_v5 = vpack.c.bf16 %v454_v8, %v454_v8  ;;  %v665_v46 = vshrl.u32 %v487_v3, 16 }
  0x55   : > { %839 = vst [vmem:[#allocation2 + $0x1c] sm:$0xf] %v5109_v34  ;;  %v5263_v34 = vsel %vm5056_vm6, %v621_v52, %v875_v11  ;;  %v424_v11 = vadd.f32 %v5001_v6, %v388_v54  ;;  %v668_v52 = vshll.u32 %v487_v3, 16  ;;  %v5351_v3 = vld [vmem:[#allocation2 + $0x84] sm:$0xf] }
  0x56   : > { %842 = vst [vmem:[#allocation2 + $0x20] sm:$0x1] %v5113_v35  ;;  %v650_v35 = vrot.slane %v648_v36, 7  ;;  %v636_v55 = vor.u32 %v634_v22, %v633_v48  ;;  %v638_v59 = vrot.slane %v633_v48, 4  ;;  %v660_v15 = vshll.u32 %v486_v5, 16 }
  0x57   : > { %845 = vst [vmem:[#allocation2 + $0x24] sm:$0xf] %v844_v44  ;;  %v389_v44 = vmul.f32 %v4990_v1, %v353_v43  ;;  %v456_v4 = vmax.f32 %v424_v11, 0.0  ;;  %v390_v22 = vmul.f32 %v4990_v1, %v354_v12  ;;  %v5314_v27 = vrot.slane %v665_v46, 7  ;;  %v358_v12 = vld [vmem:[%s4962_s30 + $0xd0] sm:$0xff] }
  0x58   : > { %846 = vst [vmem:[#allocation2 + $0x28] sm:$0xf] %v5129_v45  ;;  %v653_v63 = vor.u32 %v651_v42, %v650_v35  ;;  %v879_v45 = vsel %vm5048_vm4, %v5246_v7, %v5248_v28  ;;  %v5284_v9 = vsel %vm5082_vm7, %v629_v33, %v636_v55  ;;  %v5292_v39 = vsel %vm5056_vm6, %v638_v59, %v882_v51  ;;  %v359_v28 = vld [vmem:[%s4962_s30 + $0xd8] sm:$0xff] }
  0x59   : > { %849 = vst [vmem:[#allocation2 + $0x2c] sm:$0x1] %v5147_v19  ;;  %v655_v19 = vrot.slane %v650_v35, 4  ;;  %v425_v18 = vadd.f32 %v5001_v6, %v389_v44  ;;  %v488_v33 = vpack.c.bf16 %v456_v4, %v456_v4  ;;  %v392_v42 = vmul.f32 %v4990_v1, %v356_v16 }
  0x5a   : > { %852 = vst [vmem:[#allocation2 + $0x30] sm:$0xf] %v851_v20  ;;  %v657_v20 = vshrl.u32 %v486_v5, 16  ;;  %v5309_v23 = vsel %vm5082_vm7, %v646_v62, %v653_v63  ;;  %v670_v50 = vor.u32 %v668_v52, %v5314_v27  ;;  %v672_v58 = vrot.slane %v5314_v27, 4  ;;  %v896_v63 = vld [vmem:[#allocation2 + $0x80] sm:$0x1] }
  0x5b   : > { %853 = vst [vmem:[#allocation2 + $0x34] sm:$0xf] %v5164_v40  ;;  %v357_v40 = vld [vmem:[%s4962_s30 + $0xc8] sm:$0xff]  ;;  %v457_v36 = vmax.f32 %v425_v18, 0.0  ;;  %v677_v8 = vshll.u32 %v488_v33, 16  ;;  %v890_v10 = vsel %vm5056_vm6, %v655_v19, %v889_v25  ;;  %v428_v55 = vadd.f32 %v5001_v6, %v392_v42 }
  0x5c   : > { %856 = vst [vmem:[#allocation2 + $0x38] sm:$0x1] %v5168_v41  ;;  %v659_v29 = vrot.slane %v657_v20, 7  ;;  %v391_v41 = vmul.f32 %v4990_v1, %v355_v13  ;;  %v393_v48 = vmul.f32 %v4990_v1, %v357_v40  ;;  %v903_v20 = vld [vmem:[#allocation2 + $0x8c] sm:$0x1]  ;;  %v394_v7 = vmul.f32 %v4990_v1, %v358_v12 }
  0x5d   : > { %859 = vst [vmem:[#allocation2 + $0x3c] sm:$0xf] %v858_v47  ;;  %v426_v47 = vadd.f32 %v5001_v6, %v390_v22  ;;  %v489_v51 = vpack.c.bf16 %v457_v36, %v457_v36  ;;  %v460_v19 = vmax.f32 %v428_v55, 0.0 }
  0x5e   : > { %860 = vst [vmem:[#allocation2 + $0x40] sm:$0xf] %v5182_v57  ;;  %v5318_v21 = vor.u32 %v660_v15, %v659_v29  ;;  %v427_v43 = vadd.f32 %v5001_v6, %v391_v41  ;;  %v663_v57 = vrot.slane %v659_v29, 4  ;;  %v429_v11 = vadd.f32 %v5001_v6, %v393_v48  ;;  %v906_v41 = vld [vmem:[#allocation2 + $0x90] sm:$0xf]  ;;  %v363_v48 = vld [vmem:[%s4962_s30 + $0xf8] sm:$0xff] }
  0x5f   : > { %863 = vst [vmem:[#allocation2 + $0x44] sm:$0x1] %v5191_v2  ;;  %v674_v2 = vshrl.u32 %v488_v33, 16  ;;  %v458_v35 = vmax.f32 %v426_v47, 0.0  ;;  %v685_v59 = vshll.u32 %v489_v51, 16  ;;  %v492_v16 = vpack.c.bf16 %v460_v19, %v460_v19  ;;  %v360_v33 = vld [vmem:[%s4962_s30 + $0xe0] sm:$0xff] }
  0x60   : > { %866 = vst [vmem:[#allocation2 + $0x48] sm:$0xf] %v865_v17  ;;  %v459_v54 = vmax.f32 %v427_v43, 0.0  ;;  %v893_v49 = vsel %vm5048_vm4, %v5318_v21, %v5320_v24  ;;  %v671_v62 = vsel %vm5082_vm7, %v663_v57, %v670_v50  ;;  %v461_v46 = vmax.f32 %v429_v11, 0.0  ;;  %v361_v47 = vld [vmem:[%s4962_s30 + $0xe8] sm:$0xff]  ;;  %v362_v43 = vld [vmem:[%s4962_s30 + $0xf0] sm:$0xff] }
  0x61   : > { %867 = vst [vmem:[#allocation2 + $0x4c] sm:$0xf] %v5207_v26  ;;  %v676_v17 = vrot.slane %v674_v2, 7  ;;  %v682_v26 = vshrl.u32 %v489_v51, 16  ;;  %v708_v40 = vshrl.u32 %v492_v16, 16  ;;  %v711_v29 = vshll.u32 %v492_v16, 16 }
  0x62   : > { %870 = vst [vmem:[#allocation2 + $0x50] sm:$0x1] %v5223_v56  ;;  %v490_v56 = vpack.c.bf16 %v458_v35, %v458_v35  ;;  %v491_v44 = vpack.c.bf16 %v459_v54, %v459_v54  ;;  %v493_v22 = vpack.c.bf16 %v461_v46, %v461_v46  ;;  %v430_v21 = vadd.f32 %v5001_v6, %v394_v7  ;;  %v924_v7 = vld [vmem:[#allocation2 + $0xb0] sm:$0x1] }
  0x63   : > { %873 = vst [vmem:[#allocation2 + $0x54] sm:$0xf] %v872_v0  ;;  %v5349_v5 = vor.u32 %v677_v8, %v676_v17  ;;  %v684_v37 = vrot.slane %v682_v26, 7  ;;  %v395_v24 = vmul.f32 %v4990_v1, %v359_v28  ;;  %v910_v8 = vld [vmem:[#allocation2 + $0x98] sm:$0x1]  ;;  %v396_v54 = vmul.f32 %v4990_v1, %v360_v33 }
  0x64   : > { %874 = vst [vmem:[#allocation2 + $0x58] sm:$0xf] %v5259_v30  ;;  %v691_v38 = vshrl.u32 %v490_v56, 16  ;;  %v694_v0 = vshll.u32 %v490_v56, 16  ;;  %v699_v13 = vshrl.u32 %v491_v44, 16  ;;  %v680_v30 = vrot.slane %v676_v17, 4 }
  0x65   : > { %877 = vst [vmem:[#allocation2 + $0x5c] sm:$0x1] %v5263_v34  ;;  %v702_v15 = vshll.u32 %v491_v44, 16  ;;  %v687_v52 = vor.u32 %v685_v59, %v684_v37  ;;  %v689_v34 = vrot.slane %v684_v37, 4  ;;  %v716_v27 = vshrl.u32 %v493_v22, 16 }
  0x66   : > { %880 = vst [vmem:[#allocation2 + $0x60] sm:$0xf] %v879_v45  ;;  %v693_v4 = vrot.slane %v691_v38, 7  ;;  %v701_v18 = vrot.slane %v699_v13, 7  ;;  %v897_v45 = vsel %vm5056_vm6, %v672_v58, %v896_v63  ;;  %v719_v42 = vshll.u32 %v493_v22, 16 }
  0x67   : > { %881 = vst [vmem:[#allocation2 + $0x64] sm:$0xf] %v5284_v9  ;;  %v900_v9 = vsel %vm5048_vm4, %v5349_v5, %v5351_v3  ;;  %v688_v31 = vsel %vm5082_vm7, %v680_v30, %v687_v52  ;;  %v904_v36 = vsel %vm5056_vm6, %v689_v34, %v903_v20  ;;  %v462_v51 = vmax.f32 %v430_v21, 0.0  ;;  %v913_v58 = vld [vmem:[#allocation2 + $0x9c] sm:$0xf] }
  0x68   : > { %884 = vst [vmem:[#allocation2 + $0x68] sm:$0x1] %v5292_v39  ;;  %v696_v39 = vor.u32 %v694_v0, %v693_v4  ;;  %v697_v25 = vrot.slane %v693_v4, 4  ;;  %v704_v32 = vor.u32 %v702_v15, %v701_v18  ;;  %v706_v50 = vrot.slane %v701_v18, 4  ;;  %v917_v63 = vld [vmem:[#allocation2 + $0xa4] sm:$0x1] }
  0x69   : > { %887 = vst [vmem:[#allocation2 + $0x6c] sm:$0xf] %v886_v60  ;;  %v710_v60 = vrot.slane %v708_v40, 7  ;;  %v431_v35 = vadd.f32 %v5001_v6, %v395_v24  ;;  %v398_v55 = vmul.f32 %v4990_v1, %v362_v43  ;;  %v399_v26 = vmul.f32 %v4990_v1, %v363_v48  ;;  %v920_v52 = vld [vmem:[#allocation2 + $0xa8] sm:$0xf] }
  0x6a   : > { %888 = vst [vmem:[#allocation2 + $0x70] sm:$0xf] %v5309_v23  ;;  %v907_v23 = vsel %vm5048_vm4, %v696_v39, %v906_v41  ;;  %v705_v57 = vsel %vm5082_vm7, %v697_v25, %v704_v32  ;;  %v494_v44 = vpack.c.bf16 %v462_v51, %v462_v51  ;;  %v432_v5 = vadd.f32 %v5001_v6, %v396_v54  ;;  %v927_v24 = vld [vmem:[#allocation2 + $0xb4] sm:$0xf] }
  0x6b   : > { %891 = vst [vmem:[#allocation2 + $0x74] sm:$0x1] %v890_v10  ;;  %v713_v2 = vor.u32 %v711_v29, %v710_v60  ;;  %v718_v10 = vrot.slane %v716_v27, 7  ;;  %v714_v17 = vrot.slane %v710_v60, 4  ;;  %v434_v19 = vadd.f32 %v5001_v6, %v398_v55 }
  0x6c   : > { %894 = vst [vmem:[#allocation2 + $0x78] sm:$0xf] %v893_v49  ;;  %v397_v49 = vmul.f32 %v4990_v1, %v361_v47  ;;  %v435_v11 = vadd.f32 %v5001_v6, %v399_v26  ;;  %v911_v12 = vsel %vm5056_vm6, %v706_v50, %v910_v8  ;;  %v725_v37 = vshrl.u32 %v494_v44, 16  ;;  %v931_v8 = vld [vmem:[#allocation2 + $0xbc] sm:$0x1] }
  0x6d   : > { %895 = vst [vmem:[#allocation2 + $0x7c] sm:$0xf] %v671_v62  ;;  %v721_v59 = vor.u32 %v719_v42, %v718_v10  ;;  %v723_v56 = vrot.slane %v718_v10, 4  ;;  %v463_v62 = vmax.f32 %v431_v35, 0.0  ;;  %v914_v1 = vsel %vm5048_vm4, %v713_v2, %v913_v58  ;;  %v934_v10 = vld [vmem:[#allocation2 + $0xc0] sm:$0xf] }
  0x6e   : > { %898 = vst [vmem:[#allocation2 + $0x80] sm:$0x1] %v897_v45  ;;  %v433_v3 = vadd.f32 %v5001_v6, %v397_v49  ;;  %v728_v38 = vshll.u32 %v494_v44, 16  ;;  %v464_v13 = vmax.f32 %v432_v5, 0.0  ;;  %v466_v20 = vmax.f32 %v434_v19, 0.0 }
  0x6f   : > { %901 = vst [vmem:[#allocation2 + $0x84] sm:$0xf] %v900_v9  ;;  %v495_v0 = vpack.c.bf16 %v463_v62, %v463_v62  ;;  %v722_v15 = vsel %vm5082_vm7, %v714_v17, %v721_v59  ;;  %v918_v6 = vsel %vm5056_vm6, %v723_v56, %v917_v63  ;;  %v727_v16 = vrot.slane %v725_v37, 7  ;;  %v938_v56 = vld [vmem:[#allocation2 + $0xc8] sm:$0x1] }
  0x70   : > { %902 = vst [vmem:[#allocation2 + $0x88] sm:$0xf] %v688_v31  ;;  %v465_v30 = vmax.f32 %v433_v3, 0.0  ;;  %v467_v46 = vmax.f32 %v435_v11, 0.0  ;;  %v496_v18 = vpack.c.bf16 %v464_v13, %v464_v13  ;;  %v498_v28 = vpack.c.bf16 %v466_v20, %v466_v20 }
  0x71   : > { %905 = vst [vmem:[#allocation2 + $0x8c] sm:$0x1] %v904_v36  ;;  %v733_v34 = vshrl.u32 %v495_v0, 16  ;;  %v736_v4 = vshll.u32 %v495_v0, 16  ;;  %v730_v29 = vor.u32 %v728_v38, %v727_v16  ;;  %v731_v22 = vrot.slane %v727_v16, 4 }
  0x72   : > { %908 = vst [vmem:[#allocation2 + $0x90] sm:$0xf] %v907_v23  ;;  %v497_v40 = vpack.c.bf16 %v465_v30, %v465_v30  ;;  %v499_v45 = vpack.c.bf16 %v467_v46, %v467_v46  ;;  %v742_v39 = vshrl.u32 %v496_v18, 16  ;;  %v745_v41 = vshll.u32 %v496_v18, 16 }
  0x73   : > { %909 = vst [vmem:[#allocation2 + $0x94] sm:$0xf] %v705_v57  ;;  %v735_v9 = vrot.slane %v733_v34, 7  ;;  %v921_v31 = vsel %vm5048_vm4, %v730_v29, %v920_v52  ;;  %v759_v60 = vshrl.u32 %v498_v28, 16  ;;  %v762_v27 = vshll.u32 %v498_v28, 16 }
  0x74   : > { %912 = vst [vmem:[#allocation2 + $0x98] sm:$0x1] %v911_v12  ;;  %v750_v25 = vshrl.u32 %v497_v40, 16  ;;  %v753_v32 = vshll.u32 %v497_v40, 16  ;;  %v744_v42 = vrot.slane %v742_v39, 7  ;;  %v767_v43 = vshrl.u32 %v499_v45, 16 }
  0x75   : > { %915 = vst [vmem:[#allocation2 + $0x9c] sm:$0xf] %v914_v1  ;;  %v738_v33 = vor.u32 %v736_v4, %v735_v9  ;;  %v740_v36 = vrot.slane %v735_v9, 4  ;;  %v761_v47 = vrot.slane %v759_v60, 7  ;;  %v770_v48 = vshll.u32 %v499_v45, 16 }
  0x76   : > { %916 = vst [vmem:[#allocation2 + $0xa0] sm:$0xf] %v722_v15  ;;  %v752_v21 = vrot.slane %v750_v25, 7  ;;  %v747_v50 = vor.u32 %v745_v41, %v744_v42  ;;  %v748_v2 = vrot.slane %v744_v42, 4  ;;  %v769_v49 = vrot.slane %v767_v43, 7 }
  0x77   : > { %919 = vst [vmem:[#allocation2 + $0xa4] sm:$0x1] %v918_v6  ;;  %v739_v23 = vsel %vm5082_vm7, %v731_v22, %v738_v33  ;;  %v925_v57 = vsel %vm5056_vm6, %v740_v36, %v924_v7  ;;  %v764_v54 = vor.u32 %v762_v27, %v761_v47  ;;  %v765_v17 = vrot.slane %v761_v47, 4 }
  0x78   : > { %922 = vst [vmem:[#allocation2 + $0xa8] sm:$0xf] %v921_v31  ;;  %v755_v51 = vor.u32 %v753_v32, %v752_v21  ;;  %v757_v35 = vrot.slane %v752_v21, 4  ;;  %v928_v58 = vsel %vm5048_vm4, %v747_v50, %v927_v24  ;;  %v772_v44 = vor.u32 %v770_v48, %v769_v49 }
  0x79   : > { %923 = vst [vmem:[#allocation2 + $0xac] sm:$0xf] %v739_v23  ;;  %v935_v59 = vsel %vm5048_vm4, %v764_v54, %v934_v10  ;;  %v774_v62 = vrot.slane %v769_v49, 4 }
  0x7a   : > { %926 = vst [vmem:[#allocation2 + $0xb0] sm:$0x1] %v925_v57  ;;  %v756_v55 = vsel %vm5082_vm7, %v748_v2, %v755_v51  ;;  %v932_v26 = vsel %vm5056_vm6, %v757_v35, %v931_v8  ;;  %v773_v63 = vsel %vm5082_vm7, %v765_v17, %v772_v44 }
  0x7b   : > { %929 = vst [vmem:[#allocation2 + $0xb4] sm:$0xf] %v928_v58  ;;  %v939_v5 = vsel %vm5056_vm6, %v774_v62, %v938_v56 }
  0x7c   : > { %930 = vst [vmem:[#allocation2 + $0xb8] sm:$0xf] %v756_v55 }
  0x7d   : > { %933 = vst [vmem:[#allocation2 + $0xbc] sm:$0x1] %v932_v26 }
  0x7e   : > { %936 = vst [vmem:[#allocation2 + $0xc0] sm:$0xf] %v935_v59 }
  0x7f   : > { %937 = vst [vmem:[#allocation2 + $0xc4] sm:$0xf] %v773_v63 }
  0x80   : > { %940 = vst [vmem:[#allocation2 + $0xc8] sm:$0x1] %v939_v5 }
  0x81 PF: > { %v4722_v53 = vld [vmem:[%s6239_s1 + $0x38] sm:$0xff]  ;;  %s4642_s29 = smul.u32 96, %s4876_s18  ;;  %v4721_v3 = vld [vmem:[%s6239_s1 + $0x30] sm:$0xff]  ;;  %v4720_v1 = vld [vmem:[%s6239_s1 + $0x28] sm:$0xff]  ;;  %vm1001_vm8 = vsmask.f32 3328 }
  0x82   : > { %4787 = vmatpush.bf16.msra.mxu1 %v4722_v53  ;;  %4788 = vmatpush.bf16.msra.mxu2 %v4722_v53  ;;  %v4719_v30 = vld [vmem:[%s6239_s1 + $0x20] sm:$0xff]  ;;  %v4718_v16 = vld [vmem:[%s6239_s1 + $0x18] sm:$0xff]  ;;  %v4717_v34 = vld [vmem:[%s6239_s1 + $0x10] sm:$0xff]  ;;  %vm1002_vm9 = vsmask.f32 7440  ;;  %vm1276_vm10 = vcmask 1042432  }
  0x83   : > { %4789 = vmatpush.bf16.msra.mxu3 %v4722_v53  ;;  %3231 = vmatpush.bf16.msra.mxu0 %v4722_v53  ;;  %s5433_s7 = scalar_lea.vmem [#allocation2], %s4642_s29  ;;  %v4716_v40 = vld [vmem:[%s6239_s1 + $0x8] sm:$0xff]  ;;  %v4715_v45 = vld [vmem:[%s6239_s1] sm:$0xff]  ;;  %v4738_v36 = vld [vmem:[%s6239_s1 + $0xb8] sm:$0xff]  ;;  %vm1277_vm12 = vcmask 1046532  }
  0x84   : > { %v4730_v2 = vld [vmem:[%s6239_s1 + $0x78] sm:$0xff]  ;;  %vm5495_vm11 = vmor %vm1001_vm8, %vm1002_vm9 }
  0x85   : > { %v4746_v58 = vld [vmem:[%s6239_s1 + $0xf8] sm:$0xff]  ;;  %vm5510_vm13 = vmor %vm1276_vm10, %vm1277_vm12 }
  0x86   : > { %4790 = vmatpush.bf16.msra.mxu1 %v4721_v3  ;;  %4791 = vmatpush.bf16.msra.mxu2 %v4721_v3  ;;  %v4754_v17 = vld [vmem:[%s6239_s1 + $0x138] sm:$0xff] }
  0x87   : > { %v949_v61 = vld [vmem:[%s5433_s7 + $0x18] sm:$0xf]  ;;  %v950_v14 = vld [vmem:[%s5433_s7 + $0x1c] sm:$0xf]  ;;  %v953_v19 = vld [vmem:[%s5433_s7 + $0x30] sm:$0xf]  ;;  %4792 = vmatpush.bf16.msra.mxu3 %v4721_v3  ;;  %3232 = vmatpush.bf16.msra.mxu0 %v4721_v3 }
  0x88   : > { %965 = vst [vmem:[#allocation3 + $0x90] sm:$0xf] %v949_v61  ;;  %v954_v11 = vld [vmem:[%s5433_s7 + $0x34] sm:$0xf]  ;;  %v957_v12 = vld [vmem:[%s5433_s7 + $0x48] sm:$0xf] }
  0x89   : > { %966 = vst [vmem:[#allocation3 + $0xb4] sm:$0xf] %v950_v14  ;;  %v958_v37 = vld [vmem:[%s5433_s7 + $0x4c] sm:$0xf]  ;;  %v945_v38 = vld [vmem:[%s5433_s7] sm:$0xf] }
  0x8a   : > { %969 = vst [vmem:[#allocation3 + $0x120] sm:$0xf] %v953_v19  ;;  %v946_v0 = vld [vmem:[%s5433_s7 + $0x4] sm:$0xf]  ;;  %4793 = vmatpush.bf16.msra.mxu1 %v4720_v1  ;;  %4794 = vmatpush.bf16.msra.mxu2 %v4720_v1  ;;  %v952_v20 = vld [vmem:[%s5433_s7 + $0x28] sm:$0xf] }
  0x8b   : > { %970 = vst [vmem:[#allocation3 + $0x144] sm:$0xf] %v954_v11  ;;  %v951_v13 = vld [vmem:[%s5433_s7 + $0x24] sm:$0xf]  ;;  %4795 = vmatpush.bf16.msra.mxu3 %v4720_v1  ;;  %3233 = vmatpush.bf16.msra.mxu0 %v4720_v1  ;;  %v955_v15 = vld [vmem:[%s5433_s7 + $0x3c] sm:$0xf] }
  0x8c   : > { %973 = vst [vmem:[#allocation3 + $0x1b0] sm:$0xf] %v957_v12  ;;  %v956_v6 = vld [vmem:[%s5433_s7 + $0x40] sm:$0xf]  ;;  %v959_v46 = vld [vmem:[%s5433_s7 + $0x54] sm:$0xf] }
  0x8d   : > { %974 = vst [vmem:[#allocation3 + $0x1d4] sm:$0xf] %v958_v37  ;;  %v960_v52 = vld [vmem:[%s5433_s7 + $0x58] sm:$0xf]  ;;  %v947_v4 = vld [vmem:[%s5433_s7 + $0xc] sm:$0xf] }
  0x8e   : > { %961 = vst [vmem:[#allocation3] sm:$0xf] %v945_v38  ;;  %4796 = vmatpush.bf16.msra.mxu1 %v4719_v30  ;;  %4797 = vmatpush.bf16.msra.mxu2 %v4719_v30  ;;  %v948_v18 = vld [vmem:[%s5433_s7 + $0x10] sm:$0xf]  ;;  %v977_v29 = vld [vmem:[%s5433_s7] sm:$0xf] }
  0x8f   : > { %962 = vst [vmem:[#allocation3 + $0x24] sm:$0xf] %v946_v0  ;;  %4798 = vmatpush.bf16.msra.mxu3 %v4719_v30  ;;  %3234 = vmatpush.bf16.msra.mxu0 %v4719_v30  ;;  %v978_v22 = vld [vmem:[%s5433_s7 + $0x4] sm:$0xf]  ;;  %v5468_v7 = vld [vmem:[#allocation3 + $0x90] sm:$0xf] }
  0x90   : > { %967 = vst [vmem:[#allocation3 + $0xd8] sm:$0xf] %v951_v13  ;;  %v5470_v28 = vld [vmem:[#allocation3 + $0xb0] sm:$0xf0]  ;;  %v1005_v41 = vshrl.u32 %v977_v29, 16  ;;  %v1008_v25 = vshll.u32 %v977_v29, 16 }
  0x91   : > { %968 = vst [vmem:[#allocation3 + $0xfc] sm:$0xf] %v952_v20  ;;  %v5475_v9 = vld [vmem:[#allocation3 + $0x120] sm:$0xf]  ;;  %v979_v60 = vld [vmem:[%s5433_s7 + $0x8] sm:$0x1]  ;;  %v4138_v50 = vor.u32 %v5470_v28, %v5468_v7 }
  0x92   : > { %971 = vst [vmem:[#allocation3 + $0x168] sm:$0xf] %v955_v15  ;;  %4799 = vmatpush.bf16.msra.mxu1 %v4718_v16  ;;  %4800 = vmatpush.bf16.msra.mxu2 %v4718_v16  ;;  %v5477_v39 = vld [vmem:[#allocation3 + $0x140] sm:$0xf0]  ;;  %v1014_v27 = vshll.u32 %v978_v22, 16  ;;  %v1018_v33 = vshrl.u32 %v978_v22, 16 }
  0x93   : > { %972 = vst [vmem:[#allocation3 + $0x18c] sm:$0xf] %v956_v6  ;;  %4801 = vmatpush.bf16.msra.mxu3 %v4718_v16  ;;  %3235 = vmatpush.bf16.msra.mxu0 %v4718_v16  ;;  %v5479_v31 = vld [vmem:[#allocation3 + $0x1b0] sm:$0xf]  ;;  %v1007_v42 = vrot.slane %v1005_v41, 4  ;;  %v1010_v21 = vrot.slane %v1008_v25, 5  ;;  %v4210_v54 = vor.u32 %v5477_v39, %v5475_v9 }
  0x94   : > { %975 = vst [vmem:[#allocation3 + $0x1f8] sm:$0xf] %v959_v46  ;;  %v5481_v32 = vld [vmem:[#allocation3 + $0x1d0] sm:$0xf0]  ;;  %v1024_v24 = vshll.u32 %v979_v60, 16  ;;  %v1016_v23 = vrot.slane %v1014_v27, 5 }
  0x95   : > { %976 = vst [vmem:[#allocation3 + $0x21c] sm:$0xf] %v960_v52  ;;  %v1228_v47 = vld [vmem:[%s5433_s7] sm:$0xe]  ;;  %v4065_v43 = vld [vmem:[#allocation3] sm:$0xf]  ;;  %v1011_v10 = vor.u32 %v1010_v21, %v1007_v42  ;;  %v4282_v62 = vor.u32 %v5481_v32, %v5479_v31 }
  0x96   : > { %963 = vst [vmem:[#allocation3 + $0x48] sm:$0xf] %v947_v4  ;;  %4802 = vmatpush.bf16.msra.mxu1 %v4717_v34  ;;  %4803 = vmatpush.bf16.msra.mxu2 %v4717_v34  ;;  %v4647_v48 = vld [vmem:[#allocation3 + $0x20] sm:$0xf0]  ;;  %v1020_v57 = vrot.slane %v1018_v33, 4  ;;  %v1026_v51 = vrot.slane %v1024_v24, 5 }
  0x97   : > { %964 = vst [vmem:[#allocation3 + $0x6c] sm:$0xf] %v948_v18  ;;  %4804 = vmatpush.bf16.msra.mxu3 %v4717_v34  ;;  %3236 = vmatpush.bf16.msra.mxu0 %v4717_v34  ;;  %v1229_v35 = vld [vmem:[%s5433_s7 + $0x4] sm:$0xf]  ;;  %v1230_v55 = vld [vmem:[%s5433_s7 + $0x8] sm:$0x1]  ;;  %v4066_v63 = vor.u32 %v4647_v48, %v4065_v43 }
  0x98   : > { %v1021_v49 = vor.u32 %v1020_v57, %v1016_v23  ;;  %v3907_v59 = vrot.slane %v1228_v47, 9  ;;  %v1281_v56 = vrot.slane %v1229_v35, 5  ;;  %v3917_v44 = vld [vmem:[%s5433_s7 + $0xc] sm:$0xf]  ;;  %v1012_v5 = vrot.slane %v1011_v10, 4  ;;  %v4737_v61 = vld [vmem:[%s6239_s1 + $0xb0] sm:$0xff] }
  0x99   : > { %v1284_v53 = vrot.slane %v1230_v55, 5  ;;  %v3918_v3 = vld [vmem:[%s5433_s7 + $0x10] sm:$0xf]  ;;  %1387 = vst [vmem:[#allocation3 + $0xc] sm:$0xf] %v3917_v44  ;;  %v4728_v29 = vld [vmem:[%s6239_s1 + $0x68] sm:$0xff] }
  0x9a   : > { %4805 = vmatpush.bf16.msra.mxu1 %v4716_v40  ;;  %4806 = vmatpush.bf16.msra.mxu2 %v4716_v40  ;;  %v4729_v14 = vld [vmem:[%s6239_s1 + $0x70] sm:$0xff]  ;;  %v1022_v19 = vrot.slane %v1021_v49, 4  ;;  %v1282_v11 = vsel %vm5510_vm13, %v3907_v59, %v1281_v56  ;;  %v1283_v12 = vrot.slane %v1281_v56, 4  ;;  %1388 = vst [vmem:[#allocation3 + $0x30] sm:$0xf] %v3918_v3  ;;  %v1017_v1 = vsel %vm5495_vm11, %v1012_v5, %v1016_v23  ;;  %v4744_v25 = vld [vmem:[%s6239_s1 + $0xe8] sm:$0xff] }
  0x9b   : > { %4807 = vmatpush.bf16.msra.mxu3 %v4716_v40  ;;  %3237 = vmatpush.bf16.msra.mxu0 %v4716_v40  ;;  %1351 = vst [vmem:[#allocation3 + $0x8] sm:$0xf] %v1282_v11  ;;  %v3933_v37 = vld [vmem:[%s5433_s7 + $0xc] sm:$0xf]  ;;  %v3934_v38 = vld [vmem:[%s5433_s7 + $0x10] sm:$0xf] }
  0x9c   : > { %v1027_v0 = vsel %vm5495_vm11, %v1022_v19, %v1026_v51  ;;  %1212 = vst [vmem:[#allocation3 + $0x4] sm:$0xf] %v1017_v1  ;;  %v1285_v13 = vsel %vm5510_vm13, %v1283_v12, %v1284_v53  ;;  %v3935_v30 = vld [vmem:[%s5433_s7 + $0x14] sm:$0x1]  ;;  %v1428_v20 = vshrl.u32 %v3933_v37, 16  ;;  %v1431_v15 = vshll.u32 %v3933_v37, 16 }
  0x9d   : > { %1213 = vst [vmem:[#allocation3 + $0x28] sm:$0xf] %v1027_v0  ;;  %v1437_v6 = vshll.u32 %v3934_v38, 16  ;;  %v1441_v16 = vshrl.u32 %v3934_v38, 16  ;;  %v1447_v46 = vshll.u32 %v3935_v30, 16  ;;  %v4745_v52 = vld [vmem:[%s6239_s1 + $0xf0] sm:$0xff] }
  0x9e   : > { %4808 = vmatpush.bf16.msra.mxu1 %v4715_v45  ;;  %4809 = vmatpush.bf16.msra.mxu2 %v4715_v45  ;;  %v4753_v34 = vld [vmem:[%s6239_s1 + $0x130] sm:$0xff]  ;;  %1352 = vst [vmem:[#allocation3 + $0x2c] sm:$0xf] %v1285_v13  ;;  %v1430_v4 = vrot.slane %v1428_v20, 4  ;;  %v1433_v18 = vrot.slane %v1431_v15, 5  ;;  %v4736_v40 = vld [vmem:[%s6239_s1 + $0xa8] sm:$0xff] }
  0x9f   : > { %4810 = vmatpush.bf16.msra.mxu3 %v4715_v45  ;;  %3238 = vmatpush.bf16.msra.mxu0 %v4715_v45  ;;  %v1439_v22 = vrot.slane %v1437_v6, 5  ;;  %v1443_v7 = vrot.slane %v1441_v16, 4  ;;  %v980_v28 = vld [vmem:[%s5433_s7 + $0xc] sm:$0xf]  ;;  %v1449_v9 = vrot.slane %v1447_v46, 5  ;;  %v4735_v32 = vld [vmem:[%s6239_s1 + $0xa0] sm:$0xff] }
  0xa0   : > { %v1434_v45 = vor.u32 %v1433_v18, %v1430_v4  ;;  %v981_v39 = vld [vmem:[%s5433_s7 + $0x10] sm:$0xf]  ;;  %v982_v41 = vld [vmem:[%s5433_s7 + $0x14] sm:$0x1]  ;;  %v4752_v31 = vld [vmem:[%s6239_s1 + $0x128] sm:$0xff]  ;;  %v1029_v27 = vshrl.u32 %v980_v28, 16 }
  0xa1   : > { %3249 = vmatmul.bf16.vlgmr.msra.gmra.mxu1 %v4138_v50  ;;  %3259 = vmatmul.bf16.vlgmr.msra.gmra.mxu2 %v4210_v54  ;;  %v1444_v60 = vor.u32 %v1443_v7, %v1439_v22  ;;  %v1032_v33 = vshll.u32 %v980_v28, 16  ;;  %v4727_v42 = vld [vmem:[%s6239_s1 + $0x60] sm:$0xff]  ;;  %v5562_v21 = vld [vmem:[#allocation3 + $0xd8] sm:$0xf]  ;;  %v5564_v24 = vld [vmem:[#allocation3 + $0xf8] sm:$0xf0] }
  0xa2   : > { %3329 = vmatpush.bf16.msrb.mxu2 %v4738_v36  ;;  %3280 = vmatpush.bf16.msrb.mxu1 %v4730_v2  ;;  %v1038_v36 = vshll.u32 %v981_v39, 16  ;;  %v1435_v47 = vrot.slane %v1434_v45, 4  ;;  %v1042_v43 = vshrl.u32 %v981_v39, 16  ;;  %v1048_v48 = vshll.u32 %v982_v41, 16  ;;  %v5566_v23 = vld [vmem:[#allocation3 + $0x168] sm:$0xf] }
  0xa3   : > { %3269 = vmatmul.bf16.vlgmr.msra.gmra.mxu3 %v4282_v62  ;;  %3239 = vmatmul.bf16.vlgmr.msra.gmra.mxu0 %v4066_v63  ;;  %v5568_v57 = vld [vmem:[#allocation3 + $0x188] sm:$0xf0]  ;;  %v1445_v50 = vrot.slane %v1444_v60, 4  ;;  %v1031_v2 = vrot.slane %v1029_v27, 4  ;;  %v1034_v10 = vrot.slane %v1032_v33, 5  ;;  %v4174_v11 = vor.u32 %v5564_v24, %v5562_v21  ;;  %v4734_v12 = vld [vmem:[%s6239_s1 + $0x98] sm:$0xff] }
  0xa4   : > { %3378 = vmatpush.bf16.msrb.mxu3 %v4746_v58  ;;  %3427 = vmatpush.bf16.msrb.mxu0 %v4754_v17  ;;  %v1040_v51 = vrot.slane %v1038_v36, 5  ;;  %v4743_v35 = vld [vmem:[%s6239_s1 + $0xe0] sm:$0xff]  ;;  %v5573_v54 = vld [vmem:[#allocation3 + $0x1f8] sm:$0xf]  ;;  %v5575_v58 = vld [vmem:[#allocation3 + $0x218] sm:$0xf0]  ;;  %v1440_v55 = vsel %vm5495_vm11, %v1435_v47, %v1439_v22  ;;  %v4246_v13 = vor.u32 %v5568_v57, %v5566_v23 }
  0xa5   : > { %v5577_v17 = vld [vmem:[#allocation3 + $0x48] sm:$0xf]  ;;  %v5579_v49 = vld [vmem:[#allocation3 + $0x68] sm:$0xf0]  ;;  %v1044_v59 = vrot.slane %v1042_v43, 4  ;;  %v1450_v62 = vsel %vm5495_vm11, %v1445_v50, %v1449_v9  ;;  %v1035_v63 = vor.u32 %v1034_v10, %v1031_v2  ;;  %v1050_v5 = vrot.slane %v1048_v48, 5 }
  0xa6   : > { %3330 = vmatpush.bf16.msrb.mxu2 %v4737_v61  ;;  %3281 = vmatpush.bf16.msrb.mxu1 %v4729_v14  ;;  %v1231_v56 = vld [vmem:[%s5433_s7 + $0xc] sm:$0xe]  ;;  %v4751_v44 = vld [vmem:[%s6239_s1 + $0x120] sm:$0xff]  ;;  %1635 = vst [vmem:[#allocation3 + $0x10] sm:$0xf] %v1440_v55  ;;  %v4726_v1 = vld [vmem:[%s6239_s1 + $0x58] sm:$0xff]  ;;  %v4102_v4 = vor.u32 %v5579_v49, %v5577_v17 }
  0xa7   : > { %v1232_v53 = vld [vmem:[%s5433_s7 + $0x10] sm:$0xf]  ;;  %1636 = vst [vmem:[#allocation3 + $0x34] sm:$0xf] %v1450_v62  ;;  %v1045_v3 = vor.u32 %v1044_v59, %v1040_v51  ;;  %v1233_v61 = vld [vmem:[%s5433_s7 + $0x14] sm:$0x1] }
  0xa8   : > { %3379 = vmatpush.bf16.msrb.mxu3 %v4745_v52  ;;  %3428 = vmatpush.bf16.msrb.mxu0 %v4753_v34  ;;  %v3908_v14 = vrot.slane %v1231_v56, 9  ;;  %v1288_v19 = vrot.slane %v1232_v53, 5  ;;  %v1036_v37 = vrot.slane %v1035_v63, 4  ;;  %v1291_v38 = vrot.slane %v1233_v61, 5  ;;  %v3919_v0 = vld [vmem:[%s5433_s7 + $0x18] sm:$0xf] }
  0xa9   : > { %v4742_v30 = vld [vmem:[%s6239_s1 + $0xd8] sm:$0xff]  ;;  %v1046_v15 = vrot.slane %v1045_v3, 4  ;;  %1389 = vst [vmem:[#allocation3 + $0x54] sm:$0xf] %v3919_v0  ;;  %v4318_v34 = vor.u32 %v5575_v58, %v5573_v54  ;;  %v4733_v18 = vld [vmem:[%s6239_s1 + $0x90] sm:$0xff]  ;;  %v4732_v24 = vld [vmem:[%s6239_s1 + $0x88] sm:$0xff] }
  0xaa   : > { %3331 = vmatpush.bf16.msrb.mxu2 %v4736_v40  ;;  %3282 = vmatpush.bf16.msrb.mxu1 %v4728_v29  ;;  %v4750_v20 = vld [vmem:[%s6239_s1 + $0x118] sm:$0xff]  ;;  %v1289_v6 = vsel %vm5510_vm13, %v3908_v14, %v1288_v19  ;;  %v1290_v16 = vrot.slane %v1288_v19, 4  ;;  %v1041_v40 = vsel %vm5495_vm11, %v1036_v37, %v1040_v51  ;;  %v3938_v22 = vld [vmem:[%s5433_s7 + $0x20] sm:$0x1]  ;;  %v4725_v41 = vld [vmem:[%s6239_s1 + $0x50] sm:$0xff] }
  0xab   : > { %v3920_v46 = vld [vmem:[%s5433_s7 + $0x1c] sm:$0xf]  ;;  %v3936_v52 = vld [vmem:[%s5433_s7 + $0x18] sm:$0xf]  ;;  %1353 = vst [vmem:[#allocation3 + $0x50] sm:$0xf] %v1289_v6  ;;  %v1051_v7 = vsel %vm5495_vm11, %v1046_v15, %v1050_v5 }
  0xac   : > { %3380 = vmatpush.bf16.msrb.mxu3 %v4744_v25  ;;  %3429 = vmatpush.bf16.msrb.mxu0 %v4752_v31  ;;  %v3937_v29 = vld [vmem:[%s5433_s7 + $0x1c] sm:$0xf]  ;;  %1214 = vst [vmem:[#allocation3 + $0x4c] sm:$0xf] %v1041_v40  ;;  %v1292_v28 = vsel %vm5510_vm13, %v1290_v16, %v1291_v38  ;;  %v1452_v45 = vshrl.u32 %v3936_v52, 16  ;;  %v1455_v9 = vshll.u32 %v3936_v52, 16 }
  0xad   : > { %v983_v39 = vld [vmem:[%s5433_s7 + $0x18] sm:$0xf]  ;;  %1215 = vst [vmem:[#allocation3 + $0x70] sm:$0xf] %v1051_v7  ;;  %v1461_v25 = vshll.u32 %v3937_v29, 16  ;;  %v1465_v31 = vshrl.u32 %v3937_v29, 16 }
  0xae   : > { %3332 = vmatpush.bf16.msrb.mxu2 %v4735_v32  ;;  %3283 = vmatpush.bf16.msrb.mxu1 %v4727_v42  ;;  %v1471_v32 = vshll.u32 %v3938_v22, 16  ;;  %1354 = vst [vmem:[#allocation3 + $0x74] sm:$0xf] %v1292_v28  ;;  %v1454_v60 = vrot.slane %v1452_v45, 4  ;;  %v1457_v27 = vrot.slane %v1455_v9, 5  ;;  %v1053_v33 = vshrl.u32 %v983_v39, 16 }
  0xaf   : > { %1390 = vst [vmem:[#allocation3 + $0x78] sm:$0xf] %v3920_v46  ;;  %v1463_v36 = vrot.slane %v1461_v25, 5  ;;  %v4741_v42 = vld [vmem:[%s6239_s1 + $0xd0] sm:$0xff]  ;;  %v1467_v43 = vrot.slane %v1465_v31, 4  ;;  %v4724_v48 = vld [vmem:[%s6239_s1 + $0x48] sm:$0xff] }
  0xb0   : > { %3381 = vmatpush.bf16.msrb.mxu3 %v4743_v35  ;;  %3430 = vmatpush.bf16.msrb.mxu0 %v4751_v44  ;;  %v4749_v21 = vld [vmem:[%s6239_s1 + $0x110] sm:$0xff]  ;;  %v1458_v47 = vor.u32 %v1457_v27, %v1454_v60  ;;  %v1473_v23 = vrot.slane %v1471_v32, 5  ;;  %v984_v57 = vld [vmem:[%s5433_s7 + $0x1c] sm:$0xf]  ;;  %v985_v50 = vld [vmem:[%s5433_s7 + $0x20] sm:$0x1] }
  0xb1   : > { %3254 = vmatmul.bf16.gmra.mxu1 %v4174_v11  ;;  %3264 = vmatmul.bf16.gmra.mxu2 %v4246_v13  ;;  %v4740_v2 = vld [vmem:[%s6239_s1 + $0xc8] sm:$0xff]  ;;  %v1468_v35 = vor.u32 %v1467_v43, %v1463_v36  ;;  %v1055_v54 = vrot.slane %v1053_v33, 4  ;;  %v1056_v58 = vshll.u32 %v983_v39, 16  ;;  %v4731_v17 = vld [vmem:[%s6239_s1 + $0x80] sm:$0xff]  ;;  %v1062_v56 = vshll.u32 %v984_v57, 16  ;;  %v4770_v53 = vld [vmem:[%s6239_s1 + $0x1b8] sm:$0xff] }
  0xb2   : > { %3333 = vmatpush.bf16.msrb.mxu2 %v4734_v12  ;;  %3284 = vmatpush.bf16.msrb.mxu1 %v4726_v1  ;;  %v4748_v10 = vld [vmem:[%s6239_s1 + $0x108] sm:$0xff]  ;;  %v1459_v51 = vrot.slane %v1458_v47, 4  ;;  %v4723_v49 = vld [vmem:[%s6239_s1 + $0x40] sm:$0xff]  ;;  %v1066_v44 = vshrl.u32 %v984_v57, 16  ;;  %v1072_v62 = vshll.u32 %v985_v50, 16  ;;  %v4778_v29 = vld [vmem:[%s6239_s1 + $0x1f8] sm:$0xff] }
  0xb3   : > { %3274 = vmatmul.bf16.gmra.mxu3 %v4318_v34  ;;  %3244 = vmatmul.bf16.gmra.mxu0 %v4102_v4  ;;  %v5657_v55 = vld [vmem:[#allocation3 + $0xc] sm:$0xf]  ;;  %v5659_v59 = vld [vmem:[#allocation3 + $0x2c] sm:$0xf0]  ;;  %v5661_v63 = vld [vmem:[#allocation3 + $0x4] sm:$0xf] }
  0xb4   : > { %3382 = vmatpush.bf16.msrb.mxu3 %v4742_v30  ;;  %3431 = vmatpush.bf16.msrb.mxu0 %v4750_v20  ;;  %v5663_v5 = vld [vmem:[#allocation3 + $0x24] sm:$0xf0]  ;;  %v1464_v3 = vsel %vm5495_vm11, %v1459_v51, %v1463_v36  ;;  %v1469_v61 = vrot.slane %v1468_v35, 4  ;;  %v1058_v14 = vrot.slane %v1056_v58, 5  ;;  %v1234_v19 = vld [vmem:[%s5433_s7 + $0x18] sm:$0xe]  ;;  %v4078_v40 = vor.u32 %v5657_v55, %v5659_v59 }
  0xb5   : > { %v5671_v11 = vld [vmem:[#allocation3 + $0x8] sm:$0xf]  ;;  %v5673_v12 = vld [vmem:[#allocation3 + $0x28] sm:$0xf0]  ;;  %v5675_v1 = vld [vmem:[#allocation3 + $0x10] sm:$0xf]  ;;  %v4070_v9 = vor.u32 %v5661_v63, %v5663_v5 }
  0xb6   : > { %3334 = vmatpush.bf16.msrb.mxu2 %v4733_v18  ;;  %3285 = vmatpush.bf16.msrb.mxu1 %v4725_v41  ;;  %1637 = vst [vmem:[#allocation3 + $0x58] sm:$0xf] %v1464_v3  ;;  %v1064_v37 = vrot.slane %v1062_v56, 5  ;;  %v1068_v38 = vrot.slane %v1066_v44, 4  ;;  %v4739_v0 = vld [vmem:[%s6239_s1 + $0xc0] sm:$0xff]  ;;  %v4762_v20 = vld [vmem:[%s6239_s1 + $0x178] sm:$0xff]  ;;  %v1474_v15 = vsel %vm5495_vm11, %v1469_v61, %v1473_v23  ;;  %v1059_v6 = vor.u32 %v1058_v14, %v1055_v54 }
  0xb7   : > { %v4747_v13 = vld [vmem:[%s6239_s1 + $0x100] sm:$0xff]  ;;  %v5683_v30 = vld [vmem:[#allocation3 + $0x30] sm:$0xf0]  ;;  %v1074_v16 = vrot.slane %v1072_v62, 5  ;;  %v1235_v46 = vld [vmem:[%s5433_s7 + $0x1c] sm:$0xf]  ;;  %v4074_v60 = vor.u32 %v5673_v12, %v5671_v11 }
  0xb8   : > { %3383 = vmatpush.bf16.msrb.mxu3 %v4741_v42  ;;  %3432 = vmatpush.bf16.msrb.mxu0 %v4749_v21  ;;  %1638 = vst [vmem:[#allocation3 + $0x7c] sm:$0xf] %v1474_v15  ;;  %v1069_v52 = vor.u32 %v1068_v38, %v1064_v37  ;;  %v1236_v34 = vld [vmem:[%s5433_s7 + $0x20] sm:$0x1]  ;;  %v3909_v4 = vrot.slane %v1234_v19, 9  ;;  %v1295_v18 = vrot.slane %v1235_v46, 5  ;;  %v4082_v27 = vor.u32 %v5683_v30, %v5675_v1 }
  0xb9   : > { %v4786_v22 = vld [vmem:[%s6239_s1 + $0x238] sm:$0xff]  ;;  %v1060_v7 = vrot.slane %v1059_v6, 4  ;;  %v1298_v28 = vrot.slane %v1236_v34, 5  ;;  %v3921_v45 = vld [vmem:[%s5433_s7 + $0x24] sm:$0xf]  ;;  %v4769_v33 = vld [vmem:[%s6239_s1 + $0x1b0] sm:$0xff] }
  0xba   : > { %3335 = vmatpush.bf16.msrb.mxu2 %v4732_v24  ;;  %3286 = vmatpush.bf16.msrb.mxu1 %v4724_v48  ;;  %v1070_v39 = vrot.slane %v1069_v52, 4  ;;  %v1296_v41 = vsel %vm5510_vm13, %v3909_v4, %v1295_v18  ;;  %v1297_v25 = vrot.slane %v1295_v18, 4  ;;  %v3922_v31 = vld [vmem:[%s5433_s7 + $0x28] sm:$0xf]  ;;  %1391 = vst [vmem:[#allocation3 + $0x9c] sm:$0xf] %v3921_v45 }
  0xbb   : > { %v3939_v32 = vld [vmem:[%s5433_s7 + $0x24] sm:$0xf]  ;;  %v1065_v36 = vsel %vm5495_vm11, %v1060_v7, %v1064_v37  ;;  %1355 = vst [vmem:[#allocation3 + $0x98] sm:$0xf] %v1296_v41  ;;  %v3940_v42 = vld [vmem:[%s5433_s7 + $0x28] sm:$0xf] }
  0xbc   : > { %3384 = vmatpush.bf16.msrb.mxu3 %v4740_v2  ;;  %3433 = vmatpush.bf16.msrb.mxu0 %v4748_v10  ;;  %v3941_v21 = vld [vmem:[%s5433_s7 + $0x2c] sm:$0x1]  ;;  %v4777_v24 = vld [vmem:[%s6239_s1 + $0x1f0] sm:$0xff]  ;;  %v1075_v47 = vsel %vm5495_vm11, %v1070_v39, %v1074_v16  ;;  %1216 = vst [vmem:[#allocation3 + $0x94] sm:$0xf] %v1065_v36  ;;  %v1299_v43 = vsel %vm5510_vm13, %v1297_v25, %v1298_v28  ;;  %v1476_v48 = vshrl.u32 %v3939_v32, 16 }
  0xbd   : > { %v1479_v23 = vshll.u32 %v3939_v32, 16  ;;  %v986_v57 = vld [vmem:[%s5433_s7 + $0x24] sm:$0xf]  ;;  %v4761_v50 = vld [vmem:[%s6239_s1 + $0x170] sm:$0xff]  ;;  %1217 = vst [vmem:[#allocation3 + $0xb8] sm:$0xf] %v1075_v47 }
  0xbe   : > { %3336 = vmatpush.bf16.msrb.mxu2 %v4731_v17  ;;  %3287 = vmatpush.bf16.msrb.mxu1 %v4723_v49  ;;  %v4785_v2 = vld [vmem:[%s6239_s1 + $0x230] sm:$0xff]  ;;  %v1485_v10 = vshll.u32 %v3940_v42, 16  ;;  %v1489_v51 = vshrl.u32 %v3940_v42, 16  ;;  %1356 = vst [vmem:[#allocation3 + $0xbc] sm:$0xf] %v1299_v43  ;;  %v1478_v35 = vrot.slane %v1476_v48, 4 }
  0xbf   : > { %v1481_v54 = vrot.slane %v1479_v23, 5  ;;  %v1495_v58 = vshll.u32 %v3941_v21, 16  ;;  %v1077_v17 = vshrl.u32 %v986_v57, 16  ;;  %1392 = vst [vmem:[#allocation3 + $0xc0] sm:$0xf] %v3922_v31  ;;  %v4768_v59 = vld [vmem:[%s6239_s1 + $0x1a8] sm:$0xff] }
  0xc0   : > { %3385 = vmatpush.bf16.msrb.mxu3 %v4739_v0  ;;  %3434 = vmatpush.bf16.msrb.mxu0 %v4747_v13  ;;  %v1487_v49 = vrot.slane %v1485_v10, 5  ;;  %v1491_v55 = vrot.slane %v1489_v51, 4  ;;  %v4760_v63 = vld [vmem:[%s6239_s1 + $0x168] sm:$0xff]  ;;  %v1080_v3 = vshll.u32 %v986_v57, 16  ;;  %v4652_v15 = vld [vmem:[#allocation3 + $0x4c] sm:$0xf] }
  0xc1   : > { %3288 = vmatmul.bf16.vlgmr.msrb.gmra.mxu1 %v4070_v9  ;;  %3337 = vmatmul.bf16.vlgmr.msrb.gmra.mxu2 %v4074_v60  ;;  %v1482_v56 = vor.u32 %v1481_v54, %v1478_v35  ;;  %v1497_v62 = vrot.slane %v1495_v58, 5  ;;  %v987_v5 = vld [vmem:[%s5433_s7 + $0x28] sm:$0xf]  ;;  %v988_v11 = vld [vmem:[%s5433_s7 + $0x2c] sm:$0x1] }
  0xc2   : > { %3525 = vmatpush.bf16.msra.mxu2 %v4770_v53  ;;  %3476 = vmatpush.bf16.msra.mxu1 %v4762_v20  ;;  %v1492_v44 = vor.u32 %v1491_v55, %v1487_v49  ;;  %v1079_v53 = vrot.slane %v1077_v17, 4  ;;  %v4776_v14 = vld [vmem:[%s6239_s1 + $0x1e8] sm:$0xff]  ;;  %v1086_v12 = vshll.u32 %v987_v5, 16  ;;  %v1082_v37 = vrot.slane %v1080_v3, 5  ;;  %v1237_v20 = vld [vmem:[%s5433_s7 + $0x24] sm:$0xe] }
  0xc3   : > { %3386 = vmatmul.bf16.vlgmr.msrb.gmra.mxu3 %v4078_v40  ;;  %3435 = vmatmul.bf16.vlgmr.msrb.gmra.mxu0 %v4082_v27  ;;  %v1483_v61 = vrot.slane %v1482_v56, 4  ;;  %v4784_v19 = vld [vmem:[%s6239_s1 + $0x228] sm:$0xff]  ;;  %v1090_v38 = vshrl.u32 %v987_v5, 16  ;;  %v1096_v30 = vshll.u32 %v988_v11, 16  ;;  %v4111_v40 = vld [vmem:[#allocation3 + $0x74] sm:$0xf0] }
  0xc4   : > { %3574 = vmatpush.bf16.msra.mxu3 %v4778_v29  ;;  %3623 = vmatpush.bf16.msra.mxu0 %v4786_v22  ;;  %v1493_v1 = vrot.slane %v1492_v44, 4  ;;  %v1088_v13 = vrot.slane %v1086_v12, 5  ;;  %v4103_v6 = vld [vmem:[#allocation3 + $0x6c] sm:$0xf0]  ;;  %v4657_v46 = vld [vmem:[#allocation3 + $0x70] sm:$0xf0]  ;;  %v1083_v34 = vor.u32 %v1082_v37, %v1079_v53 }
  0xc5   : > { %v1488_v0 = vsel %vm5495_vm11, %v1483_v61, %v1487_v49  ;;  %v4109_v16 = vld [vmem:[#allocation3 + $0x50] sm:$0xf]  ;;  %v4653_v18 = vld [vmem:[#allocation3 + $0x54] sm:$0xf]  ;;  %v1092_v29 = vrot.slane %v1090_v38, 4  ;;  %v3910_v45 = vrot.slane %v1237_v20, 9  ;;  %v4106_v21 = vor.u32 %v4652_v15, %v4103_v6 }
  0xc6   : > { %3526 = vmatpush.bf16.msra.mxu2 %v4769_v33  ;;  %3477 = vmatpush.bf16.msra.mxu1 %v4761_v50  ;;  %v1498_v52 = vsel %vm5495_vm11, %v1493_v1, %v1497_v62  ;;  %1639 = vst [vmem:[#allocation3 + $0xa0] sm:$0xf] %v1488_v0  ;;  %v1238_v4 = vld [vmem:[%s5433_s7 + $0x28] sm:$0xf]  ;;  %v4117_v22 = vld [vmem:[#allocation3 + $0x58] sm:$0xf]  ;;  %v4114_v23 = vor.u32 %v4653_v18, %v4111_v40 }
  0xc7   : > { %1640 = vst [vmem:[#allocation3 + $0xc4] sm:$0xf] %v1498_v52  ;;  %v1084_v7 = vrot.slane %v1083_v34, 4  ;;  %v1239_v28 = vld [vmem:[%s5433_s7 + $0x2c] sm:$0x1]  ;;  %v1302_v9 = vrot.slane %v1238_v4, 5  ;;  %v1093_v41 = vor.u32 %v1092_v29, %v1088_v13 }
  0xc8   : > { %3575 = vmatpush.bf16.msra.mxu3 %v4777_v24  ;;  %3624 = vmatpush.bf16.msra.mxu0 %v4785_v2  ;;  %v4658_v39 = vld [vmem:[#allocation3 + $0x78] sm:$0xf0]  ;;  %v1098_v25 = vrot.slane %v1096_v30, 5  ;;  %v1305_v31 = vrot.slane %v1239_v28, 5  ;;  %v3923_v32 = vld [vmem:[%s5433_s7 + $0x30] sm:$0xf]  ;;  %v4110_v24 = vor.u32 %v4657_v46, %v4109_v16 }
  0xc9   : > { %v1089_v60 = vsel %vm5495_vm11, %v1084_v7, %v1088_v13  ;;  %v1303_v27 = vsel %vm5510_vm13, %v3910_v45, %v1302_v9  ;;  %v1304_v33 = vrot.slane %v1302_v9, 4  ;;  %v3924_v36 = vld [vmem:[%s5433_s7 + $0x34] sm:$0xf]  ;;  %1393 = vst [vmem:[#allocation3 + $0xe4] sm:$0xf] %v3923_v32  ;;  %v1094_v47 = vrot.slane %v1093_v41, 4 }
  0xca   : > { %3527 = vmatpush.bf16.msra.mxu2 %v4768_v59  ;;  %3478 = vmatpush.bf16.msra.mxu1 %v4760_v63  ;;  %v3942_v42 = vld [vmem:[%s5433_s7 + $0x30] sm:$0xf]  ;;  %1218 = vst [vmem:[#allocation3 + $0xdc] sm:$0xf] %v1089_v60  ;;  %v3943_v43 = vld [vmem:[%s5433_s7 + $0x34] sm:$0xf]  ;;  %v4118_v51 = vor.u32 %v4658_v39, %v4117_v22 }
  0xcb   : > { %v1500_v48 = vshrl.u32 %v3942_v42, 16  ;;  %v1306_v57 = vsel %vm5510_vm13, %v1304_v33, %v1305_v31  ;;  %1357 = vst [vmem:[#allocation3 + $0xe0] sm:$0xf] %v1303_v27  ;;  %v3944_v50 = vld [vmem:[%s5433_s7 + $0x38] sm:$0x1]  ;;  %v1503_v2 = vshll.u32 %v3942_v42, 16  ;;  %v1099_v35 = vsel %vm5495_vm11, %v1094_v47, %v1098_v25 }
  0xcc   : > { %3576 = vmatpush.bf16.msra.mxu3 %v4776_v14  ;;  %3625 = vmatpush.bf16.msra.mxu0 %v4784_v19  ;;  %v1509_v10 = vshll.u32 %v3943_v43, 16  ;;  %1358 = vst [vmem:[#allocation3 + $0x104] sm:$0xf] %v1306_v57  ;;  %v1513_v58 = vshrl.u32 %v3943_v43, 16  ;;  %v1519_v59 = vshll.u32 %v3944_v50, 16  ;;  %v4767_v53 = vld [vmem:[%s6239_s1 + $0x1a0] sm:$0xff] }
  0xcd   : > { %v1502_v54 = vrot.slane %v1500_v48, 4  ;;  %1219 = vst [vmem:[#allocation3 + $0x100] sm:$0xf] %v1099_v35  ;;  %v1505_v17 = vrot.slane %v1503_v2, 5  ;;  %v989_v56 = vld [vmem:[%s5433_s7 + $0x30] sm:$0xf] }
  0xce   : > { %v1511_v49 = vrot.slane %v1509_v10, 5  ;;  %1394 = vst [vmem:[#allocation3 + $0x108] sm:$0xf] %v3924_v36  ;;  %v1515_v55 = vrot.slane %v1513_v58, 4  ;;  %v990_v62 = vld [vmem:[%s5433_s7 + $0x34] sm:$0xf]  ;;  %3528 = vmatpush.bf16.msra.mxu2 %v4767_v53 }
  0xcf   : > { %v1506_v44 = vor.u32 %v1505_v17, %v1502_v54  ;;  %v1101_v63 = vshrl.u32 %v989_v56, 16  ;;  %v1104_v5 = vshll.u32 %v989_v56, 16  ;;  %v1521_v61 = vrot.slane %v1519_v59, 5  ;;  %v4775_v14 = vld [vmem:[%s6239_s1 + $0x1e0] sm:$0xff]  ;;  %v991_v0 = vld [vmem:[%s5433_s7 + $0x38] sm:$0x1] }
  0xd0   : > { %v1516_v3 = vor.u32 %v1515_v55, %v1511_v49  ;;  %v1110_v19 = vshll.u32 %v990_v62, 16  ;;  %v4759_v12 = vld [vmem:[%s6239_s1 + $0x160] sm:$0xff]  ;;  %3577 = vmatpush.bf16.msra.mxu3 %v4775_v14  ;;  %v5781_v30 = vld [vmem:[#allocation3 + $0x94] sm:$0xf]  ;;  %v1114_v6 = vshrl.u32 %v990_v62, 16  ;;  %v1120_v16 = vshll.u32 %v991_v0, 16 }
  0xd1   : > { %3293 = vmatmul.bf16.gmra.mxu1 %v4106_v21  ;;  %3342 = vmatmul.bf16.gmra.mxu2 %v4110_v24  ;;  %v1507_v11 = vrot.slane %v1506_v44, 4  ;;  %v4783_v1 = vld [vmem:[%s6239_s1 + $0x220] sm:$0xff]  ;;  %v1103_v37 = vrot.slane %v1101_v63, 4  ;;  %v1106_v13 = vrot.slane %v1104_v5, 5  ;;  %v4139_v46 = vld [vmem:[#allocation3 + $0xb4] sm:$0xf0] }
  0xd2   : > { %v1517_v38 = vrot.slane %v1516_v3, 4  ;;  %3479 = vmatpush.bf16.msra.mxu1 %v4759_v12  ;;  %3626 = vmatpush.bf16.msra.mxu0 %v4783_v1  ;;  %v1112_v15 = vrot.slane %v1110_v19, 5  ;;  %v1240_v4 = vld [vmem:[%s5433_s7 + $0x30] sm:$0xe]  ;;  %v4666_v40 = vld [vmem:[#allocation3 + $0xb8] sm:$0xf0]  ;;  %v4142_v21 = vor.u32 %v5781_v30, %v4139_v46 }
  0xd3   : > { %3391 = vmatmul.bf16.gmra.mxu3 %v4114_v23  ;;  %3440 = vmatmul.bf16.gmra.mxu0 %v4118_v51  ;;  %v1512_v20 = vsel %vm5495_vm11, %v1507_v11, %v1511_v49  ;;  %v1107_v34 = vor.u32 %v1106_v13, %v1103_v37  ;;  %v4145_v18 = vld [vmem:[#allocation3 + $0x98] sm:$0xf]  ;;  %v1116_v29 = vrot.slane %v1114_v6, 4  ;;  %v1122_v22 = vrot.slane %v1120_v16, 5  ;;  %v3945_v7 = vld [vmem:[%s5433_s7 + $0x3c] sm:$0xf] }
  0xd4   : > { %v1522_v52 = vsel %vm5495_vm11, %v1517_v38, %v1521_v61  ;;  %1641 = vst [vmem:[#allocation3 + $0xe8] sm:$0xf] %v1512_v20  ;;  %v1241_v45 = vld [vmem:[%s5433_s7 + $0x34] sm:$0xf]  ;;  %v1242_v9 = vld [vmem:[%s5433_s7 + $0x38] sm:$0x1]  ;;  %v4146_v2 = vor.u32 %v4666_v40, %v4145_v18 }
  0xd5   : > { %1642 = vst [vmem:[#allocation3 + $0x10c] sm:$0xf] %v1522_v52  ;;  %v1108_v28 = vrot.slane %v1107_v34, 4  ;;  %v3911_v39 = vrot.slane %v1240_v4, 9  ;;  %v4662_v41 = vld [vmem:[#allocation3 + $0x9c] sm:$0xf]  ;;  %v1117_v60 = vor.u32 %v1116_v29, %v1112_v15 }
  0xd6   : > { %v4147_v25 = vld [vmem:[#allocation3 + $0xbc] sm:$0xf0]  ;;  %v4667_v32 = vld [vmem:[#allocation3 + $0xc0] sm:$0xf0]  ;;  %v1309_v27 = vrot.slane %v1241_v45, 5  ;;  %v1312_v33 = vrot.slane %v1242_v9, 5 }
  0xd7   : > { %v4153_v31 = vld [vmem:[#allocation3 + $0xa0] sm:$0xf]  ;;  %v3925_v36 = vld [vmem:[%s5433_s7 + $0x3c] sm:$0xf]  ;;  %v3926_v42 = vld [vmem:[%s5433_s7 + $0x40] sm:$0xf]  ;;  %v1113_v24 = vsel %vm5495_vm11, %v1108_v28, %v1112_v15  ;;  %v4150_v55 = vor.u32 %v4662_v41, %v4147_v25 }
  0xd8   : > { %1395 = vst [vmem:[#allocation3 + $0x12c] sm:$0xf] %v3925_v36  ;;  %v3946_v47 = vld [vmem:[%s5433_s7 + $0x40] sm:$0xf]  ;;  %v3947_v43 = vld [vmem:[%s5433_s7 + $0x44] sm:$0x1]  ;;  %v1310_v23 = vsel %vm5510_vm13, %v3911_v39, %v1309_v27  ;;  %v4154_v59 = vor.u32 %v4667_v32, %v4153_v31 }
  0xd9   : > { %v1118_v48 = vrot.slane %v1117_v60, 4  ;;  %1220 = vst [vmem:[#allocation3 + $0x124] sm:$0xf] %v1113_v24  ;;  %v1311_v57 = vrot.slane %v1309_v27, 4  ;;  %v1524_v50 = vshrl.u32 %v3945_v7, 16  ;;  %v1527_v10 = vshll.u32 %v3945_v7, 16 }
  0xda   : > { %1359 = vst [vmem:[#allocation3 + $0x128] sm:$0xf] %v1310_v23  ;;  %v1533_v51 = vshll.u32 %v3946_v47, 16  ;;  %v1537_v35 = vshrl.u32 %v3946_v47, 16  ;;  %v1543_v49 = vshll.u32 %v3947_v43, 16  ;;  %v4766_v1 = vld [vmem:[%s6239_s1 + $0x198] sm:$0xff] }
  0xdb   : > { %v1123_v54 = vsel %vm5495_vm11, %v1118_v48, %v1122_v22  ;;  %v1313_v58 = vsel %vm5510_vm13, %v1311_v57, %v1312_v33  ;;  %1396 = vst [vmem:[#allocation3 + $0x150] sm:$0xf] %v3926_v42  ;;  %v1526_v17 = vrot.slane %v1524_v50, 4  ;;  %v1529_v56 = vrot.slane %v1527_v10, 5  ;;  %v992_v63 = vld [vmem:[%s5433_s7 + $0x3c] sm:$0xf]  ;;  %3529 = vmatpush.bf16.msra.mxu2 %v4766_v1 }
  0xdc   : > { %1221 = vst [vmem:[#allocation3 + $0x148] sm:$0xf] %v1123_v54  ;;  %v1535_v44 = vrot.slane %v1533_v51, 5  ;;  %v1539_v62 = vrot.slane %v1537_v35, 4  ;;  %v993_v53 = vld [vmem:[%s5433_s7 + $0x40] sm:$0xf] }
  0xdd   : > { %1360 = vst [vmem:[#allocation3 + $0x14c] sm:$0xf] %v1313_v58  ;;  %v1530_v5 = vor.u32 %v1529_v56, %v1526_v17  ;;  %v1125_v3 = vshrl.u32 %v992_v63, 16  ;;  %v1128_v61 = vshll.u32 %v992_v63, 16  ;;  %v1545_v19 = vrot.slane %v1543_v49, 5  ;;  %v4774_v38 = vld [vmem:[%s6239_s1 + $0x1d8] sm:$0xff] }
  0xde   : > { %v1540_v14 = vor.u32 %v1539_v62, %v1535_v44  ;;  %v1134_v11 = vshll.u32 %v993_v53, 16  ;;  %v1138_v12 = vshrl.u32 %v993_v53, 16  ;;  %v4758_v30 = vld [vmem:[%s6239_s1 + $0x158] sm:$0xff]  ;;  %3578 = vmatpush.bf16.msra.mxu3 %v4774_v38  ;;  %v994_v16 = vld [vmem:[%s5433_s7 + $0x44] sm:$0x1] }
  0xdf   : > { %v1531_v37 = vrot.slane %v1530_v5, 4  ;;  %v1127_v0 = vrot.slane %v1125_v3, 4  ;;  %v4782_v20 = vld [vmem:[%s6239_s1 + $0x218] sm:$0xff]  ;;  %v1130_v15 = vrot.slane %v1128_v61, 5  ;;  %v3948_v34 = vld [vmem:[%s5433_s7 + $0x48] sm:$0xf]  ;;  %3480 = vmatpush.bf16.msra.mxu1 %v4758_v30 }
  0xe0   : > { %v1541_v13 = vrot.slane %v1540_v14, 4  ;;  %v1136_v46 = vrot.slane %v1134_v11, 5  ;;  %v1140_v52 = vrot.slane %v1138_v12, 4  ;;  %3627 = vmatpush.bf16.msra.mxu0 %v4782_v20  ;;  %v1243_v40 = vld [vmem:[%s5433_s7 + $0x3c] sm:$0xe]  ;;  %v1144_v22 = vshll.u32 %v994_v16, 16 }
  0xe1   : > { %3298 = vmatmul.bf16.gmra.mxu1 %v4142_v21  ;;  %3347 = vmatmul.bf16.gmra.mxu2 %v4146_v2  ;;  %v1536_v6 = vsel %vm5495_vm11, %v1531_v37, %v1535_v44  ;;  %v1131_v18 = vor.u32 %v1130_v15, %v1127_v0  ;;  %v3912_v7 = vrot.slane %v1243_v40, 9  ;;  %v3949_v28 = vld [vmem:[%s5433_s7 + $0x4c] sm:$0xf]  ;;  %v1244_v9 = vld [vmem:[%s5433_s7 + $0x40] sm:$0xf]  ;;  %v1548_v41 = vshrl.u32 %v3948_v34, 16 }
  0xe2   : > { %v1546_v4 = vsel %vm5495_vm11, %v1541_v13, %v1545_v19  ;;  %1643 = vst [vmem:[#allocation3 + $0x130] sm:$0xf] %v1536_v6  ;;  %v1141_v29 = vor.u32 %v1140_v52, %v1136_v46  ;;  %v1245_v39 = vld [vmem:[%s5433_s7 + $0x44] sm:$0x1]  ;;  %v4670_v25 = vld [vmem:[#allocation3 + $0xdc] sm:$0xf] }
  0xe3   : > { %3396 = vmatmul.bf16.gmra.mxu3 %v4150_v55  ;;  %3445 = vmatmul.bf16.gmra.mxu0 %v4154_v59  ;;  %1644 = vst [vmem:[#allocation3 + $0x154] sm:$0xf] %v1546_v4  ;;  %v1132_v45 = vrot.slane %v1131_v18, 4  ;;  %v4175_v31 = vld [vmem:[#allocation3 + $0xfc] sm:$0xf0]  ;;  %v1146_v33 = vrot.slane %v1144_v22, 5 }
  0xe4   : > { %v4181_v32 = vld [vmem:[#allocation3 + $0xe0] sm:$0xf]  ;;  %v4675_v60 = vld [vmem:[#allocation3 + $0x100] sm:$0xf0]  ;;  %v1142_v27 = vrot.slane %v1141_v29, 4  ;;  %v1316_v36 = vrot.slane %v1244_v9, 5  ;;  %v4178_v59 = vor.u32 %v4670_v25, %v4175_v31 }
  0xe5   : > { %v1319_v42 = vrot.slane %v1245_v39, 5  ;;  %v3927_v21 = vld [vmem:[%s5433_s7 + $0x48] sm:$0xf]  ;;  %v4671_v24 = vld [vmem:[#allocation3 + $0xe4] sm:$0xf]  ;;  %v1137_v23 = vsel %vm5495_vm11, %v1132_v45, %v1136_v46  ;;  %v1550_v35 = vrot.slane %v1548_v41, 4  ;;  %v4182_v56 = vor.u32 %v4675_v60, %v4181_v32 }
  0xe6   : > { %v4183_v47 = vld [vmem:[#allocation3 + $0x104] sm:$0xf0]  ;;  %v4676_v48 = vld [vmem:[#allocation3 + $0x108] sm:$0xf0]  ;;  %1397 = vst [vmem:[#allocation3 + $0x174] sm:$0xf] %v3927_v21  ;;  %v1147_v50 = vsel %vm5495_vm11, %v1142_v27, %v1146_v33  ;;  %v1317_v2 = vsel %vm5510_vm13, %v3912_v7, %v1316_v36 }
  0xe7   : > { %v4189_v43 = vld [vmem:[#allocation3 + $0xe8] sm:$0xf]  ;;  %v3950_v57 = vld [vmem:[%s5433_s7 + $0x50] sm:$0x1]  ;;  %1222 = vst [vmem:[#allocation3 + $0x16c] sm:$0xf] %v1137_v23  ;;  %v4186_v63 = vor.u32 %v4671_v24, %v4183_v47 }
  0xe8   : > { %v1318_v10 = vrot.slane %v1316_v36, 4  ;;  %v3928_v51 = vld [vmem:[%s5433_s7 + $0x4c] sm:$0xf]  ;;  %1223 = vst [vmem:[#allocation3 + $0x190] sm:$0xf] %v1147_v50  ;;  %v1551_v54 = vshll.u32 %v3948_v34, 16  ;;  %v4190_v5 = vor.u32 %v4676_v48, %v4189_v43 }
  0xe9   : > { %v1557_v58 = vshll.u32 %v3949_v28, 16  ;;  %v1561_v17 = vshrl.u32 %v3949_v28, 16  ;;  %1361 = vst [vmem:[#allocation3 + $0x170] sm:$0xf] %v1317_v2  ;;  %v1567_v55 = vshll.u32 %v3950_v57, 16  ;;  %v4765_v20 = vld [vmem:[%s6239_s1 + $0x190] sm:$0xff] }
  0xea   : > { %v1320_v49 = vsel %vm5510_vm13, %v1318_v10, %v1319_v42  ;;  %v1553_v44 = vrot.slane %v1551_v54, 5  ;;  %1398 = vst [vmem:[#allocation3 + $0x198] sm:$0xf] %v3928_v51  ;;  %v995_v3 = vld [vmem:[%s5433_s7 + $0x48] sm:$0xf]  ;;  %v4773_v6 = vld [vmem:[%s6239_s1 + $0x1d0] sm:$0xff]  ;;  %3530 = vmatpush.bf16.msra.mxu2 %v4765_v20 }
  0xeb   : > { %1362 = vst [vmem:[#allocation3 + $0x194] sm:$0xf] %v1320_v49  ;;  %v1559_v62 = vrot.slane %v1557_v58, 5  ;;  %v1563_v53 = vrot.slane %v1561_v17, 4  ;;  %v996_v14 = vld [vmem:[%s5433_s7 + $0x4c] sm:$0xf]  ;;  %3579 = vmatpush.bf16.msra.mxu3 %v4773_v6 }
  0xec   : > { %v1554_v61 = vor.u32 %v1553_v44, %v1550_v35  ;;  %v1149_v19 = vshrl.u32 %v995_v3, 16  ;;  %v1152_v11 = vshll.u32 %v995_v3, 16  ;;  %v1569_v1 = vrot.slane %v1567_v55, 5  ;;  %v3951_v46 = vld [vmem:[%s5433_s7 + $0x54] sm:$0xf] }
  0xed   : > { %v1564_v12 = vor.u32 %v1563_v53, %v1559_v62  ;;  %v1158_v37 = vshll.u32 %v996_v14, 16  ;;  %v1162_v38 = vshrl.u32 %v996_v14, 16  ;;  %v4757_v34 = vld [vmem:[%s6239_s1 + $0x150] sm:$0xff]  ;;  %v1572_v9 = vshrl.u32 %v3951_v46, 16  ;;  %v1246_v39 = vld [vmem:[%s5433_s7 + $0x48] sm:$0xe] }
  0xee   : > { %v1555_v0 = vrot.slane %v1554_v61, 4  ;;  %v1151_v13 = vrot.slane %v1149_v19, 4  ;;  %v1154_v30 = vrot.slane %v1152_v11, 5  ;;  %v4781_v4 = vld [vmem:[%s6239_s1 + $0x210] sm:$0xff]  ;;  %3481 = vmatpush.bf16.msra.mxu1 %v4757_v34  ;;  %v1247_v41 = vld [vmem:[%s5433_s7 + $0x4c] sm:$0xf] }
  0xef   : > { %v1565_v15 = vrot.slane %v1564_v12, 4  ;;  %v1160_v16 = vrot.slane %v1158_v37, 5  ;;  %v1164_v40 = vrot.slane %v1162_v38, 4  ;;  %v997_v22 = vld [vmem:[%s5433_s7 + $0x50] sm:$0x1]  ;;  %3628 = vmatpush.bf16.msra.mxu0 %v4781_v4  ;;  %v3913_v27 = vrot.slane %v1246_v39, 9 }
  0xf0   : > { %v1560_v52 = vsel %vm5495_vm11, %v1555_v0, %v1559_v62  ;;  %v1155_v18 = vor.u32 %v1154_v30, %v1151_v13  ;;  %v1168_v45 = vshll.u32 %v997_v22, 16  ;;  %v1248_v25 = vld [vmem:[%s5433_s7 + $0x50] sm:$0x1]  ;;  %v3929_v33 = vld [vmem:[%s5433_s7 + $0x54] sm:$0xf]  ;;  %v1323_v47 = vrot.slane %v1247_v41, 5 }
  0xf1   : > { %3303 = vmatmul.bf16.gmra.mxu1 %v4178_v59  ;;  %3352 = vmatmul.bf16.gmra.mxu2 %v4182_v56  ;;  %v1570_v29 = vsel %vm5495_vm11, %v1565_v15, %v1569_v1  ;;  %1645 = vst [vmem:[#allocation3 + $0x178] sm:$0xf] %v1560_v52  ;;  %v1165_v28 = vor.u32 %v1164_v40, %v1160_v16  ;;  %v4679_v36 = vld [vmem:[#allocation3 + $0x124] sm:$0xf]  ;;  %v4211_v42 = vld [vmem:[#allocation3 + $0x144] sm:$0xf0] }
  0xf2   : > { %1646 = vst [vmem:[#allocation3 + $0x19c] sm:$0xf] %v1570_v29  ;;  %v1156_v7 = vrot.slane %v1155_v18, 4  ;;  %v1170_v60 = vrot.slane %v1168_v45, 5  ;;  %v4217_v21 = vld [vmem:[#allocation3 + $0x128] sm:$0xf]  ;;  %v1324_v35 = vsel %vm5510_vm13, %v3913_v27, %v1323_v47 }
  0xf3   : > { %3401 = vmatmul.bf16.gmra.mxu3 %v4186_v63  ;;  %3450 = vmatmul.bf16.gmra.mxu0 %v4190_v5  ;;  %v1166_v32 = vrot.slane %v1165_v28, 4  ;;  %v4684_v24 = vld [vmem:[#allocation3 + $0x148] sm:$0xf0]  ;;  %v1326_v43 = vrot.slane %v1248_v25, 5  ;;  %v3930_v48 = vld [vmem:[%s5433_s7 + $0x58] sm:$0xf]  ;;  %v4214_v63 = vor.u32 %v4679_v36, %v4211_v42 }
  0xf4   : > { %v1161_v31 = vsel %vm5495_vm11, %v1156_v7, %v1160_v16  ;;  %v4680_v23 = vld [vmem:[#allocation3 + $0x12c] sm:$0xf]  ;;  %v4219_v57 = vld [vmem:[#allocation3 + $0x14c] sm:$0xf0]  ;;  %1399 = vst [vmem:[#allocation3 + $0x1bc] sm:$0xf] %v3929_v33  ;;  %v4218_v5 = vor.u32 %v4684_v24, %v4217_v21 }
  0xf5   : > { %1224 = vst [vmem:[#allocation3 + $0x1b4] sm:$0xf] %v1161_v31  ;;  %v4225_v50 = vld [vmem:[#allocation3 + $0x130] sm:$0xf]  ;;  %v1171_v2 = vsel %vm5495_vm11, %v1166_v32, %v1170_v60  ;;  %v3952_v10 = vld [vmem:[%s5433_s7 + $0x58] sm:$0xf]  ;;  %v4222_v61 = vor.u32 %v4680_v23, %v4219_v57 }
  0xf6   : > { %v3953_v51 = vld [vmem:[%s5433_s7 + $0x5c] sm:$0x1]  ;;  %1225 = vst [vmem:[#allocation3 + $0x1d8] sm:$0xf] %v1171_v2  ;;  %v1325_v54 = vrot.slane %v1323_v47, 4  ;;  %v1574_v58 = vrot.slane %v1572_v9, 4 }
  0xf7   : > { %v1575_v17 = vshll.u32 %v3951_v46, 16  ;;  %v4685_v49 = vld [vmem:[#allocation3 + $0x150] sm:$0xf0]  ;;  %1363 = vst [vmem:[#allocation3 + $0x1b8] sm:$0xf] %v1324_v35  ;;  %v1581_v55 = vshll.u32 %v3952_v10, 16 }
  0xf8   : > { %v1585_v59 = vshrl.u32 %v3952_v10, 16  ;;  %v1327_v56 = vsel %vm5510_vm13, %v1325_v54, %v1326_v43  ;;  %1400 = vst [vmem:[#allocation3 + $0x1e0] sm:$0xf] %v3930_v48  ;;  %v1591_v62 = vshll.u32 %v3953_v51, 16  ;;  %v4226_v14 = vor.u32 %v4685_v49, %v4225_v50  ;;  %v998_v12 = vld [vmem:[%s5433_s7 + $0x54] sm:$0xf] }
  0xf9   : > { %v1577_v44 = vrot.slane %v1575_v17, 5  ;;  %1364 = vst [vmem:[#allocation3 + $0x1dc] sm:$0xf] %v1327_v56  ;;  %v1583_v53 = vrot.slane %v1581_v55, 5  ;;  %v999_v1 = vld [vmem:[%s5433_s7 + $0x58] sm:$0xf] }
  0xfa   : > { %v1587_v3 = vrot.slane %v1585_v59, 4  ;;  %v1593_v11 = vrot.slane %v1591_v62, 5  ;;  %v1173_v38 = vshrl.u32 %v998_v12, 16  ;;  %v1176_v0 = vshll.u32 %v998_v12, 16  ;;  %v3954_v15 = vld [vmem:[%s5433_s7 + $0x60] sm:$0xf] }
  0xfb   : > { %v1578_v19 = vor.u32 %v1577_v44, %v1574_v58  ;;  %v1182_v13 = vshll.u32 %v999_v1, 16  ;;  %v1186_v20 = vshrl.u32 %v999_v1, 16  ;;  %v4764_v34 = vld [vmem:[%s6239_s1 + $0x188] sm:$0xff]  ;;  %v1000_v22 = vld [vmem:[%s5433_s7 + $0x5c] sm:$0x1]  ;;  %v1596_v28 = vshrl.u32 %v3954_v15, 16 }
  0xfc   : > { %v1588_v37 = vor.u32 %v1587_v3, %v1583_v53  ;;  %v1175_v16 = vrot.slane %v1173_v38, 4  ;;  %v1178_v46 = vrot.slane %v1176_v0, 5  ;;  %v4772_v18 = vld [vmem:[%s6239_s1 + $0x1c8] sm:$0xff]  ;;  %3531 = vmatpush.bf16.msra.mxu2 %v4764_v34  ;;  %v1192_v9 = vshll.u32 %v1000_v22, 16  ;;  %v1249_v25 = vld [vmem:[%s5433_s7 + $0x54] sm:$0xe] }
  0xfd   : > { %v1579_v30 = vrot.slane %v1578_v19, 4  ;;  %v1184_v52 = vrot.slane %v1182_v13, 5  ;;  %v1188_v40 = vrot.slane %v1186_v20, 4  ;;  %3580 = vmatpush.bf16.msra.mxu3 %v4772_v18  ;;  %v4756_v39 = vld [vmem:[%s6239_s1 + $0x148] sm:$0xff]  ;;  %v1250_v31 = vld [vmem:[%s5433_s7 + $0x58] sm:$0xf] }
  0xfe   : > { %v1589_v6 = vrot.slane %v1588_v37, 4  ;;  %v1179_v7 = vor.u32 %v1178_v46, %v1175_v16  ;;  %v1194_v60 = vrot.slane %v1192_v9, 5  ;;  %v1251_v27 = vld [vmem:[%s5433_s7 + $0x5c] sm:$0x1]  ;;  %v3914_v33 = vrot.slane %v1249_v25, 9  ;;  %3482 = vmatpush.bf16.msra.mxu1 %v4756_v39  ;;  %v4780_v42 = vld [vmem:[%s6239_s1 + $0x208] sm:$0xff] }
  0xff   : > { %v1584_v4 = vsel %vm5495_vm11, %v1579_v30, %v1583_v53  ;;  %v1189_v45 = vor.u32 %v1188_v40, %v1184_v52  ;;  %v1330_v36 = vrot.slane %v1250_v31, 5  ;;  %v1333_v24 = vrot.slane %v1251_v27, 5  ;;  %v3931_v47 = vld [vmem:[%s5433_s7 + $0x60] sm:$0xf]  ;;  %v4688_v48 = vld [vmem:[#allocation3 + $0x16c] sm:$0xf]  ;;  %3629 = vmatpush.bf16.msra.mxu0 %v4780_v42 }
 0x100   : > { %v1594_v29 = vsel %vm5495_vm11, %v1589_v6, %v1593_v11  ;;  %1647 = vst [vmem:[#allocation3 + $0x1c0] sm:$0xf] %v1584_v4  ;;  %v1180_v41 = vrot.slane %v1179_v7, 4  ;;  %v1598_v43 = vrot.slane %v1596_v28, 4  ;;  %v4247_v23 = vld [vmem:[#allocation3 + $0x18c] sm:$0xf0] }
 0x101   : > { %3308 = vmatmul.bf16.gmra.mxu1 %v4214_v63  ;;  %3357 = vmatmul.bf16.gmra.mxu2 %v4218_v5  ;;  %1648 = vst [vmem:[#allocation3 + $0x1e4] sm:$0xf] %v1594_v29  ;;  %v1190_v32 = vrot.slane %v1189_v45, 4  ;;  %v4253_v57 = vld [vmem:[#allocation3 + $0x170] sm:$0xf]  ;;  %v1331_v10 = vsel %vm5510_vm13, %v3914_v33, %v1330_v36  ;;  %v1332_v51 = vrot.slane %v1330_v36, 4  ;;  %v4250_v19 = vor.u32 %v4688_v48, %v4247_v23 }
 0x102   : > { %v1185_v21 = vsel %vm5495_vm11, %v1180_v41, %v1184_v52  ;;  %v4693_v50 = vld [vmem:[#allocation3 + $0x190] sm:$0xf0]  ;;  %v3955_v35 = vld [vmem:[%s5433_s7 + $0x64] sm:$0xf]  ;;  %v1599_v54 = vshll.u32 %v3954_v15, 16 }
 0x103   : > { %3406 = vmatmul.bf16.gmra.mxu3 %v4222_v61  ;;  %3455 = vmatmul.bf16.gmra.mxu0 %v4226_v14  ;;  %v1195_v2 = vsel %vm5495_vm11, %v1190_v32, %v1194_v60  ;;  %1226 = vst [vmem:[#allocation3 + $0x1fc] sm:$0xf] %v1185_v21  ;;  %v4689_v58 = vld [vmem:[#allocation3 + $0x174] sm:$0xf]  ;;  %v4255_v17 = vld [vmem:[#allocation3 + $0x194] sm:$0xf0]  ;;  %v1334_v44 = vsel %vm5510_vm13, %v1332_v51, %v1333_v24 }
 0x104   : > { %v4261_v49 = vld [vmem:[#allocation3 + $0x178] sm:$0xf]  ;;  %1227 = vst [vmem:[#allocation3 + $0x220] sm:$0xf] %v1195_v2  ;;  %v3956_v55 = vld [vmem:[%s5433_s7 + $0x68] sm:$0x1]  ;;  %v4254_v11 = vor.u32 %v4693_v50, %v4253_v57  ;;  %v4258_v37 = vor.u32 %v4689_v58, %v4255_v17 }
 0x105   : > { %v1605_v59 = vshll.u32 %v3955_v35, 16  ;;  %v1609_v56 = vshrl.u32 %v3955_v35, 16  ;;  %1365 = vst [vmem:[#allocation3 + $0x200] sm:$0xf] %v1331_v10  ;;  %v3932_v62 = vld [vmem:[%s5433_s7 + $0x64] sm:$0xf] }
 0x106   : > { %v1601_v63 = vrot.slane %v1599_v54, 5  ;;  %v1615_v5 = vshll.u32 %v3956_v55, 16  ;;  %v4694_v53 = vld [vmem:[#allocation3 + $0x198] sm:$0xf0]  ;;  %1366 = vst [vmem:[#allocation3 + $0x224] sm:$0xf] %v1334_v44 }
 0x107   : > { %v1607_v3 = vrot.slane %v1605_v59, 5  ;;  %v1611_v61 = vrot.slane %v1609_v56, 4  ;;  %1401 = vst [vmem:[#allocation3 + $0x204] sm:$0xf] %v3931_v47  ;;  %v4262_v38 = vor.u32 %v4694_v53, %v4261_v49  ;;  %v4007_v13 = vld [vmem:[%s5433_s7 + $0x18] sm:$0xf] }
 0x108   : > { %v1602_v14 = vor.u32 %v1601_v63, %v1598_v43  ;;  %1402 = vst [vmem:[#allocation3 + $0x228] sm:$0xf] %v3932_v62  ;;  %v1617_v1 = vrot.slane %v1615_v5, 5  ;;  %v4008_v20 = vld [vmem:[%s5433_s7 + $0x1c] sm:$0xf]  ;;  %v1848_v15 = vshrl.u32 %v4007_v13, 16 }
 0x109   : > { %v1612_v12 = vor.u32 %v1611_v61, %v1607_v3  ;;  %v1851_v6 = vshll.u32 %v4007_v13, 16  ;;  %v4763_v4 = vld [vmem:[%s6239_s1 + $0x180] sm:$0xff]  ;;  %v1857_v40 = vshll.u32 %v4008_v20, 16  ;;  %v1861_v29 = vshrl.u32 %v4008_v20, 16  ;;  %v3958_v22 = vld [vmem:[%s5433_s7 + $0x10] sm:$0xf] }
 0x10a   : > { %v1603_v0 = vrot.slane %v1602_v14, 4  ;;  %v1850_v52 = vrot.slane %v1848_v15, 4  ;;  %v4771_v18 = vld [vmem:[%s6239_s1 + $0x1c0] sm:$0xff]  ;;  %3532 = vmatpush.bf16.msra.mxu2 %v4763_v4  ;;  %v3957_v45 = vld [vmem:[%s5433_s7 + $0xc] sm:$0xe]  ;;  %v1701_v25 = vrot.slane %v3958_v22, 5 }
 0x10b   : > { %v1613_v30 = vrot.slane %v1612_v12, 4  ;;  %v1853_v34 = vrot.slane %v1851_v6, 5  ;;  %v4009_v7 = vld [vmem:[%s5433_s7 + $0x20] sm:$0x1]  ;;  %3581 = vmatpush.bf16.msra.mxu3 %v4771_v18  ;;  %v3959_v9 = vld [vmem:[%s5433_s7 + $0x14] sm:$0x1] }
 0x10c   : > { %v1608_v16 = vsel %vm5495_vm11, %v1603_v0, %v1607_v3  ;;  %v4755_v39 = vld [vmem:[%s6239_s1 + $0x140] sm:$0xff]  ;;  %v3981_v41 = vrot.slane %v3957_v45, 9  ;;  %v1704_v31 = vrot.slane %v3959_v9, 5  ;;  %v1859_v60 = vrot.slane %v1857_v40, 5  ;;  %v4031_v36 = vld [vmem:[%s5433_s7 + $0x18] sm:$0xe] }
 0x10d   : > { %v1618_v46 = vsel %vm5495_vm11, %v1613_v30, %v1617_v1  ;;  %1649 = vst [vmem:[#allocation3 + $0x208] sm:$0xf] %v1608_v16  ;;  %v1854_v28 = vor.u32 %v1853_v34, %v1850_v52  ;;  %v1863_v27 = vrot.slane %v1861_v29, 4  ;;  %v1867_v33 = vshll.u32 %v4009_v7, 16  ;;  %3483 = vmatpush.bf16.msra.mxu1 %v4755_v39  ;;  %v4779_v42 = vld [vmem:[%s6239_s1 + $0x200] sm:$0xff] }
 0x10e   : > { %1650 = vst [vmem:[#allocation3 + $0x22c] sm:$0xf] %v1618_v46  ;;  %v1702_v21 = vsel %vm5510_vm13, %v3981_v41, %v1701_v25  ;;  %v1703_v24 = vrot.slane %v1701_v25, 4  ;;  %v3991_v47 = vld [vmem:[%s5433_s7 + $0x18] sm:$0xf]  ;;  %v4055_v51 = vrot.slane %v4031_v36, 9  ;;  %3630 = vmatpush.bf16.msra.mxu0 %v4779_v42 }
 0x10f   : > { %v1855_v32 = vrot.slane %v1854_v28, 4  ;;  %v4032_v43 = vld [vmem:[%s5433_s7 + $0x1c] sm:$0xf]  ;;  %v4697_v48 = vld [vmem:[#allocation3 + $0x1b4] sm:$0xf]  ;;  %v1864_v2 = vor.u32 %v1863_v27, %v1859_v60  ;;  %v1869_v10 = vrot.slane %v1867_v33, 5 }
 0x110   : > { %v4283_v23 = vld [vmem:[#allocation3 + $0x1d4] sm:$0xf0]  ;;  %1771 = vst [vmem:[#allocation3 + $0x14] sm:$0xf] %v1702_v21  ;;  %v3992_v50 = vld [vmem:[%s5433_s7 + $0x1c] sm:$0xf]  ;;  %v1705_v17 = vsel %vm5510_vm13, %v1703_v24, %v1704_v31 }
 0x111   : > { %3313 = vmatmul.bf16.gmra.mxu1 %v4250_v19  ;;  %3362 = vmatmul.bf16.gmra.mxu2 %v4254_v11  ;;  %v4289_v57 = vld [vmem:[#allocation3 + $0x1b8] sm:$0xf]  ;;  %v4702_v35 = vld [vmem:[#allocation3 + $0x1d8] sm:$0xf0]  ;;  %v4291_v58 = vld [vmem:[#allocation3 + $0x1dc] sm:$0xf0]  ;;  %v1860_v49 = vsel %vm5495_vm11, %v1855_v32, %v1859_v60  ;;  %v4286_v61 = vor.u32 %v4697_v48, %v4283_v23 }
 0x112   : > { %v4698_v54 = vld [vmem:[#allocation3 + $0x1bc] sm:$0xf]  ;;  %1807 = vst [vmem:[#allocation3 + $0x18] sm:$0xf] %v3991_v47  ;;  %v4033_v55 = vld [vmem:[%s5433_s7 + $0x20] sm:$0x1]  ;;  %v4290_v14 = vor.u32 %v4702_v35, %v4289_v57 }
 0x113   : > { %3411 = vmatmul.bf16.gmra.mxu3 %v4258_v37  ;;  %3460 = vmatmul.bf16.gmra.mxu0 %v4262_v38  ;;  %1772 = vst [vmem:[#allocation3 + $0x38] sm:$0xf] %v1705_v17  ;;  %v1865_v59 = vrot.slane %v1864_v2, 4  ;;  %v2121_v56 = vrot.slane %v4032_v43, 5  ;;  %v2124_v44 = vrot.slane %v4033_v55, 5  ;;  %v4294_v11 = vor.u32 %v4698_v54, %v4291_v58 }
 0x114   : > { %v4297_v62 = vld [vmem:[#allocation3 + $0x1c0] sm:$0xf]  ;;  %v4703_v63 = vld [vmem:[#allocation3 + $0x1e0] sm:$0xf0]  ;;  %1808 = vst [vmem:[#allocation3 + $0x3c] sm:$0xf] %v3992_v50 }
 0x115   : > { %v1870_v5 = vsel %vm5495_vm11, %v1865_v59, %v1869_v10  ;;  %2055 = vst [vmem:[#allocation3 + $0x1c] sm:$0xf] %v1860_v49  ;;  %v2122_v53 = vsel %vm5510_vm13, %v4055_v51, %v2121_v56  ;;  %v2123_v3 = vrot.slane %v2121_v56, 4  ;;  %v4298_v12 = vor.u32 %v4703_v63, %v4297_v62  ;;  %v4010_v37 = vld [vmem:[%s5433_s7 + $0x24] sm:$0xf] }
 0x116   : > { %2056 = vst [vmem:[#allocation3 + $0x40] sm:$0xf] %v1870_v5  ;;  %v4011_v38 = vld [vmem:[%s5433_s7 + $0x28] sm:$0xf]  ;;  %v1872_v13 = vshrl.u32 %v4010_v37, 16  ;;  %v1875_v30 = vshll.u32 %v4010_v37, 16 }
 0x117   : > { %v2125_v1 = vsel %vm5510_vm13, %v2123_v3, %v2124_v44  ;;  %2191 = vst [vmem:[#allocation3 + $0x20] sm:$0xf] %v2122_v53  ;;  %v1881_v20 = vshll.u32 %v4011_v38, 16  ;;  %v3961_v16 = vld [vmem:[%s5433_s7 + $0x1c] sm:$0xf]  ;;  %v1885_v46 = vshrl.u32 %v4011_v38, 16 }
 0x118   : > { %2192 = vst [vmem:[#allocation3 + $0x44] sm:$0xf] %v2125_v1  ;;  %v1874_v15 = vrot.slane %v1872_v13, 4  ;;  %v1877_v6 = vrot.slane %v1875_v30, 5  ;;  %v1708_v52 = vrot.slane %v3961_v16, 5 }
 0x119   : > { %v4012_v34 = vld [vmem:[%s5433_s7 + $0x2c] sm:$0x1]  ;;  %v3960_v40 = vld [vmem:[%s5433_s7 + $0x18] sm:$0xe]  ;;  %v3962_v29 = vld [vmem:[%s5433_s7 + $0x20] sm:$0x1] }
 0x11a   : > { %v1878_v4 = vor.u32 %v1877_v6, %v1874_v15  ;;  %v1883_v22 = vrot.slane %v1881_v20, 5  ;;  %v3982_v28 = vrot.slane %v3960_v40, 9  ;;  %v1710_v45 = vrot.slane %v1708_v52, 4  ;;  %v3993_v33 = vld [vmem:[%s5433_s7 + $0x24] sm:$0xf] }
 0x11b   : > { %v1711_v9 = vrot.slane %v3962_v29, 5  ;;  %v1887_v25 = vrot.slane %v1885_v46, 4  ;;  %v1891_v31 = vshll.u32 %v4012_v34, 16  ;;  %v3994_v36 = vld [vmem:[%s5433_s7 + $0x28] sm:$0xf] }
 0x11c   : > { %v1879_v41 = vrot.slane %v1878_v4, 4  ;;  %v1709_v60 = vsel %vm5510_vm13, %v3982_v28, %v1708_v52  ;;  %v4034_v42 = vld [vmem:[%s5433_s7 + $0x24] sm:$0xe]  ;;  %v4706_v21 = vld [vmem:[#allocation3 + $0x1fc] sm:$0xf] }
 0x11d   : > { %v1712_v27 = vsel %vm5510_vm13, %v1710_v45, %v1711_v9  ;;  %v4319_v24 = vld [vmem:[#allocation3 + $0x21c] sm:$0xf0]  ;;  %v4711_v43 = vld [vmem:[#allocation3 + $0x220] sm:$0xf0]  ;;  %1773 = vst [vmem:[#allocation3 + $0x5c] sm:$0xf] %v1709_v60  ;;  %v1888_v48 = vor.u32 %v1887_v25, %v1883_v22 }
 0x11e   : > { %v5946_v19 = vpop.f32.mrf.mxu1  ;;  %v4325_v47 = vld [vmem:[#allocation3 + $0x200] sm:$0xf]  ;;  %v1893_v23 = vrot.slane %v1891_v31, 5  ;;  %v4035_v57 = vld [vmem:[%s5433_s7 + $0x28] sm:$0xf]  ;;  %v4056_v50 = vrot.slane %v4034_v42, 9  ;;  %v1884_v51 = vsel %vm5495_vm11, %v1879_v41, %v1883_v22  ;;  %v4322_v5 = vor.u32 %v4706_v21, %v4319_v24 }
 0x11f   : > { %v4707_v2 = vld [vmem:[#allocation3 + $0x204] sm:$0xf]  ;;  %v4327_v10 = vld [vmem:[#allocation3 + $0x224] sm:$0xf0]  ;;  %1774 = vst [vmem:[#allocation3 + $0x80] sm:$0xf] %v1712_v27  ;;  %v4326_v53 = vor.u32 %v4711_v43, %v4325_v47 }
 0x120   : > { %v5952_v0 = vpop.f32.mrf.mxu0  ;;  %v4036_v35 = vld [vmem:[%s5433_s7 + $0x2c] sm:$0x1]  ;;  %v2128_v54 = vrot.slane %v4035_v57, 5  ;;  %v4333_v58 = vld [vmem:[#allocation3 + $0x208] sm:$0xf]  ;;  %v1889_v17 = vrot.slane %v1888_v48, 4 }
 0x121   : > { %3318 = vmatmul.bf16.gmra.mxu1 %v4286_v61  ;;  %3367 = vmatmul.bf16.gmra.mxu2 %v4290_v14  ;;  %1809 = vst [vmem:[#allocation3 + $0x60] sm:$0xf] %v3993_v33  ;;  %v2131_v49 = vrot.slane %v4036_v35, 5  ;;  %v4712_v55 = vld [vmem:[#allocation3 + $0x228] sm:$0xf0]  ;;  %v4330_v14 = vor.u32 %v4707_v2, %v4327_v10 }
 0x122   : > { %1810 = vst [vmem:[#allocation3 + $0x84] sm:$0xf] %v3994_v36  ;;  %v2129_v59 = vsel %vm5510_vm13, %v4056_v50, %v2128_v54  ;;  %v2130_v56 = vrot.slane %v2128_v54, 4  ;;  %v1894_v62 = vsel %vm5495_vm11, %v1889_v17, %v1893_v23  ;;  %v4014_v1 = vld [vmem:[%s5433_s7 + $0x34] sm:$0xf] }
 0x123   : > { %3416 = vmatmul.bf16.gmra.mxu3 %v4294_v11  ;;  %3465 = vmatmul.bf16.gmra.mxu0 %v4298_v12  ;;  %2057 = vst [vmem:[#allocation3 + $0x64] sm:$0xf] %v1884_v51  ;;  %v4334_v11 = vor.u32 %v4712_v55, %v4333_v58  ;;  %v4013_v12 = vld [vmem:[%s5433_s7 + $0x30] sm:$0xf]  ;;  %v1905_v30 = vshll.u32 %v4014_v1, 16  ;;  %v1909_v16 = vshrl.u32 %v4014_v1, 16 }
 0x124   : > { %v5956_v18 = vpop.f32.mrf.mxu2  ;;  %2058 = vst [vmem:[#allocation3 + $0x88] sm:$0xf] %v1894_v62  ;;  %v2132_v3 = vsel %vm5510_vm13, %v2130_v56, %v2131_v49  ;;  %v1896_v38 = vshrl.u32 %v4013_v12, 16  ;;  %v1899_v13 = vshll.u32 %v4013_v12, 16  ;;  %v3964_v6 = vld [vmem:[%s5433_s7 + $0x28] sm:$0xf] }
 0x125   : > { %2193 = vst [vmem:[#allocation3 + $0x68] sm:$0xf] %v2129_v59  ;;  %v1715_v46 = vrot.slane %v3964_v6, 5  ;;  %v4015_v52 = vld [vmem:[%s5433_s7 + $0x38] sm:$0x1]  ;;  %v1907_v22 = vrot.slane %v1905_v30, 5 }
 0x126   : > { %v5960_v7 = vpop.f32.mrf.mxu3  ;;  %v5962_v39 = vpop.f32.mrf.mxu1  ;;  %2194 = vst [vmem:[#allocation3 + $0x8c] sm:$0xf] %v2132_v3  ;;  %v1898_v20 = vrot.slane %v1896_v38, 4  ;;  %v1901_v15 = vrot.slane %v1899_v13, 5  ;;  %v3963_v40 = vld [vmem:[%s5433_s7 + $0x24] sm:$0xe] }
 0x127   : > { %v3965_v29 = vld [vmem:[%s5433_s7 + $0x2c] sm:$0x1]  ;;  %v3983_v45 = vrot.slane %v3963_v40, 9  ;;  %v1717_v9 = vrot.slane %v1715_v46, 4  ;;  %v1911_v60 = vrot.slane %v1909_v16, 4  ;;  %v1915_v27 = vshll.u32 %v4015_v52, 16 }
 0x128   : > { %v5964_v32 = vpop.f32.mrf.mxu0  ;;  %v1902_v34 = vor.u32 %v1901_v15, %v1898_v20  ;;  %v1718_v41 = vrot.slane %v3965_v29, 5  ;;  %v3995_v21 = vld [vmem:[%s5433_s7 + $0x30] sm:$0xf]  ;;  %v3996_v24 = vld [vmem:[%s5433_s7 + $0x34] sm:$0xf] }
 0x129   : > { %v1716_v36 = vsel %vm5510_vm13, %v3983_v45, %v1715_v46  ;;  %v4037_v47 = vld [vmem:[%s5433_s7 + $0x30] sm:$0xe]  ;;  %v4645_v43 = vld [vmem:[#allocation3 + $0x14] sm:$0xf]  ;;  %v4650_v57 = vld [vmem:[#allocation3 + $0x38] sm:$0xf0]  ;;  %v1912_v50 = vor.u32 %v1911_v60, %v1907_v22 }
 0x12a   : > { %v1903_v31 = vrot.slane %v1902_v34, 4  ;;  %v1719_v42 = vsel %vm5510_vm13, %v1717_v9, %v1718_v41  ;;  %v4083_v48 = vld [vmem:[#allocation3 + $0x34] sm:$0xf0]  ;;  %1775 = vst [vmem:[#allocation3 + $0xa4] sm:$0xf] %v1716_v36  ;;  %v1917_v2 = vrot.slane %v1915_v27, 5 }
 0x12b   : > { %v4089_v23 = vld [vmem:[#allocation3 + $0x18] sm:$0xf]  ;;  %v4038_v10 = vld [vmem:[%s5433_s7 + $0x34] sm:$0xf]  ;;  %v4057_v51 = vrot.slane %v4037_v47, 9  ;;  %v1913_v59 = vrot.slane %v1912_v50, 4  ;;  %v4086_v12 = vor.u32 %v4645_v43, %v4083_v48 }
 0x12c   : > { %v5979_v44 = vpop.f32.mrf.mxu2  ;;  %v4646_v35 = vld [vmem:[#allocation3 + $0x1c] sm:$0xf]  ;;  %v4091_v54 = vld [vmem:[#allocation3 + $0x3c] sm:$0xf0]  ;;  %1776 = vst [vmem:[#allocation3 + $0xc8] sm:$0xf] %v1719_v42  ;;  %v1908_v58 = vsel %vm5495_vm11, %v1903_v31, %v1907_v22  ;;  %v4090_v1 = vor.u32 %v4650_v57, %v4089_v23 }
 0x12d   : > { %v4039_v17 = vld [vmem:[%s5433_s7 + $0x38] sm:$0x1]  ;;  %v2135_v49 = vrot.slane %v4038_v10, 5  ;;  %1811 = vst [vmem:[#allocation3 + $0xa8] sm:$0xf] %v3995_v21  ;;  %v4094_v30 = vor.u32 %v4646_v35, %v4091_v54 }
 0x12e   : > { %v5983_v63 = vpop.f32.mrf.mxu3  ;;  %v5987_v61 = vpop.f32.mrf.mxu1  ;;  %v4097_v55 = vld [vmem:[#allocation3 + $0x20] sm:$0xf]  ;;  %v2138_v56 = vrot.slane %v4039_v17, 5  ;;  %v4651_v62 = vld [vmem:[#allocation3 + $0x40] sm:$0xf0] }
 0x12f   : > { %1812 = vst [vmem:[#allocation3 + $0xcc] sm:$0xf] %v3996_v24  ;;  %v4098_v20 = vor.u32 %v4651_v62, %v4097_v55  ;;  %v4016_v15 = vld [vmem:[%s5433_s7 + $0x3c] sm:$0xf]  ;;  %v4017_v6 = vld [vmem:[%s5433_s7 + $0x40] sm:$0xf] }
 0x130   : > { %v5991_v37 = vpop.f32.mrf.mxu0  ;;  %2059 = vst [vmem:[#allocation3 + $0xac] sm:$0xf] %v1908_v58  ;;  %v1920_v52 = vshrl.u32 %v4016_v15, 16  ;;  %v1923_v34 = vshll.u32 %v4016_v15, 16  ;;  %v1929_v40 = vshll.u32 %v4017_v6, 16  ;;  %v1933_v9 = vshrl.u32 %v4017_v6, 16 }
 0x131   : > { %3323 = vmatmul.bf16.gmra.mxu1 %v4322_v5  ;;  %3372 = vmatmul.bf16.gmra.mxu2 %v4326_v53  ;;  %v2136_v5 = vsel %vm5510_vm13, %v4057_v51, %v2135_v49  ;;  %v2137_v53 = vrot.slane %v2135_v49, 4  ;;  %v3967_v45 = vld [vmem:[%s5433_s7 + $0x34] sm:$0xf]  ;;  %v4018_v31 = vld [vmem:[%s5433_s7 + $0x44] sm:$0x1] }
 0x132   : > { %2195 = vst [vmem:[#allocation3 + $0xb0] sm:$0xf] %v2136_v5  ;;  %v1922_v29 = vrot.slane %v1920_v52, 4  ;;  %v1925_v22 = vrot.slane %v1923_v34, 5  ;;  %v1722_v41 = vrot.slane %v3967_v45, 5  ;;  %v1931_v42 = vrot.slane %v1929_v40, 5 }
 0x133   : > { %3421 = vmatmul.bf16.gmra.mxu3 %v4330_v14  ;;  %3470 = vmatmul.bf16.gmra.mxu0 %v4334_v11  ;;  %v1918_v14 = vsel %vm5495_vm11, %v1913_v59, %v1917_v2  ;;  %v2139_v38 = vsel %vm5510_vm13, %v2137_v53, %v2138_v56  ;;  %v3966_v27 = vld [vmem:[%s5433_s7 + $0x30] sm:$0xe]  ;;  %v3968_v36 = vld [vmem:[%s5433_s7 + $0x38] sm:$0x1]  ;;  %v1935_v50 = vrot.slane %v1933_v9, 4  ;;  %v1939_v2 = vshll.u32 %v4018_v31, 16 }
 0x134   : > { %v5995_v4 = vpop.f32.mrf.mxu2  ;;  %2060 = vst [vmem:[#allocation3 + $0xd0] sm:$0xf] %v1918_v14  ;;  %v1926_v60 = vor.u32 %v1925_v22, %v1922_v29  ;;  %v3984_v47 = vrot.slane %v3966_v27, 9  ;;  %v1724_v43 = vrot.slane %v1722_v41, 4  ;;  %v1725_v23 = vrot.slane %v3968_v36, 5 }
 0x135   : > { %2196 = vst [vmem:[#allocation3 + $0xd4] sm:$0xf] %v2139_v38  ;;  %v4041_v10 = vld [vmem:[%s5433_s7 + $0x40] sm:$0xf]  ;;  %v3997_v17 = vld [vmem:[%s5433_s7 + $0x3c] sm:$0xf] }
 0x136   : > { %v5999_v28 = vpop.f32.mrf.mxu3  ;;  %v6001_v25 = vpop.f32.mrf.mxu1  ;;  %v1927_v57 = vrot.slane %v1926_v60, 4  ;;  %v1723_v58 = vsel %vm5510_vm13, %v3984_v47, %v1722_v41  ;;  %v3998_v49 = vld [vmem:[%s5433_s7 + $0x40] sm:$0xf]  ;;  %v4040_v55 = vld [vmem:[%s5433_s7 + $0x3c] sm:$0xe]  ;;  %v1726_v53 = vsel %vm5510_vm13, %v1724_v43, %v1725_v23 }
 0x137   : > { %v4654_v59 = vld [vmem:[#allocation3 + $0x5c] sm:$0xf]  ;;  %v4119_v56 = vld [vmem:[#allocation3 + $0x7c] sm:$0xf0]  ;;  %v4659_v5 = vld [vmem:[#allocation3 + $0x80] sm:$0xf0] }
 0x138   : > { %v6003_v33 = vpop.f32.mrf.mxu0  ;;  %v4125_v62 = vld [vmem:[#allocation3 + $0x60] sm:$0xf]  ;;  %1777 = vst [vmem:[#allocation3 + $0xec] sm:$0xf] %v1723_v58  ;;  %v1932_v14 = vsel %vm5495_vm11, %v1927_v57, %v1931_v42  ;;  %v4655_v38 = vld [vmem:[#allocation3 + $0x64] sm:$0xf] }
 0x139   : > { %1778 = vst [vmem:[#allocation3 + $0x110] sm:$0xf] %v1726_v53  ;;  %v4660_v34 = vld [vmem:[#allocation3 + $0x88] sm:$0xf0]  ;;  %v4126_v31 = vor.u32 %v4659_v5, %v4125_v62 }
 0x13a   : > { %1813 = vst [vmem:[#allocation3 + $0xf0] sm:$0xf] %v3997_v17 }
 0x13b   : > { %1814 = vst [vmem:[#allocation3 + $0x114] sm:$0xf] %v3998_v49 }
 0x13c   : > { %v6018_v3 = vpop.f32.mrf.mxu2  ;;  %2061 = vst [vmem:[#allocation3 + $0xf4] sm:$0xf] %v1932_v14 }
 0x13e   : > { %v6022_v11 = vpop.f32.mrf.mxu3  ;;  %v3289_v13 = vpop.f32.mrf.mxu1 }
 0x13f   : > { %v3290_v16 = vadd.f32 %v3289_v13, %v5952_v0  ;;  %v4127_v13 = vld [vmem:[#allocation3 + $0x84] sm:$0xf0] }
 0x140   : > { %v3436_v46 = vpop.f32.mrf.mxu0  ;;  %v4130_v27 = vor.u32 %v4655_v38, %v4127_v13  ;;  %v4044_v13 = vld [vmem:[%s5433_s7 + $0x4c] sm:$0xf] }
 0x141   : > { %3484 = vmatmul.bf16.vlgmr.msra.gmra.mxu1 %v4086_v12  ;;  %3533 = vmatmul.bf16.vlgmr.msra.gmra.mxu2 %v4090_v1  ;;  %v1936_v12 = vor.u32 %v1935_v50, %v1931_v42  ;;  %v4042_v1 = vld [vmem:[%s5433_s7 + $0x44] sm:$0x1]  ;;  %v4019_v42 = vld [vmem:[%s5433_s7 + $0x48] sm:$0xf] }
 0x142   : > { %v2145_v15 = vrot.slane %v4042_v1, 5  ;;  %v1947_v23 = vshll.u32 %v4019_v42, 16 }
 0x143   : > { %3582 = vmatmul.bf16.vlgmr.msra.gmra.mxu3 %v4094_v30  ;;  %3631 = vmatmul.bf16.vlgmr.msra.gmra.mxu0 %v4098_v20  ;;  %v4058_v30 = vrot.slane %v4040_v55, 9  ;;  %v2142_v20 = vrot.slane %v4041_v10, 5  ;;  %v1937_v52 = vrot.slane %v1936_v12, 4  ;;  %v3969_v55 = vld [vmem:[%s5433_s7 + $0x3c] sm:$0xe] }
 0x144   : > { %v3338_v0 = vpop.f32.mrf.mxu2  ;;  %v3985_v53 = vrot.slane %v3969_v55, 9 }
 0x145   : > { %v3339_v21 = vadd.f32 %v3338_v0, %v3290_v16  ;;  %v4133_v16 = vld [vmem:[#allocation3 + $0x68] sm:$0xf]  ;;  %v2143_v40 = vsel %vm5510_vm13, %v4058_v30, %v2142_v20  ;;  %v2144_v29 = vrot.slane %v2142_v20, 4 }
 0x146   : > { %v3387_v24 = vpop.f32.mrf.mxu3  ;;  %v3291_v48 = vpop.f32.mrf.mxu1  ;;  %v4134_v36 = vor.u32 %v4660_v34, %v4133_v16  ;;  %2197 = vst [vmem:[#allocation3 + $0xf8] sm:$0xf] %v2143_v40  ;;  %v4000_v34 = vld [vmem:[%s5433_s7 + $0x4c] sm:$0xf]  ;;  %v4043_v40 = vld [vmem:[%s5433_s7 + $0x48] sm:$0xe] }
 0x147   : > { %v3388_v51 = vadd.f32 %v3387_v24, %v3339_v21  ;;  %v3292_v35 = vadd.f32 %v3291_v48, %v5964_v32  ;;  %v1941_v32 = vrot.slane %v1939_v2, 5  ;;  %v2146_v60 = vsel %vm5510_vm13, %v2144_v29, %v2145_v15  ;;  %v4020_v21 = vld [vmem:[%s5433_s7 + $0x4c] sm:$0xf]  ;;  %v4663_v29 = vld [vmem:[#allocation3 + $0xa4] sm:$0xf] }
 0x148   : > { %v3438_v54 = vpop.f32.mrf.mxu0  ;;  %2198 = vst [vmem:[#allocation3 + $0x11c] sm:$0xf] %v2146_v60  ;;  %v1944_v48 = vshrl.u32 %v4019_v42, 16  ;;  %v1953_v57 = vshll.u32 %v4020_v21, 16  ;;  %v1949_v2 = vrot.slane %v1947_v23, 5  ;;  %v2149_v42 = vrot.slane %v4044_v13, 5 }
 0x149   : > { %v6045_v6 = vadd.f32 %v3436_v46, %v3388_v51  ;;  %v1942_v45 = vsel %vm5495_vm11, %v1937_v52, %v1941_v32  ;;  %v4122_v46 = vor.u32 %v4654_v59, %v4119_v56  ;;  %v3970_v51 = vld [vmem:[%s5433_s7 + $0x40] sm:$0xf]  ;;  %v3971_v59 = vld [vmem:[%s5433_s7 + $0x44] sm:$0x1]  ;;  %v3999_v52 = vld [vmem:[%s5433_s7 + $0x48] sm:$0xf] }
 0x14a   : > { %2062 = vst [vmem:[#allocation3 + $0x118] sm:$0xf] %v1942_v45  ;;  %v1946_v50 = vrot.slane %v1944_v48, 4  ;;  %v1729_v58 = vrot.slane %v3970_v51, 5  ;;  %v1955_v56 = vrot.slane %v1953_v57, 5  ;;  %v1732_v12 = vrot.slane %v3971_v59, 5 }
 0x14b   : > { %v4161_v45 = vld [vmem:[#allocation3 + $0xa8] sm:$0xf]  ;;  %v4045_v60 = vld [vmem:[%s5433_s7 + $0x50] sm:$0x1]  ;;  %1815 = vst [vmem:[#allocation3 + $0x138] sm:$0xf] %v3999_v52 }
 0x14c   : > { %v3340_v22 = vpop.f32.mrf.mxu2  ;;  %v1950_v17 = vor.u32 %v1949_v2, %v1946_v50  ;;  %v1730_v16 = vsel %vm5510_vm13, %v3985_v53, %v1729_v58  ;;  %v4669_v23 = vld [vmem:[#allocation3 + $0xd0] sm:$0xf0]  ;;  %1816 = vst [vmem:[#allocation3 + $0x15c] sm:$0xf] %v4000_v34  ;;  %v2151_v50 = vrot.slane %v2149_v42, 4 }
 0x14d   : > { %v3341_v9 = vadd.f32 %v3340_v22, %v3292_v35  ;;  %v1957_v35 = vshrl.u32 %v4020_v21, 16  ;;  %v4155_v22 = vld [vmem:[#allocation3 + $0xc4] sm:$0xf0]  ;;  %1779 = vst [vmem:[#allocation3 + $0x134] sm:$0xf] %v1730_v16  ;;  %v2152_v21 = vrot.slane %v4045_v60, 5 }
 0x14e   : > { %v3389_v41 = vpop.f32.mrf.mxu3  ;;  %v3294_v0 = vpop.f32.mrf.mxu1  ;;  %v1951_v32 = vrot.slane %v1950_v17, 4 }
 0x14f   : > { %v3390_v24 = vadd.f32 %v3389_v41, %v3341_v9  ;;  %v3295_v47 = vadd.f32 %v3294_v0, %v5991_v37  ;;  %v4021_v37 = vld [vmem:[%s5433_s7 + $0x50] sm:$0x1]  ;;  %v1959_v1 = vrot.slane %v1957_v35, 4  ;;  %v4668_v9 = vld [vmem:[#allocation3 + $0xc8] sm:$0xf0]  ;;  %v2153_v17 = vsel %vm5510_vm13, %v2151_v50, %v2152_v21 }
 0x150   : > { %v3441_v43 = vpop.f32.mrf.mxu0  ;;  %v1963_v38 = vshll.u32 %v4021_v37, 16  ;;  %v4664_v0 = vld [vmem:[#allocation3 + $0xac] sm:$0xf]  ;;  %v4162_v37 = vor.u32 %v4668_v9, %v4161_v45  ;;  %2200 = vst [vmem:[#allocation3 + $0x164] sm:$0xf] %v2153_v17 }
 0x151   : > { %3489 = vmatmul.bf16.gmra.mxu1 %v4122_v46  ;;  %3538 = vmatmul.bf16.gmra.mxu2 %v4126_v31  ;;  %v6056_v10 = vadd.f32 %v3438_v54, %v3390_v24  ;;  %v1731_v54 = vrot.slane %v1729_v58, 4  ;;  %v1956_v46 = vsel %vm5495_vm11, %v1951_v32, %v1955_v56  ;;  %v1960_v31 = vor.u32 %v1959_v1, %v1955_v56  ;;  %v4022_v56 = vld [vmem:[%s5433_s7 + $0x54] sm:$0xf]  ;;  %v4672_v50 = vld [vmem:[#allocation3 + $0xec] sm:$0xf] }
 0x152   : > { %2063 = vst [vmem:[#allocation3 + $0x13c] sm:$0xf] %v1956_v46  ;;  %v4048_v17 = vld [vmem:[%s5433_s7 + $0x5c] sm:$0x1] }
 0x153   : > { %3587 = vmatmul.bf16.gmra.mxu3 %v4130_v27  ;;  %3636 = vmatmul.bf16.gmra.mxu0 %v4134_v36  ;;  %v1733_v41 = vsel %vm5510_vm13, %v1731_v54, %v1732_v12  ;;  %v4163_v27 = vld [vmem:[#allocation3 + $0xcc] sm:$0xf0]  ;;  %v4059_v36 = vrot.slane %v4043_v40, 9  ;;  %v1961_v48 = vrot.slane %v1960_v31, 4  ;;  %v1971_v12 = vshll.u32 %v4022_v56, 16 }
 0x154   : > { %v3343_v49 = vpop.f32.mrf.mxu2  ;;  %1780 = vst [vmem:[#allocation3 + $0x158] sm:$0xf] %v1733_v41  ;;  %v4166_v55 = vor.u32 %v4664_v0, %v4163_v27  ;;  %v3972_v40 = vld [vmem:[%s5433_s7 + $0x48] sm:$0xe]  ;;  %v4047_v27 = vld [vmem:[%s5433_s7 + $0x58] sm:$0xf] }
 0x155   : > { %v3344_v62 = vadd.f32 %v3343_v49, %v3295_v47  ;;  %v4169_v47 = vld [vmem:[#allocation3 + $0xb0] sm:$0xf]  ;;  %v2150_v57 = vsel %vm5510_vm13, %v4059_v36, %v2149_v42  ;;  %v3986_v41 = vrot.slane %v3972_v40, 9 }
 0x156   : > { %v3392_v5 = vpop.f32.mrf.mxu3  ;;  %v3296_v14 = vpop.f32.mrf.mxu1  ;;  %v4170_v59 = vor.u32 %v4669_v23, %v4169_v47  ;;  %2199 = vst [vmem:[#allocation3 + $0x140] sm:$0xf] %v2150_v57  ;;  %v4002_v23 = vld [vmem:[%s5433_s7 + $0x58] sm:$0xf]  ;;  %v4046_v57 = vld [vmem:[%s5433_s7 + $0x54] sm:$0xe] }
 0x157   : > { %v3393_v30 = vadd.f32 %v3392_v5, %v3344_v62  ;;  %v3297_v20 = vadd.f32 %v3296_v14, %v6003_v33  ;;  %v1965_v33 = vrot.slane %v1963_v38, 5  ;;  %v4023_v62 = vld [vmem:[%s5433_s7 + $0x58] sm:$0xf]  ;;  %v1968_v14 = vshrl.u32 %v4022_v56, 16  ;;  %1818 = vst [vmem:[#allocation3 + $0x1a4] sm:$0xf] %v4002_v23 }
 0x158   : > { %v3443_v15 = vpop.f32.mrf.mxu0  ;;  %v1977_v32 = vshll.u32 %v4023_v62, 16  ;;  %v1973_v38 = vrot.slane %v1971_v12, 5  ;;  %v2156_v56 = vrot.slane %v4047_v27, 5  ;;  %v4678_v12 = vld [vmem:[#allocation3 + $0x118] sm:$0xf0] }
 0x159   : > { %v6074_v24 = vadd.f32 %v3441_v43, %v3393_v30  ;;  %v1966_v51 = vsel %vm5495_vm11, %v1961_v48, %v1965_v33  ;;  %v4158_v43 = vor.u32 %v4663_v29, %v4155_v22  ;;  %v1970_v1 = vrot.slane %v1968_v14, 4  ;;  %v3973_v30 = vld [vmem:[%s5433_s7 + $0x4c] sm:$0xf]  ;;  %v3974_v29 = vld [vmem:[%s5433_s7 + $0x50] sm:$0x1] }
 0x15a   : > { %2064 = vst [vmem:[#allocation3 + $0x160] sm:$0xf] %v1966_v51  ;;  %v1736_v16 = vrot.slane %v3973_v30, 5  ;;  %v1979_v22 = vrot.slane %v1977_v32, 5  ;;  %v1739_v31 = vrot.slane %v3974_v29, 5 }
 0x15b   : > { %v1974_v52 = vor.u32 %v1973_v38, %v1970_v1  ;;  %v4001_v48 = vld [vmem:[%s5433_s7 + $0x54] sm:$0xf]  ;;  %v4197_v51 = vld [vmem:[#allocation3 + $0xf0] sm:$0xf]  ;;  %v2158_v1 = vrot.slane %v2156_v56, 4 }
 0x15c   : > { %v3345_v2 = vpop.f32.mrf.mxu2  ;;  %v1737_v47 = vsel %vm5510_vm13, %v3986_v41, %v1736_v16  ;;  %1817 = vst [vmem:[#allocation3 + $0x180] sm:$0xf] %v4001_v48 }
 0x15d   : > { %v3346_v35 = vadd.f32 %v3345_v2, %v3297_v20  ;;  %v1981_v20 = vshrl.u32 %v4023_v62, 16  ;;  %v1975_v33 = vrot.slane %v1974_v52, 4  ;;  %v4191_v2 = vld [vmem:[#allocation3 + $0x10c] sm:$0xf0]  ;;  %1781 = vst [vmem:[#allocation3 + $0x17c] sm:$0xf] %v1737_v47 }
 0x15e   : > { %v3394_v58 = vpop.f32.mrf.mxu3  ;;  %v3299_v49 = vpop.f32.mrf.mxu1  ;;  %v2159_v62 = vrot.slane %v4048_v17, 5 }
 0x15f   : > { %v3395_v5 = vadd.f32 %v3394_v58, %v3346_v35  ;;  %v3300_v53 = vadd.f32 %v3299_v49, %v5946_v19  ;;  %v4024_v19 = vld [vmem:[%s5433_s7 + $0x5c] sm:$0x1]  ;;  %v1983_v60 = vrot.slane %v1981_v20, 4  ;;  %v4677_v35 = vld [vmem:[#allocation3 + $0x110] sm:$0xf0] }
 0x160   : > { %v3446_v54 = vpop.f32.mrf.mxu0  ;;  %v1987_v0 = vshll.u32 %v4024_v19, 16  ;;  %v4673_v49 = vld [vmem:[#allocation3 + $0xf4] sm:$0xf]  ;;  %v4198_v19 = vor.u32 %v4677_v35, %v4197_v51  ;;  %v2160_v52 = vsel %vm5510_vm13, %v2158_v1, %v2159_v62 }
 0x161   : > { %3494 = vmatmul.bf16.gmra.mxu1 %v4158_v43  ;;  %3543 = vmatmul.bf16.gmra.mxu2 %v4162_v37  ;;  %v6085_v13 = vadd.f32 %v3443_v15, %v3395_v5  ;;  %v1738_v15 = vrot.slane %v1736_v16, 4  ;;  %v1980_v43 = vsel %vm5495_vm11, %v1975_v33, %v1979_v22  ;;  %v1984_v37 = vor.u32 %v1983_v60, %v1979_v22  ;;  %v4025_v22 = vld [vmem:[%s5433_s7 + $0x60] sm:$0xf]  ;;  %v4681_v1 = vld [vmem:[#allocation3 + $0x134] sm:$0xf] }
 0x162   : > { %2065 = vst [vmem:[#allocation3 + $0x184] sm:$0xf] %v1980_v43 }
 0x163   : > { %3592 = vmatmul.bf16.gmra.mxu3 %v4166_v55  ;;  %3641 = vmatmul.bf16.gmra.mxu0 %v4170_v59  ;;  %v1740_v58 = vsel %vm5510_vm13, %v1738_v15, %v1739_v31  ;;  %v4199_v55 = vld [vmem:[#allocation3 + $0x114] sm:$0xf0]  ;;  %v4060_v59 = vrot.slane %v4046_v57, 9  ;;  %v1985_v14 = vrot.slane %v1984_v37, 4  ;;  %2202 = vst [vmem:[#allocation3 + $0x1ac] sm:$0xf] %v2160_v52 }
 0x164   : > { %v3348_v34 = vpop.f32.mrf.mxu2  ;;  %1782 = vst [vmem:[#allocation3 + $0x1a0] sm:$0xf] %v1740_v58  ;;  %v4202_v40 = vor.u32 %v4673_v49, %v4199_v55  ;;  %v1995_v31 = vshll.u32 %v4025_v22, 16  ;;  %v3975_v57 = vld [vmem:[%s5433_s7 + $0x54] sm:$0xe] }
 0x165   : > { %v3349_v45 = vadd.f32 %v3348_v34, %v3300_v53  ;;  %v4205_v53 = vld [vmem:[#allocation3 + $0xf8] sm:$0xf]  ;;  %v2157_v32 = vsel %vm5510_vm13, %v4060_v59, %v2156_v56  ;;  %v3987_v58 = vrot.slane %v3975_v57, 9  ;;  %v4050_v55 = vld [vmem:[%s5433_s7 + $0x64] sm:$0xf] }
 0x166   : > { %v3397_v9 = vpop.f32.mrf.mxu3  ;;  %v3301_v46 = vpop.f32.mrf.mxu1  ;;  %v4206_v29 = vor.u32 %v4678_v12, %v4205_v53  ;;  %2201 = vst [vmem:[#allocation3 + $0x188] sm:$0xf] %v2157_v32  ;;  %v4004_v12 = vld [vmem:[%s5433_s7 + $0x64] sm:$0xf]  ;;  %v4049_v32 = vld [vmem:[%s5433_s7 + $0x60] sm:$0xe] }
 0x167   : > { %v3398_v36 = vadd.f32 %v3397_v9, %v3349_v45  ;;  %v3302_v42 = vadd.f32 %v3301_v46, %v5962_v39  ;;  %v1989_v39 = vrot.slane %v1987_v0, 5  ;;  %v4026_v45 = vld [vmem:[%s5433_s7 + $0x64] sm:$0xf]  ;;  %v1992_v46 = vshrl.u32 %v4025_v22, 16  ;;  %v4051_v52 = vld [vmem:[%s5433_s7 + $0x68] sm:$0x1] }
 0x168   : > { %v3448_v21 = vpop.f32.mrf.mxu0  ;;  %v2001_v33 = vshll.u32 %v4026_v45, 16  ;;  %v1997_v0 = vrot.slane %v1995_v31, 5  ;;  %v2163_v22 = vrot.slane %v4050_v55, 5  ;;  %v4687_v31 = vld [vmem:[#allocation3 + $0x160] sm:$0xf0] }
 0x169   : > { %v6103_v5 = vadd.f32 %v3446_v54, %v3398_v36  ;;  %v1990_v30 = vsel %vm5495_vm11, %v1985_v14, %v1989_v39  ;;  %v4194_v54 = vor.u32 %v4672_v50, %v4191_v2  ;;  %v1994_v60 = vrot.slane %v1992_v46, 4  ;;  %v3976_v36 = vld [vmem:[%s5433_s7 + $0x58] sm:$0xf]  ;;  %v3977_v50 = vld [vmem:[%s5433_s7 + $0x5c] sm:$0x1] }
 0x16a   : > { %2066 = vst [vmem:[#allocation3 + $0x1a8] sm:$0xf] %v1990_v30  ;;  %v1743_v47 = vrot.slane %v3976_v36, 5  ;;  %v2003_v2 = vrot.slane %v2001_v33, 5  ;;  %v1746_v37 = vrot.slane %v3977_v50, 5 }
 0x16b   : > { %v1998_v48 = vor.u32 %v1997_v0, %v1994_v60  ;;  %v4003_v14 = vld [vmem:[%s5433_s7 + $0x60] sm:$0xf]  ;;  %v4233_v30 = vld [vmem:[#allocation3 + $0x138] sm:$0xf]  ;;  %1820 = vst [vmem:[#allocation3 + $0x1ec] sm:$0xf] %v4004_v12 }
 0x16c   : > { %v3350_v38 = vpop.f32.mrf.mxu2  ;;  %v1744_v53 = vsel %vm5510_vm13, %v3987_v58, %v1743_v47  ;;  %1819 = vst [vmem:[#allocation3 + $0x1c8] sm:$0xf] %v4003_v14  ;;  %v2165_v60 = vrot.slane %v2163_v22, 4  ;;  %v3979_v55 = vld [vmem:[%s5433_s7 + $0x64] sm:$0xf] }
 0x16d   : > { %v3351_v20 = vadd.f32 %v3350_v38, %v3302_v42  ;;  %v2005_v42 = vshrl.u32 %v4026_v45, 16  ;;  %v1999_v39 = vrot.slane %v1998_v48, 4  ;;  %v4227_v38 = vld [vmem:[#allocation3 + $0x154] sm:$0xf0]  ;;  %1783 = vst [vmem:[#allocation3 + $0x1c4] sm:$0xf] %v1744_v53 }
 0x16e   : > { %v3399_v16 = vpop.f32.mrf.mxu3  ;;  %v3304_v34 = vpop.f32.mrf.mxu1  ;;  %v2166_v45 = vrot.slane %v4051_v52, 5  ;;  %v1750_v53 = vrot.slane %v3979_v55, 5  ;;  %v4030_v14 = vld [vmem:[%s5433_s7 + $0x74] sm:$0x1] }
 0x16f   : > { %v3400_v9 = vadd.f32 %v3399_v16, %v3351_v20  ;;  %v3305_v41 = vadd.f32 %v3304_v34, %v5987_v61  ;;  %v4027_v61 = vld [vmem:[%s5433_s7 + $0x68] sm:$0x1]  ;;  %v2007_v17 = vrot.slane %v2005_v42, 4  ;;  %v4686_v20 = vld [vmem:[#allocation3 + $0x158] sm:$0xf0] }
 0x170   : > { %v3451_v15 = vpop.f32.mrf.mxu0  ;;  %v2011_v49 = vshll.u32 %v4027_v61, 16  ;;  %v4682_v34 = vld [vmem:[#allocation3 + $0x13c] sm:$0xf]  ;;  %v4234_v61 = vor.u32 %v4686_v20, %v4233_v30  ;;  %v2167_v48 = vsel %vm5510_vm13, %v2165_v60, %v2166_v45  ;;  %v4263_v60 = vld [vmem:[#allocation3 + $0x19c] sm:$0xf0] }
 0x171   : > { %3499 = vmatmul.bf16.gmra.mxu1 %v4194_v54  ;;  %3548 = vmatmul.bf16.gmra.mxu2 %v4198_v19  ;;  %v6114_v27 = vadd.f32 %v3448_v21, %v3400_v9  ;;  %v1745_v21 = vrot.slane %v1743_v47, 4  ;;  %v2004_v54 = vsel %vm5495_vm11, %v1999_v39, %v2003_v2  ;;  %v2008_v19 = vor.u32 %v2007_v17, %v2003_v2  ;;  %v4028_v2 = vld [vmem:[%s5433_s7 + $0x6c] sm:$0xf] }
 0x172   : > { %2067 = vst [vmem:[#allocation3 + $0x1cc] sm:$0xf] %v2004_v54  ;;  %v1752_v54 = vrot.slane %v1750_v53, 4 }
 0x173   : > { %3597 = vmatmul.bf16.gmra.mxu3 %v4202_v40  ;;  %3646 = vmatmul.bf16.gmra.mxu0 %v4206_v29  ;;  %v1747_v16 = vsel %vm5510_vm13, %v1745_v21, %v1746_v37  ;;  %v4235_v40 = vld [vmem:[#allocation3 + $0x15c] sm:$0xf0]  ;;  %v4061_v29 = vrot.slane %v4049_v32, 9  ;;  %v2009_v46 = vrot.slane %v2008_v19, 4  ;;  %2204 = vst [vmem:[#allocation3 + $0x1f4] sm:$0xf] %v2167_v48 }
 0x174   : > { %v3353_v23 = vpop.f32.mrf.mxu2  ;;  %1784 = vst [vmem:[#allocation3 + $0x1e8] sm:$0xf] %v1747_v16  ;;  %v4238_v57 = vor.u32 %v4682_v34, %v4235_v40  ;;  %v2016_v21 = vshrl.u32 %v4028_v2, 16  ;;  %v4053_v40 = vld [vmem:[%s5433_s7 + $0x70] sm:$0xf] }
 0x175   : > { %v3354_v51 = vadd.f32 %v3353_v23, %v3305_v41  ;;  %v4241_v41 = vld [vmem:[#allocation3 + $0x140] sm:$0xf]  ;;  %v2164_v33 = vsel %vm5510_vm13, %v4061_v29, %v2163_v22  ;;  %v4054_v48 = vld [vmem:[%s5433_s7 + $0x74] sm:$0x1] }
 0x176   : > { %v3402_v35 = vpop.f32.mrf.mxu3  ;;  %v3306_v43 = vpop.f32.mrf.mxu1  ;;  %v4242_v50 = vor.u32 %v4687_v31, %v4241_v41  ;;  %2203 = vst [vmem:[#allocation3 + $0x1d0] sm:$0xf] %v2164_v33  ;;  %v2018_v39 = vrot.slane %v2016_v21, 4  ;;  %v4005_v41 = vld [vmem:[%s5433_s7 + $0x6c] sm:$0xf] }
 0x177   : > { %v3403_v59 = vadd.f32 %v3402_v35, %v3354_v51  ;;  %v3307_v56 = vadd.f32 %v3306_v43, %v6001_v25  ;;  %v2013_v25 = vrot.slane %v2011_v49, 5  ;;  %v4029_v51 = vld [vmem:[%s5433_s7 + $0x70] sm:$0xf]  ;;  %v2019_v43 = vshll.u32 %v4028_v2, 16  ;;  %v4052_v31 = vld [vmem:[%s5433_s7 + $0x6c] sm:$0xe] }
 0x178   : > { %v3453_v62 = vpop.f32.mrf.mxu0  ;;  %v2025_v37 = vshll.u32 %v4029_v51, 16  ;;  %v4690_v33 = vld [vmem:[#allocation3 + $0x17c] sm:$0xf]  ;;  %v2170_v2 = vrot.slane %v4053_v40, 5  ;;  %v4277_v21 = vld [vmem:[#allocation3 + $0x188] sm:$0xf] }
 0x179   : > { %v6132_v9 = vadd.f32 %v3451_v15, %v3403_v59  ;;  %v2014_v36 = vsel %vm5495_vm11, %v2009_v46, %v2013_v25  ;;  %v4230_v15 = vor.u32 %v4681_v1, %v4227_v38  ;;  %v2021_v17 = vrot.slane %v2019_v43, 5  ;;  %v3978_v1 = vld [vmem:[%s5433_s7 + $0x60] sm:$0xe]  ;;  %v3980_v38 = vld [vmem:[%s5433_s7 + $0x68] sm:$0x1] }
 0x17a   : > { %2068 = vst [vmem:[#allocation3 + $0x1f0] sm:$0xf] %v2014_v36  ;;  %v2029_v59 = vshrl.u32 %v4029_v51, 16  ;;  %v2027_v30 = vrot.slane %v2025_v37, 5  ;;  %v3988_v16 = vrot.slane %v3978_v1, 9  ;;  %v1753_v25 = vrot.slane %v3980_v38, 5 }
 0x17b   : > { %v2022_v12 = vor.u32 %v2021_v17, %v2018_v39  ;;  %v4006_v46 = vld [vmem:[%s5433_s7 + $0x70] sm:$0xf]  ;;  %v4695_v36 = vld [vmem:[#allocation3 + $0x1a0] sm:$0xf0]  ;;  %v2173_v51 = vrot.slane %v4054_v48, 5  ;;  %v2172_v55 = vrot.slane %v2170_v2, 4 }
 0x17c   : > { %v3355_v0 = vpop.f32.mrf.mxu2  ;;  %v2031_v34 = vrot.slane %v2029_v59, 4  ;;  %v1751_v45 = vsel %vm5510_vm13, %v3988_v16, %v1750_v53  ;;  %1821 = vst [vmem:[#allocation3 + $0x210] sm:$0xf] %v4005_v41  ;;  %v4696_v39 = vld [vmem:[#allocation3 + $0x1a8] sm:$0xf0] }
 0x17d   : > { %v3356_v42 = vadd.f32 %v3355_v0, %v3307_v56  ;;  %v2023_v52 = vrot.slane %v2022_v12, 4  ;;  %v4269_v0 = vld [vmem:[#allocation3 + $0x180] sm:$0xf]  ;;  %1785 = vst [vmem:[#allocation3 + $0x20c] sm:$0xf] %v1751_v45  ;;  %v4278_v38 = vor.u32 %v4696_v39, %v4277_v21 }
 0x17e   : > { %v3404_v47 = vpop.f32.mrf.mxu3  ;;  %v3309_v23 = vpop.f32.mrf.mxu1  ;;  %1822 = vst [vmem:[#allocation3 + $0x234] sm:$0xf] %v4006_v46  ;;  %v4270_v12 = vor.u32 %v4695_v36, %v4269_v0  ;;  %v4704_v45 = vld [vmem:[#allocation3 + $0x1e8] sm:$0xf0] }
 0x17f   : > { %v3405_v35 = vadd.f32 %v3404_v47, %v3356_v42  ;;  %v3310_v56 = vadd.f32 %v3309_v23, %v5956_v18  ;;  %v2035_v18 = vshll.u32 %v4030_v14, 16  ;;  %v1754_v42 = vsel %vm5510_vm13, %v1752_v54, %v1753_v25  ;;  %v4691_v23 = vld [vmem:[#allocation3 + $0x184] sm:$0xf]  ;;  %v4700_v41 = vld [vmem:[#allocation3 + $0x1cc] sm:$0xf] }
 0x180   : > { %v3456_v58 = vpop.f32.mrf.mxu0  ;;  %v2028_v47 = vsel %vm5495_vm11, %v2023_v52, %v2027_v30  ;;  %1786 = vst [vmem:[#allocation3 + $0x230] sm:$0xf] %v1754_v42 }
 0x181   : > { %3504 = vmatmul.bf16.gmra.mxu1 %v4230_v15  ;;  %3553 = vmatmul.bf16.gmra.mxu2 %v4234_v61  ;;  %v6142_v49 = vadd.f32 %v3453_v62, %v3405_v35  ;;  %v2032_v15 = vor.u32 %v2031_v34, %v2027_v30  ;;  %v2037_v61 = vrot.slane %v2035_v18, 5  ;;  %2069 = vst [vmem:[#allocation3 + $0x214] sm:$0xf] %v2028_v47  ;;  %v4699_v34 = vld [vmem:[#allocation3 + $0x1c4] sm:$0xf] }
 0x182   : > { %v4299_v18 = vld [vmem:[#allocation3 + $0x1e4] sm:$0xf0]  ;;  %v4307_v46 = vld [vmem:[#allocation3 + $0x1ec] sm:$0xf0] }
 0x183   : > { %3602 = vmatmul.bf16.gmra.mxu3 %v4238_v57  ;;  %3651 = vmatmul.bf16.gmra.mxu0 %v4242_v50  ;;  %v4271_v57 = vld [vmem:[#allocation3 + $0x1a4] sm:$0xf0]  ;;  %v4062_v50 = vrot.slane %v4052_v31, 9  ;;  %v2033_v43 = vrot.slane %v2032_v15, 4  ;;  %v4313_v31 = vld [vmem:[#allocation3 + $0x1d0] sm:$0xf]  ;;  %v4302_v36 = vor.u32 %v4699_v34, %v4299_v18  ;;  %v4310_v15 = vor.u32 %v4700_v41, %v4307_v46 }
 0x184   : > { %v3358_v32 = vpop.f32.mrf.mxu2  ;;  %v4274_v1 = vor.u32 %v4691_v23, %v4271_v57  ;;  %v4708_v39 = vld [vmem:[#allocation3 + $0x20c] sm:$0xf] }
 0x185   : > { %v3359_v20 = vadd.f32 %v3358_v32, %v3310_v56  ;;  %v2171_v17 = vsel %vm5510_vm13, %v4062_v50, %v2170_v2  ;;  %v2038_v56 = vsel %vm5495_vm11, %v2033_v43, %v2037_v61  ;;  %v2174_v32 = vsel %vm5510_vm13, %v2172_v55, %v2173_v51 }
 0x186   : > { %v3407_v62 = vpop.f32.mrf.mxu3  ;;  %v3311_v19 = vpop.f32.mrf.mxu1  ;;  %2070 = vst [vmem:[#allocation3 + $0x238] sm:$0xf] %v2038_v56  ;;  %v4713_v56 = vld [vmem:[#allocation3 + $0x230] sm:$0xf0] }
 0x187   : > { %v3408_v29 = vadd.f32 %v3407_v62, %v3359_v20  ;;  %v3312_v37 = vadd.f32 %v3311_v19, %v5979_v44  ;;  %2205 = vst [vmem:[#allocation3 + $0x218] sm:$0xf] %v2171_v17  ;;  %v4335_v17 = vld [vmem:[#allocation3 + $0x22c] sm:$0xf0] }
 0x188   : > { %v3458_v22 = vpop.f32.mrf.mxu0  ;;  %2206 = vst [vmem:[#allocation3 + $0x23c] sm:$0xf] %v2174_v32 }
 0x189   : > { %v6160_v35 = vadd.f32 %v3456_v58, %v3408_v29  ;;  %v4266_v58 = vor.u32 %v4690_v33, %v4263_v60  ;;  %v4305_v29 = vld [vmem:[#allocation3 + $0x1c8] sm:$0xf]  ;;  %v4705_v33 = vld [vmem:[#allocation3 + $0x1f0] sm:$0xf0] }
 0x18a   : > { %v4306_v42 = vor.u32 %v4704_v45, %v4305_v29  ;;  %v4314_v61 = vor.u32 %v4705_v33, %v4313_v31 }
 0x18c   : > { %v3360_v59 = vpop.f32.mrf.mxu2 }
 0x18d   : > { %v3361_v53 = vadd.f32 %v3360_v59, %v3312_v37  ;;  %v4341_v59 = vld [vmem:[#allocation3 + $0x210] sm:$0xf] }
 0x18e   : > { %v3409_v14 = vpop.f32.mrf.mxu3  ;;  %v3314_v44 = vpop.f32.mrf.mxu1 }
 0x18f   : > { %v3410_v30 = vadd.f32 %v3409_v14, %v3361_v53  ;;  %v3315_v62 = vadd.f32 %v3314_v44, %v5995_v4  ;;  %v4709_v53 = vld [vmem:[#allocation3 + $0x214] sm:$0xf]  ;;  %v4714_v32 = vld [vmem:[#allocation3 + $0x238] sm:$0xf0] }
 0x190   : > { %v3461_v20 = vpop.f32.mrf.mxu0 }
 0x191   : > { %3509 = vmatmul.bf16.gmra.mxu1 %v4266_v58  ;;  %3558 = vmatmul.bf16.gmra.mxu2 %v4270_v12  ;;  %v6169_v8 = vadd.f32 %v3458_v22, %v3410_v30  ;;  %v4343_v58 = vld [vmem:[#allocation3 + $0x234] sm:$0xf0]  ;;  %v4342_v30 = vor.u32 %v4713_v56, %v4341_v59 }
 0x192   : > { %v4349_v12 = vld [vmem:[#allocation3 + $0x218] sm:$0xf] }
 0x193   : > { %3607 = vmatmul.bf16.gmra.mxu3 %v4274_v1  ;;  %3656 = vmatmul.bf16.gmra.mxu0 %v4278_v38  ;;  %v4338_v38 = vor.u32 %v4708_v39, %v4335_v17 }
 0x194   : > { %v3363_v16 = vpop.f32.mrf.mxu2 }
 0x195   : > { %v3364_v54 = vadd.f32 %v3363_v16, %v3315_v62  ;;  %v4346_v62 = vor.u32 %v4709_v53, %v4343_v58  ;;  %v4350_v16 = vor.u32 %v4714_v32, %v4349_v12 }
 0x196   : > { %v3412_v19 = vpop.f32.mrf.mxu3  ;;  %v3316_v26 = vpop.f32.mrf.mxu1 }
 0x197   : > { %v3413_v25 = vadd.f32 %v3412_v19, %v3364_v54  ;;  %v3317_v22 = vadd.f32 %v3316_v26, %v6018_v3 }
 0x198   : > { %v3463_v52 = vpop.f32.mrf.mxu0 }
 0x199   : > { %v6172_v40 = vadd.f32 %v3461_v20, %v3413_v25 }
 0x19c   : > { %v3365_v60 = vpop.f32.mrf.mxu2 }
 0x19d   : > { %v3366_v4 = vadd.f32 %v3365_v60, %v3317_v22 }
 0x19e   : > { %v3414_v0 = vpop.f32.mrf.mxu3  ;;  %v3319_v47 = vpop.f32.mrf.mxu1 }
 0x19f   : > { %v3415_v48 = vadd.f32 %v3414_v0, %v3366_v4  ;;  %v3320_v3 = vadd.f32 %v3319_v47, %v5960_v7 }
 0x1a0   : > { %v3466_v23 = vpop.f32.mrf.mxu0 }
 0x1a1   : > { %3514 = vmatmul.bf16.gmra.mxu1 %v4302_v36  ;;  %3563 = vmatmul.bf16.gmra.mxu2 %v4306_v42  ;;  %v6175_v57 = vadd.f32 %v3463_v52, %v3415_v48 }
 0x1a3   : > { %3612 = vmatmul.bf16.gmra.mxu3 %v4310_v15  ;;  %3661 = vmatmul.bf16.gmra.mxu0 %v4314_v61 }
 0x1a4   : > { %v3368_v50 = vpop.f32.mrf.mxu2 }
 0x1a5   : > { %v3369_v2 = vadd.f32 %v3368_v50, %v3320_v3 }
 0x1a6   : > { %v3417_v51 = vpop.f32.mrf.mxu3  ;;  %v3321_v21 = vpop.f32.mrf.mxu1 }
 0x1a7   : > { %v3418_v43 = vadd.f32 %v3417_v51, %v3369_v2  ;;  %v3322_v14 = vadd.f32 %v3321_v21, %v5983_v63 }
 0x1a8   : > { %v3468_v37 = vpop.f32.mrf.mxu0 }
 0x1a9   : > { %v6178_v55 = vadd.f32 %v3466_v23, %v3418_v43 }
 0x1ac   : > { %v3370_v44 = vpop.f32.mrf.mxu2 }
 0x1ad   : > { %v3371_v7 = vadd.f32 %v3370_v44, %v3322_v14 }
 0x1ae   : > { %v3419_v1 = vpop.f32.mrf.mxu3  ;;  %v3324_v20 = vpop.f32.mrf.mxu1 }
 0x1af   : > { %v3420_v54 = vadd.f32 %v3419_v1, %v3371_v7  ;;  %v3325_v63 = vadd.f32 %v3324_v20, %v5999_v28 }
 0x1b0   : > { %v3471_v19 = vpop.f32.mrf.mxu0 }
 0x1b1   : > { %3519 = vmatmul.bf16.gmra.mxu1 %v4338_v38  ;;  %3568 = vmatmul.bf16.gmra.mxu2 %v4342_v30  ;;  %v6181_v26 = vadd.f32 %v3468_v37, %v3420_v54 }
 0x1b3   : > { %3617 = vmatmul.bf16.gmra.mxu3 %v4346_v62  ;;  %3666 = vmatmul.bf16.gmra.mxu0 %v4350_v16 }
 0x1b4   : > { %v3373_v25 = vpop.f32.mrf.mxu2 }
 0x1b5   : > { %v3374_v52 = vadd.f32 %v3373_v25, %v3325_v63 }
 0x1b6   : > { %v3422_v34 = vpop.f32.mrf.mxu3  ;;  %v3326_v18 = vpop.f32.mrf.mxu1 }
 0x1b7   : > { %v3423_v29 = vadd.f32 %v3422_v34, %v3374_v52  ;;  %v3327_v22 = vadd.f32 %v3326_v18, %v6022_v11 }
 0x1b8   : > { %v3473_v45 = vpop.f32.mrf.mxu0 }
 0x1b9   : > { %v6184_v41 = vadd.f32 %v3471_v19, %v3423_v29 }
 0x1bc   : > { %v3375_v46 = vpop.f32.mrf.mxu2 }
 0x1bd   : > { %v3376_v31 = vadd.f32 %v3375_v46, %v3327_v22 }
 0x1be   : > { %v3424_v33 = vpop.f32.mrf.mxu3  ;;  %v3485_v60 = vpop.f32.mrf.mxu1 }
 0x1bf   : > { %v3425_v4 = vadd.f32 %v3424_v33, %v3376_v31  ;;  %v3486_v28 = vadd.f32 %v3485_v60, %v6045_v6 }
 0x1c0   : > { %v3632_v0 = vpop.f32.mrf.mxu0 }
 0x1c1   : > { %v6187_v36 = vadd.f32 %v3473_v45, %v3425_v4 }
 0x1c4   : > { %v3534_v42 = vpop.f32.mrf.mxu2 }
 0x1c5   : > { %v3535_v47 = vadd.f32 %v3534_v42, %v3486_v28 }
 0x1c6   : > { %v3583_v15 = vpop.f32.mrf.mxu3  ;;  %v3487_v61 = vpop.f32.mrf.mxu1 }
 0x1c7   : > { %v3584_v48 = vadd.f32 %v3583_v15, %v3535_v47  ;;  %v3488_v11 = vadd.f32 %v3487_v61, %v6056_v10 }
 0x1c8   : > { %v3634_v23 = vpop.f32.mrf.mxu0 }
 0x1c9   : > { %v3633_v3 = vadd.f32 %v3632_v0, %v3584_v48 }
 0x1cb   : > { %3672 = vst [vmem:[%s4967_s11] sm:$0xff] %v3633_v3  ;;  %v3703_v6 = vmul.f32 %v3633_v3, %v3633_v3 }
 0x1cc   : > { %v3536_v50 = vpop.f32.mrf.mxu2 }
 0x1cd   : > { %v3537_v2 = vadd.f32 %v3536_v50, %v3488_v11 }
 0x1ce   : > { %v3585_v51 = vpop.f32.mrf.mxu3  ;;  %v3490_v21 = vpop.f32.mrf.mxu1 }
 0x1cf   : > { %v3586_v43 = vadd.f32 %v3585_v51, %v3537_v2  ;;  %v3491_v56 = vadd.f32 %v3490_v21, %v6074_v24 }
 0x1d0   : > { %v3637_v37 = vpop.f32.mrf.mxu0 }
 0x1d1   : > { %v3635_v39 = vadd.f32 %v3634_v23, %v3586_v43 }
 0x1d3   : > { %3673 = vst [vmem:[%s4967_s11 + $0x8] sm:$0xff] %v3635_v39  ;;  %v3688_v17 = vadd.f32 %v3635_v39, %v3633_v3  ;;  %v3704_v59 = vmul.f32 %v3635_v39, %v3635_v39 }
 0x1d4   : > { %v3539_v53 = vpop.f32.mrf.mxu2 }
 0x1d5   : > { %v3719_v14 = vadd.f32 %v3704_v59, %v3703_v6  ;;  %v3540_v58 = vadd.f32 %v3539_v53, %v3491_v56 }
 0x1d6   : > { %v3588_v12 = vpop.f32.mrf.mxu3  ;;  %v3492_v32 = vpop.f32.mrf.mxu1 }
 0x1d7   : > { %v3589_v10 = vadd.f32 %v3588_v12, %v3540_v58  ;;  %v3493_v30 = vadd.f32 %v3492_v32, %v6085_v13 }
 0x1d8   : > { %v3639_v44 = vpop.f32.mrf.mxu0 }
 0x1d9   : > { %v3638_v7 = vadd.f32 %v3637_v37, %v3589_v10 }
 0x1db   : > { %3674 = vst [vmem:[%s4967_s11 + $0x10] sm:$0xff] %v3638_v7  ;;  %v3689_v1 = vadd.f32 %v3688_v17, %v3638_v7  ;;  %v3705_v38 = vmul.f32 %v3638_v7, %v3638_v7 }
 0x1dc   : > { %v3541_v20 = vpop.f32.mrf.mxu2 }
 0x1dd   : > { %v3720_v62 = vadd.f32 %v3719_v14, %v3705_v38  ;;  %v3542_v16 = vadd.f32 %v3541_v20, %v3493_v30 }
 0x1de   : > { %v3590_v54 = vpop.f32.mrf.mxu3  ;;  %v3495_v19 = vpop.f32.mrf.mxu1 }
 0x1df   : > { %v3591_v24 = vadd.f32 %v3590_v54, %v3542_v16  ;;  %v3496_v18 = vadd.f32 %v3495_v19, %v6103_v5 }
 0x1e0   : > { %v3642_v63 = vpop.f32.mrf.mxu0 }
 0x1e1   : > { %v3640_v25 = vadd.f32 %v3639_v44, %v3591_v24 }
 0x1e3   : > { %3675 = vst [vmem:[%s4967_s11 + $0x18] sm:$0xff] %v3640_v25  ;;  %v3690_v52 = vadd.f32 %v3689_v1, %v3640_v25  ;;  %v3706_v34 = vmul.f32 %v3640_v25, %v3640_v25 }
 0x1e4   : > { %v3544_v29 = vpop.f32.mrf.mxu2 }
 0x1e5   : > { %v3721_v45 = vadd.f32 %v3720_v62, %v3706_v34  ;;  %v3545_v22 = vadd.f32 %v3544_v29, %v3496_v18 }
 0x1e6   : > { %v3593_v46 = vpop.f32.mrf.mxu3  ;;  %v3497_v31 = vpop.f32.mrf.mxu1 }
 0x1e7   : > { %v3594_v13 = vadd.f32 %v3593_v46, %v3545_v22  ;;  %v3498_v28 = vadd.f32 %v3497_v31, %v6114_v27 }
 0x1e8   : > { %v3644_v33 = vpop.f32.mrf.mxu0 }
 0x1e9   : > { %v3643_v60 = vadd.f32 %v3642_v63, %v3594_v13 }
 0x1eb   : > { %3676 = vst [vmem:[%s4967_s11 + $0x20] sm:$0xff] %v3643_v60  ;;  %v3691_v4 = vadd.f32 %v3690_v52, %v3643_v60  ;;  %v3707_v0 = vmul.f32 %v3643_v60, %v3643_v60 }
 0x1ec   : > { %v3546_v42 = vpop.f32.mrf.mxu2 }
 0x1ed   : > { %v3722_v47 = vadd.f32 %v3721_v45, %v3707_v0  ;;  %v3547_v15 = vadd.f32 %v3546_v42, %v3498_v28 }
 0x1ee   : > { %v3595_v61 = vpop.f32.mrf.mxu3  ;;  %v3500_v48 = vpop.f32.mrf.mxu1 }
 0x1ef   : > { %v3596_v5 = vadd.f32 %v3595_v61, %v3547_v15  ;;  %v3501_v2 = vadd.f32 %v3500_v48, %v6132_v9 }
 0x1f0   : > { %v3647_v23 = vpop.f32.mrf.mxu0 }
 0x1f1   : > { %v3645_v3 = vadd.f32 %v3644_v33, %v3596_v5 }
 0x1f3   : > { %3677 = vst [vmem:[%s4967_s11 + $0x28] sm:$0xff] %v3645_v3  ;;  %v3692_v11 = vadd.f32 %v3691_v4, %v3645_v3  ;;  %v3708_v50 = vmul.f32 %v3645_v3, %v3645_v3 }
 0x1f4   : > { %v3549_v51 = vpop.f32.mrf.mxu2 }
 0x1f5   : > { %v3723_v21 = vadd.f32 %v3722_v47, %v3708_v50  ;;  %v3550_v43 = vadd.f32 %v3549_v51, %v3501_v2 }
 0x1f6   : > { %v3598_v37 = vpop.f32.mrf.mxu3  ;;  %v3502_v39 = vpop.f32.mrf.mxu1 }
 0x1f7   : > { %v3599_v27 = vadd.f32 %v3598_v37, %v3550_v43  ;;  %v3503_v53 = vadd.f32 %v3502_v39, %v6142_v49 }
 0x1f8   : > { %v3649_v6 = vpop.f32.mrf.mxu0 }
 0x1f9   : > { %v3648_v17 = vadd.f32 %v3647_v23, %v3599_v27 }
 0x1fb   : > { %3678 = vst [vmem:[%s4967_s11 + $0x30] sm:$0xff] %v3648_v17  ;;  %v3693_v59 = vadd.f32 %v3692_v11, %v3648_v17  ;;  %v3709_v56 = vmul.f32 %v3648_v17, %v3648_v17 }
 0x1fc   : > { %v3551_v14 = vpop.f32.mrf.mxu2 }
 0x1fd   : > { %v3724_v58 = vadd.f32 %v3723_v21, %v3709_v56  ;;  %v3552_v12 = vadd.f32 %v3551_v14, %v3503_v53 }
 0x1fe   : > { %v3600_v32 = vpop.f32.mrf.mxu3  ;;  %v3505_v10 = vpop.f32.mrf.mxu1 }
 0x1ff   : > { %v3601_v9 = vadd.f32 %v3600_v32, %v3552_v12  ;;  %v3506_v30 = vadd.f32 %v3505_v10, %v6160_v35 }
 0x200   : > { %v3652_v44 = vpop.f32.mrf.mxu0 }
 0x201   : > { %v3650_v7 = vadd.f32 %v3649_v6, %v3601_v9 }
 0x203   : > { %3679 = vst [vmem:[%s4967_s11 + $0x38] sm:$0xff] %v3650_v7  ;;  %v3694_v1 = vadd.f32 %v3693_v59, %v3650_v7  ;;  %v3710_v38 = vmul.f32 %v3650_v7, %v3650_v7 }
 0x204   : > { %v3554_v20 = vpop.f32.mrf.mxu2 }
 0x205   : > { %v3725_v62 = vadd.f32 %v3724_v58, %v3710_v38  ;;  %v3555_v16 = vadd.f32 %v3554_v20, %v3506_v30 }
 0x206   : > { %v3603_v54 = vpop.f32.mrf.mxu3  ;;  %v3507_v19 = vpop.f32.mrf.mxu1 }
 0x207   : > { %v3604_v49 = vadd.f32 %v3603_v54, %v3555_v16  ;;  %v3508_v34 = vadd.f32 %v3507_v19, %v6169_v8 }
 0x208   : > { %v3654_v24 = vpop.f32.mrf.mxu0 }
 0x209   : > { %v3653_v63 = vadd.f32 %v3652_v44, %v3604_v49 }
 0x20b   : > { %3680 = vst [vmem:[%s4967_s11 + $0x40] sm:$0xff] %v3653_v63  ;;  %v3695_v25 = vadd.f32 %v3694_v1, %v3653_v63  ;;  %v3711_v52 = vmul.f32 %v3653_v63, %v3653_v63 }
 0x20c   : > { %v3556_v18 = vpop.f32.mrf.mxu2 }
 0x20d   : > { %v3726_v29 = vadd.f32 %v3725_v62, %v3711_v52  ;;  %v3557_v45 = vadd.f32 %v3556_v18, %v3508_v34 }
 0x20e   : > { %v3605_v22 = vpop.f32.mrf.mxu3  ;;  %v3510_v46 = vpop.f32.mrf.mxu1 }
 0x20f   : > { %v3606_v35 = vadd.f32 %v3605_v22, %v3557_v45  ;;  %v3511_v4 = vadd.f32 %v3510_v46, %v6172_v40 }
 0x210   : > { %v3657_v31 = vpop.f32.mrf.mxu0 }
 0x211   : > { %v3655_v13 = vadd.f32 %v3654_v24, %v3606_v35 }
 0x213   : > { %3681 = vst [vmem:[%s4967_s11 + $0x48] sm:$0xff] %v3655_v13  ;;  %v3696_v33 = vadd.f32 %v3695_v25, %v3655_v13  ;;  %v3712_v60 = vmul.f32 %v3655_v13, %v3655_v13 }
 0x214   : > { %v3559_v0 = vpop.f32.mrf.mxu2 }
 0x215   : > { %v3727_v28 = vadd.f32 %v3726_v29, %v3712_v60  ;;  %v3560_v42 = vadd.f32 %v3559_v0, %v3511_v4 }
 0x216   : > { %v3608_v47 = vpop.f32.mrf.mxu3  ;;  %v3512_v15 = vpop.f32.mrf.mxu1 }
 0x217   : > { %v3609_v8 = vadd.f32 %v3608_v47, %v3560_v42  ;;  %v3513_v3 = vadd.f32 %v3512_v15, %v6175_v57 }
 0x218   : > { %v3659_v61 = vpop.f32.mrf.mxu0 }
 0x219   : > { %v3658_v48 = vadd.f32 %v3657_v31, %v3609_v8 }
 0x21b   : > { %3682 = vst [vmem:[%s4967_s11 + $0x50] sm:$0xff] %v3658_v48  ;;  %v3697_v5 = vadd.f32 %v3696_v33, %v3658_v48  ;;  %v3713_v23 = vmul.f32 %v3658_v48, %v3658_v48 }
 0x21c   : > { %v3561_v11 = vpop.f32.mrf.mxu2 }
 0x21d   : > { %v3728_v50 = vadd.f32 %v3727_v28, %v3713_v23  ;;  %v3562_v2 = vadd.f32 %v3561_v11, %v3513_v3 }
 0x21e   : > { %v3610_v51 = vpop.f32.mrf.mxu3  ;;  %v3515_v40 = vpop.f32.mrf.mxu1 }
 0x21f   : > { %v3611_v21 = vadd.f32 %v3610_v51, %v3562_v2  ;;  %v3516_v6 = vadd.f32 %v3515_v40, %v6178_v55 }
 0x220   : > { %v3662_v37 = vpop.f32.mrf.mxu0 }
 0x221   : > { %v3660_v43 = vadd.f32 %v3659_v61, %v3611_v21 }
 0x223   : > { %3683 = vst [vmem:[%s4967_s11 + $0x58] sm:$0xff] %v3660_v43  ;;  %v3698_v39 = vadd.f32 %v3697_v5, %v3660_v43  ;;  %v3714_v27 = vmul.f32 %v3660_v43, %v3660_v43 }
 0x224   : > { %v3564_v17 = vpop.f32.mrf.mxu2 }
 0x225   : > { %v3729_v59 = vadd.f32 %v3728_v50, %v3714_v27  ;;  %v3565_v56 = vadd.f32 %v3564_v17, %v3516_v6 }
 0x226   : > { %v3613_v53 = vpop.f32.mrf.mxu3  ;;  %v3517_v57 = vpop.f32.mrf.mxu1 }
 0x227   : > { %v3614_v14 = vadd.f32 %v3613_v53, %v3565_v56  ;;  %v3518_v10 = vadd.f32 %v3517_v57, %v6181_v26 }
 0x228   : > { %v3664_v9 = vpop.f32.mrf.mxu0 }
 0x229   : > { %v3663_v58 = vadd.f32 %v3662_v37, %v3614_v14 }
 0x22b   : > { %3684 = vst [vmem:[%s4967_s11 + $0x60] sm:$0xff] %v3663_v58  ;;  %v3699_v12 = vadd.f32 %v3698_v39, %v3663_v58  ;;  %v3715_v32 = vmul.f32 %v3663_v58, %v3663_v58 }
 0x22c   : > { %v3566_v44 = vpop.f32.mrf.mxu2 }
 0x22d   : > { %v3730_v7 = vadd.f32 %v3729_v59, %v3715_v32  ;;  %v3567_v1 = vadd.f32 %v3566_v44, %v3518_v10 }
 0x22e   : > { %v3615_v38 = vpop.f32.mrf.mxu3  ;;  %v3520_v55 = vpop.f32.mrf.mxu1 }
 0x22f   : > { %v3616_v30 = vadd.f32 %v3615_v38, %v3567_v1  ;;  %v3521_v54 = vadd.f32 %v3520_v55, %v6184_v41 }
 0x230   : > { %v3667_v26 = vpop.f32.mrf.mxu0 }
 0x231   : > { %v3665_v20 = vadd.f32 %v3664_v9, %v3616_v30 }
 0x233   : > { %3685 = vst [vmem:[%s4967_s11 + $0x68] sm:$0xff] %v3665_v20  ;;  %v3700_v62 = vadd.f32 %v3699_v12, %v3665_v20  ;;  %v3716_v16 = vmul.f32 %v3665_v20, %v3665_v20 }
 0x234   : > { %v3569_v19 = vpop.f32.mrf.mxu2 }
 0x235   : > { %v3731_v49 = vadd.f32 %v3730_v7, %v3716_v16  ;;  %v3570_v24 = vadd.f32 %v3569_v19, %v3521_v54 }
 0x236   : > { %v3618_v63 = vpop.f32.mrf.mxu3  ;;  %v3522_v52 = vpop.f32.mrf.mxu1 }
 0x237   : > { %v3619_v25 = vadd.f32 %v3618_v63, %v3570_v24  ;;  %v3523_v45 = vadd.f32 %v3522_v52, %v6187_v36 }
 0x238   : > { %v3669_v13 = vpop.f32.mrf.mxu0 }
 0x239   : > { %v3668_v34 = vadd.f32 %v3667_v26, %v3619_v25 }
 0x23b   : > { %3686 = vst [vmem:[%s4967_s11 + $0x70] sm:$0xff] %v3668_v34  ;;  %v3701_v18 = vadd.f32 %v3700_v62, %v3668_v34  ;;  %v3717_v29 = vmul.f32 %v3668_v34, %v3668_v34 }
 0x23c   : > { %v3571_v22 = vpop.f32.mrf.mxu2 }
 0x23d   : > { %v3732_v46 = vadd.f32 %v3731_v49, %v3717_v29  ;;  %v3572_v35 = vadd.f32 %v3571_v22, %v3523_v45 }
 0x23e   : > { %v3620_v41 = vpop.f32.mrf.mxu3 }
 0x23f   : > { %v3621_v31 = vadd.f32 %v3620_v41, %v3572_v35 }
 0x241   : > { %v3670_v33 = vadd.f32 %v3669_v13, %v3621_v31 }
 0x243   : > { %3687 = vst [vmem:[%s4967_s11 + $0x78] sm:$0xff] %v3670_v33  ;;  %v3702_v60 = vadd.f32 %v3701_v18, %v3670_v33  ;;  %v3718_v4 = vmul.f32 %v3670_v33, %v3670_v33 }
 0x245   : > { %v3733_v0 = vadd.f32 %v3732_v46, %v3718_v4  ;;  %3734 = vst [vmem:[%s4973_s23] sm:$0xff] %v3702_v60 }
 0x247   : > { %3735 = vst [vmem:[%s4973_s23 + $0x8] sm:$0xff] %v3733_v0 }
 0x248 PF: > { %s16_s22 = sadd.s32 1, %s4892_s22   ;;  %s6256_s7 = sld [smem:[#allocation4_spill]] }
 0x249   : > { %p13_p9 = scmp.ge.s32.totalorder %s16_s22, 6   ;;  %s6257_s15 = sld [smem:[#allocation5_spill]] }
 0x24a   : > { %s6258_s18 = smov %s4884_s20  ;;  %s6259_s19 = smov %s4888_s21 }
 0x24b   :  { %15 = sbr.rel (!%p13_p9) target bundleno = 3 (0x3), region = 86 }
 0x24e   : > { %s6260_s20 = smov %s6256_s7 }
 0x24f   : > { %s6261_s21 = smov %s6257_s15 }

// kernel: basic_block_forward.3
= control target key start
LH: loop header
LB: loop body
LE: loop exit
PB: predicated region body
PF: predicated region fallthrough
CT: control target
= control target key end

     0   :  { %s5464_s21 = smov 0   ;;  %s5466_s22 = smov 0   ;;  %s6735_s0 = inlined_call_operand.vmem [shape: bf16[2,16,16,4], index: 0, kind: input, shape index: {}]   ;;  %s6736_s1 = inlined_call_operand.vmem [shape: bf16[1152,128], index: 1, kind: input, shape index: {}]   ;;  %s6737_s2 = inlined_call_operand.vmem [shape: bf16[128,128], index: 2, kind: input, shape index: {}]   ;;  %s6738_s3 = inlined_call_operand.vmem [shape: f32[2,16,16,128], index: 3, kind: output, shape index: {0}]   ;;  %s6739_s4 = inlined_call_operand.vmem [shape: f32[2,2,16,128], index: 4, kind: output, shape index: {1}]   ;;  %s6740_s5 = inlined_call_operand.vmem [shape: f32[2,16,16,128], index: 5, kind: output, shape index: {2}]   ;;  %s6741_s6 = inlined_call_operand.vmem [shape: f32[2,2,16,128], index: 6, kind: output, shape index: {3}]  }
   0x1   :  { %s5468_s23 = smov 0   ;;  %s5470_s24 = smov 0  }
   0x2   :  { %s5472_s25 = smov 0  }
   0x3 LB: > { %s26_s26 = sadd.s32 1, %s5418_s23  ;;  %s29_s27 = sadd.s32 1, %s5422_s24  ;;  %s5426_s25 = sphi %s5472_s25, %s17_s25   ;;  %s5422_s24 = sphi %s5470_s24, %s6759_s24   ;;  %s5418_s23 = sphi %s5468_s23, %s6758_s23   ;;  %s5414_s22 = sphi %s5466_s22, %s6757_s22   ;;  %s5410_s21 = sphi %s5464_s21, %s6756_s21  }
   0x4   : > { %p27_p0 = scmp.ge.s32.totalorder %s26_s26, 2  ;;  %p4366_p1 = scmp.ge.s32.totalorder %s5426_s25, 1 }
   0x5   : > { %p239_p2 = scmp.lt.s32.totalorder %s5426_s25, 5 }
   0x6   : > { %s6761_s26 = smov (%p27_p0, %s26_s26), 0  ;;  %s6763_s27 = smov (!%p27_p0, %s29_s27), %s5422_s24 }
   0x7   : > { %6742 = sst [smem:[#allocation4_spill]] %s6761_s26  ;;  %p240_p3 = pnand %p4366_p1, %p239_p2 }
   0x8   : > { %p31_p4 = scmp.ge.s32.totalorder %s6763_s27, 2  ;;  %p302_p5 = scmp.lt.s32.totalorder (!%p240_p3), %s5414_s22, 1 }
   0x9   : > { %243 = sbr.rel (%p240_p3) target bundleno = 617 (0x269), region = 32  ;;  %s4369_s28 = sshll.u32 (!%p240_p3), %s5410_s21, 3 }
   0xa   : > { %s6765_s27 = smov (%p31_p4, %s6763_s27), 0  ;;  %p310_p6 = scmp.lt.s32.totalorder (!%p240_p3), %s4369_s28, 15 }
   0xb   : > { %6743 = sst [smem:[#allocation5_spill]] %s6765_s27  ;;  %p320_p7 = scmp.lt.s32.totalorder (!%p240_p3), %s5410_s21, 1 }
   0xc   : > { %p4383_p8 = scmp.ne.s32.totalorder (!%p240_p3), %s5410_s21, 0 }
   0xe   : > { %s6767_s22 = smov (!%p302_p5, %s5414_s22), 1  ;;  %s6769_s28 = smov (!%p310_p6, %s4369_s28), 15 }
   0xf   : > { %s5177_s29 = sshll.u32 %s6767_s22, 7  ;;  %s4371_s30 = sshll.u32 %s6767_s22, 5 }
  0x10   : > { %s5501_s9 = scalar_lea.vmem %s6735_s0, %s5177_s29  ;;  %s4370_s10 = sshll.u32 %s6769_s28, 1 }
  0x11   : > { %s314_s11 = sadd.s32 %s4371_s30, %s4370_s10  ;;  %s4374_s13 = sshll.u32 %s6767_s22, 2 }
  0x12   : > { %s4372_s12 = sshll.u32 %s314_s11, 3 }
  0x13   : > { %s5506_s16 = scalar_lea.vmem %s6738_s3, %s4372_s12  ;;  %s5511_s19 = scalar_lea.vmem %s6740_s5, %s4372_s12 }
  0x14   : > { %s321_s20 = scalar_select %p320_p7, %s5410_s21, 1 }
  0x15   : > { %351 = sbr.rel (%p4383_p8) target bundleno = 129 (0x81), region = 36 }
  0x16   : > { %s4373_s27 = sshll.u32 %s321_s20, 1 }
  0x17   : > { %s324_s26 = sadd.s32 %s4374_s13, %s4373_s27 }
  0x18   : > { %s4375_s7 = sshll.u32 %s324_s26, 3 }
  0x19   : > { %s5517_s28 = scalar_lea.vmem %s6739_s4, %s4375_s7  ;;  %s5522_s10 = scalar_lea.vmem %s6741_s6, %s4375_s7 }
  0x1a   : > { %v5428_v0 = vmov 0   ;;  %v406_v1 = vld [vmem:[%s5501_s9] sm:$0xf]  ;;  %v407_v3 = vld [vmem:[%s5501_s9 + $0x4] sm:$0xf]  ;;  %vm762_vm1 = vcmask 27648  }
  0x1b   : > { %355 = vst [vmem:[#allocation2 + $0xc] sm:$0xf] %v5428_v0  ;;  %v442_v2 = vshrl.u32 %v406_v1, 16  ;;  %v450_v4 = vshrl.u32 %v407_v3, 16  ;;  %v408_v5 = vld [vmem:[%s5501_s9 + $0x8] sm:$0xf] }
  0x1c   : > { %352 = vst [vmem:[#allocation2] sm:$0xf] %v5428_v0  ;;  %v445_v7 = vshll.u32 %v406_v1, 16  ;;  %v409_v8 = vld [vmem:[%s5501_s9 + $0xc] sm:$0xf]  ;;  %v459_v10 = vshrl.u32 %v408_v5, 16 }
  0x1d   : > { %353 = vst [vmem:[#allocation2 + $0x4] sm:$0xf] %v5428_v0  ;;  %v5567_v6 = vrot.slane %v442_v2, 7  ;;  %vm763_vm0 = vsmask.f32 7938  ;;  %v5574_v11 = vrot.slane %v450_v4, 7 }
  0x1e   : > { %354 = vst [vmem:[#allocation2 + $0x8] sm:$0x1] %v5428_v0  ;;  %v410_v9 = vld [vmem:[%s5501_s9 + $0x10] sm:$0xf]  ;;  %vm438_vm2 = vsmask.f32 256  ;;  %vm5593_vm4 = vmand %vm762_vm1, %vm763_vm0 }
  0x1f   : > { %356 = vst [vmem:[#allocation2 + $0x10] sm:$0xf] %v5428_v0  ;;  %v467_v12 = vshrl.u32 %v409_v8, 16  ;;  %v411_v13 = vld [vmem:[%s5501_s9 + $0x14] sm:$0xf]  ;;  %v448_v14 = vrot.slane %v5567_v6, 4  ;;  %v447_v20 = vor.u32 %v445_v7, %v5567_v6 }
  0x20   : > { %357 = vst [vmem:[#allocation2 + $0x14] sm:$0x1] %v5428_v0  ;;  %vm439_vm3 = vsmask.f32 4368  ;;  %v476_v15 = vshrl.u32 %v410_v9, 16  ;;  %v453_v17 = vshll.u32 %v407_v3, 16 }
  0x21   : > { %358 = vst [vmem:[#allocation2 + $0x18] sm:$0xf] %v5428_v0  ;;  %v462_v18 = vshll.u32 %v408_v5, 16  ;;  %v5583_v19 = vld [vmem:[%s5501_s9 + $0x18] sm:$0xf]  ;;  %v461_v21 = vrot.slane %v459_v10, 7  ;;  %vm5617_vm6 = vmor %vm438_vm2, %vm439_vm3 }
  0x22   : > { %359 = vst [vmem:[#allocation2 + $0x1c] sm:$0xf] %v5428_v0  ;;  %v5580_v16 = vld [vmem:[#allocation2 + $0xc] sm:$0xf]  ;;  %v484_v22 = vshrl.u32 %v411_v13, 16  ;;  %v469_v25 = vrot.slane %v467_v12, 7  ;;  %v455_v31 = vor.u32 %v453_v17, %v5574_v11 }
  0x23   : > { %360 = vst [vmem:[#allocation2 + $0x20] sm:$0x1] %v5428_v0  ;;  %v5588_v23 = vld [vmem:[%s5501_s9 + $0x1c] sm:$0xf]  ;;  %v470_v26 = vshll.u32 %v409_v8, 16  ;;  %v457_v28 = vrot.slane %v5574_v11, 4  ;;  %v766_v35 = vsel %vm5593_vm4, %v447_v20, %v5580_v16  ;;  %v464_v43 = vor.u32 %v462_v18, %v461_v21 }
  0x24   : > { %361 = vst [vmem:[#allocation2 + $0x24] sm:$0xf] %v5428_v0  ;;  %v5598_v27 = vld [vmem:[%s5501_s9 + $0x20] sm:$0xf]  ;;  %vm770_vm5 = vcmask 24576   ;;  %v5602_v29 = vrot.slane %v476_v15, 7  ;;  %v456_v53 = vsel %vm5617_vm6, %v448_v14, %v455_v31 }
  0x25   : > { %362 = vst [vmem:[#allocation2 + $0x28] sm:$0xf] %v5428_v0  ;;  %v493_v30 = vshrl.u32 %v5583_v19, 16  ;;  %v479_v32 = vshll.u32 %v410_v9, 16  ;;  %v501_v33 = vshrl.u32 %v5588_v23, 16  ;;  %v486_v40 = vrot.slane %v484_v22, 7  ;;  %vm5629_vm7 = vmand %vm770_vm5, %vm438_vm2 }
  0x26   : > { %363 = vst [vmem:[#allocation2 + $0x2c] sm:$0x1] %v5428_v0  ;;  %v5609_v34 = vld [vmem:[%s5501_s9 + $0x24] sm:$0xf]  ;;  %v487_v41 = vshll.u32 %v411_v13, 16  ;;  %v510_v42 = vshrl.u32 %v5598_v27, 16  ;;  %v472_v45 = vor.u32 %v470_v26, %v469_v25 }
  0x27   : > { %364 = vst [vmem:[#allocation2 + $0x30] sm:$0xf] %v5428_v0  ;;  %v772_v37 = vld [vmem:[#allocation2 + $0x14] sm:$0x1]  ;;  %v465_v44 = vrot.slane %v461_v21, 4  ;;  %v474_v46 = vrot.slane %v469_v25, 4  ;;  %v481_v54 = vor.u32 %v479_v32, %v5602_v29 }
  0x28   : > { %365 = vst [vmem:[#allocation2 + $0x34] sm:$0xf] %v5428_v0  ;;  %v775_v38 = vld [vmem:[#allocation2 + $0x18] sm:$0xf]  ;;  %v5624_v47 = vld [vmem:[%s5501_s9 + $0x28] sm:$0xf]  ;;  %v489_v59 = vor.u32 %v487_v41, %v486_v40  ;;  %v773_v63 = vsel %vm5629_vm7, %v457_v28, %v772_v37 }
  0x29   : > { %366 = vst [vmem:[#allocation2 + $0x38] sm:$0x1] %v5428_v0  ;;  %v482_v49 = vrot.slane %v5602_v29, 4  ;;  %v495_v50 = vrot.slane %v493_v30, 7  ;;  %v496_v51 = vshll.u32 %v5583_v19, 16  ;;  %v518_v52 = vshrl.u32 %v5609_v34, 16 }
  0x2a   : > { %367 = vst [vmem:[#allocation2 + $0x3c] sm:$0xf] %v5428_v0  ;;  %v779_v39 = vld [vmem:[#allocation2 + $0x20] sm:$0x1]  ;;  %v503_v56 = vrot.slane %v501_v33, 7  ;;  %v504_v57 = vshll.u32 %v5588_v23, 16  ;;  %v776_v1 = vsel %vm5593_vm4, %v464_v43, %v775_v38  ;;  %v473_v2 = vsel %vm5617_vm6, %v465_v44, %v472_v45 }
  0x2b   : > { %368 = vst [vmem:[#allocation2 + $0x40] sm:$0xf] %v5428_v0  ;;  %v782_v55 = vld [vmem:[#allocation2 + $0x24] sm:$0xf]  ;;  %v5642_v58 = vld [vmem:[%s5501_s9 + $0x2c] sm:$0xf]  ;;  %v780_v3 = vsel %vm5629_vm7, %v474_v46, %v779_v39  ;;  %v498_v10 = vor.u32 %v496_v51, %v495_v50  ;;  %v490_v16 = vsel %vm5617_vm6, %v482_v49, %v489_v59 }
  0x2c   : > { %369 = vst [vmem:[#allocation2 + $0x44] sm:$0x1] %v5428_v0  ;;  %v512_v60 = vrot.slane %v510_v42, 7  ;;  %v513_v61 = vshll.u32 %v5598_v27, 16  ;;  %v527_v62 = vshrl.u32 %v5624_v47, 16  ;;  %v491_v7 = vrot.slane %v486_v40, 4 }
  0x2d   : > { %370 = vst [vmem:[#allocation2 + $0x48] sm:$0xf] %v5428_v0  ;;  %v786_v4 = vld [vmem:[#allocation2 + $0x2c] sm:$0x1]  ;;  %v5657_v5 = vld [vmem:[%s5501_s9 + $0x30] sm:$0xf]  ;;  %v506_v13 = vor.u32 %v504_v57, %v503_v56  ;;  %v783_v15 = vsel %vm5593_vm4, %v481_v54, %v782_v55 }
  0x2e   : > { %371 = vst [vmem:[#allocation2 + $0x4c] sm:$0xf] %v5428_v0  ;;  %v5660_v6 = vld [vmem:[%s5501_s9 + $0x34] sm:$0xf]  ;;  %v521_v8 = vshll.u32 %v5609_v34, 16  ;;  %v535_v9 = vshrl.u32 %v5642_v58, 16  ;;  %v515_v22 = vor.u32 %v513_v61, %v512_v60  ;;  %v787_v27 = vsel %vm5629_vm7, %v491_v7, %v786_v4 }
  0x2f   : > { %372 = vst [vmem:[#allocation2 + $0x50] sm:$0x1] %v5428_v0  ;;  %v789_v11 = vld [vmem:[#allocation2 + $0x30] sm:$0xf]  ;;  %v499_v12 = vrot.slane %v495_v50, 4  ;;  %v508_v14 = vrot.slane %v503_v56, 4 }
  0x30   : > { %373 = vst [vmem:[#allocation2 + $0x54] sm:$0xf] %v5428_v0  ;;  %v793_v17 = vld [vmem:[#allocation2 + $0x38] sm:$0x1]  ;;  %v544_v19 = vshrl.u32 %v5657_v5, 16  ;;  %v552_v20 = vshrl.u32 %v5660_v6, 16  ;;  %v790_v33 = vsel %vm5593_vm4, %v498_v10, %v789_v11 }
  0x31   : > { %374 = vst [vmem:[#allocation2 + $0x58] sm:$0xf] %v5428_v0  ;;  %v796_v18 = vld [vmem:[#allocation2 + $0x3c] sm:$0xf]  ;;  %v5672_v21 = vld [vmem:[%s5501_s9 + $0x38] sm:$0xf]  ;;  %v507_v34 = vsel %vm5617_vm6, %v499_v12, %v506_v13  ;;  %v794_v43 = vsel %vm5629_vm7, %v508_v14, %v793_v17 }
  0x32   : > { %375 = vst [vmem:[#allocation2 + $0x5c] sm:$0x1] %v5428_v0  ;;  %v516_v23 = vrot.slane %v512_v60, 4  ;;  %v529_v25 = vrot.slane %v527_v62, 7  ;;  %v530_v26 = vshll.u32 %v5624_v47, 16  ;;  %v537_v30 = vrot.slane %v535_v9, 7 }
  0x33   : > { %376 = vst [vmem:[#allocation2 + $0x60] sm:$0xf] %v5428_v0  ;;  %v800_v29 = vld [vmem:[#allocation2 + $0x44] sm:$0x1]  ;;  %v538_v31 = vshll.u32 %v5642_v58, 16  ;;  %v561_v37 = vshrl.u32 %v5672_v21, 16  ;;  %v797_v44 = vsel %vm5593_vm4, %v515_v22, %v796_v18 }
  0x34   : > { %377 = vst [vmem:[#allocation2 + $0x64] sm:$0xf] %v5428_v0  ;;  %v5680_v32 = vld [vmem:[%s5501_s9 + $0x3c] sm:$0xf]  ;;  %v422_v38 = vld [vmem:[%s5501_s9 + $0x40] sm:$0xf]  ;;  %v532_v50 = vor.u32 %v530_v26, %v529_v25 }
  0x35   : > { %378 = vst [vmem:[#allocation2 + $0x68] sm:$0x1] %v5428_v0  ;;  %v546_v39 = vrot.slane %v544_v19, 7  ;;  %v547_v40 = vshll.u32 %v5657_v5, 16  ;;  %v5689_v41 = vrot.slane %v552_v20, 7  ;;  %v555_v42 = vshll.u32 %v5660_v6, 16 }
  0x36   : > { %379 = vst [vmem:[#allocation2 + $0x6c] sm:$0xf] %v5428_v0  ;;  %v569_v45 = vshrl.u32 %v5680_v32, 16  ;;  %v578_v46 = vshrl.u32 %v422_v38, 16  ;;  %v423_v47 = vld [vmem:[%s5501_s9 + $0x44] sm:$0xf] }
  0x37   : > { %380 = vst [vmem:[#allocation2 + $0x70] sm:$0xf] %v5428_v0  ;;  %v803_v51 = vld [vmem:[#allocation2 + $0x48] sm:$0xf]  ;;  %v807_v55 = vld [vmem:[#allocation2 + $0x50] sm:$0x1]  ;;  %v549_v61 = vor.u32 %v547_v40, %v546_v39 }
  0x38   : > { %381 = vst [vmem:[#allocation2 + $0x74] sm:$0x1] %v5428_v0  ;;  %v810_v56 = vld [vmem:[#allocation2 + $0x54] sm:$0xf]  ;;  %v563_v57 = vrot.slane %v561_v37, 7  ;;  %v564_v58 = vshll.u32 %v5672_v21, 16  ;;  %v804_v6 = vsel %vm5593_vm4, %v532_v50, %v803_v51 }
  0x39   : > { %382 = vst [vmem:[#allocation2 + $0x78] sm:$0xf] %v5428_v0  ;;  %v586_v59 = vshrl.u32 %v423_v47, 16  ;;  %v542_v60 = vrot.slane %v537_v30, 4  ;;  %v550_v62 = vrot.slane %v546_v39, 4  ;;  %v5708_v4 = vrot.slane %v578_v46, 7 }
  0x3a   : > { %383 = vst [vmem:[#allocation2 + $0x7c] sm:$0xf] %v5428_v0  ;;  %v581_v5 = vshll.u32 %v422_v38, 16  ;;  %v817_v9 = vld [vmem:[#allocation2 + $0x60] sm:$0xf]  ;;  %v566_v12 = vor.u32 %v564_v58, %v563_v57  ;;  %v589_v14 = vshll.u32 %v423_v47, 16  ;;  %v811_v17 = vsel %vm5593_vm4, %v549_v61, %v810_v56 }
  0x3b   : > { %384 = vst [vmem:[#allocation2 + $0x80] sm:$0x1] %v5428_v0  ;;  %v425_v11 = vld [vmem:[%s5501_s9 + $0x4c] sm:$0xf]  ;;  %v588_v13 = vrot.slane %v586_v59, 7  ;;  %v567_v19 = vrot.slane %v563_v57, 4 }
  0x3c   : > { %385 = vst [vmem:[#allocation2 + $0x84] sm:$0xf] %v5428_v0  ;;  %v821_v20 = vld [vmem:[#allocation2 + $0x68] sm:$0x1]  ;;  %v427_v38 = vld [vmem:[%s5501_s9 + $0x54] sm:$0xf] }
  0x3d   : > { %386 = vst [vmem:[#allocation2 + $0x88] sm:$0xf] %v5428_v0  ;;  %v593_v39 = vrot.slane %v588_v13, 4  ;;  %v623_v46 = vshll.u32 %v427_v38, 16 }
  0x3e   : > { %387 = vst [vmem:[#allocation2 + $0x8c] sm:$0x1] %v5428_v0 }
  0x3f   : > { %388 = vst [vmem:[#allocation2 + $0x90] sm:$0xf] %v5428_v0  ;;  %v828_v37 = vld [vmem:[#allocation2 + $0x74] sm:$0x1] }
  0x40   : > { %389 = vst [vmem:[#allocation2 + $0x94] sm:$0xf] %v5428_v0  ;;  %v829_v59 = vsel %vm5629_vm7, %v593_v39, %v828_v37 }
  0x41   : > { %390 = vst [vmem:[#allocation2 + $0x98] sm:$0x1] %v5428_v0 }
  0x42   : > { %391 = vst [vmem:[#allocation2 + $0x9c] sm:$0xf] %v5428_v0 }
  0x43   : > { %392 = vst [vmem:[#allocation2 + $0xa0] sm:$0xf] %v5428_v0  ;;  %v838_v61 = vld [vmem:[#allocation2 + $0x84] sm:$0xf] }
  0x44   : > { %393 = vst [vmem:[#allocation2 + $0xa4] sm:$0x1] %v5428_v0 }
  0x45   : > { %394 = vst [vmem:[#allocation2 + $0xa8] sm:$0xf] %v5428_v0 }
  0x46   : > { %395 = vst [vmem:[#allocation2 + $0xac] sm:$0xf] %v5428_v0 }
  0x47   : > { %396 = vst [vmem:[#allocation2 + $0xb0] sm:$0x1] %v5428_v0 }
  0x48   : > { %397 = vst [vmem:[#allocation2 + $0xb4] sm:$0xf] %v5428_v0 }
  0x49   : > { %398 = vst [vmem:[#allocation2 + $0xb8] sm:$0xf] %v5428_v0 }
  0x4a   : > { %399 = vst [vmem:[#allocation2 + $0xbc] sm:$0x1] %v5428_v0 }
  0x4b   : > { %400 = vst [vmem:[#allocation2 + $0xc0] sm:$0xf] %v5428_v0  ;;  %v856_v39 = vld [vmem:[#allocation2 + $0xa4] sm:$0x1] }
  0x4c   : > { %401 = vst [vmem:[#allocation2 + $0xc4] sm:$0xf] %v5428_v0 }
  0x4d   : > { %402 = vst [vmem:[#allocation2 + $0xc8] sm:$0x1] %v5428_v0 }
  0x4e   : > { %403 = vst [vmem:[#allocation2 + $0xcc] sm:$0xf] %v5428_v0 }
  0x4f   : > { %404 = vst [vmem:[#allocation2 + $0xd0] sm:$0xf] %v5428_v0 }
  0x50   : > { %405 = vst [vmem:[#allocation2 + $0xd4] sm:$0x1] %v5428_v0  ;;  %v520_v0 = vrot.slane %v518_v52, 7  ;;  %v533_v52 = vrot.slane %v529_v25, 4  ;;  %v824_v25 = vld [vmem:[#allocation2 + $0x6c] sm:$0xf] }
  0x51   : > { %767 = vst [vmem:[#allocation2 + $0xc] sm:$0xf] %v766_v35 }
  0x52   : > { %769 = vst.msk [vmem:[#allocation2 + $0x10] sm:$0xf] %vm762_vm1, %v456_v53  ;;  %v523_v28 = vor.u32 %v521_v8, %v520_v0  ;;  %v525_v35 = vrot.slane %v520_v0, 4  ;;  %v540_v53 = vor.u32 %v538_v31, %v537_v30  ;;  %v559_v0 = vrot.slane %v5689_v41, 4  ;;  %v814_v8 = vld [vmem:[#allocation2 + $0x5c] sm:$0x1] }
  0x53   : > { %774 = vst [vmem:[#allocation2 + $0x14] sm:$0x1] %v773_v63  ;;  %v557_v63 = vor.u32 %v555_v42, %v5689_v41  ;;  %v606_v30 = vshll.u32 %v425_v11, 16  ;;  %v620_v42 = vshrl.u32 %v427_v38, 16 }
  0x54   : > { %777 = vst [vmem:[#allocation2 + $0x18] sm:$0xf] %v776_v1  ;;  %v524_v49 = vsel %vm5617_vm6, %v516_v23, %v523_v28  ;;  %v801_v54 = vsel %vm5629_vm7, %v525_v35, %v800_v29  ;;  %v424_v1 = vld [vmem:[%s5501_s9 + $0x48] sm:$0xf]  ;;  %v541_v7 = vsel %vm5617_vm6, %v533_v52, %v540_v53  ;;  %v583_v23 = vor.u32 %v581_v5, %v5708_v4  ;;  %v835_v52 = vld [vmem:[#allocation2 + $0x80] sm:$0x1] }
  0x55   : > { %778 = vst.msk [vmem:[#allocation2 + $0x1c] sm:$0xf] %vm762_vm1, %v473_v2  ;;  %v571_v2 = vrot.slane %v569_v45, 7  ;;  %v595_v10 = vshrl.u32 %v424_v1, 16  ;;  %v558_v18 = vsel %vm5617_vm6, %v550_v62, %v557_v63  ;;  %v598_v26 = vshll.u32 %v424_v1, 16 }
  0x56   : > { %781 = vst [vmem:[#allocation2 + $0x20] sm:$0x1] %v780_v3  ;;  %v572_v3 = vshll.u32 %v5680_v32, 16  ;;  %v815_v32 = vsel %vm5629_vm7, %v559_v0, %v814_v8  ;;  %v591_v35 = vor.u32 %v589_v14, %v588_v13  ;;  %v831_v45 = vld [vmem:[#allocation2 + $0x78] sm:$0xf]  ;;  %v825_v47 = vsel %vm5593_vm4, %v583_v23, %v824_v25 }
  0x57   : > { %784 = vst [vmem:[#allocation2 + $0x24] sm:$0xf] %v783_v15  ;;  %v603_v15 = vshrl.u32 %v425_v11, 16  ;;  %v576_v22 = vrot.slane %v571_v2, 4  ;;  %v597_v28 = vrot.slane %v595_v10, 7 }
  0x58   : > { %785 = vst.msk [vmem:[#allocation2 + $0x28] sm:$0xf] %vm762_vm1, %v490_v16  ;;  %v808_v16 = vsel %vm5629_vm7, %v542_v60, %v807_v55  ;;  %v574_v21 = vor.u32 %v572_v3, %v571_v2  ;;  %v428_v53 = vld [vmem:[%s5501_s9 + $0x58] sm:$0xf]  ;;  %v622_v55 = vrot.slane %v620_v42, 7 }
  0x59   : > { %788 = vst [vmem:[#allocation2 + $0x2c] sm:$0x1] %v787_v27  ;;  %v426_v27 = vld [vmem:[%s5501_s9 + $0x50] sm:$0xf]  ;;  %v605_v29 = vrot.slane %v603_v15, 7  ;;  %v601_v50 = vrot.slane %v597_v28, 4 }
  0x5a   : > { %791 = vst [vmem:[#allocation2 + $0x30] sm:$0xf] %v790_v33  ;;  %v612_v31 = vshrl.u32 %v426_v27, 16  ;;  %v818_v33 = vsel %vm5593_vm4, %v566_v12, %v817_v9  ;;  %v615_v41 = vshll.u32 %v426_v27, 16  ;;  %v629_v56 = vshrl.u32 %v428_v53, 16 }
  0x5b   : > { %792 = vst.msk [vmem:[#allocation2 + $0x34] sm:$0xf] %vm762_vm1, %v507_v34  ;;  %v584_v34 = vrot.slane %v5708_v4, 4  ;;  %v608_v51 = vor.u32 %v606_v30, %v605_v29  ;;  %v632_v57 = vshll.u32 %v428_v53, 16  ;;  %v429_v62 = vld [vmem:[%s5501_s9 + $0x5c] sm:$0xf]  ;;  %v625_v1 = vor.u32 %v623_v46, %v622_v55 }
  0x5c   : > { %795 = vst [vmem:[#allocation2 + $0x38] sm:$0x1] %v794_v43  ;;  %v614_v40 = vrot.slane %v612_v31, 7  ;;  %v575_v43 = vsel %vm5617_vm6, %v567_v19, %v574_v21  ;;  %v631_v2 = vrot.slane %v629_v56, 7  ;;  %v637_v3 = vshrl.u32 %v429_v62, 16 }
  0x5d   : > { %798 = vst [vmem:[#allocation2 + $0x3c] sm:$0xf] %v797_v44  ;;  %v822_v44 = vsel %vm5629_vm7, %v576_v22, %v821_v20  ;;  %v592_v58 = vsel %vm5617_vm6, %v584_v34, %v591_v35  ;;  %v842_v5 = vld [vmem:[#allocation2 + $0x8c] sm:$0x1]  ;;  %v627_v8 = vrot.slane %v622_v55, 4 }
  0x5e   : > { %799 = vst.msk [vmem:[#allocation2 + $0x40] sm:$0xf] %vm762_vm1, %v524_v49  ;;  %v600_v49 = vor.u32 %v598_v26, %v597_v28  ;;  %v617_v60 = vor.u32 %v615_v41, %v614_v40  ;;  %v618_v63 = vrot.slane %v614_v40, 4  ;;  %v634_v9 = vor.u32 %v632_v57, %v631_v2  ;;  %v845_v10 = vld [vmem:[#allocation2 + $0x90] sm:$0xf] }
  0x5f   : > { %802 = vst [vmem:[#allocation2 + $0x44] sm:$0x1] %v801_v54  ;;  %v610_v54 = vrot.slane %v605_v29, 4  ;;  %v430_v11 = vld [vmem:[%s5501_s9 + $0x60] sm:$0xf]  ;;  %v635_v12 = vrot.slane %v631_v2, 4  ;;  %v843_v25 = vsel %vm5629_vm7, %v627_v8, %v842_v5 }
  0x60   : > { %805 = vst [vmem:[#allocation2 + $0x48] sm:$0xf] %v804_v6  ;;  %v832_v4 = vsel %vm5593_vm4, %v600_v49, %v831_v45  ;;  %v640_v6 = vshll.u32 %v429_v62, 16  ;;  %v639_v13 = vrot.slane %v637_v3, 7  ;;  %v646_v14 = vshrl.u32 %v430_v11, 16 }
  0x61   : > { %806 = vst.msk [vmem:[#allocation2 + $0x4c] sm:$0xf] %vm762_vm1, %v541_v7  ;;  %v609_v7 = vsel %vm5617_vm6, %v601_v50, %v608_v51  ;;  %v836_v0 = vsel %vm5629_vm7, %v610_v54, %v835_v52  ;;  %v649_v15 = vshll.u32 %v430_v11, 16  ;;  %v431_v19 = vld [vmem:[%s5501_s9 + $0x64] sm:$0xf]  ;;  %v846_v28 = vsel %vm5593_vm4, %v634_v9, %v845_v10 }
  0x62   : > { %809 = vst [vmem:[#allocation2 + $0x50] sm:$0x1] %v808_v16  ;;  %v839_v16 = vsel %vm5593_vm4, %v617_v60, %v838_v61  ;;  %v642_v20 = vor.u32 %v640_v6, %v639_v13  ;;  %v644_v21 = vrot.slane %v639_v13, 4  ;;  %v648_v22 = vrot.slane %v646_v14, 7  ;;  %v852_v26 = vld [vmem:[#allocation2 + $0x9c] sm:$0xf] }
  0x63   : > { %812 = vst [vmem:[#allocation2 + $0x54] sm:$0xf] %v811_v17  ;;  %v626_v17 = vsel %vm5617_vm6, %v618_v63, %v625_v1  ;;  %v654_v23 = vshrl.u32 %v431_v19, 16  ;;  %v657_v27 = vshll.u32 %v431_v19, 16  ;;  %v432_v31 = vld [vmem:[%s5501_s9 + $0x68] sm:$0xf] }
  0x64   : > { %813 = vst.msk [vmem:[#allocation2 + $0x58] sm:$0xf] %vm762_vm1, %v558_v18  ;;  %v849_v18 = vld [vmem:[#allocation2 + $0x98] sm:$0x1]  ;;  %v643_v29 = vsel %vm5617_vm6, %v635_v12, %v642_v20  ;;  %v651_v30 = vor.u32 %v649_v15, %v648_v22  ;;  %v663_v34 = vshrl.u32 %v432_v31, 16  ;;  %v666_v35 = vshll.u32 %v432_v31, 16 }
  0x65   : > { %816 = vst [vmem:[#allocation2 + $0x5c] sm:$0x1] %v815_v32  ;;  %v652_v32 = vrot.slane %v648_v22, 4  ;;  %v850_v37 = vsel %vm5629_vm7, %v644_v21, %v849_v18  ;;  %v433_v40 = vld [vmem:[%s5501_s9 + $0x6c] sm:$0xf] }
  0x66   : > { %819 = vst [vmem:[#allocation2 + $0x60] sm:$0xf] %v818_v33  ;;  %v656_v33 = vrot.slane %v654_v23, 7  ;;  %v853_v38 = vsel %vm5593_vm4, %v651_v30, %v852_v26  ;;  %v859_v45 = vld [vmem:[#allocation2 + $0xa8] sm:$0xf]  ;;  %v674_v46 = vshll.u32 %v433_v40, 16 }
  0x67   : > { %820 = vst.msk [vmem:[#allocation2 + $0x64] sm:$0xf] %vm762_vm1, %v575_v43  ;;  %v665_v43 = vrot.slane %v663_v34, 7  ;;  %v434_v51 = vld [vmem:[%s5501_s9 + $0x70] sm:$0xf] }
  0x68   : > { %823 = vst [vmem:[#allocation2 + $0x68] sm:$0x1] %v822_v44  ;;  %v659_v41 = vor.u32 %v657_v27, %v656_v33  ;;  %v661_v42 = vrot.slane %v656_v33, 4  ;;  %v671_v44 = vshrl.u32 %v433_v40, 16  ;;  %v680_v54 = vshrl.u32 %v434_v51, 16 }
  0x69   : > { %826 = vst [vmem:[#allocation2 + $0x6c] sm:$0xf] %v825_v47  ;;  %v668_v50 = vor.u32 %v666_v35, %v665_v43  ;;  %v669_v52 = vrot.slane %v665_v43, 4  ;;  %v683_v55 = vshll.u32 %v434_v51, 16  ;;  %v863_v57 = vld [vmem:[#allocation2 + $0xb0] sm:$0x1] }
  0x6a   : > { %827 = vst.msk [vmem:[#allocation2 + $0x70] sm:$0xf] %vm762_vm1, %v592_v58  ;;  %v660_v47 = vsel %vm5617_vm6, %v652_v32, %v659_v41  ;;  %v857_v49 = vsel %vm5629_vm7, %v661_v42, %v856_v39  ;;  %v673_v53 = vrot.slane %v671_v44, 7  ;;  %v435_v58 = vld [vmem:[%s5501_s9 + $0x74] sm:$0xf]  ;;  %v682_v61 = vrot.slane %v680_v54, 7 }
  0x6b   : > { %830 = vst [vmem:[#allocation2 + $0x74] sm:$0x1] %v829_v59  ;;  %v860_v56 = vsel %vm5593_vm4, %v668_v50, %v859_v45  ;;  %v688_v62 = vshrl.u32 %v435_v58, 16  ;;  %v866_v63 = vld [vmem:[#allocation2 + $0xb4] sm:$0xf]  ;;  %v691_v1 = vshll.u32 %v435_v58, 16 }
  0x6c   : > { %833 = vst [vmem:[#allocation2 + $0x78] sm:$0xf] %v832_v4  ;;  %v676_v59 = vor.u32 %v674_v46, %v673_v53  ;;  %v678_v60 = vrot.slane %v673_v53, 4  ;;  %v685_v4 = vor.u32 %v683_v55, %v682_v61  ;;  %v436_v5 = vld [vmem:[%s5501_s9 + $0x78] sm:$0xf]  ;;  %v686_v6 = vrot.slane %v682_v61, 4 }
  0x6d   : > { %834 = vst.msk [vmem:[#allocation2 + $0x7c] sm:$0xf] %vm762_vm1, %v609_v7  ;;  %v690_v7 = vrot.slane %v688_v62, 7  ;;  %v700_v8 = vshll.u32 %v436_v5, 16  ;;  %v870_v10 = vld [vmem:[#allocation2 + $0xbc] sm:$0x1] }
  0x6e   : > { %837 = vst [vmem:[#allocation2 + $0x80] sm:$0x1] %v836_v0  ;;  %v677_v2 = vsel %vm5617_vm6, %v669_v52, %v676_v59  ;;  %v864_v3 = vsel %vm5629_vm7, %v678_v60, %v863_v57  ;;  %v697_v0 = vshrl.u32 %v436_v5, 16  ;;  %v867_v9 = vsel %vm5593_vm4, %v685_v4, %v866_v63  ;;  %v437_v11 = vld [vmem:[%s5501_s9 + $0x7c] sm:$0xf] }
  0x6f   : > { %840 = vst [vmem:[#allocation2 + $0x84] sm:$0xf] %v839_v16  ;;  %v693_v12 = vor.u32 %v691_v1, %v690_v7  ;;  %v695_v13 = vrot.slane %v690_v7, 4  ;;  %v705_v15 = vshrl.u32 %v437_v11, 16  ;;  %v873_v16 = vld [vmem:[#allocation2 + $0xc0] sm:$0xf] }
  0x70   : > { %841 = vst.msk [vmem:[#allocation2 + $0x88] sm:$0xf] %vm762_vm1, %v626_v17  ;;  %v699_v14 = vrot.slane %v697_v0, 7  ;;  %v708_v17 = vshll.u32 %v437_v11, 16 }
  0x71   : > { %844 = vst [vmem:[#allocation2 + $0x8c] sm:$0x1] %v843_v25  ;;  %v694_v18 = vsel %vm5617_vm6, %v686_v6, %v693_v12  ;;  %v871_v19 = vsel %vm5629_vm7, %v695_v13, %v870_v10  ;;  %v707_v22 = vrot.slane %v705_v15, 7  ;;  %v877_v25 = vld [vmem:[#allocation2 + $0xc8] sm:$0x1] }
  0x72   : > { %847 = vst [vmem:[#allocation2 + $0x90] sm:$0xf] %v846_v28  ;;  %v702_v20 = vor.u32 %v700_v8, %v699_v14  ;;  %v703_v21 = vrot.slane %v699_v14, 4 }
  0x73   : > { %848 = vst.msk [vmem:[#allocation2 + $0x94] sm:$0xf] %vm762_vm1, %v643_v29  ;;  %v710_v26 = vor.u32 %v708_v17, %v707_v22  ;;  %v712_v27 = vrot.slane %v707_v22, 4 }
  0x74   : > { %851 = vst [vmem:[#allocation2 + $0x98] sm:$0x1] %v850_v37  ;;  %v874_v23 = vsel %vm5593_vm4, %v702_v20, %v873_v16 }
  0x75   : > { %854 = vst [vmem:[#allocation2 + $0x9c] sm:$0xf] %v853_v38  ;;  %v711_v28 = vsel %vm5617_vm6, %v703_v21, %v710_v26  ;;  %v878_v29 = vsel %vm5629_vm7, %v712_v27, %v877_v25 }
  0x76   : > { %855 = vst.msk [vmem:[#allocation2 + $0xa0] sm:$0xf] %vm762_vm1, %v660_v47 }
  0x77   : > { %858 = vst [vmem:[#allocation2 + $0xa4] sm:$0x1] %v857_v49 }
  0x78   : > { %861 = vst [vmem:[#allocation2 + $0xa8] sm:$0xf] %v860_v56 }
  0x79   : > { %862 = vst.msk [vmem:[#allocation2 + $0xac] sm:$0xf] %vm762_vm1, %v677_v2 }
  0x7a   : > { %865 = vst [vmem:[#allocation2 + $0xb0] sm:$0x1] %v864_v3 }
  0x7b   : > { %868 = vst [vmem:[#allocation2 + $0xb4] sm:$0xf] %v867_v9 }
  0x7c   : > { %869 = vst.msk [vmem:[#allocation2 + $0xb8] sm:$0xf] %vm762_vm1, %v694_v18 }
  0x7d   : > { %872 = vst [vmem:[#allocation2 + $0xbc] sm:$0x1] %v871_v19 }
  0x7e   : > { %875 = vst [vmem:[#allocation2 + $0xc0] sm:$0xf] %v874_v23 }
  0x7f   : > { %876 = vst.msk [vmem:[#allocation2 + $0xc4] sm:$0xf] %vm762_vm1, %v711_v28 }
  0x80   : > { %879 = vst [vmem:[#allocation2 + $0xc8] sm:$0x1] %v878_v29 }
  0x81 PF: > { %v5258_v24 = vld [vmem:[%s6736_s1 + $0x38] sm:$0xff]  ;;  %s5178_s12 = smul.u32 96, %s5410_s21  ;;  %v5257_v36 = vld [vmem:[%s6736_s1 + $0x30] sm:$0xff]  ;;  %v5256_v31 = vld [vmem:[%s6736_s1 + $0x28] sm:$0xff]  ;;  %vm940_vm8 = vsmask.f32 3328 }
  0x82   : > { %v5266_v30 = vld [vmem:[%s6736_s1 + $0x78] sm:$0xff]  ;;  %5331 = vmatpush.bf16.msra.mxu2 %v5258_v24  ;;  %v5265_v48 = vld [vmem:[%s6736_s1 + $0x70] sm:$0xff]  ;;  %3170 = vmatpush.bf16.msra.mxu0 %v5258_v24  ;;  %v5264_v32 = vld [vmem:[%s6736_s1 + $0x68] sm:$0xff]  ;;  %vm941_vm9 = vsmask.f32 7440  ;;  %vm1215_vm11 = vcmask 1042432  }
  0x83   : > { %3219 = vmatpush.bf16.msra.mxu1 %v5266_v30  ;;  %5339 = vmatpush.bf16.msra.mxu3 %v5266_v30  ;;  %s5823_s21 = scalar_lea.vmem [#allocation2], %s5178_s12  ;;  %v5255_v41 = vld [vmem:[%s6736_s1 + $0x20] sm:$0xff]  ;;  %vm5843_vm10 = vmor %vm940_vm8, %vm941_vm9  ;;  %v5254_v7 = vld [vmem:[%s6736_s1 + $0x18] sm:$0xff]  ;;  %vm1216_vm12 = vcmask 1046532  }
  0x84   : > { %v5263_v51 = vld [vmem:[%s6736_s1 + $0x60] sm:$0xff]  ;;  %v5262_v0 = vld [vmem:[%s6736_s1 + $0x58] sm:$0xff]  ;;  %v5253_v13 = vld [vmem:[%s6736_s1 + $0x10] sm:$0xff] }
  0x85   : > { %v5261_v14 = vld [vmem:[%s6736_s1 + $0x50] sm:$0xff]  ;;  %vm6027_vm13 = vmor %vm1215_vm11, %vm1216_vm12 }
  0x86   : > { %5332 = vmatpush.bf16.msra.mxu2 %v5257_v36  ;;  %3171 = vmatpush.bf16.msra.mxu0 %v5257_v36 }
  0x87   : > { %v892_v33 = vld [vmem:[%s5823_s21 + $0x30] sm:$0xf]  ;;  %v893_v34 = vld [vmem:[%s5823_s21 + $0x34] sm:$0xf]  ;;  %3220 = vmatpush.bf16.msra.mxu1 %v5265_v48  ;;  %v916_v35 = vld [vmem:[%s5823_s21] sm:$0xf]  ;;  %5340 = vmatpush.bf16.msra.mxu3 %v5265_v48 }
  0x88   : > { %908 = vst [vmem:[#allocation3 + $0x120] sm:$0xf] %v892_v33  ;;  %v917_v37 = vld [vmem:[%s5823_s21 + $0x4] sm:$0xf]  ;;  %v918_v38 = vld [vmem:[%s5823_s21 + $0x8] sm:$0x1] }
  0x89   : > { %909 = vst [vmem:[#allocation3 + $0x144] sm:$0xf] %v893_v34  ;;  %v944_v39 = vshrl.u32 %v916_v35, 16  ;;  %v947_v40 = vshll.u32 %v916_v35, 16  ;;  %v953_v42 = vshll.u32 %v917_v37, 16  ;;  %v957_v43 = vshrl.u32 %v917_v37, 16 }
  0x8a   : > { %v963_v44 = vshll.u32 %v918_v38, 16  ;;  %v928_v45 = vld [vmem:[%s5823_s21 + $0x30] sm:$0xf]  ;;  %v929_v49 = vld [vmem:[%s5823_s21 + $0x34] sm:$0xf]  ;;  %5333 = vmatpush.bf16.msra.mxu2 %v5256_v31  ;;  %3172 = vmatpush.bf16.msra.mxu0 %v5256_v31  ;;  %v5252_v48 = vld [vmem:[%s6736_s1 + $0x8] sm:$0xff] }
  0x8b   : > { %v946_v46 = vrot.slane %v944_v39, 4  ;;  %v949_v47 = vrot.slane %v947_v40, 5  ;;  %v930_v50 = vld [vmem:[%s5823_s21 + $0x38] sm:$0x1]  ;;  %3221 = vmatpush.bf16.msra.mxu1 %v5264_v32  ;;  %v955_v52 = vrot.slane %v953_v42, 5  ;;  %v959_v53 = vrot.slane %v957_v43, 4  ;;  %5341 = vmatpush.bf16.msra.mxu3 %v5264_v32 }
  0x8c   : > { %v1040_v54 = vshrl.u32 %v928_v45, 16  ;;  %v884_v55 = vld [vmem:[%s5823_s21] sm:$0xf]  ;;  %v1043_v57 = vshll.u32 %v928_v45, 16  ;;  %v1049_v58 = vshll.u32 %v929_v49, 16  ;;  %v1053_v59 = vshrl.u32 %v929_v49, 16 }
  0x8d   : > { %v950_v56 = vor.u32 %v949_v47, %v946_v46  ;;  %v885_v60 = vld [vmem:[%s5823_s21 + $0x4] sm:$0xf]  ;;  %v960_v62 = vor.u32 %v959_v53, %v955_v52  ;;  %v965_v63 = vrot.slane %v963_v44, 5  ;;  %v1059_v2 = vshll.u32 %v930_v50, 16  ;;  %900 = vst [vmem:[#allocation3] sm:$0xf] %v884_v55 }
  0x8e   : > { %v1042_v1 = vrot.slane %v1040_v54, 4  ;;  %v1045_v4 = vrot.slane %v1043_v57, 5  ;;  %v1051_v5 = vrot.slane %v1049_v58, 5  ;;  %v1055_v6 = vrot.slane %v1053_v59, 4  ;;  %5334 = vmatpush.bf16.msra.mxu2 %v5255_v41  ;;  %901 = vst [vmem:[#allocation3 + $0x24] sm:$0xf] %v885_v60  ;;  %3173 = vmatpush.bf16.msra.mxu0 %v5255_v41 }
  0x8f   : > { %v951_v3 = vrot.slane %v950_v56, 4  ;;  %3222 = vmatpush.bf16.msra.mxu1 %v5263_v51  ;;  %v961_v8 = vrot.slane %v960_v62, 4  ;;  %5342 = vmatpush.bf16.msra.mxu3 %v5263_v51  ;;  %v1061_v11 = vrot.slane %v1059_v2, 5  ;;  %v894_v12 = vld [vmem:[%s5823_s21 + $0x3c] sm:$0xf]  ;;  %v5260_v32 = vld [vmem:[%s6736_s1 + $0x48] sm:$0xff] }
  0x90   : > { %v1046_v10 = vor.u32 %v1045_v4, %v1042_v1  ;;  %v1056_v16 = vor.u32 %v1055_v6, %v1051_v5  ;;  %v895_v17 = vld [vmem:[%s5823_s21 + $0x40] sm:$0xf]  ;;  %v919_v18 = vld [vmem:[%s5823_s21 + $0xc] sm:$0xf]  ;;  %v920_v20 = vld [vmem:[%s5823_s21 + $0x10] sm:$0xf] }
  0x91   : > { %v956_v9 = vsel %vm5843_vm10, %v951_v3, %v955_v52  ;;  %v966_v15 = vsel %vm5843_vm10, %v961_v8, %v965_v63  ;;  %v968_v21 = vshrl.u32 %v919_v18, 16  ;;  %910 = vst [vmem:[#allocation3 + $0x168] sm:$0xf] %v894_v12  ;;  %v921_v23 = vld [vmem:[%s5823_s21 + $0x14] sm:$0x1]  ;;  %v971_v25 = vshll.u32 %v919_v18, 16 }
  0x92   : > { %1151 = vst [vmem:[#allocation3 + $0x4] sm:$0xf] %v956_v9  ;;  %v1047_v19 = vrot.slane %v1046_v10, 4  ;;  %5335 = vmatpush.bf16.msra.mxu2 %v5254_v7  ;;  %v1057_v22 = vrot.slane %v1056_v16, 4  ;;  %3174 = vmatpush.bf16.msra.mxu0 %v5254_v7  ;;  %v977_v28 = vshll.u32 %v920_v20, 16  ;;  %v981_v30 = vshrl.u32 %v920_v20, 16 }
  0x93   : > { %1152 = vst [vmem:[#allocation3 + $0x28] sm:$0xf] %v966_v15  ;;  %3223 = vmatpush.bf16.msra.mxu1 %v5262_v0  ;;  %5343 = vmatpush.bf16.msra.mxu3 %v5262_v0  ;;  %v970_v27 = vrot.slane %v968_v21, 4  ;;  %v973_v24 = vrot.slane %v971_v25, 5  ;;  %v987_v36 = vshll.u32 %v921_v23, 16  ;;  %v5251_v42 = vld [vmem:[%s6736_s1] sm:$0xff] }
  0x94   : > { %v1052_v26 = vsel %vm5843_vm10, %v1047_v19, %v1051_v5  ;;  %911 = vst [vmem:[#allocation3 + $0x18c] sm:$0xf] %v895_v17  ;;  %v1062_v29 = vsel %vm5843_vm10, %v1057_v22, %v1061_v11  ;;  %v979_v31 = vrot.slane %v977_v28, 5  ;;  %v983_v34 = vrot.slane %v981_v30, 4  ;;  %v931_v35 = vld [vmem:[%s5823_s21 + $0x3c] sm:$0xf] }
  0x95   : > { %1159 = vst [vmem:[#allocation3 + $0x124] sm:$0xf] %v1052_v26  ;;  %v974_v33 = vor.u32 %v973_v24, %v970_v27  ;;  %v932_v37 = vld [vmem:[%s5823_s21 + $0x40] sm:$0xf]  ;;  %v989_v38 = vrot.slane %v987_v36, 5  ;;  %v1064_v40 = vshrl.u32 %v931_v35, 16 }
  0x96   : > { %1160 = vst [vmem:[#allocation3 + $0x148] sm:$0xf] %v1062_v29  ;;  %5336 = vmatpush.bf16.msra.mxu2 %v5253_v13  ;;  %3175 = vmatpush.bf16.msra.mxu0 %v5253_v13  ;;  %v933_v39 = vld [vmem:[%s5823_s21 + $0x44] sm:$0x1]  ;;  %v1067_v41 = vshll.u32 %v931_v35, 16  ;;  %v984_v46 = vor.u32 %v983_v34, %v979_v31  ;;  %v1073_v47 = vshll.u32 %v932_v37, 16 }
  0x97   : > { %3224 = vmatpush.bf16.msra.mxu1 %v5261_v14  ;;  %5344 = vmatpush.bf16.msra.mxu3 %v5261_v14  ;;  %v4689_v43 = vld [vmem:[#allocation3 + $0x120] sm:$0xf]  ;;  %v5219_v44 = vld [vmem:[#allocation3 + $0x140] sm:$0xf0]  ;;  %v975_v45 = vrot.slane %v974_v33, 4  ;;  %v1077_v49 = vshrl.u32 %v932_v37, 16 }
  0x98   : > { %v5259_v50 = vld [vmem:[%s6736_s1 + $0x40] sm:$0xff]  ;;  %v4545_v52 = vld [vmem:[#allocation3] sm:$0xf]  ;;  %v5183_v53 = vld [vmem:[#allocation3 + $0x20] sm:$0xf0]  ;;  %v1066_v54 = vrot.slane %v1064_v40, 4  ;;  %v4690_v9 = vor.u32 %v5219_v44, %v4689_v43 }
  0x99   : > { %v5179_v51 = vld [vmem:[#allocation3 + $0x4] sm:$0xf]  ;;  %v1069_v55 = vrot.slane %v1067_v41, 5  ;;  %v1083_v56 = vshll.u32 %v933_v39, 16  ;;  %v980_v59 = vsel %vm5843_vm10, %v975_v45, %v979_v31  ;;  %v985_v60 = vrot.slane %v984_v46, 4  ;;  %v5273_v15 = vld [vmem:[%s6736_s1 + $0xb0] sm:$0xff] }
  0x9a   : > { %5337 = vmatpush.bf16.msra.mxu2 %v5252_v48  ;;  %v4547_v57 = vld [vmem:[#allocation3 + $0x24] sm:$0xf0]  ;;  %v5274_v58 = vld [vmem:[%s6736_s1 + $0xb8] sm:$0xff]  ;;  %v1075_v62 = vrot.slane %v1073_v47, 5  ;;  %v1079_v63 = vrot.slane %v1077_v49, 4  ;;  %3176 = vmatpush.bf16.msra.mxu0 %v5252_v48  ;;  %v4546_v14 = vor.u32 %v5183_v53, %v4545_v52  ;;  %v5281_v16 = vld [vmem:[%s6736_s1 + $0xf0] sm:$0xff] }
  0x9b   : > { %3225 = vmatpush.bf16.msra.mxu1 %v5260_v32  ;;  %5345 = vmatpush.bf16.msra.mxu3 %v5260_v32  ;;  %v5282_v2 = vld [vmem:[%s6736_s1 + $0xf8] sm:$0xff]  ;;  %1153 = vst [vmem:[#allocation3 + $0x4c] sm:$0xf] %v980_v59  ;;  %v1070_v3 = vor.u32 %v1069_v55, %v1066_v54  ;;  %v1085_v4 = vrot.slane %v1083_v56, 5  ;;  %v990_v6 = vsel %vm5843_vm10, %v985_v60, %v989_v38  ;;  %v886_v0 = vld [vmem:[%s5823_s21 + $0xc] sm:$0xf] }
  0x9c   : > { %v5215_v1 = vld [vmem:[#allocation3 + $0x124] sm:$0xf]  ;;  %v1080_v7 = vor.u32 %v1079_v63, %v1075_v62  ;;  %v887_v8 = vld [vmem:[%s5823_s21 + $0x10] sm:$0xf]  ;;  %v4550_v10 = vor.u32 %v5179_v51, %v4547_v57  ;;  %1154 = vst [vmem:[#allocation3 + $0x70] sm:$0xf] %v990_v6 }
  0x9d   : > { %v4691_v5 = vld [vmem:[#allocation3 + $0x144] sm:$0xf0]  ;;  %v5290_v11 = vld [vmem:[%s6736_s1 + $0x138] sm:$0xff]  ;;  %v1071_v12 = vrot.slane %v1070_v3, 4  ;;  %902 = vst [vmem:[#allocation3 + $0x48] sm:$0xf] %v886_v0 }
  0x9e   : > { %5338 = vmatpush.bf16.msra.mxu2 %v5251_v42  ;;  %v4694_v13 = vor.u32 %v5215_v1, %v4691_v5  ;;  %v5298_v17 = vld [vmem:[%s6736_s1 + $0x178] sm:$0xff]  ;;  %v1081_v18 = vrot.slane %v1080_v7, 4  ;;  %v896_v19 = vld [vmem:[%s5823_s21 + $0x48] sm:$0xf]  ;;  %3177 = vmatpush.bf16.msra.mxu0 %v5251_v42  ;;  %903 = vst [vmem:[#allocation3 + $0x6c] sm:$0xf] %v887_v8 }
  0x9f   : > { %3226 = vmatpush.bf16.msra.mxu1 %v5259_v50  ;;  %5346 = vmatpush.bf16.msra.mxu3 %v5259_v50  ;;  %v1076_v20 = vsel %vm5843_vm10, %v1071_v12, %v1075_v62  ;;  %v897_v21 = vld [vmem:[%s5823_s21 + $0x4c] sm:$0xf]  ;;  %v922_v22 = vld [vmem:[%s5823_s21 + $0x18] sm:$0xf]  ;;  %v923_v25 = vld [vmem:[%s5823_s21 + $0x1c] sm:$0xf] }
  0xa0   : > { %v1086_v23 = vsel %vm5843_vm10, %v1081_v18, %v1085_v4  ;;  %1161 = vst [vmem:[#allocation3 + $0x16c] sm:$0xf] %v1076_v20  ;;  %v924_v26 = vld [vmem:[%s5823_s21 + $0x20] sm:$0x1]  ;;  %v992_v27 = vshrl.u32 %v922_v22, 16  ;;  %v995_v28 = vshll.u32 %v922_v22, 16 }
  0xa1   : > { %3198 = vmatmul.bf16.vlgmr.msra.gmra.mxu2 %v4690_v9  ;;  %1162 = vst [vmem:[#allocation3 + $0x190] sm:$0xf] %v1086_v23  ;;  %v1001_v29 = vshll.u32 %v923_v25, 16  ;;  %v1005_v24 = vshrl.u32 %v923_v25, 16  ;;  %3178 = vmatmul.bf16.vlgmr.msra.gmra.mxu0 %v4546_v14  ;;  %v5289_v30 = vld [vmem:[%s6736_s1 + $0x130] sm:$0xff]  ;;  %v1011_v48 = vshll.u32 %v924_v26, 16 }
  0xa2   : > { %3268 = vmatpush.bf16.msrb.mxu2 %v5274_v58  ;;  %3227 = vmatmul.bf16.vlgmr.msra.gmra.mxu1 %v4550_v10  ;;  %v5297_v36 = vld [vmem:[%s6736_s1 + $0x170] sm:$0xff]  ;;  %912 = vst [vmem:[#allocation3 + $0x1b0] sm:$0xf] %v896_v19  ;;  %v994_v31 = vrot.slane %v992_v27, 4  ;;  %v997_v32 = vrot.slane %v995_v28, 5  ;;  %v5272_v35 = vld [vmem:[%s6736_s1 + $0xa8] sm:$0xff] }
  0xa3   : > { %3317 = vmatpush.bf16.msrb.mxu3 %v5282_v2  ;;  %3366 = vmatpush.bf16.msrb.mxu0 %v5290_v11  ;;  %913 = vst [vmem:[#allocation3 + $0x1d4] sm:$0xf] %v897_v21  ;;  %v1003_v33 = vrot.slane %v1001_v29, 5  ;;  %v1007_v34 = vrot.slane %v1005_v24, 4  ;;  %v5280_v37 = vld [vmem:[%s6736_s1 + $0xe8] sm:$0xff]  ;;  %v1013_v41 = vrot.slane %v1011_v48, 5 }
  0xa4   : > { %3247 = vmatmul.bf16.vlgmr.msra.gmra.mxu3 %v4694_v13  ;;  %3415 = vmatpush.bf16.msrb.mxu1 %v5298_v17  ;;  %v934_v38 = vld [vmem:[%s5823_s21 + $0x48] sm:$0xf]  ;;  %v998_v39 = vor.u32 %v997_v32, %v994_v31  ;;  %v935_v42 = vld [vmem:[%s5823_s21 + $0x4c] sm:$0xf]  ;;  %v936_v43 = vld [vmem:[%s5823_s21 + $0x50] sm:$0x1] }
  0xa5   : > { %v1008_v40 = vor.u32 %v1007_v34, %v1003_v33  ;;  %v5271_v44 = vld [vmem:[%s6736_s1 + $0xa0] sm:$0xff]  ;;  %v1088_v45 = vshrl.u32 %v934_v38, 16  ;;  %v1091_v46 = vshll.u32 %v934_v38, 16  ;;  %v1097_v47 = vshll.u32 %v935_v42, 16  ;;  %v5288_v51 = vld [vmem:[%s6736_s1 + $0x128] sm:$0xff]  ;;  %v5278_v17 = vld [vmem:[%s6736_s1 + $0xd8] sm:$0xff] }
  0xa6   : > { %3269 = vmatpush.bf16.msrb.mxu2 %v5273_v15  ;;  %v1101_v49 = vshrl.u32 %v935_v42, 16  ;;  %v5279_v50 = vld [vmem:[%s6736_s1 + $0xe0] sm:$0xff]  ;;  %v5296_v52 = vld [vmem:[%s6736_s1 + $0x168] sm:$0xff]  ;;  %v999_v53 = vrot.slane %v998_v39, 4  ;;  %v1107_v55 = vshll.u32 %v936_v43, 16  ;;  %v5286_v20 = vld [vmem:[%s6736_s1 + $0x118] sm:$0xff] }
  0xa7   : > { %3318 = vmatpush.bf16.msrb.mxu3 %v5281_v16  ;;  %3367 = vmatpush.bf16.msrb.mxu0 %v5289_v30  ;;  %v1009_v54 = vrot.slane %v1008_v40, 4  ;;  %v4725_v56 = vld [vmem:[#allocation3 + $0x168] sm:$0xf]  ;;  %v5228_v57 = vld [vmem:[#allocation3 + $0x188] sm:$0xf0]  ;;  %v1090_v60 = vrot.slane %v1088_v45, 4 }
  0xa8   : > { %3416 = vmatpush.bf16.msrb.mxu1 %v5297_v36  ;;  %v5188_v58 = vld [vmem:[#allocation3 + $0x4c] sm:$0xf]  ;;  %v4583_v59 = vld [vmem:[#allocation3 + $0x6c] sm:$0xf0]  ;;  %v1093_v62 = vrot.slane %v1091_v46, 5  ;;  %v1099_v63 = vrot.slane %v1097_v47, 5  ;;  %v1004_v5 = vsel %vm5843_vm10, %v999_v53, %v1003_v33  ;;  %v4726_v18 = vor.u32 %v5228_v57, %v4725_v56 }
  0xa9   : > { %v1103_v1 = vrot.slane %v1101_v49, 4  ;;  %v5224_v2 = vld [vmem:[#allocation3 + $0x16c] sm:$0xf]  ;;  %v4581_v3 = vld [vmem:[#allocation3 + $0x48] sm:$0xf]  ;;  %v1014_v6 = vsel %vm5843_vm10, %v1009_v54, %v1013_v41  ;;  %v1109_v9 = vrot.slane %v1107_v55, 5  ;;  %v4586_v19 = vor.u32 %v5188_v58, %v4583_v59 }
  0xaa   : > { %3270 = vmatpush.bf16.msrb.mxu2 %v5272_v35  ;;  %v5192_v4 = vld [vmem:[#allocation3 + $0x68] sm:$0xf0]  ;;  %v888_v7 = vld [vmem:[%s5823_s21 + $0x18] sm:$0xf]  ;;  %1155 = vst [vmem:[#allocation3 + $0x94] sm:$0xf] %v1004_v5  ;;  %v1094_v0 = vor.u32 %v1093_v62, %v1090_v60 }
  0xab   : > { %3319 = vmatpush.bf16.msrb.mxu3 %v5280_v37  ;;  %v1104_v8 = vor.u32 %v1103_v1, %v1099_v63  ;;  %v889_v10 = vld [vmem:[%s5823_s21 + $0x1c] sm:$0xf]  ;;  %v4727_v11 = vld [vmem:[#allocation3 + $0x18c] sm:$0xf0]  ;;  %3368 = vmatpush.bf16.msrb.mxu0 %v5288_v51  ;;  %1156 = vst [vmem:[#allocation3 + $0xb8] sm:$0xf] %v1014_v6  ;;  %v4582_v26 = vor.u32 %v5192_v4, %v4581_v3 }
  0xac   : > { %3417 = vmatpush.bf16.msrb.mxu1 %v5296_v52  ;;  %v5287_v12 = vld [vmem:[%s6736_s1 + $0x120] sm:$0xff]  ;;  %v1095_v14 = vrot.slane %v1094_v0, 4  ;;  %v5270_v16 = vld [vmem:[%s6736_s1 + $0x98] sm:$0xff]  ;;  %904 = vst [vmem:[#allocation3 + $0x90] sm:$0xf] %v888_v7  ;;  %v4730_v25 = vor.u32 %v5224_v2, %v4727_v11  ;;  %v5269_v29 = vld [vmem:[%s6736_s1 + $0x90] sm:$0xff] }
  0xad   : > { %v5295_v13 = vld [vmem:[%s6736_s1 + $0x160] sm:$0xff]  ;;  %v1105_v15 = vrot.slane %v1104_v8, 4  ;;  %905 = vst [vmem:[#allocation3 + $0xb4] sm:$0xf] %v889_v10  ;;  %v5294_v21 = vld [vmem:[%s6736_s1 + $0x158] sm:$0xff]  ;;  %v5277_v32 = vld [vmem:[%s6736_s1 + $0xd0] sm:$0xff] }
  0xae   : > { %3271 = vmatpush.bf16.msrb.mxu2 %v5271_v44  ;;  %v898_v22 = vld [vmem:[%s5823_s21 + $0x54] sm:$0xf]  ;;  %v899_v23 = vld [vmem:[%s5823_s21 + $0x58] sm:$0xf]  ;;  %v1100_v27 = vsel %vm5843_vm10, %v1095_v14, %v1099_v63  ;;  %v925_v24 = vld [vmem:[%s5823_s21 + $0x24] sm:$0xf] }
  0xaf   : > { %3320 = vmatpush.bf16.msrb.mxu3 %v5279_v50  ;;  %v1110_v28 = vsel %vm5843_vm10, %v1105_v15, %v1109_v9  ;;  %914 = vst [vmem:[#allocation3 + $0x1f8] sm:$0xf] %v898_v22  ;;  %v926_v30 = vld [vmem:[%s5823_s21 + $0x28] sm:$0xf]  ;;  %3369 = vmatpush.bf16.msrb.mxu0 %v5287_v12  ;;  %v927_v36 = vld [vmem:[%s5823_s21 + $0x2c] sm:$0x1] }
  0xb0   : > { %1163 = vst [vmem:[#allocation3 + $0x1b4] sm:$0xf] %v1100_v27  ;;  %3418 = vmatpush.bf16.msrb.mxu1 %v5295_v13  ;;  %v1016_v48 = vshrl.u32 %v925_v24, 16  ;;  %v1019_v31 = vshll.u32 %v925_v24, 16  ;;  %v1025_v33 = vshll.u32 %v926_v30, 16  ;;  %v1029_v34 = vshrl.u32 %v926_v30, 16 }
  0xb1   : > { %1164 = vst [vmem:[#allocation3 + $0x1d8] sm:$0xf] %v1110_v28  ;;  %v1035_v35 = vshll.u32 %v927_v36, 16  ;;  %3203 = vmatmul.bf16.gmra.mxu2 %v4726_v18  ;;  %3183 = vmatmul.bf16.gmra.mxu0 %v4582_v26  ;;  %v937_v42 = vld [vmem:[%s5823_s21 + $0x54] sm:$0xf]  ;;  %v5268_v50 = vld [vmem:[%s6736_s1 + $0x88] sm:$0xff] }
  0xb2   : > { %3272 = vmatpush.bf16.msrb.mxu2 %v5270_v16  ;;  %3232 = vmatmul.bf16.gmra.mxu1 %v4586_v19  ;;  %915 = vst [vmem:[#allocation3 + $0x21c] sm:$0xf] %v899_v23  ;;  %v1018_v37 = vrot.slane %v1016_v48, 4  ;;  %v1021_v38 = vrot.slane %v1019_v31, 5  ;;  %v1027_v39 = vrot.slane %v1025_v33, 5  ;;  %v1031_v40 = vrot.slane %v1029_v34, 4 }
  0xb3   : > { %3321 = vmatpush.bf16.msrb.mxu3 %v5278_v17  ;;  %3370 = vmatpush.bf16.msrb.mxu0 %v5286_v20  ;;  %v938_v43 = vld [vmem:[%s5823_s21 + $0x58] sm:$0xf]  ;;  %v1037_v45 = vrot.slane %v1035_v35, 5  ;;  %v939_v46 = vld [vmem:[%s5823_s21 + $0x5c] sm:$0x1]  ;;  %v1112_v47 = vshrl.u32 %v937_v42, 16 }
  0xb4   : > { %3252 = vmatmul.bf16.gmra.mxu3 %v4730_v25  ;;  %3419 = vmatpush.bf16.msrb.mxu1 %v5294_v21  ;;  %v1022_v41 = vor.u32 %v1021_v38, %v1018_v37  ;;  %v1032_v44 = vor.u32 %v1031_v40, %v1027_v39  ;;  %v1115_v49 = vshll.u32 %v937_v42, 16  ;;  %v1121_v52 = vshll.u32 %v938_v43, 16  ;;  %v5276_v54 = vld [vmem:[%s6736_s1 + $0xc8] sm:$0xff]  ;;  %v890_v3 = vld [vmem:[%s5823_s21 + $0x24] sm:$0xf]  ;;  %v5285_v0 = vld [vmem:[%s6736_s1 + $0x110] sm:$0xff] }
  0xb5   : > { %v1125_v53 = vshrl.u32 %v938_v43, 16  ;;  %v1114_v56 = vrot.slane %v1112_v47, 4  ;;  %v1131_v58 = vshll.u32 %v939_v46, 16  ;;  %v4761_v59 = vld [vmem:[#allocation3 + $0x1b0] sm:$0xf]  ;;  %v5293_v14 = vld [vmem:[%s6736_s1 + $0x150] sm:$0xff] }
  0xb6   : > { %3273 = vmatpush.bf16.msrb.mxu2 %v5269_v29  ;;  %v1023_v51 = vrot.slane %v1022_v41, 4  ;;  %v1033_v55 = vrot.slane %v1032_v44, 4  ;;  %v1117_v57 = vrot.slane %v1115_v49, 5  ;;  %v5237_v60 = vld [vmem:[#allocation3 + $0x1d0] sm:$0xf0]  ;;  %v1123_v1 = vrot.slane %v1121_v52, 5 }
  0xb7   : > { %3322 = vmatpush.bf16.msrb.mxu3 %v5277_v32  ;;  %v5197_v62 = vld [vmem:[#allocation3 + $0x94] sm:$0xf]  ;;  %v1127_v2 = vrot.slane %v1125_v53, 4  ;;  %v4619_v4 = vld [vmem:[#allocation3 + $0xb4] sm:$0xf0]  ;;  %v1133_v7 = vrot.slane %v1131_v58, 5  ;;  %3371 = vmatpush.bf16.msrb.mxu0 %v5285_v0  ;;  %v4762_v21 = vor.u32 %v5237_v60, %v4761_v59 }
  0xb8   : > { %v1028_v63 = vsel %vm5843_vm10, %v1023_v51, %v1027_v39  ;;  %v1038_v5 = vsel %vm5843_vm10, %v1033_v55, %v1037_v45  ;;  %v1118_v6 = vor.u32 %v1117_v57, %v1114_v56  ;;  %v5233_v8 = vld [vmem:[#allocation3 + $0x1b4] sm:$0xf]  ;;  %v4763_v9 = vld [vmem:[#allocation3 + $0x1d4] sm:$0xf0]  ;;  %v4617_v10 = vld [vmem:[#allocation3 + $0x90] sm:$0xf]  ;;  %3420 = vmatpush.bf16.msrb.mxu1 %v5293_v14  ;;  %v4622_v22 = vor.u32 %v5197_v62, %v4619_v4 }
  0xb9   : > { %1157 = vst [vmem:[#allocation3 + $0xdc] sm:$0xf] %v1028_v63  ;;  %v5201_v11 = vld [vmem:[#allocation3 + $0xb0] sm:$0xf0]  ;;  %v1128_v12 = vor.u32 %v1127_v2, %v1123_v1  ;;  %v891_v13 = vld [vmem:[%s5823_s21 + $0x28] sm:$0xf]  ;;  %v4766_v30 = vor.u32 %v5233_v8, %v4763_v9 }
  0xba   : > { %3274 = vmatpush.bf16.msrb.mxu2 %v5268_v50  ;;  %1158 = vst [vmem:[#allocation3 + $0x100] sm:$0xf] %v1038_v5  ;;  %v5267_v15 = vld [vmem:[%s6736_s1 + $0x80] sm:$0xff]  ;;  %v1119_v16 = vrot.slane %v1118_v6, 4  ;;  %v5284_v18 = vld [vmem:[%s6736_s1 + $0x108] sm:$0xff]  ;;  %v4618_v36 = vor.u32 %v5201_v11, %v4617_v10  ;;  %v5306_v46 = vld [vmem:[%s6736_s1 + $0x1b8] sm:$0xff] }
  0xbb   : > { %3323 = vmatpush.bf16.msrb.mxu3 %v5276_v54  ;;  %906 = vst [vmem:[#allocation3 + $0xd8] sm:$0xf] %v890_v3  ;;  %v5275_v17 = vld [vmem:[%s6736_s1 + $0xc0] sm:$0xff]  ;;  %v1129_v19 = vrot.slane %v1128_v12, 4  ;;  %v5292_v20 = vld [vmem:[%s6736_s1 + $0x148] sm:$0xff]  ;;  %3372 = vmatpush.bf16.msrb.mxu0 %v5284_v18  ;;  %v5314_v57 = vld [vmem:[%s6736_s1 + $0x1f8] sm:$0xff] }
  0xbc   : > { %907 = vst [vmem:[#allocation3 + $0xfc] sm:$0xf] %v891_v13  ;;  %v1124_v23 = vsel %vm5843_vm10, %v1119_v16, %v1123_v1  ;;  %v1167_v25 = vld [vmem:[%s5823_s21] sm:$0xe]  ;;  %v1168_v26 = vld [vmem:[%s5823_s21 + $0x4] sm:$0xf]  ;;  %3421 = vmatpush.bf16.msrb.mxu1 %v5292_v20 }
  0xbd   : > { %v1169_v27 = vld [vmem:[%s5823_s21 + $0x8] sm:$0x1]  ;;  %v1134_v28 = vsel %vm5843_vm10, %v1129_v19, %v1133_v7  ;;  %1165 = vst [vmem:[#allocation3 + $0x1fc] sm:$0xf] %v1124_v23  ;;  %v4387_v29 = vrot.slane %v1167_v25, 9  ;;  %v1220_v24 = vrot.slane %v1168_v26, 5 }
  0xbe   : > { %3275 = vmatpush.bf16.msrb.mxu2 %v5267_v15  ;;  %1166 = vst [vmem:[#allocation3 + $0x220] sm:$0xf] %v1134_v28  ;;  %v1223_v31 = vrot.slane %v1169_v27, 5  ;;  %v4397_v32 = vld [vmem:[%s5823_s21 + $0xc] sm:$0xf]  ;;  %v5291_v33 = vld [vmem:[%s6736_s1 + $0x140] sm:$0xff] }
  0xbf   : > { %3324 = vmatpush.bf16.msrb.mxu3 %v5275_v17  ;;  %v5283_v34 = vld [vmem:[%s6736_s1 + $0x100] sm:$0xff]  ;;  %v1221_v35 = vsel %vm6027_vm13, %v4387_v29, %v1220_v24  ;;  %v1222_v37 = vrot.slane %v1220_v24, 4  ;;  %v4398_v38 = vld [vmem:[%s5823_s21 + $0x10] sm:$0xf]  ;;  %v4437_v39 = vld [vmem:[%s5823_s21 + $0xc] sm:$0xe] }
  0xc0   : > { %1290 = vst [vmem:[#allocation3 + $0x8] sm:$0xf] %v1221_v35  ;;  %v4438_v41 = vld [vmem:[%s5823_s21 + $0x10] sm:$0xf]  ;;  %v4439_v42 = vld [vmem:[%s5823_s21 + $0x14] sm:$0x1]  ;;  %3422 = vmatpush.bf16.msrb.mxu1 %v5291_v33  ;;  %3373 = vmatpush.bf16.msrb.mxu0 %v5283_v34 }
  0xc1   : > { %3208 = vmatmul.bf16.gmra.mxu2 %v4762_v21  ;;  %v1224_v40 = vsel %vm6027_vm13, %v1222_v37, %v1223_v31  ;;  %1326 = vst [vmem:[#allocation3 + $0xc] sm:$0xf] %v4397_v32  ;;  %3188 = vmatmul.bf16.gmra.mxu0 %v4618_v36  ;;  %v4461_v43 = vrot.slane %v4437_v39, 9  ;;  %v1640_v44 = vrot.slane %v4438_v41, 5  ;;  %v1643_v45 = vrot.slane %v4439_v42, 5  ;;  %v5322_v1 = vld [vmem:[%s6736_s1 + $0x238] sm:$0xff] }
  0xc2   : > { %3237 = vmatmul.bf16.gmra.mxu1 %v4622_v22  ;;  %1291 = vst [vmem:[#allocation3 + $0x2c] sm:$0xf] %v1224_v40  ;;  %v4413_v47 = vld [vmem:[%s5823_s21 + $0xc] sm:$0xf]  ;;  %v4414_v49 = vld [vmem:[%s5823_s21 + $0x10] sm:$0xf]  ;;  %3464 = vmatpush.bf16.msra.mxu2 %v5306_v46 }
  0xc3   : > { %1327 = vst [vmem:[#allocation3 + $0x30] sm:$0xf] %v4398_v38  ;;  %v1641_v50 = vsel %vm6027_vm13, %v4461_v43, %v1640_v44  ;;  %v1642_v51 = vrot.slane %v1640_v44, 4  ;;  %v4415_v52 = vld [vmem:[%s5823_s21 + $0x14] sm:$0x1]  ;;  %v1367_v53 = vshrl.u32 %v4413_v47, 16  ;;  %3513 = vmatpush.bf16.msra.mxu3 %v5314_v57 }
  0xc4   : > { %3257 = vmatmul.bf16.gmra.mxu3 %v4766_v30  ;;  %1710 = vst [vmem:[#allocation3 + $0x14] sm:$0xf] %v1641_v50  ;;  %v1370_v54 = vshll.u32 %v4413_v47, 16  ;;  %v1376_v55 = vshll.u32 %v4414_v49, 16  ;;  %v1380_v56 = vshrl.u32 %v4414_v49, 16  ;;  %v1386_v63 = vshll.u32 %v4415_v52, 16  ;;  %3562 = vmatpush.bf16.msra.mxu0 %v5322_v1 }
  0xc5   : > { %v4797_v58 = vld [vmem:[#allocation3 + $0x1f8] sm:$0xf]  ;;  %v5246_v59 = vld [vmem:[#allocation3 + $0x218] sm:$0xf0]  ;;  %v1644_v60 = vsel %vm6027_vm13, %v1642_v51, %v1643_v45  ;;  %v1369_v62 = vrot.slane %v1367_v53, 4  ;;  %v5330_v2 = vld [vmem:[%s6737_s2 + $0x38] sm:$0xff] }
  0xc6   : > { %v5206_v3 = vld [vmem:[#allocation3 + $0xdc] sm:$0xf]  ;;  %v4655_v4 = vld [vmem:[#allocation3 + $0xfc] sm:$0xf0]  ;;  %1711 = vst [vmem:[#allocation3 + $0x38] sm:$0xf] %v1644_v60  ;;  %3987 = vmatpush.bf16.msra.mxu1 %v5330_v2  ;;  %v4798_v21 = vor.u32 %v5246_v59, %v4797_v58 }
  0xc7   : > { %v1372_v5 = vrot.slane %v1370_v54, 5  ;;  %v1378_v6 = vrot.slane %v1376_v55, 5  ;;  %v5242_v7 = vld [vmem:[#allocation3 + $0x1fc] sm:$0xf]  ;;  %v4799_v0 = vld [vmem:[#allocation3 + $0x21c] sm:$0xf0]  ;;  %v4658_v26 = vor.u32 %v5206_v3, %v4655_v4 }
  0xc8   : > { %v4653_v8 = vld [vmem:[#allocation3 + $0xd8] sm:$0xf]  ;;  %v5210_v9 = vld [vmem:[#allocation3 + $0xf8] sm:$0xf0]  ;;  %v1382_v10 = vrot.slane %v1380_v56, 4  ;;  %v1388_v13 = vrot.slane %v1386_v63, 5  ;;  %v4802_v24 = vor.u32 %v5242_v7, %v4799_v0 }
  0xc9   : > { %v1170_v11 = vld [vmem:[%s5823_s21 + $0xc] sm:$0xe]  ;;  %v1373_v12 = vor.u32 %v1372_v5, %v1369_v62  ;;  %v1171_v14 = vld [vmem:[%s5823_s21 + $0x10] sm:$0xf]  ;;  %v1172_v15 = vld [vmem:[%s5823_s21 + $0x14] sm:$0x1]  ;;  %v4654_v30 = vor.u32 %v5210_v9, %v4653_v8 }
  0xca   : > { %v1383_v16 = vor.u32 %v1382_v10, %v1378_v6  ;;  %v4388_v17 = vrot.slane %v1170_v11, 9  ;;  %v1227_v18 = vrot.slane %v1171_v14, 5  ;;  %v4399_v19 = vld [vmem:[%s5823_s21 + $0x18] sm:$0xf]  ;;  %v4400_v20 = vld [vmem:[%s5823_s21 + $0x1c] sm:$0xf] }
  0xcb   : > { %v1374_v22 = vrot.slane %v1373_v12, 4  ;;  %v1230_v23 = vrot.slane %v1172_v15, 5  ;;  %1328 = vst [vmem:[#allocation3 + $0x54] sm:$0xf] %v4399_v19  ;;  %v4440_v25 = vld [vmem:[%s5823_s21 + $0x18] sm:$0xe] }
  0xcc   : > { %v1384_v27 = vrot.slane %v1383_v16, 4  ;;  %v1228_v28 = vsel %vm6027_vm13, %v4388_v17, %v1227_v18  ;;  %v1229_v29 = vrot.slane %v1227_v18, 4  ;;  %1329 = vst [vmem:[#allocation3 + $0x78] sm:$0xf] %v4400_v20  ;;  %v4441_v31 = vld [vmem:[%s5823_s21 + $0x1c] sm:$0xf] }
  0xcd   : > { %v1379_v36 = vsel %vm5843_vm10, %v1374_v22, %v1378_v6  ;;  %1292 = vst [vmem:[#allocation3 + $0x50] sm:$0xf] %v1228_v28  ;;  %v4442_v32 = vld [vmem:[%s5823_s21 + $0x20] sm:$0x1]  ;;  %v4462_v35 = vrot.slane %v4440_v25, 9  ;;  %v1647_v37 = vrot.slane %v4441_v31, 5 }
  0xce   : > { %v1389_v33 = vsel %vm5843_vm10, %v1384_v27, %v1388_v13  ;;  %1574 = vst [vmem:[#allocation3 + $0x10] sm:$0xf] %v1379_v36  ;;  %v1231_v34 = vsel %vm6027_vm13, %v1229_v29, %v1230_v23  ;;  %v1650_v38 = vrot.slane %v4442_v32, 5  ;;  %v4416_v39 = vld [vmem:[%s5823_s21 + $0x18] sm:$0xf]  ;;  %v5305_v44 = vld [vmem:[%s6736_s1 + $0x1b0] sm:$0xff] }
  0xcf   : > { %1575 = vst [vmem:[#allocation3 + $0x34] sm:$0xf] %v1389_v33  ;;  %v1648_v40 = vsel %vm6027_vm13, %v4462_v35, %v1647_v37  ;;  %v1649_v41 = vrot.slane %v1647_v37, 4  ;;  %v4417_v42 = vld [vmem:[%s5823_s21 + $0x1c] sm:$0xf]  ;;  %v1391_v43 = vshrl.u32 %v4416_v39, 16  ;;  %3465 = vmatpush.bf16.msra.mxu2 %v5305_v44 }
  0xd0   : > { %1293 = vst [vmem:[#allocation3 + $0x74] sm:$0xf] %v1231_v34  ;;  %v4418_v45 = vld [vmem:[%s5823_s21 + $0x20] sm:$0x1]  ;;  %v1394_v46 = vshll.u32 %v4416_v39, 16  ;;  %v1400_v50 = vshll.u32 %v4417_v42, 16 }
  0xd1   : > { %3213 = vmatmul.bf16.gmra.mxu2 %v4798_v21  ;;  %3193 = vmatmul.bf16.gmra.mxu0 %v4654_v30  ;;  %1712 = vst [vmem:[#allocation3 + $0x5c] sm:$0xf] %v1648_v40  ;;  %v1651_v47 = vsel %vm6027_vm13, %v1649_v41, %v1650_v38  ;;  %v1393_v49 = vrot.slane %v1391_v43, 4  ;;  %v1404_v51 = vshrl.u32 %v4417_v42, 16  ;;  %v5313_v52 = vld [vmem:[%s6736_s1 + $0x1f0] sm:$0xff]  ;;  %v1410_v54 = vshll.u32 %v4418_v45, 16 }
  0xd2   : > { %3242 = vmatmul.bf16.gmra.mxu1 %v4658_v26  ;;  %1713 = vst [vmem:[#allocation3 + $0x80] sm:$0xf] %v1651_v47  ;;  %v1396_v53 = vrot.slane %v1394_v46, 5  ;;  %v1402_v55 = vrot.slane %v1400_v50, 5  ;;  %3514 = vmatpush.bf16.msra.mxu3 %v5313_v52  ;;  %v5321_v57 = vld [vmem:[%s6736_s1 + $0x230] sm:$0xff]  ;;  %v5304_v44 = vld [vmem:[%s6736_s1 + $0x1a8] sm:$0xff] }
  0xd3   : > { %v1406_v56 = vrot.slane %v1404_v51, 4  ;;  %v5329_v58 = vld [vmem:[%s6737_s2 + $0x30] sm:$0xff]  ;;  %v1173_v60 = vld [vmem:[%s5823_s21 + $0x18] sm:$0xe]  ;;  %v4553_v62 = vld [vmem:[#allocation3 + $0x8] sm:$0xf]  ;;  %3563 = vmatpush.bf16.msra.mxu0 %v5321_v57  ;;  %3466 = vmatpush.bf16.msra.mxu2 %v5304_v44 }
  0xd4   : > { %3262 = vmatmul.bf16.gmra.mxu3 %v4802_v24  ;;  %v1397_v59 = vor.u32 %v1396_v53, %v1393_v49  ;;  %v5184_v63 = vld [vmem:[#allocation3 + $0x28] sm:$0xf0]  ;;  %v1412_v2 = vrot.slane %v1410_v54, 5  ;;  %3988 = vmatpush.bf16.msra.mxu1 %v5329_v58  ;;  %v1174_v3 = vld [vmem:[%s5823_s21 + $0x1c] sm:$0xf]  ;;  %v4389_v0 = vrot.slane %v1173_v60, 9 }
  0xd5   : > { %v1407_v1 = vor.u32 %v1406_v56, %v1402_v55  ;;  %v1175_v4 = vld [vmem:[%s5823_s21 + $0x20] sm:$0x1]  ;;  %v5181_v5 = vld [vmem:[#allocation3 + $0x14] sm:$0xf]  ;;  %v4563_v6 = vld [vmem:[#allocation3 + $0x34] sm:$0xf0]  ;;  %v4554_v22 = vor.u32 %v5184_v63, %v4553_v62 }
  0xd6   : > { %v1398_v7 = vrot.slane %v1397_v59, 4  ;;  %v1234_v8 = vrot.slane %v1174_v3, 5  ;;  %v5180_v9 = vld [vmem:[#allocation3 + $0xc] sm:$0xf]  ;;  %v4555_v10 = vld [vmem:[#allocation3 + $0x2c] sm:$0xf0]  ;;  %v4566_v27 = vor.u32 %v5181_v5, %v4563_v6 }
  0xd7   : > { %v4561_v11 = vld [vmem:[#allocation3 + $0x10] sm:$0xf]  ;;  %v1408_v12 = vrot.slane %v1407_v1, 4  ;;  %v1237_v13 = vrot.slane %v1175_v4, 5  ;;  %v4401_v14 = vld [vmem:[%s5823_s21 + $0x24] sm:$0xf]  ;;  %v4558_v30 = vor.u32 %v5180_v9, %v4555_v10 }
  0xd8   : > { %v5185_v15 = vld [vmem:[#allocation3 + $0x30] sm:$0xf0]  ;;  %v1403_v16 = vsel %vm5843_vm10, %v1398_v7, %v1402_v55  ;;  %v1235_v17 = vsel %vm6027_vm13, %v4389_v0, %v1234_v8  ;;  %v1236_v18 = vrot.slane %v1234_v8, 4  ;;  %1330 = vst [vmem:[#allocation3 + $0x9c] sm:$0xf] %v4401_v14 }
  0xd9   : > { %v1413_v19 = vsel %vm5843_vm10, %v1408_v12, %v1412_v2  ;;  %1576 = vst [vmem:[#allocation3 + $0x58] sm:$0xf] %v1403_v16  ;;  %v4402_v20 = vld [vmem:[%s5823_s21 + $0x28] sm:$0xf]  ;;  %v4443_v21 = vld [vmem:[%s5823_s21 + $0x24] sm:$0xe]  ;;  %v4562_v36 = vor.u32 %v5185_v15, %v4561_v11 }
  0xda   : > { %1577 = vst [vmem:[#allocation3 + $0x7c] sm:$0xf] %v1413_v19  ;;  %v1238_v23 = vsel %vm6027_vm13, %v1236_v18, %v1237_v13  ;;  %v4444_v25 = vld [vmem:[%s5823_s21 + $0x28] sm:$0xf]  ;;  %v4445_v26 = vld [vmem:[%s5823_s21 + $0x2c] sm:$0x1] }
  0xdb   : > { %1294 = vst [vmem:[#allocation3 + $0x98] sm:$0xf] %v1235_v17  ;;  %v4463_v28 = vrot.slane %v4443_v21, 9  ;;  %v1654_v29 = vrot.slane %v4444_v25, 5  ;;  %v1657_v24 = vrot.slane %v4445_v26, 5  ;;  %v5312_v49 = vld [vmem:[%s6736_s1 + $0x1e8] sm:$0xff] }
  0xdc   : > { %1295 = vst [vmem:[#allocation3 + $0xbc] sm:$0xf] %v1238_v23  ;;  %v4419_v31 = vld [vmem:[%s5823_s21 + $0x24] sm:$0xf]  ;;  %v4420_v32 = vld [vmem:[%s5823_s21 + $0x28] sm:$0xf]  ;;  %3515 = vmatpush.bf16.msra.mxu3 %v5312_v49 }
  0xdd   : > { %1331 = vst [vmem:[#allocation3 + $0xc0] sm:$0xf] %v4402_v20  ;;  %v1655_v33 = vsel %vm6027_vm13, %v4463_v28, %v1654_v29  ;;  %v1656_v34 = vrot.slane %v1654_v29, 4  ;;  %v4421_v35 = vld [vmem:[%s5823_s21 + $0x2c] sm:$0x1]  ;;  %v1415_v37 = vshrl.u32 %v4419_v31, 16 }
  0xde   : > { %1714 = vst [vmem:[#allocation3 + $0xa4] sm:$0xf] %v1655_v33  ;;  %v1418_v38 = vshll.u32 %v4419_v31, 16  ;;  %v1424_v39 = vshll.u32 %v4420_v32, 16  ;;  %v1428_v40 = vshrl.u32 %v4420_v32, 16  ;;  %v1434_v43 = vshll.u32 %v4421_v35, 16 }
  0xdf   : > { %v1658_v41 = vsel %vm6027_vm13, %v1656_v34, %v1657_v24  ;;  %v1417_v42 = vrot.slane %v1415_v37, 4  ;;  %v5320_v51 = vld [vmem:[%s6736_s1 + $0x228] sm:$0xff]  ;;  %v4422_v53 = vld [vmem:[%s5823_s21 + $0x30] sm:$0xf]  ;;  %v1176_v56 = vld [vmem:[%s5823_s21 + $0x24] sm:$0xe] }
  0xe0   : > { %1715 = vst [vmem:[#allocation3 + $0xc8] sm:$0xf] %v1658_v41  ;;  %v1420_v45 = vrot.slane %v1418_v38, 5  ;;  %v1426_v46 = vrot.slane %v1424_v39, 5  ;;  %v1430_v47 = vrot.slane %v1428_v40, 4  ;;  %v5328_v52 = vld [vmem:[%s6737_s2 + $0x28] sm:$0xff]  ;;  %3564 = vmatpush.bf16.msra.mxu0 %v5320_v51 }
  0xe1   : > { %3276 = vmatmul.bf16.vlgmr.msrb.gmra.mxu2 %v4554_v22  ;;  %3374 = vmatmul.bf16.vlgmr.msrb.gmra.mxu0 %v4562_v36  ;;  %v1436_v55 = vrot.slane %v1434_v43, 5  ;;  %v1177_v57 = vld [vmem:[%s5823_s21 + $0x28] sm:$0xf]  ;;  %v1178_v59 = vld [vmem:[%s5823_s21 + $0x2c] sm:$0x1]  ;;  %v4390_v60 = vrot.slane %v1176_v56, 9 }
  0xe2   : > { %3423 = vmatmul.bf16.vlgmr.msrb.gmra.mxu1 %v4566_v27  ;;  %v1421_v50 = vor.u32 %v1420_v45, %v1417_v42  ;;  %v1431_v54 = vor.u32 %v1430_v47, %v1426_v46  ;;  %v4589_v62 = vld [vmem:[#allocation3 + $0x50] sm:$0xf]  ;;  %v5193_v63 = vld [vmem:[#allocation3 + $0x70] sm:$0xf0]  ;;  %v5190_v1 = vld [vmem:[#allocation3 + $0x5c] sm:$0xf] }
  0xe3   : > { %3989 = vmatpush.bf16.msra.mxu1 %v5328_v52  ;;  %v4599_v2 = vld [vmem:[#allocation3 + $0x7c] sm:$0xf0]  ;;  %v1241_v4 = vrot.slane %v1177_v57, 5  ;;  %v1244_v5 = vrot.slane %v1178_v59, 5  ;;  %v4403_v7 = vld [vmem:[%s5823_s21 + $0x30] sm:$0xf]  ;;  %v4590_v26 = vor.u32 %v5193_v63, %v4589_v62 }
  0xe4   : > { %3325 = vmatmul.bf16.vlgmr.msrb.gmra.mxu3 %v4558_v30  ;;  %v1422_v58 = vrot.slane %v1421_v50, 4  ;;  %v1432_v3 = vrot.slane %v1431_v54, 4  ;;  %v4446_v0 = vld [vmem:[%s5823_s21 + $0x30] sm:$0xe]  ;;  %v1439_v8 = vshrl.u32 %v4422_v53, 16  ;;  %v1442_v9 = vshll.u32 %v4422_v53, 16 }
  0xe5   : > { %v5189_v10 = vld [vmem:[#allocation3 + $0x54] sm:$0xf]  ;;  %v4591_v11 = vld [vmem:[#allocation3 + $0x74] sm:$0xf0]  ;;  %v5194_v13 = vld [vmem:[#allocation3 + $0x78] sm:$0xf0]  ;;  %v1242_v15 = vsel %vm6027_vm13, %v4390_v60, %v1241_v4  ;;  %v4602_v27 = vor.u32 %v5190_v1, %v4599_v2 }
  0xe6   : > { %v1427_v6 = vsel %vm5843_vm10, %v1422_v58, %v1426_v46  ;;  %v4597_v12 = vld [vmem:[#allocation3 + $0x58] sm:$0xf]  ;;  %v1437_v14 = vsel %vm5843_vm10, %v1432_v3, %v1436_v55  ;;  %v1243_v16 = vrot.slane %v1241_v4, 4  ;;  %v4404_v17 = vld [vmem:[%s5823_s21 + $0x34] sm:$0xf]  ;;  %v4464_v18 = vrot.slane %v4446_v0, 9 }
  0xe7   : > { %1578 = vst [vmem:[#allocation3 + $0xa0] sm:$0xf] %v1427_v6  ;;  %v4447_v19 = vld [vmem:[%s5823_s21 + $0x34] sm:$0xf]  ;;  %v4448_v20 = vld [vmem:[%s5823_s21 + $0x38] sm:$0x1]  ;;  %v4594_v33 = vor.u32 %v5189_v10, %v4591_v11  ;;  %v4598_v34 = vor.u32 %v5194_v13, %v4597_v12 }
  0xe8   : > { %1579 = vst [vmem:[#allocation3 + $0xc4] sm:$0xf] %v1437_v14  ;;  %v1245_v21 = vsel %vm6027_vm13, %v1243_v16, %v1244_v5  ;;  %v1661_v22 = vrot.slane %v4447_v19, 5  ;;  %v1664_v23 = vrot.slane %v4448_v20, 5  ;;  %v4423_v25 = vld [vmem:[%s5823_s21 + $0x34] sm:$0xf] }
  0xe9   : > { %1296 = vst [vmem:[#allocation3 + $0xe0] sm:$0xf] %v1242_v15  ;;  %v4424_v28 = vld [vmem:[%s5823_s21 + $0x38] sm:$0x1]  ;;  %v1441_v29 = vrot.slane %v1439_v8, 4  ;;  %v1444_v24 = vrot.slane %v1442_v9, 5 }
  0xea   : > { %1297 = vst [vmem:[#allocation3 + $0x104] sm:$0xf] %v1245_v21  ;;  %v1662_v30 = vsel %vm6027_vm13, %v4464_v18, %v1661_v22  ;;  %v1663_v36 = vrot.slane %v1661_v22, 4  ;;  %v1448_v31 = vshll.u32 %v4423_v25, 16  ;;  %v1452_v32 = vshrl.u32 %v4423_v25, 16  ;;  %v5303_v45 = vld [vmem:[%s6736_s1 + $0x1a0] sm:$0xff] }
  0xeb   : > { %1332 = vst [vmem:[#allocation3 + $0xe4] sm:$0xf] %v4403_v7  ;;  %v1445_v35 = vor.u32 %v1444_v24, %v1441_v29  ;;  %v1458_v37 = vshll.u32 %v4424_v28, 16  ;;  %v4425_v44 = vld [vmem:[%s5823_s21 + $0x3c] sm:$0xf]  ;;  %v5311_v47 = vld [vmem:[%s6736_s1 + $0x1e0] sm:$0xff]  ;;  %3467 = vmatpush.bf16.msra.mxu2 %v5303_v45 }
  0xec   : > { %1333 = vst [vmem:[#allocation3 + $0x108] sm:$0xf] %v4404_v17  ;;  %v1665_v38 = vsel %vm6027_vm13, %v1663_v36, %v1664_v23  ;;  %v1450_v39 = vrot.slane %v1448_v31, 5  ;;  %v1454_v40 = vrot.slane %v1452_v32, 4  ;;  %v1463_v49 = vshrl.u32 %v4425_v44, 16  ;;  %v5319_v51 = vld [vmem:[%s6736_s1 + $0x220] sm:$0xff]  ;;  %3516 = vmatpush.bf16.msra.mxu3 %v5311_v47 }
  0xed   : > { %1716 = vst [vmem:[#allocation3 + $0xec] sm:$0xf] %v1662_v30  ;;  %v1446_v41 = vrot.slane %v1445_v35, 4  ;;  %v1460_v43 = vrot.slane %v1458_v37, 5  ;;  %v1466_v52 = vshll.u32 %v4425_v44, 16  ;;  %v5327_v53 = vld [vmem:[%s6737_s2 + $0x20] sm:$0xff]  ;;  %3565 = vmatpush.bf16.msra.mxu0 %v5319_v51 }
  0xee   : > { %1717 = vst [vmem:[#allocation3 + $0x110] sm:$0xf] %v1665_v38  ;;  %v1455_v42 = vor.u32 %v1454_v40, %v1450_v39  ;;  %v1179_v54 = vld [vmem:[%s5823_s21 + $0x30] sm:$0xe]  ;;  %v4426_v55 = vld [vmem:[%s5823_s21 + $0x40] sm:$0xf]  ;;  %3990 = vmatpush.bf16.msra.mxu1 %v5327_v53 }
  0xef   : > { %v1451_v46 = vsel %vm5843_vm10, %v1446_v41, %v1450_v39  ;;  %v1180_v57 = vld [vmem:[%s5823_s21 + $0x34] sm:$0xf]  ;;  %v1181_v58 = vld [vmem:[%s5823_s21 + $0x38] sm:$0x1]  ;;  %v1465_v59 = vrot.slane %v1463_v49, 4  ;;  %v4391_v60 = vrot.slane %v1179_v54, 9 }
  0xf0   : > { %v1456_v50 = vrot.slane %v1455_v42, 4  ;;  %1580 = vst [vmem:[#allocation3 + $0xe8] sm:$0xf] %v1451_v46  ;;  %v1248_v62 = vrot.slane %v1180_v57, 5  ;;  %v4625_v63 = vld [vmem:[#allocation3 + $0x98] sm:$0xf] }
  0xf1   : > { %3281 = vmatmul.bf16.gmra.mxu2 %v4590_v26  ;;  %3379 = vmatmul.bf16.gmra.mxu0 %v4598_v34  ;;  %v5202_v1 = vld [vmem:[#allocation3 + $0xb8] sm:$0xf0]  ;;  %v1251_v2 = vrot.slane %v1181_v58, 5  ;;  %v4405_v3 = vld [vmem:[%s5823_s21 + $0x3c] sm:$0xf]  ;;  %v1468_v4 = vrot.slane %v1466_v52, 5 }
  0xf2   : > { %3428 = vmatmul.bf16.gmra.mxu1 %v4602_v27  ;;  %v1461_v56 = vsel %vm5843_vm10, %v1456_v50, %v1460_v43  ;;  %v5199_v5 = vld [vmem:[#allocation3 + $0xa4] sm:$0xf]  ;;  %v4635_v6 = vld [vmem:[#allocation3 + $0xc4] sm:$0xf0]  ;;  %v1249_v7 = vsel %vm6027_vm13, %v4391_v60, %v1248_v62  ;;  %v1250_v0 = vrot.slane %v1248_v62, 4  ;;  %v1472_v9 = vshll.u32 %v4426_v55, 16 }
  0xf3   : > { %1581 = vst [vmem:[#allocation3 + $0x10c] sm:$0xf] %v1461_v56  ;;  %v4406_v8 = vld [vmem:[%s5823_s21 + $0x40] sm:$0xf]  ;;  %v5198_v10 = vld [vmem:[#allocation3 + $0x9c] sm:$0xf]  ;;  %v1469_v15 = vor.u32 %v1468_v4, %v1465_v59  ;;  %v4626_v23 = vor.u32 %v5202_v1, %v4625_v63  ;;  %v4638_v28 = vor.u32 %v5199_v5, %v4635_v6 }
  0xf4   : > { %3330 = vmatmul.bf16.gmra.mxu3 %v4594_v33  ;;  %1334 = vst [vmem:[#allocation3 + $0x12c] sm:$0xf] %v4405_v3  ;;  %v4627_v11 = vld [vmem:[#allocation3 + $0xbc] sm:$0xf0]  ;;  %v4449_v13 = vld [vmem:[%s5823_s21 + $0x3c] sm:$0xe]  ;;  %v1252_v17 = vsel %vm6027_vm13, %v1250_v0, %v1251_v2 }
  0xf5   : > { %v4633_v12 = vld [vmem:[#allocation3 + $0xa0] sm:$0xf]  ;;  %1298 = vst [vmem:[#allocation3 + $0x128] sm:$0xf] %v1249_v7  ;;  %v4450_v14 = vld [vmem:[%s5823_s21 + $0x40] sm:$0xf]  ;;  %v4630_v36 = vor.u32 %v5198_v10, %v4627_v11 }
  0xf6   : > { %v5203_v16 = vld [vmem:[#allocation3 + $0xc0] sm:$0xf0]  ;;  %1335 = vst [vmem:[#allocation3 + $0x150] sm:$0xf] %v4406_v8  ;;  %v4451_v18 = vld [vmem:[%s5823_s21 + $0x44] sm:$0x1] }
  0xf7   : > { %1299 = vst [vmem:[#allocation3 + $0x14c] sm:$0xf] %v1252_v17  ;;  %v4465_v19 = vrot.slane %v4449_v13, 9  ;;  %v1668_v20 = vrot.slane %v4450_v14, 5  ;;  %v1671_v21 = vrot.slane %v4451_v18, 5  ;;  %v1470_v22 = vrot.slane %v1469_v15, 4 }
  0xf8   : > { %v4427_v25 = vld [vmem:[%s5823_s21 + $0x44] sm:$0x1]  ;;  %v1474_v26 = vrot.slane %v1472_v9, 5  ;;  %v1476_v27 = vshrl.u32 %v4426_v55, 16  ;;  %v4634_v31 = vor.u32 %v5203_v16, %v4633_v12  ;;  %v4428_v38 = vld [vmem:[%s5823_s21 + $0x48] sm:$0xf] }
  0xf9   : > { %v1669_v29 = vsel %vm6027_vm13, %v4465_v19, %v1668_v20  ;;  %v1670_v24 = vrot.slane %v1668_v20, 4  ;;  %v1482_v30 = vshll.u32 %v4427_v25, 16  ;;  %v1487_v39 = vshrl.u32 %v4428_v38, 16  ;;  %v5302_v41 = vld [vmem:[%s6736_s1 + $0x198] sm:$0xff]  ;;  %v4429_v44 = vld [vmem:[%s5823_s21 + $0x4c] sm:$0xf] }
  0xfa   : > { %1718 = vst [vmem:[#allocation3 + $0x134] sm:$0xf] %v1669_v29  ;;  %v1475_v32 = vsel %vm5843_vm10, %v1470_v22, %v1474_v26  ;;  %v1478_v33 = vrot.slane %v1476_v27, 4  ;;  %v1490_v40 = vshll.u32 %v4428_v38, 16  ;;  %v5310_v43 = vld [vmem:[%s6736_s1 + $0x1d8] sm:$0xff]  ;;  %3468 = vmatpush.bf16.msra.mxu2 %v5302_v41  ;;  %v1496_v60 = vshll.u32 %v4429_v44, 16 }
  0xfb   : > { %v1672_v34 = vsel %vm6027_vm13, %v1670_v24, %v1671_v21  ;;  %1582 = vst [vmem:[#allocation3 + $0x130] sm:$0xf] %v1475_v32  ;;  %v1484_v37 = vrot.slane %v1482_v30, 5  ;;  %v1183_v45 = vld [vmem:[%s5823_s21 + $0x40] sm:$0xf]  ;;  %v1489_v47 = vrot.slane %v1487_v39, 4  ;;  %3517 = vmatpush.bf16.msra.mxu3 %v5310_v43 }
  0xfc   : > { %1719 = vst [vmem:[#allocation3 + $0x158] sm:$0xf] %v1672_v34  ;;  %v1479_v35 = vor.u32 %v1478_v33, %v1474_v26  ;;  %v4453_v46 = vld [vmem:[%s5823_s21 + $0x4c] sm:$0xf]  ;;  %v1492_v49 = vrot.slane %v1490_v40, 5  ;;  %v1255_v53 = vrot.slane %v1183_v45, 5 }
  0xfd   : > { %v1182_v51 = vld [vmem:[%s5823_s21 + $0x3c] sm:$0xe]  ;;  %v1184_v52 = vld [vmem:[%s5823_s21 + $0x44] sm:$0x1]  ;;  %v1675_v54 = vrot.slane %v4453_v46, 5  ;;  %v1498_v16 = vrot.slane %v1496_v60, 5 }
  0xfe   : > { %v1480_v42 = vrot.slane %v1479_v35, 4  ;;  %v4392_v55 = vrot.slane %v1182_v51, 9  ;;  %v1258_v56 = vrot.slane %v1184_v52, 5  ;;  %v1493_v57 = vor.u32 %v1492_v49, %v1489_v47  ;;  %v4452_v59 = vld [vmem:[%s5823_s21 + $0x48] sm:$0xe]  ;;  %v5318_v7 = vld [vmem:[%s6736_s1 + $0x218] sm:$0xff] }
  0xff   : > { %v1257_v58 = vrot.slane %v1255_v53, 4  ;;  %v4407_v63 = vld [vmem:[%s5823_s21 + $0x48] sm:$0xf]  ;;  %v4408_v1 = vld [vmem:[%s5823_s21 + $0x4c] sm:$0xf]  ;;  %v1677_v2 = vrot.slane %v1675_v54, 4  ;;  %3566 = vmatpush.bf16.msra.mxu0 %v5318_v7 }
 0x100   : > { %v1485_v50 = vsel %vm5843_vm10, %v1480_v42, %v1484_v37  ;;  %v1256_v62 = vsel %vm6027_vm13, %v4392_v55, %v1255_v53  ;;  %v4661_v3 = vld [vmem:[#allocation3 + $0xe0] sm:$0xf]  ;;  %v5211_v4 = vld [vmem:[#allocation3 + $0x100] sm:$0xf0]  ;;  %v5208_v5 = vld [vmem:[#allocation3 + $0xec] sm:$0xf] }
 0x101   : > { %3286 = vmatmul.bf16.gmra.mxu2 %v4626_v23  ;;  %3384 = vmatmul.bf16.gmra.mxu0 %v4634_v31  ;;  %1583 = vst [vmem:[#allocation3 + $0x154] sm:$0xf] %v1485_v50  ;;  %v4671_v6 = vld [vmem:[#allocation3 + $0x10c] sm:$0xf0]  ;;  %v1259_v0 = vsel %vm6027_vm13, %v1257_v58, %v1258_v56  ;;  %v4454_v8 = vld [vmem:[%s5823_s21 + $0x50] sm:$0x1]  ;;  %v4662_v25 = vor.u32 %v5211_v4, %v4661_v3 }
 0x102   : > { %3433 = vmatmul.bf16.gmra.mxu1 %v4638_v28  ;;  %1300 = vst [vmem:[#allocation3 + $0x170] sm:$0xf] %v1256_v62  ;;  %v4466_v9 = vrot.slane %v4452_v59, 9  ;;  %v5207_v10 = vld [vmem:[#allocation3 + $0xe4] sm:$0xf]  ;;  %v1678_v12 = vrot.slane %v4454_v8, 5  ;;  %v4674_v26 = vor.u32 %v5208_v5, %v4671_v6 }
 0x103   : > { %v4663_v11 = vld [vmem:[#allocation3 + $0x104] sm:$0xf0]  ;;  %1301 = vst [vmem:[#allocation3 + $0x194] sm:$0xf] %v1259_v0  ;;  %v4430_v13 = vld [vmem:[%s5823_s21 + $0x50] sm:$0x1] }
 0x104   : > { %3335 = vmatmul.bf16.gmra.mxu3 %v4630_v36  ;;  %v1494_v14 = vrot.slane %v1493_v57, 4  ;;  %1336 = vst [vmem:[#allocation3 + $0x174] sm:$0xf] %v4407_v63  ;;  %v1676_v15 = vsel %vm6027_vm13, %v4466_v9, %v1675_v54  ;;  %v1500_v17 = vshrl.u32 %v4429_v44, 16  ;;  %v1506_v18 = vshll.u32 %v4430_v13, 16  ;;  %v5326_v29 = vld [vmem:[%s6737_s2 + $0x18] sm:$0xff] }
 0x105   : > { %v4669_v19 = vld [vmem:[#allocation3 + $0xe8] sm:$0xf]  ;;  %v5212_v20 = vld [vmem:[#allocation3 + $0x108] sm:$0xf0]  ;;  %1337 = vst [vmem:[#allocation3 + $0x198] sm:$0xf] %v4408_v1  ;;  %v1679_v21 = vsel %vm6027_vm13, %v1677_v2, %v1678_v12  ;;  %v4666_v27 = vor.u32 %v5207_v10, %v4663_v11  ;;  %3991 = vmatpush.bf16.msra.mxu1 %v5326_v29 }
 0x106   : > { %1720 = vst [vmem:[#allocation3 + $0x17c] sm:$0xf] %v1676_v15  ;;  %v1499_v22 = vsel %vm5843_vm10, %v1494_v14, %v1498_v16  ;;  %v1502_v23 = vrot.slane %v1500_v17, 4  ;;  %v4670_v28 = vor.u32 %v5212_v20, %v4669_v19  ;;  %v1508_v30 = vrot.slane %v1506_v18, 5  ;;  %v4431_v31 = vld [vmem:[%s5823_s21 + $0x54] sm:$0xf] }
 0x107   : > { %1721 = vst [vmem:[#allocation3 + $0x1a0] sm:$0xf] %v1679_v21  ;;  %v4432_v32 = vld [vmem:[%s5823_s21 + $0x58] sm:$0xf]  ;;  %v5301_v33 = vld [vmem:[%s6736_s1 + $0x190] sm:$0xff]  ;;  %v1511_v38 = vshrl.u32 %v4431_v31, 16 }
 0x108   : > { %v1503_v24 = vor.u32 %v1502_v23, %v1498_v16  ;;  %1584 = vst [vmem:[#allocation3 + $0x178] sm:$0xf] %v1499_v22  ;;  %v5309_v35 = vld [vmem:[%s6736_s1 + $0x1d0] sm:$0xff]  ;;  %v1186_v37 = vld [vmem:[%s5823_s21 + $0x4c] sm:$0xf]  ;;  %3469 = vmatpush.bf16.msra.mxu2 %v5301_v33  ;;  %v1514_v41 = vshll.u32 %v4431_v31, 16 }
 0x109   : > { %3518 = vmatpush.bf16.msra.mxu3 %v5309_v35  ;;  %v1185_v39 = vld [vmem:[%s5823_s21 + $0x48] sm:$0xe]  ;;  %v1187_v40 = vld [vmem:[%s5823_s21 + $0x50] sm:$0x1]  ;;  %v1520_v42 = vshll.u32 %v4432_v32, 16  ;;  %v1262_v44 = vrot.slane %v1186_v37, 5 }
 0x10a   : > { %v1504_v36 = vrot.slane %v1503_v24, 4  ;;  %v4393_v43 = vrot.slane %v1185_v39, 9  ;;  %v1265_v45 = vrot.slane %v1187_v40, 5  ;;  %v1524_v46 = vshrl.u32 %v4432_v32, 16  ;;  %v4455_v47 = vld [vmem:[%s5823_s21 + $0x54] sm:$0xe] }
 0x10b   : > { %v4456_v49 = vld [vmem:[%s5823_s21 + $0x58] sm:$0xf]  ;;  %v4457_v50 = vld [vmem:[%s5823_s21 + $0x5c] sm:$0x1]  ;;  %v1264_v52 = vrot.slane %v1262_v44, 4  ;;  %v4467_v55 = vrot.slane %v4455_v47, 9 }
 0x10c   : > { %v1509_v34 = vsel %vm5843_vm10, %v1504_v36, %v1508_v30  ;;  %v1263_v51 = vsel %vm6027_vm13, %v4393_v43, %v1262_v44  ;;  %v4409_v53 = vld [vmem:[%s5823_s21 + $0x54] sm:$0xf]  ;;  %v4410_v54 = vld [vmem:[%s5823_s21 + $0x58] sm:$0xf]  ;;  %v4697_v56 = vld [vmem:[#allocation3 + $0x128] sm:$0xf] }
 0x10d   : > { %1585 = vst [vmem:[#allocation3 + $0x19c] sm:$0xf] %v1509_v34  ;;  %v5220_v57 = vld [vmem:[#allocation3 + $0x148] sm:$0xf0]  ;;  %v5217_v58 = vld [vmem:[#allocation3 + $0x134] sm:$0xf]  ;;  %v1266_v4 = vsel %vm6027_vm13, %v1264_v52, %v1265_v45 }
 0x10e   : > { %v5317_v59 = vld [vmem:[%s6736_s1 + $0x210] sm:$0xff]  ;;  %1302 = vst [vmem:[#allocation3 + $0x1b8] sm:$0xf] %v1263_v51  ;;  %v1682_v60 = vrot.slane %v4456_v49, 5  ;;  %v1685_v62 = vrot.slane %v4457_v50, 5  ;;  %v1513_v63 = vrot.slane %v1511_v38, 4  ;;  %v4698_v16 = vor.u32 %v5220_v57, %v4697_v56 }
 0x10f   : > { %v5216_v1 = vld [vmem:[#allocation3 + $0x12c] sm:$0xf]  ;;  %v4699_v2 = vld [vmem:[#allocation3 + $0x14c] sm:$0xf0]  ;;  %1338 = vst [vmem:[#allocation3 + $0x1bc] sm:$0xf] %v4409_v53  ;;  %3567 = vmatpush.bf16.msra.mxu0 %v5317_v59 }
 0x110   : > { %v4705_v3 = vld [vmem:[#allocation3 + $0x130] sm:$0xf]  ;;  %v4433_v5 = vld [vmem:[%s5823_s21 + $0x5c] sm:$0x1]  ;;  %v1516_v6 = vrot.slane %v1514_v41, 5  ;;  %v1522_v7 = vrot.slane %v1520_v42, 5  ;;  %v1683_v8 = vsel %vm6027_vm13, %v4467_v55, %v1682_v60  ;;  %v4702_v21 = vor.u32 %v5216_v1, %v4699_v2 }
 0x111   : > { %3291 = vmatmul.bf16.gmra.mxu2 %v4662_v25  ;;  %3389 = vmatmul.bf16.gmra.mxu0 %v4670_v28  ;;  %v4707_v0 = vld [vmem:[#allocation3 + $0x154] sm:$0xf0]  ;;  %1303 = vst [vmem:[#allocation3 + $0x1dc] sm:$0xf] %v1266_v4  ;;  %v1684_v9 = vrot.slane %v1682_v60, 4  ;;  %v1526_v10 = vrot.slane %v1524_v46, 4 }
 0x112   : > { %3438 = vmatmul.bf16.gmra.mxu1 %v4674_v26  ;;  %v5221_v11 = vld [vmem:[#allocation3 + $0x150] sm:$0xf0]  ;;  %1339 = vst [vmem:[#allocation3 + $0x1e0] sm:$0xf] %v4410_v54  ;;  %v1517_v12 = vor.u32 %v1516_v6, %v1513_v63  ;;  %v1530_v13 = vshll.u32 %v4433_v5, 16  ;;  %v4710_v17 = vor.u32 %v5217_v58, %v4707_v0  ;;  %v5325_v23 = vld [vmem:[%s6737_s2 + $0x10] sm:$0xff] }
 0x113   : > { %v1686_v14 = vsel %vm6027_vm13, %v1684_v9, %v1685_v62  ;;  %1722 = vst [vmem:[#allocation3 + $0x1c4] sm:$0xf] %v1683_v8  ;;  %v1527_v15 = vor.u32 %v1526_v10, %v1522_v7  ;;  %v4706_v22 = vor.u32 %v5221_v11, %v4705_v3  ;;  %3992 = vmatpush.bf16.msra.mxu1 %v5325_v23  ;;  %v4434_v24 = vld [vmem:[%s5823_s21 + $0x60] sm:$0xf]  ;;  %v5300_v30 = vld [vmem:[%s6736_s1 + $0x188] sm:$0xff] }
 0x114   : > { %3340 = vmatmul.bf16.gmra.mxu3 %v4666_v27  ;;  %1723 = vst [vmem:[#allocation3 + $0x1e8] sm:$0xf] %v1686_v14  ;;  %v1518_v18 = vrot.slane %v1517_v12, 4  ;;  %v1532_v19 = vrot.slane %v1530_v13, 5  ;;  %v5308_v36 = vld [vmem:[%s6736_s1 + $0x1c8] sm:$0xff]  ;;  %3470 = vmatpush.bf16.msra.mxu2 %v5300_v30  ;;  %v1535_v37 = vshrl.u32 %v4434_v24, 16 }
 0x115   : > { %v1528_v25 = vrot.slane %v1527_v15, 4  ;;  %v1189_v31 = vld [vmem:[%s5823_s21 + $0x58] sm:$0xf]  ;;  %v4459_v32 = vld [vmem:[%s5823_s21 + $0x64] sm:$0xf]  ;;  %3519 = vmatpush.bf16.msra.mxu3 %v5308_v36  ;;  %v1538_v43 = vshll.u32 %v4434_v24, 16 }
 0x116   : > { %v1523_v27 = vsel %vm5843_vm10, %v1518_v18, %v1522_v7  ;;  %v1188_v34 = vld [vmem:[%s5823_s21 + $0x54] sm:$0xe]  ;;  %v1190_v35 = vld [vmem:[%s5823_s21 + $0x5c] sm:$0x1]  ;;  %v1269_v40 = vrot.slane %v1189_v31, 5  ;;  %v1689_v49 = vrot.slane %v4459_v32, 5 }
 0x117   : > { %v1533_v29 = vsel %vm5843_vm10, %v1528_v25, %v1532_v19  ;;  %1586 = vst [vmem:[#allocation3 + $0x1c0] sm:$0xf] %v1523_v27  ;;  %v4394_v39 = vrot.slane %v1188_v34, 9  ;;  %v1272_v41 = vrot.slane %v1190_v35, 5  ;;  %v4458_v42 = vld [vmem:[%s5823_s21 + $0x60] sm:$0xe] }
 0x118   : > { %1587 = vst [vmem:[#allocation3 + $0x1e4] sm:$0xf] %v1533_v29  ;;  %v4460_v46 = vld [vmem:[%s5823_s21 + $0x68] sm:$0x1]  ;;  %v4468_v47 = vrot.slane %v4458_v42, 9  ;;  %v1271_v53 = vrot.slane %v1269_v40, 4 }
 0x119   : > { %v4435_v50 = vld [vmem:[%s5823_s21 + $0x64] sm:$0xf]  ;;  %v1270_v52 = vsel %vm6027_vm13, %v4394_v39, %v1269_v40  ;;  %v4411_v54 = vld [vmem:[%s5823_s21 + $0x60] sm:$0xf]  ;;  %v1692_v55 = vrot.slane %v4460_v46, 5  ;;  %v5316_v2 = vld [vmem:[%s6736_s1 + $0x208] sm:$0xff] }
 0x11a   : > { %v4436_v56 = vld [vmem:[%s5823_s21 + $0x68] sm:$0x1]  ;;  %v5229_v59 = vld [vmem:[#allocation3 + $0x190] sm:$0xf0]  ;;  %v4735_v62 = vld [vmem:[#allocation3 + $0x194] sm:$0xf0]  ;;  %v1273_v4 = vsel %vm6027_vm13, %v1271_v53, %v1272_v41  ;;  %v1690_v6 = vsel %vm6027_vm13, %v4468_v47, %v1689_v49  ;;  %3568 = vmatpush.bf16.msra.mxu0 %v5316_v2 }
 0x11b   : > { %v4733_v58 = vld [vmem:[#allocation3 + $0x170] sm:$0xf]  ;;  %v5225_v60 = vld [vmem:[#allocation3 + $0x174] sm:$0xf]  ;;  %v5226_v63 = vld [vmem:[#allocation3 + $0x17c] sm:$0xf] }
 0x11c   : > { %v4743_v1 = vld [vmem:[#allocation3 + $0x19c] sm:$0xf0]  ;;  %1304 = vst [vmem:[#allocation3 + $0x200] sm:$0xf] %v1270_v52  ;;  %v1691_v3 = vrot.slane %v1689_v49, 4  ;;  %v1537_v7 = vrot.slane %v1535_v37, 4  ;;  %v4734_v19 = vor.u32 %v5229_v59, %v4733_v58 }
 0x11d   : > { %v4412_v5 = vld [vmem:[%s5823_s21 + $0x64] sm:$0xf]  ;;  %1340 = vst [vmem:[#allocation3 + $0x204] sm:$0xf] %v4411_v54  ;;  %v1540_v0 = vrot.slane %v1538_v43, 5  ;;  %v1544_v9 = vshll.u32 %v4435_v50, 16 }
 0x11e   : > { %v3179_v26 = vpop.f32.mrf.mxu0  ;;  %1305 = vst [vmem:[#allocation3 + $0x224] sm:$0xf] %v1273_v4  ;;  %v1693_v8 = vsel %vm6027_vm13, %v1691_v3, %v1692_v55  ;;  %v1548_v10 = vshrl.u32 %v4435_v50, 16  ;;  %v1554_v11 = vshll.u32 %v4436_v56, 16  ;;  %v4741_v12 = vld [vmem:[#allocation3 + $0x178] sm:$0xf] }
 0x11f   : > { %v3228_v20 = vpop.f32.mrf.mxu1  ;;  %v5230_v13 = vld [vmem:[#allocation3 + $0x198] sm:$0xf0]  ;;  %1341 = vst [vmem:[#allocation3 + $0x228] sm:$0xf] %v4412_v5  ;;  %v1541_v14 = vor.u32 %v1540_v0, %v1537_v7  ;;  %v5324_v27 = vld [vmem:[%s6737_s2 + $0x8] sm:$0xff]  ;;  %v5299_v43 = vld [vmem:[%s6736_s1 + $0x180] sm:$0xff] }
 0x120   : > { %v6265_v28 = vadd.f32 %v3228_v20, %v3179_v26  ;;  %1724 = vst [vmem:[#allocation3 + $0x20c] sm:$0xf] %v1690_v6  ;;  %v4738_v20 = vor.u32 %v5225_v60, %v4735_v62  ;;  %v4742_v26 = vor.u32 %v5230_v13, %v4741_v12  ;;  %v1556_v24 = vrot.slane %v1554_v11, 5  ;;  %v4487_v30 = vld [vmem:[%s5823_s21 + $0x18] sm:$0xf]  ;;  %3993 = vmatpush.bf16.msra.mxu1 %v5324_v27  ;;  %v5307_v46 = vld [vmem:[%s6736_s1 + $0x1c0] sm:$0xff] }
 0x121   : > { %3296 = vmatmul.bf16.gmra.mxu2 %v4698_v16  ;;  %3394 = vmatmul.bf16.gmra.mxu0 %v4706_v22  ;;  %v1546_v16 = vrot.slane %v1544_v9, 5  ;;  %1725 = vst [vmem:[#allocation3 + $0x230] sm:$0xf] %v1693_v8  ;;  %v1542_v22 = vrot.slane %v1541_v14, 4  ;;  %v4488_v36 = vld [vmem:[%s5823_s21 + $0x1c] sm:$0xf] }
 0x122   : > { %3443 = vmatmul.bf16.gmra.mxu1 %v4710_v17  ;;  %v1550_v17 = vrot.slane %v1548_v10, 4  ;;  %v1790_v34 = vshll.u32 %v4487_v30, 16  ;;  %v1796_v35 = vshll.u32 %v4488_v36, 16  ;;  %v1800_v39 = vshrl.u32 %v4488_v36, 16  ;;  %v4489_v49 = vld [vmem:[%s5823_s21 + $0x20] sm:$0x1]  ;;  %3471 = vmatpush.bf16.msra.mxu2 %v5299_v43 }
 0x123   : > { %v1547_v32 = vsel %vm5843_vm10, %v1542_v22, %v1546_v16  ;;  %3520 = vmatpush.bf16.msra.mxu3 %v5307_v46  ;;  %v1806_v53 = vshll.u32 %v4489_v49, 16  ;;  %v4769_v4 = vld [vmem:[#allocation3 + $0x1b8] sm:$0xf]  ;;  %v5238_v5 = vld [vmem:[#allocation3 + $0x1d8] sm:$0xf0]  ;;  %v5315_v8 = vld [vmem:[%s6736_s1 + $0x200] sm:$0xff] }
 0x124   : > { %3345 = vmatmul.bf16.gmra.mxu3 %v4702_v21  ;;  %v3199_v33 = vpop.f32.mrf.mxu2  ;;  %v4746_v21 = vor.u32 %v5226_v63, %v4743_v1  ;;  %v1551_v29 = vor.u32 %v1550_v17, %v1546_v16  ;;  %1588 = vst [vmem:[#allocation3 + $0x208] sm:$0xf] %v1547_v32  ;;  %v1792_v41 = vrot.slane %v1790_v34, 5  ;;  %v1798_v42 = vrot.slane %v1796_v35, 5  ;;  %v4471_v63 = vld [vmem:[%s5823_s21 + $0x18] sm:$0xf]  ;;  %3569 = vmatpush.bf16.msra.mxu0 %v5315_v8 }
 0x125   : > { %v1802_v47 = vrot.slane %v1800_v39, 4  ;;  %v1808_v60 = vrot.slane %v1806_v53, 5  ;;  %v4472_v1 = vld [vmem:[%s5823_s21 + $0x1c] sm:$0xf]  ;;  %v5234_v6 = vld [vmem:[#allocation3 + $0x1bc] sm:$0xf] }
 0x126   : > { %v3181_v51 = vpop.f32.mrf.mxu0  ;;  %v4771_v7 = vld [vmem:[#allocation3 + $0x1dc] sm:$0xf0]  ;;  %v5235_v0 = vld [vmem:[#allocation3 + $0x1c4] sm:$0xf]  ;;  %1746 = vst [vmem:[#allocation3 + $0x18] sm:$0xf] %v4471_v63 }
 0x127   : > { %v3248_v38 = vpop.f32.mrf.mxu3  ;;  %v3230_v45 = vpop.f32.mrf.mxu1  ;;  %v1803_v52 = vor.u32 %v1802_v47, %v1798_v42  ;;  %v4779_v10 = vld [vmem:[#allocation3 + $0x1e4] sm:$0xf0]  ;;  %1747 = vst [vmem:[#allocation3 + $0x3c] sm:$0xf] %v4472_v1  ;;  %v4511_v11 = vld [vmem:[%s5823_s21 + $0x18] sm:$0xe]  ;;  %v4774_v22 = vor.u32 %v5234_v6, %v4771_v7 }
 0x128   : > { %v6281_v44 = vadd.f32 %v3248_v38, %v3199_v33  ;;  %v6289_v57 = vadd.f32 %v3230_v45, %v3181_v51  ;;  %v1787_v33 = vshrl.u32 %v4487_v30, 16  ;;  %v1552_v38 = vrot.slane %v1551_v29, 4  ;;  %v4777_v12 = vld [vmem:[#allocation3 + $0x1c0] sm:$0xf]  ;;  %v4512_v13 = vld [vmem:[%s5823_s21 + $0x1c] sm:$0xf] }
 0x129   : > { %v1804_v59 = vrot.slane %v1803_v52, 4  ;;  %v5239_v14 = vld [vmem:[#allocation3 + $0x1e0] sm:$0xf0]  ;;  %v4535_v17 = vrot.slane %v4511_v11, 9  ;;  %v5119_v27 = vld [vmem:[%s5823_s21 + $0xc] sm:$0xf] }
 0x12a   : > { %v1789_v40 = vrot.slane %v1787_v33, 4  ;;  %v1557_v45 = vsel %vm5843_vm10, %v1552_v38, %v1556_v24  ;;  %v4778_v30 = vor.u32 %v5239_v14, %v4777_v12  ;;  %v4490_v32 = vld [vmem:[%s5823_s21 + $0x24] sm:$0xf]  ;;  %v4491_v33 = vld [vmem:[%s5823_s21 + $0x28] sm:$0xf]  ;;  %v3703_v53 = vshll.u32 %v5119_v27, 16 }
 0x12b   : > { %1589 = vst [vmem:[#allocation3 + $0x22c] sm:$0xf] %v1557_v45  ;;  %v1809_v9 = vsel %vm5843_vm10, %v1804_v59, %v1808_v60  ;;  %v1811_v35 = vshrl.u32 %v4490_v32, 16  ;;  %v1820_v43 = vshll.u32 %v4491_v33, 16  ;;  %v5120_v45 = vld [vmem:[%s5823_s21 + $0x10] sm:$0xf] }
 0x12c   : > { %v3201_v15 = vpop.f32.mrf.mxu2  ;;  %v1793_v50 = vor.u32 %v1792_v41, %v1789_v40  ;;  %1995 = vst [vmem:[#allocation3 + $0x40] sm:$0xf] %v1809_v9  ;;  %v1814_v40 = vshll.u32 %v4490_v32, 16  ;;  %v3700_v41 = vshrl.u32 %v5119_v27, 16  ;;  %v4492_v46 = vld [vmem:[%s5823_s21 + $0x2c] sm:$0x1] }
 0x12d   : > { %v1824_v49 = vshrl.u32 %v4491_v33, 16  ;;  %v3709_v60 = vshll.u32 %v5120_v45, 16  ;;  %v4514_v6 = vld [vmem:[%s5823_s21 + $0x24] sm:$0xe]  ;;  %v5247_v8 = vld [vmem:[#allocation3 + $0x220] sm:$0xf0] }
 0x12e   : > { %v3184_v31 = vpop.f32.mrf.mxu0  ;;  %v1794_v55 = vrot.slane %v1793_v50, 4  ;;  %v1816_v47 = vrot.slane %v1814_v40, 5  ;;  %v1822_v50 = vrot.slane %v1820_v43, 5  ;;  %v6353_v59 = vrot.slane %v3700_v41, 4  ;;  %v4473_v9 = vld [vmem:[%s5823_s21 + $0x24] sm:$0xf] }
 0x12f   : > { %v3250_v18 = vpop.f32.mrf.mxu3  ;;  %v3233_v25 = vpop.f32.mrf.mxu1  ;;  %v4515_v11 = vld [vmem:[%s5823_s21 + $0x28] sm:$0xf]  ;;  %v4807_v14 = vld [vmem:[#allocation3 + $0x224] sm:$0xf0]  ;;  %1748 = vst [vmem:[#allocation3 + $0x60] sm:$0xf] %v4473_v9 }
 0x130   : > { %v6301_v23 = vadd.f32 %v3250_v18, %v3201_v15  ;;  %v6310_v37 = vadd.f32 %v3233_v25, %v3184_v31  ;;  %v1799_v2 = vsel %vm5843_vm10, %v1794_v55, %v1798_v42  ;;  %v4513_v15 = vld [vmem:[%s5823_s21 + $0x20] sm:$0x1]  ;;  %v2060_v18 = vrot.slane %v4512_v13, 5  ;;  %v5243_v13 = vld [vmem:[#allocation3 + $0x204] sm:$0xf] }
 0x131   : > { %3301 = vmatmul.bf16.gmra.mxu2 %v4734_v19  ;;  %3399 = vmatmul.bf16.gmra.mxu0 %v4742_v26  ;;  %1994 = vst [vmem:[#allocation3 + $0x1c] sm:$0xf] %v1799_v2  ;;  %v2063_v19 = vrot.slane %v4513_v15, 5  ;;  %v4782_v25 = vor.u32 %v5235_v0, %v4779_v10  ;;  %v5323_v26 = vld [vmem:[%s6737_s2] sm:$0xff]  ;;  %v1813_v42 = vrot.slane %v1811_v35, 4  ;;  %v1826_v55 = vrot.slane %v1824_v49, 4 }
 0x132   : > { %3448 = vmatmul.bf16.gmra.mxu1 %v4746_v21  ;;  %v4770_v21 = vor.u32 %v5238_v5, %v4769_v4  ;;  %v2061_v36 = vsel %vm6027_vm13, %v4535_v17, %v2060_v18  ;;  %v2062_v31 = vrot.slane %v2060_v18, 4  ;;  %v4805_v0 = vld [vmem:[#allocation3 + $0x200] sm:$0xf]  ;;  %v4474_v10 = vld [vmem:[%s5823_s21 + $0x28] sm:$0xf]  ;;  %v4810_v40 = vor.u32 %v5243_v13, %v4807_v14 }
 0x133   : > { %3994 = vmatpush.bf16.msra.mxu1 %v5323_v26  ;;  %2130 = vst [vmem:[#allocation3 + $0x20] sm:$0xf] %v2061_v36  ;;  %v1827_v4 = vor.u32 %v1826_v55, %v1822_v50  ;;  %v5244_v15 = vld [vmem:[#allocation3 + $0x20c] sm:$0xf]  ;;  %v4813_v17 = vld [vmem:[#allocation3 + $0x208] sm:$0xf]  ;;  %v4806_v33 = vor.u32 %v5247_v8, %v4805_v0 }
 0x134   : > { %3350 = vmatmul.bf16.gmra.mxu3 %v4738_v20  ;;  %v3204_v51 = vpop.f32.mrf.mxu2  ;;  %v2064_v39 = vsel %vm6027_vm13, %v2062_v31, %v2063_v19  ;;  %v5121_v18 = vld [vmem:[%s5823_s21 + $0x14] sm:$0x1]  ;;  %v3705_v19 = vrot.slane %v3703_v53, 5  ;;  %1749 = vst [vmem:[#allocation3 + $0x84] sm:$0xf] %v4474_v10  ;;  %v4536_v26 = vrot.slane %v4514_v6, 9 }
 0x135   : > { %2131 = vst [vmem:[#allocation3 + $0x44] sm:$0xf] %v2064_v39  ;;  %v2067_v36 = vrot.slane %v4515_v11, 5  ;;  %v3719_v43 = vshll.u32 %v5121_v18, 16  ;;  %v4495_v0 = vld [vmem:[%s5823_s21 + $0x38] sm:$0x1] }
 0x136   : > { %v3186_v62 = vpop.f32.mrf.mxu0  ;;  %v1854_v13 = vshll.u32 %v4495_v0, 16 }
 0x137   : > { %v3253_v54 = vpop.f32.mrf.mxu3  ;;  %v3235_v58 = vpop.f32.mrf.mxu1  ;;  %v2069_v35 = vrot.slane %v2067_v36, 4 }
 0x138   : > { %v6321_v56 = vadd.f32 %v3253_v54, %v3204_v51  ;;  %v6327_v3 = vadd.f32 %v3235_v58, %v3186_v62  ;;  %v1830_v51 = vshll.u32 %v4492_v46, 16  ;;  %v1817_v54 = vor.u32 %v1816_v47, %v1813_v42 }
 0x139   : > { %v3713_v62 = vshrl.u32 %v5120_v45, 16  ;;  %v3706_v47 = vor.u32 %v3705_v19, %v6353_v59  ;;  %v3721_v59 = vrot.slane %v3719_v43, 5 }
 0x13a   : > { %v1818_v2 = vrot.slane %v1817_v54, 4  ;;  %v1832_v5 = vrot.slane %v1830_v51, 5  ;;  %v4493_v51 = vld [vmem:[%s5823_s21 + $0x30] sm:$0xf] }
 0x13b   : > { %v3715_v27 = vrot.slane %v3713_v62, 4  ;;  %v1835_v54 = vshrl.u32 %v4493_v51, 16  ;;  %v1838_v55 = vshll.u32 %v4493_v51, 16  ;;  %v3707_v6 = vrot.slane %v3706_v47, 4  ;;  %v5182_v47 = vld [vmem:[#allocation3 + $0x1c] sm:$0xf] }
 0x13c   : > { %v3206_v16 = vpop.f32.mrf.mxu2 }
 0x13e   : > { %v3189_v34 = vpop.f32.mrf.mxu0 }
 0x13f   : > { %v3255_v20 = vpop.f32.mrf.mxu3  ;;  %v3238_v24 = vpop.f32.mrf.mxu1 }
 0x140   : > { %v6341_v29 = vadd.f32 %v3255_v20, %v3206_v16  ;;  %v6347_v38 = vadd.f32 %v3238_v24, %v3189_v34  ;;  %v4815_v16 = vld [vmem:[#allocation3 + $0x22c] sm:$0xf0]  ;;  %v1823_v20 = vsel %vm5843_vm10, %v1818_v2, %v1822_v50  ;;  %v2068_v34 = vsel %vm6027_vm13, %v4536_v26, %v2067_v36  ;;  %v5123_v2 = vld [vmem:[%s5823_s21 + $0x1c] sm:$0xf]  ;;  %v4518_v36 = vld [vmem:[%s5823_s21 + $0x34] sm:$0xf] }
 0x141   : > { %3306 = vmatmul.bf16.gmra.mxu2 %v4770_v21  ;;  %3404 = vmatmul.bf16.gmra.mxu0 %v4778_v30  ;;  %v1828_v21 = vrot.slane %v1827_v4, 4  ;;  %1996 = vst [vmem:[#allocation3 + $0x64] sm:$0xf] %v1823_v20  ;;  %v4516_v30 = vld [vmem:[%s5823_s21 + $0x2c] sm:$0x1]  ;;  %v4818_v41 = vor.u32 %v5244_v15, %v4815_v16  ;;  %v1837_v4 = vrot.slane %v1835_v54, 4 }
 0x142   : > { %3453 = vmatmul.bf16.gmra.mxu1 %v4782_v25  ;;  %v6366_v25 = vrot.slane %v3709_v60, 5  ;;  %v2070_v31 = vrot.slane %v4516_v30, 5  ;;  %2132 = vst [vmem:[#allocation3 + $0x68] sm:$0xf] %v2068_v34  ;;  %v5122_v60 = vld [vmem:[%s5823_s21 + $0x18] sm:$0xf] }
 0x143   : > { %v1833_v24 = vsel %vm5843_vm10, %v1828_v21, %v1832_v5  ;;  %v1840_v5 = vrot.slane %v1838_v55, 5  ;;  %v3724_v10 = vshrl.u32 %v5122_v60, 16  ;;  %v3727_v15 = vshll.u32 %v5122_v60, 16  ;;  %v4517_v54 = vld [vmem:[%s5823_s21 + $0x30] sm:$0xe] }
 0x144   : > { %3355 = vmatmul.bf16.gmra.mxu3 %v4774_v22  ;;  %v3209_v52 = vpop.f32.mrf.mxu2  ;;  %v5248_v22 = vld [vmem:[#allocation3 + $0x228] sm:$0xf0]  ;;  %1997 = vst [vmem:[#allocation3 + $0x88] sm:$0xf] %v1833_v24  ;;  %v3716_v49 = vor.u32 %v3715_v27, %v6366_v25  ;;  %v2071_v50 = vsel %vm6027_vm13, %v2069_v35, %v2070_v31  ;;  %v3733_v16 = vshll.u32 %v5123_v2, 16  ;;  %v3737_v19 = vshrl.u32 %v5123_v2, 16 }
 0x145   : > { %v4814_v42 = vor.u32 %v5248_v22, %v4813_v17  ;;  %2133 = vst [vmem:[#allocation3 + $0x8c] sm:$0xf] %v2071_v50  ;;  %v1841_v11 = vor.u32 %v1840_v5, %v1837_v4  ;;  %v1856_v21 = vrot.slane %v1854_v13, 5  ;;  %v3712_v27 = vsel %vm5843_vm10, %v3707_v6, %v6366_v25  ;;  %v4475_v35 = vld [vmem:[%s5823_s21 + $0x30] sm:$0xf] }
 0x146   : > { %v3191_v7 = vpop.f32.mrf.mxu0  ;;  %v3726_v34 = vrot.slane %v3724_v10, 4  ;;  %v3729_v25 = vrot.slane %v3727_v15, 5  ;;  %v6401_v43 = vrot.slane %v3733_v16, 5  ;;  %1750 = vst [vmem:[#allocation3 + $0xa8] sm:$0xf] %v4475_v35  ;;  %v3907_v50 = vunpack.c.l.b16 %v3712_v27 }
 0x147   : > { %v3258_v58 = vpop.f32.mrf.mxu3  ;;  %v3240_v1 = vpop.f32.mrf.mxu1  ;;  %v1842_v20 = vrot.slane %v1841_v11, 4  ;;  %v2074_v55 = vrot.slane %v4518_v36, 5  ;;  %v4519_v60 = vld [vmem:[%s5823_s21 + $0x38] sm:$0x1] }
 0x148   : > { %v6355_v63 = vadd.f32 %v3258_v58, %v3209_v52  ;;  %v6361_v12 = vadd.f32 %v3240_v1, %v3191_v7  ;;  %v4494_v52 = vld [vmem:[%s5823_s21 + $0x34] sm:$0xf]  ;;  %v3717_v7 = vrot.slane %v3716_v49, 4  ;;  %v4571_v49 = vld [vmem:[#allocation3 + $0x3c] sm:$0xf0]  ;;  %v2077_v2 = vrot.slane %v4519_v60, 5 }
 0x149   : > { %v1844_v62 = vshll.u32 %v4494_v52, 16  ;;  %v1848_v1 = vshrl.u32 %v4494_v52, 16  ;;  %v4577_v52 = vld [vmem:[#allocation3 + $0x20] sm:$0xf]  ;;  %v3730_v6 = vor.u32 %v3729_v25, %v3726_v34  ;;  %v4574_v15 = vor.u32 %v5182_v47, %v4571_v49 }
 0x14a   : > { %v3722_v24 = vsel %vm5843_vm10, %v3717_v7, %v3721_v59  ;;  %v2076_v59 = vrot.slane %v2074_v55, 4 }
 0x14b   : > { %v1846_v8 = vrot.slane %v1844_v62, 5  ;;  %v1850_v9 = vrot.slane %v1848_v1, 4  ;;  %v3908_v51 = vunpack.c.l.b16 %v3722_v24  ;;  %v4537_v62 = vrot.slane %v4517_v54, 9  ;;  %v5187_v1 = vld [vmem:[#allocation3 + $0x40] sm:$0xf0] }
 0x14c   : > { %v3211_v32 = vpop.f32.mrf.mxu2  ;;  %v2078_v11 = vsel %vm6027_vm13, %v2076_v59, %v2077_v2  ;;  %v4578_v16 = vor.u32 %v5187_v1, %v4577_v52  ;;  %v3731_v24 = vrot.slane %v3730_v6, 4 }
 0x14d   : > { %v1851_v17 = vor.u32 %v1850_v9, %v1846_v8  ;;  %v2075_v7 = vsel %vm6027_vm13, %v4537_v62, %v2074_v55  ;;  %2135 = vst [vmem:[#allocation3 + $0xd4] sm:$0xf] %v2078_v11 }
 0x14e   : > { %v3194_v53 = vpop.f32.mrf.mxu0  ;;  %2134 = vst [vmem:[#allocation3 + $0xb0] sm:$0xf] %v2075_v7  ;;  %v4477_v7 = vld [vmem:[%s5823_s21 + $0x3c] sm:$0xf] }
 0x14f   : > { %v3260_v39 = vpop.f32.mrf.mxu3  ;;  %v3243_v46 = vpop.f32.mrf.mxu1  ;;  %v1852_v30 = vrot.slane %v1851_v17, 4  ;;  %v4496_v17 = vld [vmem:[%s5823_s21 + $0x3c] sm:$0xf]  ;;  %1752 = vst [vmem:[#allocation3 + $0xf0] sm:$0xf] %v4477_v7 }
 0x150   : > { %v6373_v45 = vadd.f32 %v3260_v39, %v3211_v32  ;;  %v6381_v58 = vadd.f32 %v3243_v46, %v3194_v53  ;;  %v4569_v32 = vld [vmem:[#allocation3 + $0x18] sm:$0xf]  ;;  %v4476_v39 = vld [vmem:[%s5823_s21 + $0x34] sm:$0xf]  ;;  %v3739_v53 = vrot.slane %v3737_v19, 4 }
 0x151   : > { %3311 = vmatmul.bf16.gmra.mxu2 %v4806_v33  ;;  %3409 = vmatmul.bf16.gmra.mxu0 %v4814_v42  ;;  %v5186_v33 = vld [vmem:[#allocation3 + $0x38] sm:$0xf0]  ;;  %v5124_v42 = vld [vmem:[%s5823_s21 + $0x20] sm:$0x1]  ;;  %v1857_v46 = vsel %vm5843_vm10, %v1852_v30, %v1856_v21  ;;  %1751 = vst [vmem:[#allocation3 + $0xcc] sm:$0xf] %v4476_v39 }
 0x152   : > { %3458 = vmatmul.bf16.gmra.mxu1 %v4818_v41  ;;  %1999 = vst [vmem:[#allocation3 + $0xd0] sm:$0xf] %v1857_v46  ;;  %v4570_v5 = vor.u32 %v5186_v33, %v4569_v32  ;;  %v3740_v9 = vor.u32 %v3739_v53, %v6401_v43  ;;  %v3743_v10 = vshll.u32 %v5124_v42, 16  ;;  %v1859_v21 = vshrl.u32 %v4496_v17, 16  ;;  %v5126_v32 = vld [vmem:[%s5823_s21 + $0x28] sm:$0xf] }
 0x153   : > { %v3761_v55 = vshrl.u32 %v5126_v32, 16 }
 0x154   : > { %3360 = vmatmul.bf16.gmra.mxu3 %v4810_v40  ;;  %v3214_v14 = vpop.f32.mrf.mxu2  ;;  %v1847_v40 = vsel %vm5843_vm10, %v1842_v20, %v1846_v8  ;;  %v3923_v8 = vpack.c.b16 %v3908_v51, %v3907_v50  ;;  %v5125_v20 = vld [vmem:[%s5823_s21 + $0x24] sm:$0xf]  ;;  %v3741_v36 = vrot.slane %v3740_v9, 4  ;;  %v1861_v33 = vrot.slane %v1859_v21, 4  ;;  %v4605_v9 = vld [vmem:[#allocation3 + $0x60] sm:$0xf] }
 0x155   : > { %1998 = vst [vmem:[#allocation3 + $0xac] sm:$0xf] %v1847_v40  ;;  %v3748_v35 = vshrl.u32 %v5125_v20, 16  ;;  %v3751_v39 = vshll.u32 %v5125_v20, 16  ;;  %v4498_v40 = vld [vmem:[%s5823_s21 + $0x44] sm:$0x1]  ;;  %v3736_v50 = vsel %vm5843_vm10, %v3731_v24, %v6401_v43 }
 0x156   : > { %v3196_v31 = vpop.f32.mrf.mxu0  ;;  %v1878_v47 = vshll.u32 %v4498_v40, 16  ;;  %v3757_v51 = vshll.u32 %v5126_v32, 16  ;;  %v3909_v11 = vunpack.c.l.b16 %v3736_v50  ;;  %v4607_v20 = vld [vmem:[#allocation3 + $0x84] sm:$0xf0]  ;;  %v3763_v24 = vrot.slane %v3761_v55, 4 }
 0x157   : > { %v3263_v18 = vpop.f32.mrf.mxu3  ;;  %v3245_v26 = vpop.f32.mrf.mxu1  ;;  %v3750_v2 = vrot.slane %v3748_v35, 4 }
 0x158   : > { %v6386_v22 = vadd.f32 %v3263_v18, %v3214_v14  ;;  %v6398_v41 = vadd.f32 %v3245_v26, %v3196_v31  ;;  %v4497_v18 = vld [vmem:[%s5823_s21 + $0x40] sm:$0xf]  ;;  %v1862_v26 = vshll.u32 %v4496_v17, 16  ;;  %v3745_v31 = vrot.slane %v3743_v10, 5  ;;  %v5195_v10 = vld [vmem:[#allocation3 + $0x80] sm:$0xf0] }
 0x159   : > { %v1868_v27 = vshll.u32 %v4497_v18, 16  ;;  %v1872_v30 = vshrl.u32 %v4497_v18, 16  ;;  %v1880_v62 = vrot.slane %v1878_v47, 5  ;;  %v5191_v18 = vld [vmem:[#allocation3 + $0x64] sm:$0xf] }
 0x15a   : > { %v1864_v34 = vrot.slane %v1862_v26, 5  ;;  %v3746_v59 = vsel %vm5843_vm10, %v3741_v36, %v3745_v31  ;;  %v4613_v26 = vld [vmem:[#allocation3 + $0x68] sm:$0xf]  ;;  %v4522_v36 = vld [vmem:[%s5823_s21 + $0x44] sm:$0x1] }
 0x15b   : > { %v1870_v42 = vrot.slane %v1868_v27, 5  ;;  %v1874_v25 = vrot.slane %v1872_v30, 4  ;;  %v3910_v21 = vunpack.c.l.b16 %v3746_v59  ;;  %v6437_v27 = vrot.slane %v3757_v51, 5  ;;  %v4521_v30 = vld [vmem:[%s5823_s21 + $0x40] sm:$0xf] }
 0x15c   : > { %v3216_v4 = vpop.f32.mrf.mxu2  ;;  %v1865_v46 = vor.u32 %v1864_v34, %v1861_v33  ;;  %v2081_v32 = vrot.slane %v4521_v30, 5  ;;  %v5196_v33 = vld [vmem:[#allocation3 + $0x88] sm:$0xf0]  ;;  %v2084_v35 = vrot.slane %v4522_v36, 5 }
 0x15d   : > { %v1875_v52 = vor.u32 %v1874_v25, %v1870_v42  ;;  %v3924_v50 = vpack.c.b16 %v3910_v21, %v3909_v11  ;;  %v3764_v51 = vor.u32 %v3763_v24, %v6437_v27 }
 0x15e   : > { %v3375_v19 = vpop.f32.mrf.mxu0  ;;  %v1866_v60 = vrot.slane %v1865_v46, 4  ;;  %v2083_v25 = vrot.slane %v2081_v32, 4 }
 0x15f   : > { %v3265_v0 = vpop.f32.mrf.mxu3  ;;  %v6414_v14 = vpop.f32.mrf.mxu1 }
 0x160   : > { %v6412_v13 = vadd.f32 %v3265_v0, %v3216_v4  ;;  %v3753_v4 = vrot.slane %v3751_v39, 5  ;;  %v4478_v0 = vld [vmem:[%s5823_s21 + $0x40] sm:$0xf]  ;;  %v2085_v55 = vsel %vm6027_vm13, %v2083_v25, %v2084_v35 }
 0x161   : > { %3472 = vmatmul.bf16.vlgmr.msra.gmra.mxu2 %v4570_v5  ;;  %3570 = vmatmul.bf16.vlgmr.msra.gmra.mxu0 %v4578_v16  ;;  %v1876_v5 = vrot.slane %v1875_v52, 4  ;;  %1753 = vst [vmem:[#allocation3 + $0x114] sm:$0xf] %v4478_v0 }
 0x162   : > { %3995 = vmatmul.bf16.vlgmr.msra.gmra.mxu1 %v3923_v8  ;;  %v4520_v8 = vld [vmem:[%s5823_s21 + $0x3c] sm:$0xe]  ;;  %v3754_v34 = vor.u32 %v3753_v4, %v3750_v2  ;;  %v5129_v4 = vld [vmem:[%s5823_s21 + $0x34] sm:$0xf]  ;;  %2137 = vst [vmem:[#allocation3 + $0x11c] sm:$0xf] %v2085_v55 }
 0x163   : > { %v1881_v16 = vsel %vm5843_vm10, %v1876_v5, %v1880_v62  ;;  %v4538_v31 = vrot.slane %v4520_v8, 9  ;;  %v4500_v62 = vld [vmem:[%s5823_s21 + $0x4c] sm:$0xf]  ;;  %v3785_v21 = vshrl.u32 %v5129_v4, 16  ;;  %v5130_v55 = vld [vmem:[%s5823_s21 + $0x38] sm:$0x1] }
 0x164   : > { %3521 = vmatmul.bf16.vlgmr.msra.gmra.mxu3 %v4574_v15  ;;  %v3277_v49 = vpop.f32.mrf.mxu2  ;;  %v5127_v15 = vld [vmem:[%s5823_s21 + $0x2c] sm:$0x1]  ;;  %2001 = vst [vmem:[#allocation3 + $0x118] sm:$0xf] %v1881_v16  ;;  %v1892_v0 = vshll.u32 %v4500_v62, 16  ;;  %v3781_v16 = vshll.u32 %v5129_v4, 16 }
 0x165   : > { %v3278_v53 = vadd.f32 %v3277_v49, %v6265_v28  ;;  %v1871_v28 = vsel %vm5843_vm10, %v1866_v60, %v1870_v42  ;;  %v3767_v40 = vshll.u32 %v5127_v15, 16  ;;  %v2082_v42 = vsel %vm6027_vm13, %v4538_v31, %v2081_v32  ;;  %v4499_v60 = vld [vmem:[%s5823_s21 + $0x48] sm:$0xf] }
 0x166   : > { %v3377_v6 = vpop.f32.mrf.mxu0  ;;  %2000 = vst [vmem:[#allocation3 + $0xf4] sm:$0xf] %v1871_v28  ;;  %v4606_v49 = vor.u32 %v5195_v10, %v4605_v9  ;;  %v1883_v5 = vshrl.u32 %v4499_v60, 16  ;;  %v1886_v7 = vshll.u32 %v4499_v60, 16  ;;  %v1896_v28 = vshrl.u32 %v4500_v62, 16 }
 0x167   : > { %v3326_v54 = vpop.f32.mrf.mxu3  ;;  %v6425_v1 = vpop.f32.mrf.mxu1  ;;  %2136 = vst [vmem:[#allocation3 + $0xf8] sm:$0xf] %v2082_v42  ;;  %v3765_v9 = vrot.slane %v3764_v51, 4  ;;  %v6468_v25 = vrot.slane %v3781_v16, 5  ;;  %v4479_v51 = vld [vmem:[%s5823_s21 + $0x48] sm:$0xf] }
 0x168   : > { %v3327_v43 = vadd.f32 %v3326_v54, %v3278_v53  ;;  %v4614_v53 = vor.u32 %v5196_v33, %v4613_v26  ;;  %v5128_v54 = vld [vmem:[%s5823_s21 + $0x30] sm:$0xf]  ;;  %v1885_v11 = vrot.slane %v1883_v5, 4  ;;  %v1898_v26 = vrot.slane %v1896_v28, 4  ;;  %1754 = vst [vmem:[#allocation3 + $0x138] sm:$0xf] %v4479_v51 }
 0x169   : > { %v3772_v10 = vshrl.u32 %v5128_v54, 16  ;;  %v3775_v15 = vshll.u32 %v5128_v54, 16  ;;  %v5204_v54 = vld [vmem:[#allocation3 + $0xc8] sm:$0xf0]  ;;  %v3791_v16 = vshll.u32 %v5130_v55, 16 }
 0x16a   : > { %v3376_v17 = vadd.f32 %v3375_v19, %v3327_v43  ;;  %v3769_v43 = vrot.slane %v3767_v40, 5 }
 0x16b   : > { %v3777_v42 = vrot.slane %v3775_v15, 5 }
 0x16c   : > { %v6442_v19 = vadd.f32 %v6414_v14, %v3376_v17  ;;  %v3279_v39 = vpop.f32.mrf.mxu2  ;;  %v4610_v14 = vor.u32 %v5191_v18, %v4607_v20  ;;  %v4501_v17 = vld [vmem:[%s5823_s21 + $0x50] sm:$0x1]  ;;  %v1888_v18 = vrot.slane %v1886_v7, 5  ;;  %v1894_v20 = vrot.slane %v1892_v0, 5  ;;  %v4523_v0 = vld [vmem:[%s5823_s21 + $0x48] sm:$0xe] }
 0x16d   : > { %v3280_v46 = vadd.f32 %v3279_v39, %v6289_v57  ;;  %v3755_v57 = vrot.slane %v3754_v34, 4  ;;  %v1902_v24 = vshll.u32 %v4501_v17, 16  ;;  %v3770_v34 = vsel %vm5843_vm10, %v3765_v9, %v3769_v43  ;;  %v4649_v43 = vld [vmem:[#allocation3 + $0xb0] sm:$0xf] }
 0x16e   : > { %v3380_v2 = vpop.f32.mrf.mxu0  ;;  %v1889_v31 = vor.u32 %v1888_v18, %v1885_v11  ;;  %v1899_v35 = vor.u32 %v1898_v26, %v1894_v20  ;;  %v3912_v5 = vunpack.c.l.b16 %v3770_v34  ;;  %v4539_v9 = vrot.slane %v4523_v0, 9  ;;  %v5205_v11 = vld [vmem:[#allocation3 + $0xd0] sm:$0xf0] }
 0x16f   : > { %v3328_v47 = vpop.f32.mrf.mxu3  ;;  %v6448_v52 = vpop.f32.mrf.mxu1  ;;  %v3760_v36 = vsel %vm5843_vm10, %v3755_v57, %v6437_v27  ;;  %v1904_v39 = vrot.slane %v1902_v24, 5  ;;  %v4524_v27 = vld [vmem:[%s5823_s21 + $0x4c] sm:$0xf]  ;;  %v4643_v57 = vld [vmem:[#allocation3 + $0xcc] sm:$0xf0] }
 0x170   : > { %v3329_v59 = vadd.f32 %v3328_v47, %v3280_v46  ;;  %v1890_v46 = vrot.slane %v1889_v31, 4  ;;  %v3911_v4 = vunpack.c.l.b16 %v3760_v36 }
 0x171   : > { %3477 = vmatmul.bf16.gmra.mxu2 %v4606_v49  ;;  %3575 = vmatmul.bf16.gmra.mxu0 %v4614_v53  ;;  %v4641_v53 = vld [vmem:[#allocation3 + $0xa8] sm:$0xf] }
 0x172   : > { %v3378_v8 = vadd.f32 %v3377_v6, %v3329_v59  ;;  %4000 = vmatmul.bf16.gmra.mxu1 %v3924_v50  ;;  %v3787_v50 = vrot.slane %v3785_v21, 4  ;;  %v1895_v60 = vsel %vm5843_vm10, %v1890_v46, %v1894_v20  ;;  %v5200_v59 = vld [vmem:[#allocation3 + $0xac] sm:$0xf]  ;;  %v3925_v36 = vpack.c.b16 %v3912_v5, %v3911_v4 }
 0x173   : > { %2002 = vst [vmem:[#allocation3 + $0x13c] sm:$0xf] %v1895_v60  ;;  %v4504_v60 = vld [vmem:[%s5823_s21 + $0x5c] sm:$0x1] }
 0x174   : > { %3526 = vmatmul.bf16.gmra.mxu3 %v4610_v14  ;;  %v6458_v30 = vadd.f32 %v6425_v1, %v3378_v8  ;;  %v3282_v6 = vpop.f32.mrf.mxu2  ;;  %v3774_v1 = vrot.slane %v3772_v10, 4  ;;  %v1900_v14 = vrot.slane %v1899_v35, 4  ;;  %v4525_v8 = vld [vmem:[%s5823_s21 + $0x50] sm:$0x1]  ;;  %v2088_v10 = vrot.slane %v4524_v27, 5 }
 0x175   : > { %v3283_v32 = vadd.f32 %v3282_v6, %v6310_v37  ;;  %v4480_v37 = vld [vmem:[%s5823_s21 + $0x4c] sm:$0xf]  ;;  %v3788_v15 = vor.u32 %v3787_v50, %v6468_v25  ;;  %v4642_v6 = vor.u32 %v5204_v54, %v4641_v53  ;;  %v4502_v35 = vld [vmem:[%s5823_s21 + $0x54] sm:$0xf]  ;;  %v5132_v53 = vld [vmem:[%s5823_s21 + $0x40] sm:$0xf] }
 0x176   : > { %v3382_v49 = vpop.f32.mrf.mxu0  ;;  %1755 = vst [vmem:[#allocation3 + $0x15c] sm:$0xf] %v4480_v37  ;;  %v1905_v7 = vsel %vm5843_vm10, %v1900_v14, %v1904_v39  ;;  %v3778_v28 = vor.u32 %v3777_v42, %v3774_v1  ;;  %v2089_v20 = vsel %vm6027_vm13, %v4539_v9, %v2088_v10  ;;  %v2090_v21 = vrot.slane %v2088_v10, 4  ;;  %v4503_v39 = vld [vmem:[%s5823_s21 + $0x58] sm:$0xf] }
 0x177   : > { %v3331_v33 = vpop.f32.mrf.mxu3  ;;  %v6466_v40 = vpop.f32.mrf.mxu1  ;;  %2003 = vst [vmem:[#allocation3 + $0x160] sm:$0xf] %v1905_v7  ;;  %v3789_v46 = vrot.slane %v3788_v15, 4  ;;  %v1907_v27 = vshrl.u32 %v4502_v35, 16  ;;  %v1916_v50 = vshll.u32 %v4503_v39, 16  ;;  %v1920_v51 = vshrl.u32 %v4503_v39, 16 }
 0x178   : > { %v3332_v47 = vadd.f32 %v3331_v33, %v3283_v32  ;;  %2138 = vst [vmem:[#allocation3 + $0x140] sm:$0xf] %v2089_v20  ;;  %v4646_v32 = vor.u32 %v5200_v59, %v4643_v57  ;;  %v4650_v33 = vor.u32 %v5205_v11, %v4649_v43  ;;  %v3779_v34 = vrot.slane %v3778_v28, 4  ;;  %v5131_v14 = vld [vmem:[%s5823_s21 + $0x3c] sm:$0xf] }
 0x179   : > { %v1909_v54 = vrot.slane %v1907_v27, 4  ;;  %v1918_v59 = vrot.slane %v1916_v50, 5  ;;  %v1922_v4 = vrot.slane %v1920_v51, 4  ;;  %v3796_v7 = vshrl.u32 %v5131_v14, 16  ;;  %v4526_v51 = vld [vmem:[%s5823_s21 + $0x54] sm:$0xe] }
 0x17a   : > { %v3381_v62 = vadd.f32 %v3380_v2, %v3332_v47  ;;  %v2091_v2 = vrot.slane %v4525_v8, 5  ;;  %v1910_v47 = vshll.u32 %v4502_v35, 16  ;;  %v3784_v55 = vsel %vm5843_vm10, %v3779_v34, %v6468_v25 }
 0x17b   : > { %v3799_v0 = vshll.u32 %v5131_v14, 16  ;;  %v3805_v28 = vshll.u32 %v5132_v53, 16  ;;  %v3809_v10 = vshrl.u32 %v5132_v53, 16  ;;  %v1923_v11 = vor.u32 %v1922_v4, %v1918_v59 }
 0x17c   : > { %v6482_v17 = vadd.f32 %v6448_v52, %v3381_v62  ;;  %v3284_v18 = vpop.f32.mrf.mxu2  ;;  %v2092_v52 = vsel %vm6027_vm13, %v2090_v21, %v2091_v2  ;;  %v1912_v62 = vrot.slane %v1910_v47, 5  ;;  %v3913_v21 = vunpack.c.l.b16 %v3784_v55 }
 0x17d   : > { %v3285_v26 = vadd.f32 %v3284_v18, %v6327_v3  ;;  %v3793_v3 = vrot.slane %v3791_v16, 5  ;;  %2139 = vst [vmem:[#allocation3 + $0x164] sm:$0xf] %v2092_v52  ;;  %v4527_v18 = vld [vmem:[%s5823_s21 + $0x58] sm:$0xf]  ;;  %v3798_v34 = vrot.slane %v3796_v7, 4 }
 0x17e   : > { %v3385_v42 = vpop.f32.mrf.mxu0  ;;  %v1913_v8 = vor.u32 %v1912_v62, %v1909_v54  ;;  %v3801_v52 = vrot.slane %v3799_v0, 5  ;;  %v6513_v27 = vrot.slane %v3805_v28, 5  ;;  %v3811_v47 = vrot.slane %v3809_v10, 4  ;;  %v5214_v54 = vld [vmem:[#allocation3 + $0x118] sm:$0xf0] }
 0x17f   : > { %v3333_v24 = vpop.f32.mrf.mxu3  ;;  %v6487_v31 = vpop.f32.mrf.mxu1  ;;  %v3794_v57 = vsel %vm5843_vm10, %v3789_v46, %v3793_v3  ;;  %v4679_v46 = vld [vmem:[#allocation3 + $0x114] sm:$0xf0]  ;;  %v4540_v14 = vrot.slane %v4526_v51, 9  ;;  %v2095_v53 = vrot.slane %v4527_v18, 5 }
 0x180   : > { %v3334_v1 = vadd.f32 %v3333_v24, %v3285_v26  ;;  %v1914_v2 = vrot.slane %v1913_v8, 4  ;;  %v4481_v26 = vld [vmem:[%s5823_s21 + $0x54] sm:$0xf]  ;;  %v4482_v24 = vld [vmem:[%s5823_s21 + $0x58] sm:$0xf]  ;;  %v3812_v28 = vor.u32 %v3811_v47, %v6513_v27 }
 0x181   : > { %3482 = vmatmul.bf16.gmra.mxu2 %v4642_v6  ;;  %3580 = vmatmul.bf16.gmra.mxu0 %v4650_v33  ;;  %v1924_v6 = vrot.slane %v1923_v11, 4  ;;  %v3914_v33 = vunpack.c.l.b16 %v3794_v57  ;;  %1756 = vst [vmem:[#allocation3 + $0x180] sm:$0xf] %v4481_v26  ;;  %v4685_v3 = vld [vmem:[#allocation3 + $0xf8] sm:$0xf]  ;;  %v2096_v57 = vsel %vm6027_vm13, %v4540_v14, %v2095_v53  ;;  %v2097_v4 = vrot.slane %v2095_v53, 4 }
 0x182   : > { %v3383_v37 = vadd.f32 %v3382_v49, %v3334_v1  ;;  %4005 = vmatmul.bf16.gmra.mxu1 %v3925_v36  ;;  %v1926_v49 = vshll.u32 %v4504_v60, 16  ;;  %v4677_v36 = vld [vmem:[#allocation3 + $0xf0] sm:$0xf]  ;;  %v1919_v35 = vsel %vm5843_vm10, %v1914_v2, %v1918_v59  ;;  %v5209_v1 = vld [vmem:[#allocation3 + $0xf4] sm:$0xf]  ;;  %v3802_v59 = vor.u32 %v3801_v52, %v3798_v34 }
 0x183   : > { %1757 = vst [vmem:[#allocation3 + $0x1a4] sm:$0xf] %v4482_v24  ;;  %v3926_v0 = vpack.c.b16 %v3914_v33, %v3913_v21  ;;  %v4505_v11 = vld [vmem:[%s5823_s21 + $0x60] sm:$0xf]  ;;  %v3813_v33 = vrot.slane %v3812_v28, 4 }
 0x184   : > { %3531 = vmatmul.bf16.gmra.mxu3 %v4646_v32  ;;  %v6502_v5 = vadd.f32 %v6466_v40, %v3383_v37  ;;  %v3287_v43 = vpop.f32.mrf.mxu2  ;;  %v1928_v15 = vrot.slane %v1926_v49, 5  ;;  %v5213_v32 = vld [vmem:[#allocation3 + $0x110] sm:$0xf0]  ;;  %2004 = vst [vmem:[#allocation3 + $0x184] sm:$0xf] %v1919_v35  ;;  %v1931_v21 = vshrl.u32 %v4505_v11, 16 }
 0x185   : > { %v3288_v25 = vadd.f32 %v3287_v43, %v6347_v38  ;;  %v5133_v38 = vld [vmem:[%s5823_s21 + $0x44] sm:$0x1]  ;;  %v4528_v37 = vld [vmem:[%s5823_s21 + $0x5c] sm:$0x1]  ;;  %v4678_v7 = vor.u32 %v5213_v32, %v4677_v36  ;;  %2140 = vst [vmem:[#allocation3 + $0x188] sm:$0xf] %v2096_v57 }
 0x186   : > { %v3387_v20 = vpop.f32.mrf.mxu0  ;;  %v1929_v50 = vsel %vm5843_vm10, %v1924_v6, %v1928_v15  ;;  %v3815_v55 = vshll.u32 %v5133_v38, 16  ;;  %v4506_v15 = vld [vmem:[%s5823_s21 + $0x64] sm:$0xf]  ;;  %v3803_v26 = vrot.slane %v3802_v59, 4  ;;  %v1934_v24 = vshll.u32 %v4505_v11, 16 }
 0x187   : > { %v3336_v9 = vpop.f32.mrf.mxu3  ;;  %v6505_v16 = vpop.f32.mrf.mxu1  ;;  %2005 = vst [vmem:[#allocation3 + $0x1a8] sm:$0xf] %v1929_v50  ;;  %v1940_v6 = vshll.u32 %v4506_v15, 16  ;;  %v1944_v36 = vshrl.u32 %v4506_v15, 16  ;;  %v1933_v34 = vrot.slane %v1931_v21, 4 }
 0x188   : > { %v3337_v40 = vadd.f32 %v3336_v9, %v3288_v25  ;;  %v4686_v25 = vor.u32 %v5214_v54, %v4685_v3  ;;  %v5134_v9 = vld [vmem:[%s5823_s21 + $0x48] sm:$0xf]  ;;  %v4483_v28 = vld [vmem:[%s5823_s21 + $0x60] sm:$0xf] }
 0x189   : > { %v3820_v38 = vshrl.u32 %v5134_v9, 16  ;;  %v3823_v52 = vshll.u32 %v5134_v9, 16  ;;  %v1946_v47 = vrot.slane %v1944_v36, 4  ;;  %v5222_v9 = vld [vmem:[#allocation3 + $0x158] sm:$0xf0] }
 0x18a   : > { %v3386_v39 = vadd.f32 %v3385_v42, %v3337_v40  ;;  %v2098_v42 = vrot.slane %v4528_v37, 5  ;;  %v5135_v40 = vld [vmem:[%s5823_s21 + $0x4c] sm:$0xf]  ;;  %v3808_v37 = vsel %vm5843_vm10, %v3803_v26, %v6513_v27  ;;  %v4530_v27 = vld [vmem:[%s5823_s21 + $0x64] sm:$0xf] }
 0x18b   : > { %v3829_v35 = vshll.u32 %v5135_v40, 16  ;;  %v3833_v3 = vshrl.u32 %v5135_v40, 16  ;;  %v3825_v57 = vrot.slane %v3823_v52, 5  ;;  %1758 = vst [vmem:[#allocation3 + $0x1c8] sm:$0xf] %v4483_v28  ;;  %v3915_v40 = vunpack.c.l.b16 %v3808_v37 }
 0x18c   : > { %v6520_v60 = vadd.f32 %v6487_v31, %v3386_v39  ;;  %v3289_v62 = vpop.f32.mrf.mxu2  ;;  %v4682_v31 = vor.u32 %v5209_v1, %v4679_v46  ;;  %v2099_v10 = vsel %vm6027_vm13, %v2097_v4, %v2098_v42  ;;  %v4507_v39 = vld [vmem:[%s5823_s21 + $0x68] sm:$0x1]  ;;  %v1936_v1 = vrot.slane %v1934_v24, 5  ;;  %v4721_v26 = vld [vmem:[#allocation3 + $0x140] sm:$0xf] }
 0x18d   : > { %v3290_v49 = vadd.f32 %v3289_v62, %v6361_v12  ;;  %v3817_v12 = vrot.slane %v3815_v55, 5  ;;  %2141 = vst [vmem:[#allocation3 + $0x1ac] sm:$0xf] %v2099_v10  ;;  %v1942_v46 = vrot.slane %v1940_v6, 5  ;;  %v1950_v50 = vshll.u32 %v4507_v39, 16 }
 0x18e   : > { %v3390_v18 = vpop.f32.mrf.mxu0  ;;  %v1937_v14 = vor.u32 %v1936_v1, %v1933_v34  ;;  %v6546_v4 = vrot.slane %v3829_v35, 5  ;;  %v5136_v10 = vld [vmem:[%s5823_s21 + $0x50] sm:$0x1]  ;;  %v4529_v6 = vld [vmem:[%s5823_s21 + $0x60] sm:$0xe] }
 0x18f   : > { %v3338_v43 = vpop.f32.mrf.mxu3  ;;  %v6526_v8 = vpop.f32.mrf.mxu1  ;;  %v3818_v55 = vsel %vm5843_vm10, %v3813_v33, %v3817_v12  ;;  %v1947_v42 = vor.u32 %v1946_v47, %v1942_v46  ;;  %v1952_v62 = vrot.slane %v1950_v50, 5  ;;  %v4715_v12 = vld [vmem:[#allocation3 + $0x15c] sm:$0xf0]  ;;  %v4541_v33 = vrot.slane %v4529_v6, 9  ;;  %v5223_v34 = vld [vmem:[#allocation3 + $0x160] sm:$0xf0] }
 0x190   : > { %v3339_v2 = vadd.f32 %v3338_v43, %v3290_v49  ;;  %v1938_v49 = vrot.slane %v1937_v14, 4  ;;  %v3916_v21 = vunpack.c.l.b16 %v3818_v55  ;;  %v3839_v35 = vshll.u32 %v5136_v10, 16 }
 0x191   : > { %3487 = vmatmul.bf16.gmra.mxu2 %v4678_v7  ;;  %3585 = vmatmul.bf16.gmra.mxu0 %v4686_v25  ;;  %v4713_v25 = vld [vmem:[#allocation3 + $0x138] sm:$0xf] }
 0x192   : > { %v3388_v32 = vadd.f32 %v3387_v20, %v3339_v2  ;;  %4010 = vmatmul.bf16.gmra.mxu1 %v3926_v0  ;;  %v3835_v0 = vrot.slane %v3833_v3, 4  ;;  %v1943_v11 = vsel %vm5843_vm10, %v1938_v49, %v1942_v46  ;;  %v5218_v2 = vld [vmem:[#allocation3 + $0x13c] sm:$0xf]  ;;  %v3927_v37 = vpack.c.b16 %v3916_v21, %v3915_v40 }
 0x193   : > { %2006 = vst [vmem:[#allocation3 + $0x1cc] sm:$0xf] %v1943_v11  ;;  %v4510_v11 = vld [vmem:[%s5823_s21 + $0x74] sm:$0x1] }
 0x194   : > { %3536 = vmatmul.bf16.gmra.mxu3 %v4682_v31  ;;  %v6536_v51 = vadd.f32 %v6505_v16, %v3388_v32  ;;  %v3292_v20 = vpop.f32.mrf.mxu2  ;;  %v3822_v16 = vrot.slane %v3820_v38, 4  ;;  %v1948_v31 = vrot.slane %v1947_v42, 4  ;;  %v4531_v32 = vld [vmem:[%s5823_s21 + $0x68] sm:$0x1]  ;;  %v2102_v38 = vrot.slane %v4530_v27, 5 }
 0x195   : > { %v3293_v53 = vadd.f32 %v3292_v20, %v6381_v58  ;;  %v4484_v58 = vld [vmem:[%s5823_s21 + $0x64] sm:$0xf]  ;;  %v3836_v52 = vor.u32 %v3835_v0, %v6546_v4  ;;  %v4714_v20 = vor.u32 %v5222_v9, %v4713_v25  ;;  %v4508_v42 = vld [vmem:[%s5823_s21 + $0x6c] sm:$0xf]  ;;  %v5138_v25 = vld [vmem:[%s5823_s21 + $0x58] sm:$0xf] }
 0x196   : > { %v3392_v7 = vpop.f32.mrf.mxu0  ;;  %1759 = vst [vmem:[#allocation3 + $0x1ec] sm:$0xf] %v4484_v58  ;;  %v1953_v24 = vsel %vm5843_vm10, %v1948_v31, %v1952_v62  ;;  %v3826_v36 = vor.u32 %v3825_v57, %v3822_v16  ;;  %v2103_v46 = vsel %vm6027_vm13, %v4541_v33, %v2102_v38  ;;  %v2104_v3 = vrot.slane %v2102_v38, 4  ;;  %v4509_v62 = vld [vmem:[%s5823_s21 + $0x70] sm:$0xf] }
 0x197   : > { %v3341_v54 = vpop.f32.mrf.mxu3  ;;  %v6544_v59 = vpop.f32.mrf.mxu1  ;;  %2007 = vst [vmem:[#allocation3 + $0x1f0] sm:$0xf] %v1953_v24  ;;  %v3837_v49 = vrot.slane %v3836_v52, 4  ;;  %v1955_v27 = vshrl.u32 %v4508_v42, 16  ;;  %v1964_v0 = vshll.u32 %v4509_v62, 16  ;;  %v1968_v28 = vshrl.u32 %v4509_v62, 16 }
 0x198   : > { %v3342_v43 = vadd.f32 %v3341_v54, %v3293_v53  ;;  %2142 = vst [vmem:[#allocation3 + $0x1d0] sm:$0xf] %v2103_v46  ;;  %v4718_v53 = vor.u32 %v5218_v2, %v4715_v12  ;;  %v4722_v54 = vor.u32 %v5223_v34, %v4721_v26  ;;  %v3827_v55 = vrot.slane %v3826_v36, 4  ;;  %v5137_v31 = vld [vmem:[%s5823_s21 + $0x54] sm:$0xf] }
 0x199   : > { %v1957_v9 = vrot.slane %v1955_v27, 4  ;;  %v1966_v2 = vrot.slane %v1964_v0, 5  ;;  %v1970_v40 = vrot.slane %v1968_v28, 4  ;;  %v3844_v24 = vshrl.u32 %v5137_v31, 16  ;;  %v4532_v28 = vld [vmem:[%s5823_s21 + $0x6c] sm:$0xe] }
 0x19a   : > { %v3391_v15 = vadd.f32 %v3390_v18, %v3342_v43  ;;  %v2105_v18 = vrot.slane %v4531_v32, 5  ;;  %v1958_v43 = vshll.u32 %v4508_v42, 16  ;;  %v3832_v10 = vsel %vm5843_vm10, %v3827_v55, %v6546_v4 }
 0x19b   : > { %v3847_v6 = vshll.u32 %v5137_v31, 16  ;;  %v3853_v36 = vshll.u32 %v5138_v25, 16  ;;  %v3857_v38 = vshrl.u32 %v5138_v25, 16  ;;  %v1971_v34 = vor.u32 %v1970_v40, %v1966_v2 }
 0x19c   : > { %v6560_v39 = vadd.f32 %v6526_v8, %v3391_v15  ;;  %v3294_v1 = vpop.f32.mrf.mxu2  ;;  %v2106_v8 = vsel %vm6027_vm13, %v2104_v3, %v2105_v18  ;;  %v1960_v15 = vrot.slane %v1958_v43, 5  ;;  %v4749_v3 = vld [vmem:[#allocation3 + $0x180] sm:$0xf]  ;;  %v3846_v55 = vrot.slane %v3844_v24, 4 }
 0x19d   : > { %v3295_v47 = vadd.f32 %v3294_v1, %v6398_v41  ;;  %v3841_v41 = vrot.slane %v3839_v35, 5  ;;  %2143 = vst [vmem:[#allocation3 + $0x1f4] sm:$0xf] %v2106_v8  ;;  %v4533_v1 = vld [vmem:[%s5823_s21 + $0x70] sm:$0xf]  ;;  %v3849_v8 = vrot.slane %v3847_v6, 5 }
 0x19e   : > { %v3395_v57 = vpop.f32.mrf.mxu0  ;;  %v1961_v32 = vor.u32 %v1960_v15, %v1957_v9  ;;  %v3855_v27 = vrot.slane %v3853_v36, 5  ;;  %v3859_v43 = vrot.slane %v3857_v38, 4  ;;  %v4542_v31 = vrot.slane %v4532_v28, 9  ;;  %v5232_v9 = vld [vmem:[#allocation3 + $0x1a8] sm:$0xf0] }
 0x19f   : > { %v3343_v50 = vpop.f32.mrf.mxu3  ;;  %v6565_v14 = vpop.f32.mrf.mxu1  ;;  %v3842_v12 = vsel %vm5843_vm10, %v3837_v49, %v3841_v41  ;;  %v4751_v49 = vld [vmem:[#allocation3 + $0x1a4] sm:$0xf0]  ;;  %v2109_v25 = vrot.slane %v4533_v1, 5  ;;  %v3850_v24 = vor.u32 %v3849_v8, %v3846_v55 }
 0x1a0   : > { %v3344_v16 = vadd.f32 %v3343_v50, %v3295_v47  ;;  %v1962_v18 = vrot.slane %v1961_v32, 4  ;;  %v5231_v47 = vld [vmem:[#allocation3 + $0x1a0] sm:$0xf0]  ;;  %v3917_v50 = vunpack.c.l.b16 %v3832_v10  ;;  %v4757_v41 = vld [vmem:[#allocation3 + $0x188] sm:$0xf]  ;;  %v3860_v6 = vor.u32 %v3859_v43, %v3855_v27 }
 0x1a1   : > { %3492 = vmatmul.bf16.gmra.mxu2 %v4714_v20  ;;  %3590 = vmatmul.bf16.gmra.mxu0 %v4722_v54  ;;  %v4485_v20 = vld [vmem:[%s5823_s21 + $0x6c] sm:$0xf]  ;;  %v3918_v54 = vunpack.c.l.b16 %v3842_v12  ;;  %v4750_v15 = vor.u32 %v5231_v47, %v4749_v3  ;;  %v2110_v12 = vsel %vm6027_vm13, %v4542_v31, %v2109_v25  ;;  %v2111_v40 = vrot.slane %v2109_v25, 4  ;;  %v5141_v3 = vld [vmem:[%s5823_s21 + $0x64] sm:$0xf] }
 0x1a2   : > { %v3393_v58 = vadd.f32 %v3392_v7, %v3344_v16  ;;  %4015 = vmatmul.bf16.gmra.mxu1 %v3927_v37  ;;  %v1974_v7 = vshll.u32 %v4510_v11, 16  ;;  %v4486_v37 = vld [vmem:[%s5823_s21 + $0x70] sm:$0xf]  ;;  %1760 = vst [vmem:[#allocation3 + $0x210] sm:$0xf] %v4485_v20  ;;  %v1967_v42 = vsel %vm5843_vm10, %v1962_v18, %v1966_v2  ;;  %v3861_v18 = vrot.slane %v3860_v6, 4 }
 0x1a3   : > { %v5227_v16 = vld [vmem:[#allocation3 + $0x184] sm:$0xf]  ;;  %1761 = vst [vmem:[#allocation3 + $0x234] sm:$0xf] %v4486_v37  ;;  %v3928_v2 = vpack.c.b16 %v3918_v54, %v3917_v50  ;;  %v3877_v55 = vshll.u32 %v5141_v3, 16  ;;  %v3881_v8 = vshrl.u32 %v5141_v3, 16 }
 0x1a4   : > { %3541 = vmatmul.bf16.gmra.mxu3 %v4718_v53  ;;  %v6580_v21 = vadd.f32 %v6544_v59, %v3393_v58  ;;  %v3297_v26 = vpop.f32.mrf.mxu2  ;;  %v1976_v52 = vrot.slane %v1974_v7, 5  ;;  %v1972_v53 = vrot.slane %v1971_v34, 4  ;;  %2008 = vst [vmem:[#allocation3 + $0x214] sm:$0xf] %v1967_v42  ;;  %v4534_v58 = vld [vmem:[%s5823_s21 + $0x74] sm:$0x1] }
 0x1a5   : > { %v3298_v4 = vadd.f32 %v3297_v26, %v6281_v44  ;;  %v5139_v44 = vld [vmem:[%s5823_s21 + $0x5c] sm:$0x1]  ;;  %v2112_v10 = vrot.slane %v4534_v58, 5  ;;  %2144 = vst [vmem:[#allocation3 + $0x218] sm:$0xf] %v2110_v12  ;;  %v3879_v58 = vrot.slane %v3877_v55, 5 }
 0x1a6   : > { %v3397_v59 = vpop.f32.mrf.mxu0  ;;  %v1977_v0 = vsel %vm5843_vm10, %v1972_v53, %v1976_v52  ;;  %v3863_v36 = vshll.u32 %v5139_v44, 16  ;;  %v3883_v31 = vrot.slane %v3881_v8, 4  ;;  %v4793_v25 = vld [vmem:[#allocation3 + $0x1d0] sm:$0xf] }
 0x1a7   : > { %v3346_v33 = vpop.f32.mrf.mxu3  ;;  %v3446_v35 = vpop.f32.mrf.mxu1  ;;  %2009 = vst [vmem:[#allocation3 + $0x238] sm:$0xf] %v1977_v0  ;;  %v4787_v0 = vld [vmem:[#allocation3 + $0x1ec] sm:$0xf0] }
 0x1a8   : > { %v3347_v46 = vadd.f32 %v3346_v33, %v3298_v4  ;;  %v4754_v4 = vor.u32 %v5227_v16, %v4751_v49  ;;  %v2113_v33 = vsel %vm6027_vm13, %v2111_v40, %v2112_v10  ;;  %v3865_v1 = vrot.slane %v3863_v36, 5  ;;  %v4785_v16 = vld [vmem:[#allocation3 + $0x1c8] sm:$0xf]  ;;  %v5240_v49 = vld [vmem:[#allocation3 + $0x1e8] sm:$0xf0] }
 0x1a9   : > { %2145 = vst [vmem:[#allocation3 + $0x23c] sm:$0xf] %v2113_v33  ;;  %v5142_v10 = vld [vmem:[%s5823_s21 + $0x68] sm:$0x1]  ;;  %v4786_v40 = vor.u32 %v5240_v49, %v4785_v16 }
 0x1aa   : > { %v3396_v62 = vadd.f32 %v3395_v57, %v3347_v46  ;;  %v5140_v46 = vld [vmem:[%s5823_s21 + $0x60] sm:$0xf]  ;;  %v4821_v55 = vld [vmem:[#allocation3 + $0x210] sm:$0xf]  ;;  %v5249_v8 = vld [vmem:[#allocation3 + $0x230] sm:$0xf0] }
 0x1ab   : > { %v3868_v54 = vshrl.u32 %v5140_v46, 16  ;;  %v3871_v44 = vshll.u32 %v5140_v46, 16 }
 0x1ac   : > { %v6594_v11 = vadd.f32 %v6565_v14, %v3396_v62  ;;  %v3299_v57 = vpop.f32.mrf.mxu2  ;;  %v4758_v14 = vor.u32 %v5232_v9, %v4757_v41  ;;  %v5236_v41 = vld [vmem:[#allocation3 + $0x1cc] sm:$0xf]  ;;  %v5241_v9 = vld [vmem:[#allocation3 + $0x1f0] sm:$0xf0] }
 0x1ad   : > { %v3300_v7 = vadd.f32 %v3299_v57, %v6301_v23  ;;  %v3851_v23 = vrot.slane %v3850_v24, 4  ;;  %v3870_v28 = vrot.slane %v3868_v54, 4  ;;  %v4794_v6 = vor.u32 %v5241_v9, %v4793_v25 }
 0x1ae   : > { %v3400_v34 = vpop.f32.mrf.mxu0 }
 0x1af   : > { %v3348_v26 = vpop.f32.mrf.mxu3  ;;  %v3449_v32 = vpop.f32.mrf.mxu1  ;;  %v3856_v37 = vsel %vm5843_vm10, %v3851_v23, %v3855_v27  ;;  %v3873_v27 = vrot.slane %v3871_v44, 5 }
 0x1b0   : > { %v3349_v38 = vadd.f32 %v3348_v26, %v3300_v7  ;;  %v4790_v7 = vor.u32 %v5236_v41, %v4787_v0 }
 0x1b1   : > { %3497 = vmatmul.bf16.gmra.mxu2 %v4750_v15  ;;  %3595 = vmatmul.bf16.gmra.mxu0 %v4758_v14  ;;  %v3874_v36 = vor.u32 %v3873_v27, %v3870_v28  ;;  %v3887_v14 = vshll.u32 %v5142_v10, 16 }
 0x1b2   : > { %v3398_v52 = vadd.f32 %v3397_v59, %v3349_v38  ;;  %4020 = vmatmul.bf16.gmra.mxu1 %v3928_v2  ;;  %v3866_v59 = vsel %vm5843_vm10, %v3861_v18, %v3865_v1 }
 0x1b3   : > { %v3920_v43 = vunpack.c.l.b16 %v3866_v59  ;;  %v3889_v23 = vrot.slane %v3887_v14, 5 }
 0x1b4   : > { %3546 = vmatmul.bf16.gmra.mxu3 %v4754_v4  ;;  %v6603_v47 = vadd.f32 %v3446_v35, %v3398_v52  ;;  %v3302_v50 = vpop.f32.mrf.mxu2  ;;  %v3884_v4 = vor.u32 %v3883_v31, %v3879_v58 }
 0x1b5   : > { %v3303_v20 = vadd.f32 %v3302_v50, %v6321_v56  ;;  %v3919_v56 = vunpack.c.l.b16 %v3856_v37 }
 0x1b6   : > { %v3402_v62 = vpop.f32.mrf.mxu0  ;;  %v3885_v52 = vrot.slane %v3884_v4, 4 }
 0x1b7   : > { %v3351_v48 = vpop.f32.mrf.mxu3  ;;  %v3451_v53 = vpop.f32.mrf.mxu1  ;;  %v3929_v26 = vpack.c.b16 %v3920_v43, %v3919_v56  ;;  %v4822_v56 = vor.u32 %v5249_v8, %v4821_v55 }
 0x1b8   : > { %v3352_v42 = vadd.f32 %v3351_v48, %v3303_v20  ;;  %v3890_v20 = vsel %vm5843_vm10, %v3885_v52, %v3889_v23 }
 0x1b9   : > { %v3922_v44 = vunpack.c.l.b16 %v3890_v20 }
 0x1ba   : > { %v3401_v35 = vadd.f32 %v3400_v34, %v3352_v42  ;;  %v4823_v42 = vld [vmem:[#allocation3 + $0x234] sm:$0xf0] }
 0x1bc   : > { %v6611_v57 = vadd.f32 %v3449_v32, %v3401_v35  ;;  %v3304_v15 = vpop.f32.mrf.mxu2  ;;  %v3875_v32 = vrot.slane %v3874_v36, 4  ;;  %v5250_v35 = vld [vmem:[#allocation3 + $0x238] sm:$0xf0] }
 0x1bd   : > { %v3305_v2 = vadd.f32 %v3304_v15, %v6341_v29 }
 0x1be   : > { %v3405_v38 = vpop.f32.mrf.mxu0  ;;  %v3880_v50 = vsel %vm5843_vm10, %v3875_v32, %v3879_v58 }
 0x1bf   : > { %v3353_v12 = vpop.f32.mrf.mxu3  ;;  %v3454_v24 = vpop.f32.mrf.mxu1  ;;  %v3921_v54 = vunpack.c.l.b16 %v3880_v50 }
 0x1c0   : > { %v3354_v33 = vadd.f32 %v3353_v12, %v3305_v2 }
 0x1c1   : > { %3502 = vmatmul.bf16.gmra.mxu2 %v4786_v40  ;;  %3600 = vmatmul.bf16.gmra.mxu0 %v4794_v6  ;;  %v3930_v61 = vpack.c.b16 %v3922_v44, %v3921_v54 }
 0x1c2   : > { %v3403_v34 = vadd.f32 %v3402_v62, %v3354_v33  ;;  %4025 = vmatmul.bf16.gmra.mxu1 %v3929_v26  ;;  %v4829_v62 = vld [vmem:[#allocation3 + $0x218] sm:$0xf] }
 0x1c3   : > { %v4830_v28 = vor.u32 %v5250_v35, %v4829_v62 }
 0x1c4   : > { %3551 = vmatmul.bf16.gmra.mxu3 %v4790_v7  ;;  %v6614_v29 = vadd.f32 %v3451_v53, %v3403_v34  ;;  %v3307_v18 = vpop.f32.mrf.mxu2  ;;  %v5245_v53 = vld [vmem:[#allocation3 + $0x214] sm:$0xf] }
 0x1c5   : > { %v3308_v1 = vadd.f32 %v3307_v18, %v6355_v63  ;;  %v4826_v0 = vor.u32 %v5245_v53, %v4823_v42 }
 0x1c6   : > { %v3407_v37 = vpop.f32.mrf.mxu0 }
 0x1c7   : > { %v3356_v46 = vpop.f32.mrf.mxu3  ;;  %v3456_v3 = vpop.f32.mrf.mxu1 }
 0x1c8   : > { %v3357_v48 = vadd.f32 %v3356_v46, %v3308_v1 }
 0x1ca   : > { %v3406_v59 = vadd.f32 %v3405_v38, %v3357_v48 }
 0x1cc   : > { %v6621_v63 = vadd.f32 %v3454_v24, %v3406_v59  ;;  %v3309_v16 = vpop.f32.mrf.mxu2 }
 0x1cd   : > { %v3310_v49 = vadd.f32 %v3309_v16, %v6373_v45 }
 0x1ce   : > { %v3410_v58 = vpop.f32.mrf.mxu0 }
 0x1cf   : > { %v3358_v41 = vpop.f32.mrf.mxu3  ;;  %v3459_v43 = vpop.f32.mrf.mxu1 }
 0x1d0   : > { %v3359_v27 = vadd.f32 %v3358_v41, %v3310_v49 }
 0x1d1   : > { %3507 = vmatmul.bf16.gmra.mxu2 %v4822_v56  ;;  %3605 = vmatmul.bf16.gmra.mxu0 %v4830_v28 }
 0x1d2   : > { %v3408_v31 = vadd.f32 %v3407_v37, %v3359_v27  ;;  %4030 = vmatmul.bf16.gmra.mxu1 %v3930_v61 }
 0x1d4   : > { %3556 = vmatmul.bf16.gmra.mxu3 %v4826_v0  ;;  %v6624_v25 = vadd.f32 %v3456_v3, %v3408_v31  ;;  %v3312_v9 = vpop.f32.mrf.mxu2 }
 0x1d5   : > { %v3313_v10 = vadd.f32 %v3312_v9, %v6386_v22 }
 0x1d6   : > { %v3412_v12 = vpop.f32.mrf.mxu0 }
 0x1d7   : > { %v3361_v45 = vpop.f32.mrf.mxu3  ;;  %v3461_v15 = vpop.f32.mrf.mxu1 }
 0x1d8   : > { %v3362_v2 = vadd.f32 %v3361_v45, %v3313_v10 }
 0x1da   : > { %v3411_v40 = vadd.f32 %v3410_v58, %v3362_v2 }
 0x1dc   : > { %v6627_v7 = vadd.f32 %v3459_v43, %v3411_v40  ;;  %v3314_v26 = vpop.f32.mrf.mxu2 }
 0x1dd   : > { %v3315_v24 = vadd.f32 %v3314_v26, %v6412_v13 }
 0x1de   : > { %v3571_v14 = vpop.f32.mrf.mxu0 }
 0x1df   : > { %v3363_v6 = vpop.f32.mrf.mxu3  ;;  %v3996_v36 = vpop.f32.mrf.mxu1 }
 0x1e0   : > { %v3364_v4 = vadd.f32 %v3363_v6, %v3315_v24  ;;  %4036 = vst [vmem:[%s5511_s19] sm:$0xff] %v3996_v36  ;;  %v4067_v34 = vmul.f32 %v3996_v36, %v3996_v36 }
 0x1e2   : > { %v3413_v33 = vadd.f32 %v3412_v12, %v3364_v4 }
 0x1e4   : > { %v6631_v38 = vadd.f32 %v3461_v15, %v3413_v33  ;;  %v3473_v22 = vpop.f32.mrf.mxu2 }
 0x1e5   : > { %v3474_v32 = vadd.f32 %v3473_v22, %v6442_v19 }
 0x1e6   : > { %v3573_v46 = vpop.f32.mrf.mxu0 }
 0x1e7   : > { %v3522_v52 = vpop.f32.mrf.mxu3  ;;  %v3998_v23 = vpop.f32.mrf.mxu1 }
 0x1e8   : > { %v3523_v18 = vadd.f32 %v3522_v52, %v3474_v32  ;;  %4037 = vst [vmem:[%s5511_s19 + $0x8] sm:$0xff] %v3998_v23  ;;  %v4052_v1 = vadd.f32 %v3998_v23, %v3996_v36  ;;  %v4068_v13 = vmul.f32 %v3998_v23, %v3998_v23 }
 0x1ea   : > { %v3572_v3 = vadd.f32 %v3571_v14, %v3523_v18  ;;  %v4083_v50 = vadd.f32 %v4068_v13, %v4067_v34 }
 0x1ec   : > { %3611 = vst [vmem:[%s5506_s16] sm:$0xff] %v3572_v3  ;;  %v3475_v20 = vpop.f32.mrf.mxu2  ;;  %v3642_v42 = vmul.f32 %v3572_v3, %v3572_v3 }
 0x1ed   : > { %v3476_v48 = vadd.f32 %v3475_v20, %v6458_v30 }
 0x1ee   : > { %v3576_v55 = vpop.f32.mrf.mxu0 }
 0x1ef   : > { %v3524_v37 = vpop.f32.mrf.mxu3  ;;  %v4001_v59 = vpop.f32.mrf.mxu1 }
 0x1f0   : > { %v3525_v54 = vadd.f32 %v3524_v37, %v3476_v48  ;;  %4038 = vst [vmem:[%s5511_s19 + $0x10] sm:$0xff] %v4001_v59  ;;  %v4053_v19 = vadd.f32 %v4052_v1, %v4001_v59  ;;  %v4069_v44 = vmul.f32 %v4001_v59, %v4001_v59 }
 0x1f2   : > { %v3574_v8 = vadd.f32 %v3573_v46, %v3525_v54  ;;  %v4084_v53 = vadd.f32 %v4083_v50, %v4069_v44 }
 0x1f4   : > { %3612 = vst [vmem:[%s5506_s16 + $0x8] sm:$0xff] %v3574_v8  ;;  %v3627_v62 = vadd.f32 %v3574_v8, %v3572_v3  ;;  %v3643_v35 = vmul.f32 %v3574_v8, %v3574_v8  ;;  %v3478_v16 = vpop.f32.mrf.mxu2 }
 0x1f5   : > { %v3479_v41 = vadd.f32 %v3478_v16, %v6482_v17 }
 0x1f6   : > { %v3658_v49 = vadd.f32 %v3643_v35, %v3642_v42  ;;  %v3578_v28 = vpop.f32.mrf.mxu0 }
 0x1f7   : > { %v3527_v30 = vpop.f32.mrf.mxu3  ;;  %v4003_v56 = vpop.f32.mrf.mxu1 }
 0x1f8   : > { %v3528_v61 = vadd.f32 %v3527_v30, %v3479_v41  ;;  %4039 = vst [vmem:[%s5511_s19 + $0x18] sm:$0xff] %v4003_v56  ;;  %v4054_v43 = vadd.f32 %v4053_v19, %v4003_v56  ;;  %v4070_v0 = vmul.f32 %v4003_v56, %v4003_v56 }
 0x1fa   : > { %v3577_v27 = vadd.f32 %v3576_v55, %v3528_v61  ;;  %v4085_v58 = vadd.f32 %v4084_v53, %v4070_v0 }
 0x1fc   : > { %3613 = vst [vmem:[%s5506_s16 + $0x10] sm:$0xff] %v3577_v27  ;;  %v3628_v31 = vadd.f32 %v3627_v62, %v3577_v27  ;;  %v3644_v9 = vmul.f32 %v3577_v27, %v3577_v27  ;;  %v3480_v10 = vpop.f32.mrf.mxu2 }
 0x1fd   : > { %v3481_v15 = vadd.f32 %v3480_v10, %v6502_v5 }
 0x1fe   : > { %v3659_v45 = vadd.f32 %v3658_v49, %v3644_v9  ;;  %v3581_v24 = vpop.f32.mrf.mxu0 }
 0x1ff   : > { %v3529_v2 = vpop.f32.mrf.mxu3  ;;  %v4006_v17 = vpop.f32.mrf.mxu1 }
 0x200   : > { %v3530_v12 = vadd.f32 %v3529_v2, %v3481_v15  ;;  %4040 = vst [vmem:[%s5511_s19 + $0x20] sm:$0xff] %v4006_v17  ;;  %v6644_v40 = vadd.f32 %v4054_v43, %v4006_v17  ;;  %v4071_v26 = vmul.f32 %v4006_v17, %v4006_v17 }
 0x202   : > { %v3579_v6 = vadd.f32 %v3578_v28, %v3530_v12  ;;  %v6646_v36 = vadd.f32 %v4085_v58, %v4071_v26 }
 0x204   : > { %3614 = vst [vmem:[%s5506_s16 + $0x18] sm:$0xff] %v3579_v6  ;;  %v3629_v4 = vadd.f32 %v3628_v31, %v3579_v6  ;;  %v3645_v14 = vmul.f32 %v3579_v6, %v3579_v6  ;;  %v3483_v33 = vpop.f32.mrf.mxu2 }
 0x205   : > { %v3484_v5 = vadd.f32 %v3483_v33, %v6520_v60 }
 0x206   : > { %v3660_v22 = vadd.f32 %v3659_v45, %v3645_v14  ;;  %v3583_v23 = vpop.f32.mrf.mxu0 }
 0x207   : > { %v3532_v34 = vpop.f32.mrf.mxu3  ;;  %v6650_v32 = vpop.f32.mrf.mxu1 }
 0x208   : > { %v3533_v52 = vadd.f32 %v3532_v34, %v3484_v5  ;;  %4041 = vst [vmem:[%s5511_s19 + $0x28] sm:$0xff] %v6650_v32 }
 0x20a   : > { %v3582_v18 = vadd.f32 %v3581_v24, %v3533_v52 }
 0x20c   : > { %3615 = vst [vmem:[%s5506_s16 + $0x20] sm:$0xff] %v3582_v18  ;;  %v3630_v1 = vadd.f32 %v3629_v4, %v3582_v18  ;;  %v3646_v13 = vmul.f32 %v3582_v18, %v3582_v18  ;;  %v3485_v46 = vpop.f32.mrf.mxu2 }
 0x20d   : > { %v3486_v50 = vadd.f32 %v3485_v46, %v6536_v51 }
 0x20e   : > { %v3661_v3 = vadd.f32 %v3660_v22, %v3646_v13  ;;  %v3586_v37 = vpop.f32.mrf.mxu0 }
 0x20f   : > { %v3534_v20 = vpop.f32.mrf.mxu3  ;;  %v6656_v60 = vpop.f32.mrf.mxu1 }
 0x210   : > { %v3535_v48 = vadd.f32 %v3534_v20, %v3486_v50  ;;  %4042 = vst [vmem:[%s5511_s19 + $0x30] sm:$0xff] %v6656_v60 }
 0x212   : > { %v3584_v59 = vadd.f32 %v3583_v23, %v3535_v48 }
 0x214   : > { %3616 = vst [vmem:[%s5506_s16 + $0x28] sm:$0xff] %v3584_v59  ;;  %v3631_v54 = vadd.f32 %v3630_v1, %v3584_v59  ;;  %v3647_v19 = vmul.f32 %v3584_v59, %v3584_v59  ;;  %v3488_v44 = vpop.f32.mrf.mxu2 }
 0x215   : > { %v3489_v8 = vadd.f32 %v3488_v44, %v6560_v39 }
 0x216   : > { %v3662_v55 = vadd.f32 %v3661_v3, %v3647_v19  ;;  %v3588_v62 = vpop.f32.mrf.mxu0 }
 0x217   : > { %v3537_v53 = vpop.f32.mrf.mxu3  ;;  %v6662_v51 = vpop.f32.mrf.mxu1 }
 0x218   : > { %v3538_v42 = vadd.f32 %v3537_v53, %v3489_v8  ;;  %4043 = vst [vmem:[%s5511_s19 + $0x38] sm:$0xff] %v6662_v51  ;;  %v4073_v53 = vmul.f32 %v6656_v60, %v6656_v60 }
 0x21a   : > { %v3587_v35 = vadd.f32 %v3586_v37, %v3538_v42 }
 0x21c   : > { %3617 = vst [vmem:[%s5506_s16 + $0x30] sm:$0xff] %v3587_v35  ;;  %v3632_v16 = vadd.f32 %v3631_v54, %v3587_v35  ;;  %v3648_v49 = vmul.f32 %v3587_v35, %v3587_v35  ;;  %v3490_v41 = vpop.f32.mrf.mxu2 }
 0x21d   : > { %v3491_v56 = vadd.f32 %v3490_v41, %v6580_v21 }
 0x21e   : > { %v3663_v30 = vadd.f32 %v3662_v55, %v3648_v49  ;;  %v3591_v0 = vpop.f32.mrf.mxu0  ;;  %v4074_v49 = vmul.f32 %v6662_v51, %v6662_v51 }
 0x21f   : > { %v3539_v61 = vpop.f32.mrf.mxu3  ;;  %v6668_v39 = vpop.f32.mrf.mxu1 }
 0x220   : > { %v3540_v43 = vadd.f32 %v3539_v61, %v3491_v56  ;;  %4044 = vst [vmem:[%s5511_s19 + $0x40] sm:$0xff] %v6668_v39 }
 0x222   : > { %v3589_v28 = vadd.f32 %v3588_v62, %v3540_v43  ;;  %v4056_v62 = vadd.f32 %v6644_v40, %v6650_v32  ;;  %v4075_v40 = vmul.f32 %v6668_v39, %v6668_v39 }
 0x224   : > { %3618 = vst [vmem:[%s5506_s16 + $0x38] sm:$0xff] %v3589_v28  ;;  %v3633_v27 = vadd.f32 %v3632_v16, %v3589_v28  ;;  %v3649_v58 = vmul.f32 %v3589_v28, %v3589_v28  ;;  %v3493_v31 = vpop.f32.mrf.mxu2 }
 0x225   : > { %v3494_v10 = vadd.f32 %v3493_v31, %v6594_v11 }
 0x226   : > { %v3664_v9 = vadd.f32 %v3663_v30, %v3649_v58  ;;  %v3593_v2 = vpop.f32.mrf.mxu0  ;;  %v4057_v30 = vadd.f32 %v4056_v62, %v6656_v60 }
 0x227   : > { %v3542_v45 = vpop.f32.mrf.mxu3  ;;  %v6674_v21 = vpop.f32.mrf.mxu1 }
 0x228   : > { %v3543_v15 = vadd.f32 %v3542_v45, %v3494_v10  ;;  %4045 = vst [vmem:[%s5511_s19 + $0x48] sm:$0xff] %v6674_v21  ;;  %v4058_v28 = vadd.f32 %v4057_v30, %v6662_v51  ;;  %v4076_v58 = vmul.f32 %v6674_v21, %v6674_v21 }
 0x22a   : > { %v3592_v17 = vadd.f32 %v3591_v0, %v3543_v15  ;;  %v4059_v60 = vadd.f32 %v4058_v28, %v6668_v39 }
 0x22c   : > { %3619 = vst [vmem:[%s5506_s16 + $0x40] sm:$0xff] %v3592_v17  ;;  %v3634_v12 = vadd.f32 %v3633_v27, %v3592_v17  ;;  %v3650_v26 = vmul.f32 %v3592_v17, %v3592_v17  ;;  %v3495_v24 = vpop.f32.mrf.mxu2 }
 0x22d   : > { %v3496_v4 = vadd.f32 %v3495_v24, %v6603_v47 }
 0x22e   : > { %v3665_v6 = vadd.f32 %v3664_v9, %v3650_v26  ;;  %v3596_v22 = vpop.f32.mrf.mxu0 }
 0x22f   : > { %v3544_v14 = vpop.f32.mrf.mxu3  ;;  %v4021_v11 = vpop.f32.mrf.mxu1 }
 0x230   : > { %v3545_v33 = vadd.f32 %v3544_v14, %v3496_v4  ;;  %4046 = vst [vmem:[%s5511_s19 + $0x50] sm:$0xff] %v4021_v11  ;;  %v4077_v10 = vmul.f32 %v4021_v11, %v4021_v11 }
 0x232   : > { %v3594_v5 = vadd.f32 %v3593_v2, %v3545_v33 }
 0x234   : > { %3620 = vst [vmem:[%s5506_s16 + $0x48] sm:$0xff] %v3594_v5  ;;  %v3635_v34 = vadd.f32 %v3634_v12, %v3594_v5  ;;  %v3651_v52 = vmul.f32 %v3594_v5, %v3594_v5  ;;  %v3498_v23 = vpop.f32.mrf.mxu2 }
 0x235   : > { %v3499_v1 = vadd.f32 %v3498_v23, %v6611_v57  ;;  %v4072_v57 = vmul.f32 %v6650_v32, %v6650_v32 }
 0x236   : > { %v3666_v18 = vadd.f32 %v3665_v6, %v3651_v52  ;;  %v3598_v47 = vpop.f32.mrf.mxu0 }
 0x237   : > { %v3547_v13 = vpop.f32.mrf.mxu3  ;;  %v4023_v46 = vpop.f32.mrf.mxu1 }
 0x238   : > { %v3548_v3 = vadd.f32 %v3547_v13, %v3499_v1  ;;  %4047 = vst [vmem:[%s5511_s19 + $0x58] sm:$0xff] %v4023_v46  ;;  %v4078_v17 = vmul.f32 %v4023_v46, %v4023_v46 }
 0x23a   : > { %v3597_v50 = vadd.f32 %v3596_v22, %v3548_v3 }
 0x23c   : > { %3621 = vst [vmem:[%s5506_s16 + $0x50] sm:$0xff] %v3597_v50  ;;  %v3636_v20 = vadd.f32 %v3635_v34, %v3597_v50  ;;  %v3652_v48 = vmul.f32 %v3597_v50, %v3597_v50  ;;  %v3500_v37 = vpop.f32.mrf.mxu2 }
 0x23d   : > { %v3501_v54 = vadd.f32 %v3500_v37, %v6614_v29  ;;  %v4087_v29 = vadd.f32 %v6646_v36, %v4072_v57 }
 0x23e   : > { %v3667_v59 = vadd.f32 %v3666_v18, %v3652_v48  ;;  %v3601_v42 = vpop.f32.mrf.mxu0 }
 0x23f   : > { %v3549_v19 = vpop.f32.mrf.mxu3  ;;  %v4026_v44 = vpop.f32.mrf.mxu1  ;;  %v4088_v0 = vadd.f32 %v4087_v29, %v4073_v53 }
 0x240   : > { %v3550_v55 = vadd.f32 %v3549_v19, %v3501_v54  ;;  %4048 = vst [vmem:[%s5511_s19 + $0x60] sm:$0xff] %v4026_v44  ;;  %v4079_v14 = vmul.f32 %v4026_v44, %v4026_v44 }
 0x241   : > { %v4089_v36 = vadd.f32 %v4088_v0, %v4074_v49 }
 0x242   : > { %v3599_v8 = vadd.f32 %v3598_v47, %v3550_v55 }
 0x243   : > { %v4090_v9 = vadd.f32 %v4089_v36, %v4075_v40 }
 0x244   : > { %3622 = vst [vmem:[%s5506_s16 + $0x58] sm:$0xff] %v3599_v8  ;;  %v3637_v35 = vadd.f32 %v3636_v20, %v3599_v8  ;;  %v3653_v16 = vmul.f32 %v3599_v8, %v3599_v8  ;;  %v3503_v41 = vpop.f32.mrf.mxu2 }
 0x245   : > { %v3504_v61 = vadd.f32 %v3503_v41, %v6621_v63  ;;  %v4060_v63 = vadd.f32 %v4059_v60, %v6674_v21  ;;  %v4091_v2 = vadd.f32 %v4090_v9, %v4076_v58 }
 0x246   : > { %v3668_v56 = vadd.f32 %v3667_v59, %v3653_v16  ;;  %v3603_v51 = vpop.f32.mrf.mxu0 }
 0x247   : > { %v3552_v43 = vpop.f32.mrf.mxu3  ;;  %v4028_v32 = vpop.f32.mrf.mxu1  ;;  %v4061_v26 = vadd.f32 %v4060_v63, %v4021_v11  ;;  %v4092_v39 = vadd.f32 %v4091_v2, %v4077_v10 }
 0x248   : > { %v3553_v27 = vadd.f32 %v3552_v43, %v3504_v61  ;;  %4049 = vst [vmem:[%s5511_s19 + $0x68] sm:$0xff] %v4028_v32  ;;  %v4080_v52 = vmul.f32 %v4028_v32, %v4028_v32 }
 0x249   : > { %v4062_v22 = vadd.f32 %v4061_v26, %v4023_v46  ;;  %v4093_v21 = vadd.f32 %v4092_v39, %v4078_v17 }
 0x24a   : > { %v3602_v31 = vadd.f32 %v3601_v42, %v3553_v27 }
 0x24b   : > { %v4063_v34 = vadd.f32 %v4062_v22, %v4026_v44  ;;  %v4094_v18 = vadd.f32 %v4093_v21, %v4079_v14 }
 0x24c   : > { %3623 = vst [vmem:[%s5506_s16 + $0x60] sm:$0xff] %v3602_v31  ;;  %v3638_v45 = vadd.f32 %v3637_v35, %v3602_v31  ;;  %v3654_v15 = vmul.f32 %v3602_v31, %v3602_v31  ;;  %v3505_v12 = vpop.f32.mrf.mxu2 }
 0x24d   : > { %v3506_v6 = vadd.f32 %v3505_v12, %v6624_v25  ;;  %v4064_v1 = vadd.f32 %v4063_v34, %v4028_v32  ;;  %v4095_v47 = vadd.f32 %v4094_v18, %v4080_v52 }
 0x24e   : > { %v3669_v24 = vadd.f32 %v3668_v56, %v3654_v15  ;;  %v3606_v37 = vpop.f32.mrf.mxu0 }
 0x24f   : > { %v3554_v4 = vpop.f32.mrf.mxu3  ;;  %v4031_v33 = vpop.f32.mrf.mxu1 }
 0x250   : > { %v3555_v5 = vadd.f32 %v3554_v4, %v3506_v6  ;;  %4050 = vst [vmem:[%s5511_s19 + $0x70] sm:$0xff] %v4031_v33  ;;  %v4081_v3 = vmul.f32 %v4031_v33, %v4031_v33  ;;  %v4065_v20 = vadd.f32 %v4064_v1, %v4031_v33 }
 0x252   : > { %v3604_v23 = vadd.f32 %v3603_v51, %v3555_v5  ;;  %v4096_v54 = vadd.f32 %v4095_v47, %v4081_v3 }
 0x254   : > { %3624 = vst [vmem:[%s5506_s16 + $0x68] sm:$0xff] %v3604_v23  ;;  %v3639_v11 = vadd.f32 %v3638_v45, %v3604_v23  ;;  %v3655_v13 = vmul.f32 %v3604_v23, %v3604_v23  ;;  %v3508_v25 = vpop.f32.mrf.mxu2 }
 0x255   : > { %v3509_v46 = vadd.f32 %v3508_v25, %v6627_v7 }
 0x256   : > { %v3670_v50 = vadd.f32 %v3669_v24, %v3655_v13  ;;  %v3608_v49 = vpop.f32.mrf.mxu0 }
 0x257   : > { %v3557_v48 = vpop.f32.mrf.mxu3  ;;  %v4033_v59 = vpop.f32.mrf.mxu1 }
 0x258   : > { %v3558_v19 = vadd.f32 %v3557_v48, %v3509_v46  ;;  %4051 = vst [vmem:[%s5511_s19 + $0x78] sm:$0xff] %v4033_v59  ;;  %v4066_v44 = vadd.f32 %v4065_v20, %v4033_v59  ;;  %v4082_v55 = vmul.f32 %v4033_v59, %v4033_v59 }
 0x25a   : > { %v3607_v57 = vadd.f32 %v3606_v37, %v3558_v19  ;;  %v4097_v8 = vadd.f32 %v4096_v54, %v4082_v55  ;;  %4098 = vst [vmem:[%s5522_s10] sm:$0xff] %v4066_v44 }
 0x25c   : > { %3625 = vst [vmem:[%s5506_s16 + $0x70] sm:$0xff] %v3607_v57  ;;  %v3640_v53 = vadd.f32 %v3639_v11, %v3607_v57  ;;  %v3656_v42 = vmul.f32 %v3607_v57, %v3607_v57  ;;  %v3510_v62 = vpop.f32.mrf.mxu2 }
 0x25d   : > { %4099 = vst [vmem:[%s5522_s10 + $0x8] sm:$0xff] %v4097_v8  ;;  %v3511_v35 = vadd.f32 %v3510_v62, %v6631_v38 }
 0x25e   : > { %v3671_v7 = vadd.f32 %v3670_v50, %v3656_v42 }
 0x25f   : > { %v3559_v16 = vpop.f32.mrf.mxu3 }
 0x260   : > { %v3560_v29 = vadd.f32 %v3559_v16, %v3511_v35 }
 0x262   : > { %v3609_v41 = vadd.f32 %v3608_v49, %v3560_v29 }
 0x264   : > { %3626 = vst [vmem:[%s5506_s16 + $0x78] sm:$0xff] %v3609_v41  ;;  %v3641_v30 = vadd.f32 %v3640_v53, %v3609_v41  ;;  %v3657_v56 = vmul.f32 %v3609_v41, %v3609_v41 }
 0x266   : > { %v3672_v61 = vadd.f32 %v3671_v7, %v3657_v56  ;;  %3673 = vst [vmem:[%s5517_s28] sm:$0xff] %v3641_v30 }
 0x268   : > { %3674 = vst [vmem:[%s5517_s28 + $0x8] sm:$0xff] %v3672_v61 }
 0x269 PF: > { %s17_s25 = sadd.s32 1, %s5426_s25   ;;  %s6754_s19 = sld [smem:[#allocation4_spill]] }
 0x26a   : > { %p14_p9 = scmp.ge.s32.totalorder %s17_s25, 6   ;;  %s6755_s10 = sld [smem:[#allocation5_spill]] }
 0x26b   : > { %s6756_s21 = smov %s5418_s23  ;;  %s6757_s22 = smov %s5422_s24 }
 0x26c   :  { %16 = sbr.rel (!%p14_p9) target bundleno = 3 (0x3), region = 106 }
 0x26f   : > { %s6758_s23 = smov %s6754_s19 }
 0x270   : > { %s6759_s24 = smov %s6755_s10 }

</bundles_post_ra>
